<compile_context>
chip_gen: v5e
topology: v5e:2x2
jax: 0.10.0
libtpu: 0.0.40
codegen_flags: <defaults>
</compile_context>

<pallas_src>
from functools import partial

import numpy as np
import jax
import jax.numpy as jnp
from jax.experimental import pallas as pl
from jax.experimental.pallas import tpu as pltpu

EPS = 1e-5          # torch.nn.InstanceNorm2d default eps
NEG_SLOPE = 0.2     # LeakyReLU negative slope


def _resblock_kernel(xpad_ref, x_ref, w1_ref, w2_ref,
                     g1_ref, b1_ref, g2_ref, b2_ref,
                     o_ref, col_ref, mid_ref, *, H, W, C):
    """One batch element per grid step.

    xpad_ref : (1, H+2, W+2, C) bf16   zero-padded NHWC input (conv1 operand)
    x_ref    : (1, H,   W,   C) f32    un-padded input (residual add)
    w1_ref   : (9*C, C) bf16           conv1 weights, (dy,dx,ci)-major rows
    w2_ref   : (9*C, C) bf16           conv2 weights
    g*/b*    : (1, C) f32              InstanceNorm affine params
    o_ref    : (1, H, W, C) f32        output
    col_ref  : (H*W, 9*C) bf16         im2col slab scratch (shared by convs)
    mid_ref  : (H+2, W+2, C) bf16      padded conv2-input scratch
    """
    HW = H * W

    def im2col_from(get_tap):
        # Pack the 9 shifted taps into the (HW, 9C) bf16 slab.
        for t in range(9):
            dy, dx = divmod(t, 3)
            col_ref[:, t * C:(t + 1) * C] = get_tap(dy, dx).reshape(HW, C)

    def inorm_affine(acc, g_ref, b_ref):
        # InstanceNorm2d(C, affine=True) over the H*W axis, all in f32.
        mean = jnp.mean(acc, axis=0, keepdims=True)
        cent = acc - mean
        var = jnp.mean(cent * cent, axis=0, keepdims=True)
        return cent * jax.lax.rsqrt(var + EPS) * g_ref[...] + b_ref[...]

    # ---- conv1: single im2col matmul, bf16 x bf16 -> f32 on the MXU ----
    im2col_from(lambda dy, dx: xpad_ref[0, dy:dy + H, dx:dx + W, :])
    acc1 = jnp.dot(col_ref[...], w1_ref[...],
                   preferred_element_type=jnp.float32)          # (HW, C) f32

    # ---- InstanceNorm #1 + LeakyReLU(0.2), f32 ----
    y = inorm_affine(acc1, g1_ref, b1_ref)
    y = jnp.where(y > 0, y, NEG_SLOPE * y)

    # ---- padded bf16 intermediate: zero 1-px border only, overwrite interior ----
    zrow = jnp.zeros((1, W + 2, C), jnp.bfloat16)
    mid_ref[0:1, :, :] = zrow
    mid_ref[H + 1:H + 2, :, :] = zrow
    zcol = jnp.zeros((H, 1, C), jnp.bfloat16)
    mid_ref[1:H + 1, 0:1, :] = zcol
    mid_ref[1:H + 1, W + 1:W + 2, :] = zcol
    mid_ref[1:H + 1, 1:W + 1, :] = y.astype(jnp.bfloat16).reshape(H, W, C)

    # ---- conv2: single im2col matmul ----
    im2col_from(lambda dy, dx: mid_ref[dy:dy + H, dx:dx + W, :])
    acc2 = jnp.dot(col_ref[...], w2_ref[...],
                   preferred_element_type=jnp.float32)          # (HW, C) f32

    # ---- InstanceNorm #2 + residual add (identity stays exact f32) ----
    y2 = inorm_affine(acc2, g2_ref, b2_ref)
    out = y2 + x_ref[0].reshape(HW, C)
    o_ref[...] = out.reshape(1, H, W, C)


def residual_block(x_nchw, w1, w2, g1, b1, g2, b2):
    """x_nchw: (N, C, H, W) f32.  w1/w2: (3, 3, Cin, Cout) HWIO f32.
       g*/b*: (C,) f32 InstanceNorm affine parameters."""
    N, C, H, W = x_nchw.shape

    x = jnp.transpose(x_nchw, (0, 2, 3, 1)).astype(jnp.float32)       # NHWC f32
    xpad = jnp.pad(x, ((0, 0), (1, 1), (1, 1), (0, 0))).astype(jnp.bfloat16)

    # conv weights packed for im2col: row index = (dy*3+dx)*C + ci, bf16.
    w1p = w1.reshape(9 * C, C).astype(jnp.bfloat16)
    w2p = w2.reshape(9 * C, C).astype(jnp.bfloat16)

    kernel = partial(_resblock_kernel, H=H, W=W, C=C)
    out = pl.pallas_call(
        kernel,
        out_shape=jax.ShapeDtypeStruct((N, H, W, C), jnp.float32),
        grid_spec=pltpu.PrefetchScalarGridSpec(
            num_scalar_prefetch=0,
            grid=(N,),
            in_specs=[
                pl.BlockSpec((1, H + 2, W + 2, C), lambda n: (n, 0, 0, 0)),
                pl.BlockSpec((1, H, W, C), lambda n: (n, 0, 0, 0)),
                pl.BlockSpec((9 * C, C), lambda n: (0, 0)),
                pl.BlockSpec((9 * C, C), lambda n: (0, 0)),
                pl.BlockSpec((1, C), lambda n: (0, 0)),
                pl.BlockSpec((1, C), lambda n: (0, 0)),
                pl.BlockSpec((1, C), lambda n: (0, 0)),
                pl.BlockSpec((1, C), lambda n: (0, 0)),
            ],
            out_specs=pl.BlockSpec((1, H, W, C), lambda n: (n, 0, 0, 0)),
            scratch_shapes=[
                pltpu.VMEM((H * W, 9 * C), jnp.bfloat16),     # im2col slab
                pltpu.VMEM((H + 2, W + 2, C), jnp.bfloat16),  # padded mid
            ],
        ),
        compiler_params=pltpu.CompilerParams(
            dimension_semantics=("parallel",)),
    )(xpad, x, w1p, w2p, g1.reshape(1, C), b1.reshape(1, C),
      g2.reshape(1, C), b2.reshape(1, C))

    return jnp.transpose(out, (0, 3, 1, 2))                            # NCHW


def _reference(x_nchw, w1, w2, g1, b1, g2, b2, matmul_dtype=jnp.float32):
    """Pure-JAX reference matching the PyTorch forward pass.

    matmul_dtype=bf16 reproduces the kernel's MXU-operand precision exactly;
    matmul_dtype=f32 is the full-precision PyTorch-equivalent forward."""
    x = jnp.transpose(x_nchw, (0, 2, 3, 1)).astype(jnp.float32)

    def conv(a, w):
        return jax.lax.conv_general_dilated(
            a.astype(matmul_dtype), w.astype(matmul_dtype),
            window_strides=(1, 1), padding="SAME",
            dimension_numbers=("NHWC", "HWIO", "NHWC"),
            preferred_element_type=jnp.float32)

    def inorm(a, g, b):
        m = jnp.mean(a, axis=(1, 2), keepdims=True)
        v = jnp.mean((a - m) ** 2, axis=(1, 2), keepdims=True)
        return (a - m) * jax.lax.rsqrt(v + EPS) * g + b

    y = conv(x, w1)
    y = inorm(y, g1, b1)
    y = jnp.where(y > 0, y, NEG_SLOPE * y)
    y = conv(y, w2)
    y = inorm(y, g2, b2)
    y = y + x
    return jnp.transpose(y, (0, 3, 1, 2))


if __name__ == "__main__":
    # Module hard-codes 64 channels; keep spatial small.
    N, C, H, W = 2, 64, 16, 16

    key = jax.random.PRNGKey(0)
    kx, kw1, kw2, kg1, kb1, kg2, kb2 = jax.random.split(key, 7)

    x = jax.random.normal(kx, (N, C, H, W), jnp.float32)

    fan_in = C * 3 * 3
    w1 = jax.random.normal(kw1, (3, 3, C, C), jnp.float32) / np.sqrt(fan_in)
    w2 = jax.random.normal(kw2, (3, 3, C, C), jnp.float32) / np.sqrt(fan_in)

    g1 = 1.0 + 0.1 * jax.random.normal(kg1, (C,), jnp.float32)
    b1 = 0.1 * jax.random.normal(kb1, (C,), jnp.float32)
    g2 = 1.0 + 0.1 * jax.random.normal(kg2, (C,), jnp.float32)
    b2 = 0.1 * jax.random.normal(kb2, (C,), jnp.float32)

    out = jax.block_until_ready(residual_block(x, w1, w2, g1, b1, g2, b2))

    # (1) tight check vs a reference with matched bf16 MXU-operand precision.
    ref_bf = jax.block_until_ready(
        _reference(x, w1, w2, g1, b1, g2, b2, matmul_dtype=jnp.bfloat16))
    np.testing.assert_allclose(np.asarray(out), np.asarray(ref_bf),
                               rtol=2e-3, atol=2e-3)

    # (2) loose sanity check vs the full-f32 PyTorch-equivalent forward
    #     (expected deviation ~3e-2 from bf16 matmul operands).
    ref_f32 = jax.block_until_ready(
        _reference(x, w1, w2, g1, b1, g2, b2, matmul_dtype=jnp.float32))
    np.testing.assert_allclose(np.asarray(out), np.asarray(ref_f32),
                               rtol=1e-1, atol=1e-1)

    print("KERNEL_OK")
</pallas_src>

<mosaic_0001>
module attributes {stable_mosaic.version = 11 : i64} {
  func.func @_resblock_kernel(%arg0: i32, %arg1: memref<1x18x18x64xbf16, #tpu.memory_space<vmem>>, %arg2: memref<1x16x16x64xf32, #tpu.memory_space<vmem>>, %arg3: memref<576x64xbf16, #tpu.memory_space<vmem>>, %arg4: memref<576x64xbf16, #tpu.memory_space<vmem>>, %arg5: memref<1x64xf32, #tpu.memory_space<vmem>>, %arg6: memref<1x64xf32, #tpu.memory_space<vmem>>, %arg7: memref<1x64xf32, #tpu.memory_space<vmem>>, %arg8: memref<1x64xf32, #tpu.memory_space<vmem>>, %arg9: memref<1x16x16x64xf32, #tpu.memory_space<vmem>>, %arg10: memref<256x576xbf16, #tpu.memory_space<vmem>>, %arg11: memref<18x18x64xbf16, #tpu.memory_space<vmem>>) attributes {dimension_semantics = [#tpu.dimension_semantics<parallel>], iteration_bounds = array<i64: 2>, scalar_prefetch = 0 : i64, scratch_operands = 2 : i64, tpu.core_type = #tpu.core_type<tc>, window_params = [{transform_indices = @transform_0, window_bounds = array<i64: 1, 18, 18, 64>}, {transform_indices = @transform_1, window_bounds = array<i64: 1, 16, 16, 64>}, {pipeline_mode = #tpu.pipeline_mode<synchronous>, transform_indices = @transform_2, window_bounds = array<i64: 576, 64>}, {pipeline_mode = #tpu.pipeline_mode<synchronous>, transform_indices = @transform_3, window_bounds = array<i64: 576, 64>}, {pipeline_mode = #tpu.pipeline_mode<synchronous>, transform_indices = @transform_4, window_bounds = array<i64: 1, 64>}, {pipeline_mode = #tpu.pipeline_mode<synchronous>, transform_indices = @transform_5, window_bounds = array<i64: 1, 64>}, {pipeline_mode = #tpu.pipeline_mode<synchronous>, transform_indices = @transform_6, window_bounds = array<i64: 1, 64>}, {pipeline_mode = #tpu.pipeline_mode<synchronous>, transform_indices = @transform_7, window_bounds = array<i64: 1, 64>}, {transform_indices = @transform_8, window_bounds = array<i64: 1, 16, 16, 64>}]} {
    %c0 = arith.constant 0 : index
    %c0_0 = arith.constant 0 : index
    %c0_1 = arith.constant 0 : index
    %c0_2 = arith.constant 0 : index
    %0 = vector.load %arg1[%c0, %c0_0, %c0_1, %c0_2] : memref<1x18x18x64xbf16, #tpu.memory_space<vmem>>, vector<1x16x16x64xbf16>
    %1 = vector.shape_cast %0 : vector<1x16x16x64xbf16> to vector<16x16x64xbf16>
    %2 = vector.shape_cast %1 : vector<16x16x64xbf16> to vector<256x64xbf16>
    %c0_3 = arith.constant 0 : index
    %c0_4 = arith.constant 0 : index
    %3 = vector.load %arg10[%c0_3, %c0_4] : memref<256x576xbf16, #tpu.memory_space<vmem>>, vector<256x64xbf16>
    tpu.vector_store %arg10[%c0_3, %c0_4], %2 {strides = array<i32>} : memref<256x576xbf16, #tpu.memory_space<vmem>>, vector<256x64xbf16>,
    %c0_5 = arith.constant 0 : index
    %c0_6 = arith.constant 0 : index
    %c1 = arith.constant 1 : index
    %c0_7 = arith.constant 0 : index
    %4 = vector.load %arg1[%c0_5, %c0_6, %c1, %c0_7] : memref<1x18x18x64xbf16, #tpu.memory_space<vmem>>, vector<1x16x16x64xbf16>
    %5 = vector.shape_cast %4 : vector<1x16x16x64xbf16> to vector<16x16x64xbf16>
    %6 = vector.shape_cast %5 : vector<16x16x64xbf16> to vector<256x64xbf16>
    %c0_8 = arith.constant 0 : index
    %c64 = arith.constant 64 : index
    %7 = vector.load %arg10[%c0_8, %c64] : memref<256x576xbf16, #tpu.memory_space<vmem>>, vector<256x64xbf16>
    tpu.vector_store %arg10[%c0_8, %c64], %6 {strides = array<i32>} : memref<256x576xbf16, #tpu.memory_space<vmem>>, vector<256x64xbf16>,
    %c0_9 = arith.constant 0 : index
    %c0_10 = arith.constant 0 : index
    %c2 = arith.constant 2 : index
    %c0_11 = arith.constant 0 : index
    %8 = vector.load %arg1[%c0_9, %c0_10, %c2, %c0_11] : memref<1x18x18x64xbf16, #tpu.memory_space<vmem>>, vector<1x16x16x64xbf16>
    %9 = vector.shape_cast %8 : vector<1x16x16x64xbf16> to vector<16x16x64xbf16>
    %10 = vector.shape_cast %9 : vector<16x16x64xbf16> to vector<256x64xbf16>
    %c0_12 = arith.constant 0 : index
    %c128 = arith.constant 128 : index
    %11 = vector.load %arg10[%c0_12, %c128] : memref<256x576xbf16, #tpu.memory_space<vmem>>, vector<256x64xbf16>
    tpu.vector_store %arg10[%c0_12, %c128], %10 {strides = array<i32>} : memref<256x576xbf16, #tpu.memory_space<vmem>>, vector<256x64xbf16>,
    %c0_13 = arith.constant 0 : index
    %c1_14 = arith.constant 1 : index
    %c0_15 = arith.constant 0 : index
    %c0_16 = arith.constant 0 : index
    %12 = vector.load %arg1[%c0_13, %c1_14, %c0_15, %c0_16] : memref<1x18x18x64xbf16, #tpu.memory_space<vmem>>, vector<1x16x16x64xbf16>
    %13 = vector.shape_cast %12 : vector<1x16x16x64xbf16> to vector<16x16x64xbf16>
    %14 = vector.shape_cast %13 : vector<16x16x64xbf16> to vector<256x64xbf16>
    %c0_17 = arith.constant 0 : index
    %c192 = arith.constant 192 : index
    %15 = vector.load %arg10[%c0_17, %c192] : memref<256x576xbf16, #tpu.memory_space<vmem>>, vector<256x64xbf16>
    tpu.vector_store %arg10[%c0_17, %c192], %14 {strides = array<i32>} : memref<256x576xbf16, #tpu.memory_space<vmem>>, vector<256x64xbf16>,
    %c0_18 = arith.constant 0 : index
    %c1_19 = arith.constant 1 : index
    %c1_20 = arith.constant 1 : index
    %c0_21 = arith.constant 0 : index
    %16 = vector.load %arg1[%c0_18, %c1_19, %c1_20, %c0_21] : memref<1x18x18x64xbf16, #tpu.memory_space<vmem>>, vector<1x16x16x64xbf16>
    %17 = vector.shape_cast %16 : vector<1x16x16x64xbf16> to vector<16x16x64xbf16>
    %18 = vector.shape_cast %17 : vector<16x16x64xbf16> to vector<256x64xbf16>
    %c0_22 = arith.constant 0 : index
    %c256 = arith.constant 256 : index
    %19 = vector.load %arg10[%c0_22, %c256] : memref<256x576xbf16, #tpu.memory_space<vmem>>, vector<256x64xbf16>
    tpu.vector_store %arg10[%c0_22, %c256], %18 {strides = array<i32>} : memref<256x576xbf16, #tpu.memory_space<vmem>>, vector<256x64xbf16>,
    %c0_23 = arith.constant 0 : index
    %c1_24 = arith.constant 1 : index
    %c2_25 = arith.constant 2 : index
    %c0_26 = arith.constant 0 : index
    %20 = vector.load %arg1[%c0_23, %c1_24, %c2_25, %c0_26] : memref<1x18x18x64xbf16, #tpu.memory_space<vmem>>, vector<1x16x16x64xbf16>
    %21 = vector.shape_cast %20 : vector<1x16x16x64xbf16> to vector<16x16x64xbf16>
    %22 = vector.shape_cast %21 : vector<16x16x64xbf16> to vector<256x64xbf16>
    %c0_27 = arith.constant 0 : index
    %c320 = arith.constant 320 : index
    %23 = vector.load %arg10[%c0_27, %c320] : memref<256x576xbf16, #tpu.memory_space<vmem>>, vector<256x64xbf16>
    tpu.vector_store %arg10[%c0_27, %c320], %22 {strides = array<i32>} : memref<256x576xbf16, #tpu.memory_space<vmem>>, vector<256x64xbf16>,
    %c0_28 = arith.constant 0 : index
    %c2_29 = arith.constant 2 : index
    %c0_30 = arith.constant 0 : index
    %c0_31 = arith.constant 0 : index
    %24 = vector.load %arg1[%c0_28, %c2_29, %c0_30, %c0_31] : memref<1x18x18x64xbf16, #tpu.memory_space<vmem>>, vector<1x16x16x64xbf16>
    %25 = vector.shape_cast %24 : vector<1x16x16x64xbf16> to vector<16x16x64xbf16>
    %26 = vector.shape_cast %25 : vector<16x16x64xbf16> to vector<256x64xbf16>
    %c0_32 = arith.constant 0 : index
    %c384 = arith.constant 384 : index
    %27 = vector.load %arg10[%c0_32, %c384] : memref<256x576xbf16, #tpu.memory_space<vmem>>, vector<256x64xbf16>
    tpu.vector_store %arg10[%c0_32, %c384], %26 {strides = array<i32>} : memref<256x576xbf16, #tpu.memory_space<vmem>>, vector<256x64xbf16>,
    %c0_33 = arith.constant 0 : index
    %c2_34 = arith.constant 2 : index
    %c1_35 = arith.constant 1 : index
    %c0_36 = arith.constant 0 : index
    %28 = vector.load %arg1[%c0_33, %c2_34, %c1_35, %c0_36] : memref<1x18x18x64xbf16, #tpu.memory_space<vmem>>, vector<1x16x16x64xbf16>
    %29 = vector.shape_cast %28 : vector<1x16x16x64xbf16> to vector<16x16x64xbf16>
    %30 = vector.shape_cast %29 : vector<16x16x64xbf16> to vector<256x64xbf16>
    %c0_37 = arith.constant 0 : index
    %c448 = arith.constant 448 : index
    %31 = vector.load %arg10[%c0_37, %c448] : memref<256x576xbf16, #tpu.memory_space<vmem>>, vector<256x64xbf16>
    tpu.vector_store %arg10[%c0_37, %c448], %30 {strides = array<i32>} : memref<256x576xbf16, #tpu.memory_space<vmem>>, vector<256x64xbf16>,
    %c0_38 = arith.constant 0 : index
    %c2_39 = arith.constant 2 : index
    %c2_40 = arith.constant 2 : index
    %c0_41 = arith.constant 0 : index
    %32 = vector.load %arg1[%c0_38, %c2_39, %c2_40, %c0_41] : memref<1x18x18x64xbf16, #tpu.memory_space<vmem>>, vector<1x16x16x64xbf16>
    %33 = vector.shape_cast %32 : vector<1x16x16x64xbf16> to vector<16x16x64xbf16>
    %34 = vector.shape_cast %33 : vector<16x16x64xbf16> to vector<256x64xbf16>
    %c0_42 = arith.constant 0 : index
    %c512 = arith.constant 512 : index
    %35 = vector.load %arg10[%c0_42, %c512] : memref<256x576xbf16, #tpu.memory_space<vmem>>, vector<256x64xbf16>
    tpu.vector_store %arg10[%c0_42, %c512], %34 {strides = array<i32>} : memref<256x576xbf16, #tpu.memory_space<vmem>>, vector<256x64xbf16>,
    %c0_43 = arith.constant 0 : index
    %c0_44 = arith.constant 0 : index
    %36 = vector.load %arg10[%c0_43, %c0_44] : memref<256x576xbf16, #tpu.memory_space<vmem>>, vector<256x576xbf16>
    %c0_45 = arith.constant 0 : index
    %c0_46 = arith.constant 0 : index
    %37 = vector.load %arg3[%c0_45, %c0_46] : memref<576x64xbf16, #tpu.memory_space<vmem>>, vector<576x64xbf16>
    %cst = arith.constant dense<0.000000e+00> : vector<256x64xf32>
    %38 = tpu.matmul %36, %37, %cst {dimension_numbers = #tpu.dot_dimension_numbers<[1], [0], [0], [1], [0, 0, 1, 1], [], []>} : vector<256x576xbf16>, vector<576x64xbf16>, vector<256x64xf32> -> vector<256x64xf32>
    %cst_47 = arith.constant dense<0.000000e+00> : vector<64xf32>
    %39 = vector.multi_reduction <add>, %38, %cst_47 [0] : vector<256x64xf32> to vector<64xf32>
    %40 = vector.shape_cast %39 : vector<64xf32> to vector<1x64xf32>
    %cst_48 = arith.constant 2.560000e+02 : f32
    %41 = vector.broadcast %cst_48 : f32 to vector<1x64xf32>
    %42 = arith.divf %40, %41 : vector<1x64xf32>
    %43 = vector.broadcast %42 : vector<1x64xf32> to vector<256x64xf32>
    %44 = arith.subf %38, %43 : vector<256x64xf32>
    %45 = arith.mulf %44, %44 : vector<256x64xf32>
    %cst_49 = arith.constant dense<0.000000e+00> : vector<64xf32>
    %46 = vector.multi_reduction <add>, %45, %cst_49 [0] : vector<256x64xf32> to vector<64xf32>
    %47 = vector.shape_cast %46 : vector<64xf32> to vector<1x64xf32>
    %cst_50 = arith.constant 2.560000e+02 : f32
    %48 = vector.broadcast %cst_50 : f32 to vector<1x64xf32>
    %49 = arith.divf %47, %48 : vector<1x64xf32>
    %cst_51 = arith.constant 9.99999974E-6 : f32
    %50 = vector.broadcast %cst_51 : f32 to vector<1x64xf32>
    %51 = arith.addf %49, %50 : vector<1x64xf32>
    %52 = math.rsqrt %51 : vector<1x64xf32>
    %53 = vector.broadcast %52 : vector<1x64xf32> to vector<256x64xf32>
    %54 = arith.mulf %44, %53 : vector<256x64xf32>
    %c0_52 = arith.constant 0 : index
    %c0_53 = arith.constant 0 : index
    %55 = vector.load %arg5[%c0_52, %c0_53] : memref<1x64xf32, #tpu.memory_space<vmem>>, vector<1x64xf32>
    %56 = vector.broadcast %55 : vector<1x64xf32> to vector<256x64xf32>
    %57 = arith.mulf %54, %56 : vector<256x64xf32>
    %c0_54 = arith.constant 0 : index
    %c0_55 = arith.constant 0 : index
    %58 = vector.load %arg6[%c0_54, %c0_55] : memref<1x64xf32, #tpu.memory_space<vmem>>, vector<1x64xf32>
    %59 = vector.broadcast %58 : vector<1x64xf32> to vector<256x64xf32>
    %60 = arith.addf %57, %59 : vector<256x64xf32>
    %cst_56 = arith.constant 0.000000e+00 : f32
    %61 = vector.broadcast %cst_56 : f32 to vector<256x64xf32>
    %62 = arith.cmpf ogt, %60, %61 : vector<256x64xf32>
    %cst_57 = arith.constant 2.000000e-01 : f32
    %63 = vector.broadcast %cst_57 : f32 to vector<256x64xf32>
    %64 = arith.mulf %63, %60 : vector<256x64xf32>
    %65 = arith.select %62, %60, %64 : vector<256x64xi1>, vector<256x64xf32>
    %cst_58 = arith.constant 0.000000e+00 : bf16
    %66 = vector.broadcast %cst_58 : bf16 to vector<1x18x64xbf16>
    %c0_59 = arith.constant 0 : index
    %c0_60 = arith.constant 0 : index
    %c0_61 = arith.constant 0 : index
    %67 = vector.load %arg11[%c0_59, %c0_60, %c0_61] : memref<18x18x64xbf16, #tpu.memory_space<vmem>>, vector<1x18x64xbf16>
    tpu.vector_store %arg11[%c0_59, %c0_60, %c0_61], %66 {strides = array<i32>} : memref<18x18x64xbf16, #tpu.memory_space<vmem>>, vector<1x18x64xbf16>,
    %c17 = arith.constant 17 : index
    %c0_62 = arith.constant 0 : index
    %c0_63 = arith.constant 0 : index
    %68 = vector.load %arg11[%c17, %c0_62, %c0_63] : memref<18x18x64xbf16, #tpu.memory_space<vmem>>, vector<1x18x64xbf16>
    tpu.vector_store %arg11[%c17, %c0_62, %c0_63], %66 {strides = array<i32>} : memref<18x18x64xbf16, #tpu.memory_space<vmem>>, vector<1x18x64xbf16>,
    %cst_64 = arith.constant 0.000000e+00 : bf16
    %69 = vector.broadcast %cst_64 : bf16 to vector<16x1x64xbf16>
    %c1_65 = arith.constant 1 : index
    %c0_66 = arith.constant 0 : index
    %c0_67 = arith.constant 0 : index
    %70 = vector.load %arg11[%c1_65, %c0_66, %c0_67] : memref<18x18x64xbf16, #tpu.memory_space<vmem>>, vector<16x1x64xbf16>
    tpu.vector_store %arg11[%c1_65, %c0_66, %c0_67], %69 {strides = array<i32>} : memref<18x18x64xbf16, #tpu.memory_space<vmem>>, vector<16x1x64xbf16>,
    %c1_68 = arith.constant 1 : index
    %c17_69 = arith.constant 17 : index
    %c0_70 = arith.constant 0 : index
    %71 = vector.load %arg11[%c1_68, %c17_69, %c0_70] : memref<18x18x64xbf16, #tpu.memory_space<vmem>>, vector<16x1x64xbf16>
    tpu.vector_store %arg11[%c1_68, %c17_69, %c0_70], %69 {strides = array<i32>} : memref<18x18x64xbf16, #tpu.memory_space<vmem>>, vector<16x1x64xbf16>,
    %72 = arith.truncf %65 : vector<256x64xf32> to vector<256x64xbf16>
    %73 = vector.shape_cast %72 : vector<256x64xbf16> to vector<16x16x64xbf16>
    %c1_71 = arith.constant 1 : index
    %c1_72 = arith.constant 1 : index
    %c0_73 = arith.constant 0 : index
    %74 = vector.load %arg11[%c1_71, %c1_72, %c0_73] : memref<18x18x64xbf16, #tpu.memory_space<vmem>>, vector<16x16x64xbf16>
    tpu.vector_store %arg11[%c1_71, %c1_72, %c0_73], %73 {strides = array<i32>} : memref<18x18x64xbf16, #tpu.memory_space<vmem>>, vector<16x16x64xbf16>,
    %c0_74 = arith.constant 0 : index
    %c0_75 = arith.constant 0 : index
    %c0_76 = arith.constant 0 : index
    %75 = vector.load %arg11[%c0_74, %c0_75, %c0_76] : memref<18x18x64xbf16, #tpu.memory_space<vmem>>, vector<16x16x64xbf16>
    %76 = vector.shape_cast %75 : vector<16x16x64xbf16> to vector<256x64xbf16>
    %c0_77 = arith.constant 0 : index
    %c0_78 = arith.constant 0 : index
    %77 = vector.load %arg10[%c0_77, %c0_78] : memref<256x576xbf16, #tpu.memory_space<vmem>>, vector<256x64xbf16>
    tpu.vector_store %arg10[%c0_77, %c0_78], %76 {strides = array<i32>} : memref<256x576xbf16, #tpu.memory_space<vmem>>, vector<256x64xbf16>,
    %c0_79 = arith.constant 0 : index
    %c1_80 = arith.constant 1 : index
    %c0_81 = arith.constant 0 : index
    %78 = vector.load %arg11[%c0_79, %c1_80, %c0_81] : memref<18x18x64xbf16, #tpu.memory_space<vmem>>, vector<16x16x64xbf16>
    %79 = vector.shape_cast %78 : vector<16x16x64xbf16> to vector<256x64xbf16>
    %c0_82 = arith.constant 0 : index
    %c64_83 = arith.constant 64 : index
    %80 = vector.load %arg10[%c0_82, %c64_83] : memref<256x576xbf16, #tpu.memory_space<vmem>>, vector<256x64xbf16>
    tpu.vector_store %arg10[%c0_82, %c64_83], %79 {strides = array<i32>} : memref<256x576xbf16, #tpu.memory_space<vmem>>, vector<256x64xbf16>,
    %c0_84 = arith.constant 0 : index
    %c2_85 = arith.constant 2 : index
    %c0_86 = arith.constant 0 : index
    %81 = vector.load %arg11[%c0_84, %c2_85, %c0_86] : memref<18x18x64xbf16, #tpu.memory_space<vmem>>, vector<16x16x64xbf16>
    %82 = vector.shape_cast %81 : vector<16x16x64xbf16> to vector<256x64xbf16>
    %c0_87 = arith.constant 0 : index
    %c128_88 = arith.constant 128 : index
    %83 = vector.load %arg10[%c0_87, %c128_88] : memref<256x576xbf16, #tpu.memory_space<vmem>>, vector<256x64xbf16>
    tpu.vector_store %arg10[%c0_87, %c128_88], %82 {strides = array<i32>} : memref<256x576xbf16, #tpu.memory_space<vmem>>, vector<256x64xbf16>,
    %c1_89 = arith.constant 1 : index
    %c0_90 = arith.constant 0 : index
    %c0_91 = arith.constant 0 : index
    %84 = vector.load %arg11[%c1_89, %c0_90, %c0_91] : memref<18x18x64xbf16, #tpu.memory_space<vmem>>, vector<16x16x64xbf16>
    %85 = vector.shape_cast %84 : vector<16x16x64xbf16> to vector<256x64xbf16>
    %c0_92 = arith.constant 0 : index
    %c192_93 = arith.constant 192 : index
    %86 = vector.load %arg10[%c0_92, %c192_93] : memref<256x576xbf16, #tpu.memory_space<vmem>>, vector<256x64xbf16>
    tpu.vector_store %arg10[%c0_92, %c192_93], %85 {strides = array<i32>} : memref<256x576xbf16, #tpu.memory_space<vmem>>, vector<256x64xbf16>,
    %c1_94 = arith.constant 1 : index
    %c1_95 = arith.constant 1 : index
    %c0_96 = arith.constant 0 : index
    %87 = vector.load %arg11[%c1_94, %c1_95, %c0_96] : memref<18x18x64xbf16, #tpu.memory_space<vmem>>, vector<16x16x64xbf16>
    %88 = vector.shape_cast %87 : vector<16x16x64xbf16> to vector<256x64xbf16>
    %c0_97 = arith.constant 0 : index
    %c256_98 = arith.constant 256 : index
    %89 = vector.load %arg10[%c0_97, %c256_98] : memref<256x576xbf16, #tpu.memory_space<vmem>>, vector<256x64xbf16>
    tpu.vector_store %arg10[%c0_97, %c256_98], %88 {strides = array<i32>} : memref<256x576xbf16, #tpu.memory_space<vmem>>, vector<256x64xbf16>,
    %c1_99 = arith.constant 1 : index
    %c2_100 = arith.constant 2 : index
    %c0_101 = arith.constant 0 : index
    %90 = vector.load %arg11[%c1_99, %c2_100, %c0_101] : memref<18x18x64xbf16, #tpu.memory_space<vmem>>, vector<16x16x64xbf16>
    %91 = vector.shape_cast %90 : vector<16x16x64xbf16> to vector<256x64xbf16>
    %c0_102 = arith.constant 0 : index
    %c320_103 = arith.constant 320 : index
    %92 = vector.load %arg10[%c0_102, %c320_103] : memref<256x576xbf16, #tpu.memory_space<vmem>>, vector<256x64xbf16>
    tpu.vector_store %arg10[%c0_102, %c320_103], %91 {strides = array<i32>} : memref<256x576xbf16, #tpu.memory_space<vmem>>, vector<256x64xbf16>,
    %c2_104 = arith.constant 2 : index
    %c0_105 = arith.constant 0 : index
    %c0_106 = arith.constant 0 : index
    %93 = vector.load %arg11[%c2_104, %c0_105, %c0_106] : memref<18x18x64xbf16, #tpu.memory_space<vmem>>, vector<16x16x64xbf16>
    %94 = vector.shape_cast %93 : vector<16x16x64xbf16> to vector<256x64xbf16>
    %c0_107 = arith.constant 0 : index
    %c384_108 = arith.constant 384 : index
    %95 = vector.load %arg10[%c0_107, %c384_108] : memref<256x576xbf16, #tpu.memory_space<vmem>>, vector<256x64xbf16>
    tpu.vector_store %arg10[%c0_107, %c384_108], %94 {strides = array<i32>} : memref<256x576xbf16, #tpu.memory_space<vmem>>, vector<256x64xbf16>,
    %c2_109 = arith.constant 2 : index
    %c1_110 = arith.constant 1 : index
    %c0_111 = arith.constant 0 : index
    %96 = vector.load %arg11[%c2_109, %c1_110, %c0_111] : memref<18x18x64xbf16, #tpu.memory_space<vmem>>, vector<16x16x64xbf16>
    %97 = vector.shape_cast %96 : vector<16x16x64xbf16> to vector<256x64xbf16>
    %c0_112 = arith.constant 0 : index
    %c448_113 = arith.constant 448 : index
    %98 = vector.load %arg10[%c0_112, %c448_113] : memref<256x576xbf16, #tpu.memory_space<vmem>>, vector<256x64xbf16>
    tpu.vector_store %arg10[%c0_112, %c448_113], %97 {strides = array<i32>} : memref<256x576xbf16, #tpu.memory_space<vmem>>, vector<256x64xbf16>,
    %c2_114 = arith.constant 2 : index
    %c2_115 = arith.constant 2 : index
    %c0_116 = arith.constant 0 : index
    %99 = vector.load %arg11[%c2_114, %c2_115, %c0_116] : memref<18x18x64xbf16, #tpu.memory_space<vmem>>, vector<16x16x64xbf16>
    %100 = vector.shape_cast %99 : vector<16x16x64xbf16> to vector<256x64xbf16>
    %c0_117 = arith.constant 0 : index
    %c512_118 = arith.constant 512 : index
    %101 = vector.load %arg10[%c0_117, %c512_118] : memref<256x576xbf16, #tpu.memory_space<vmem>>, vector<256x64xbf16>
    tpu.vector_store %arg10[%c0_117, %c512_118], %100 {strides = array<i32>} : memref<256x576xbf16, #tpu.memory_space<vmem>>, vector<256x64xbf16>,
    %c0_119 = arith.constant 0 : index
    %c0_120 = arith.constant 0 : index
    %102 = vector.load %arg10[%c0_119, %c0_120] : memref<256x576xbf16, #tpu.memory_space<vmem>>, vector<256x576xbf16>
    %c0_121 = arith.constant 0 : index
    %c0_122 = arith.constant 0 : index
    %103 = vector.load %arg4[%c0_121, %c0_122] : memref<576x64xbf16, #tpu.memory_space<vmem>>, vector<576x64xbf16>
    %cst_123 = arith.constant dense<0.000000e+00> : vector<256x64xf32>
    %104 = tpu.matmul %102, %103, %cst_123 {dimension_numbers = #tpu.dot_dimension_numbers<[1], [0], [0], [1], [0, 0, 1, 1], [], []>} : vector<256x576xbf16>, vector<576x64xbf16>, vector<256x64xf32> -> vector<256x64xf32>
    %cst_124 = arith.constant dense<0.000000e+00> : vector<64xf32>
    %105 = vector.multi_reduction <add>, %104, %cst_124 [0] : vector<256x64xf32> to vector<64xf32>
    %106 = vector.shape_cast %105 : vector<64xf32> to vector<1x64xf32>
    %cst_125 = arith.constant 2.560000e+02 : f32
    %107 = vector.broadcast %cst_125 : f32 to vector<1x64xf32>
    %108 = arith.divf %106, %107 : vector<1x64xf32>
    %109 = vector.broadcast %108 : vector<1x64xf32> to vector<256x64xf32>
    %110 = arith.subf %104, %109 : vector<256x64xf32>
    %111 = arith.mulf %110, %110 : vector<256x64xf32>
    %cst_126 = arith.constant dense<0.000000e+00> : vector<64xf32>
    %112 = vector.multi_reduction <add>, %111, %cst_126 [0] : vector<256x64xf32> to vector<64xf32>
    %113 = vector.shape_cast %112 : vector<64xf32> to vector<1x64xf32>
    %cst_127 = arith.constant 2.560000e+02 : f32
    %114 = vector.broadcast %cst_127 : f32 to vector<1x64xf32>
    %115 = arith.divf %113, %114 : vector<1x64xf32>
    %cst_128 = arith.constant 9.99999974E-6 : f32
    %116 = vector.broadcast %cst_128 : f32 to vector<1x64xf32>
    %117 = arith.addf %115, %116 : vector<1x64xf32>
    %118 = math.rsqrt %117 : vector<1x64xf32>
    %119 = vector.broadcast %118 : vector<1x64xf32> to vector<256x64xf32>
    %120 = arith.mulf %110, %119 : vector<256x64xf32>
    %c0_129 = arith.constant 0 : index
    %c0_130 = arith.constant 0 : index
    %121 = vector.load %arg7[%c0_129, %c0_130] : memref<1x64xf32, #tpu.memory_space<vmem>>, vector<1x64xf32>
    %122 = vector.broadcast %121 : vector<1x64xf32> to vector<256x64xf32>
    %123 = arith.mulf %120, %122 : vector<256x64xf32>
    %c0_131 = arith.constant 0 : index
    %c0_132 = arith.constant 0 : index
    %124 = vector.load %arg8[%c0_131, %c0_132] : memref<1x64xf32, #tpu.memory_space<vmem>>, vector<1x64xf32>
    %125 = vector.broadcast %124 : vector<1x64xf32> to vector<256x64xf32>
    %126 = arith.addf %123, %125 : vector<256x64xf32>
    %c0_133 = arith.constant 0 : index
    %c0_134 = arith.constant 0 : index
    %c0_135 = arith.constant 0 : index
    %c0_136 = arith.constant 0 : index
    %127 = vector.load %arg2[%c0_133, %c0_134, %c0_135, %c0_136] : memref<1x16x16x64xf32, #tpu.memory_space<vmem>>, vector<1x16x16x64xf32>
    %128 = vector.shape_cast %127 : vector<1x16x16x64xf32> to vector<16x16x64xf32>
    %129 = vector.shape_cast %128 : vector<16x16x64xf32> to vector<256x64xf32>
    %130 = arith.addf %126, %129 : vector<256x64xf32>
    %131 = vector.shape_cast %130 : vector<256x64xf32> to vector<1x16x16x64xf32>
    %c0_137 = arith.constant 0 : index
    %c0_138 = arith.constant 0 : index
    %c0_139 = arith.constant 0 : index
    %c0_140 = arith.constant 0 : index
    %132 = vector.load %arg9[%c0_137, %c0_138, %c0_139, %c0_140] : memref<1x16x16x64xf32, #tpu.memory_space<vmem>>, vector<1x16x16x64xf32>
    tpu.vector_store %arg9[%c0_137, %c0_138, %c0_139, %c0_140], %131 {strides = array<i32>} : memref<1x16x16x64xf32, #tpu.memory_space<vmem>>, vector<1x16x16x64xf32>,
    return
  }
  func.func @transform_0(%arg0: i32) -> (i32, i32, i32, i32) {
    %c0_i32 = arith.constant 0 : i32
    %c0_i32_0 = arith.constant 0 : i32
    %c0_i32_1 = arith.constant 0 : i32
    %c0_i32_2 = arith.constant 0 : i32
    return %arg0, %c0_i32, %c0_i32_0, %c0_i32_1 : i32, i32, i32, i32
  }
  func.func @transform_1(%arg0: i32) -> (i32, i32, i32, i32) {
    %c0_i32 = arith.constant 0 : i32
    %c0_i32_0 = arith.constant 0 : i32
    %c0_i32_1 = arith.constant 0 : i32
    %c0_i32_2 = arith.constant 0 : i32
    return %arg0, %c0_i32, %c0_i32_0, %c0_i32_1 : i32, i32, i32, i32
  }
  func.func @transform_2(%arg0: i32) -> (i32, i32) {
    %c0_i32 = arith.constant 0 : i32
    %c0_i32_0 = arith.constant 0 : i32
    %c0_i32_1 = arith.constant 0 : i32
    return %c0_i32, %c0_i32_0 : i32, i32
  }
  func.func @transform_3(%arg0: i32) -> (i32, i32) {
    %c0_i32 = arith.constant 0 : i32
    %c0_i32_0 = arith.constant 0 : i32
    %c0_i32_1 = arith.constant 0 : i32
    return %c0_i32, %c0_i32_0 : i32, i32
  }
  func.func @transform_4(%arg0: i32) -> (i32, i32) {
    %c0_i32 = arith.constant 0 : i32
    %c0_i32_0 = arith.constant 0 : i32
    %c0_i32_1 = arith.constant 0 : i32
    return %c0_i32, %c0_i32_0 : i32, i32
  }
  func.func @transform_5(%arg0: i32) -> (i32, i32) {
    %c0_i32 = arith.constant 0 : i32
    %c0_i32_0 = arith.constant 0 : i32
    %c0_i32_1 = arith.constant 0 : i32
    return %c0_i32, %c0_i32_0 : i32, i32
  }
  func.func @transform_6(%arg0: i32) -> (i32, i32) {
    %c0_i32 = arith.constant 0 : i32
    %c0_i32_0 = arith.constant 0 : i32
    %c0_i32_1 = arith.constant 0 : i32
    return %c0_i32, %c0_i32_0 : i32, i32
  }
  func.func @transform_7(%arg0: i32) -> (i32, i32) {
    %c0_i32 = arith.constant 0 : i32
    %c0_i32_0 = arith.constant 0 : i32
    %c0_i32_1 = arith.constant 0 : i32
    return %c0_i32, %c0_i32_0 : i32, i32
  }
  func.func @transform_8(%arg0: i32) -> (i32, i32, i32, i32) {
    %c0_i32 = arith.constant 0 : i32
    %c0_i32_0 = arith.constant 0 : i32
    %c0_i32_1 = arith.constant 0 : i32
    %c0_i32_2 = arith.constant 0 : i32
    return %arg0, %c0_i32, %c0_i32_0, %c0_i32_1 : i32, i32, i32, i32
  }
}

</mosaic_0001>

<bundles_post_ra>
// kernel: tpu_custom_call.1
= control target key start
LH: loop header
LB: loop body
LE: loop exit
PB: predicated region body
PF: predicated region fallthrough
CT: control target
= control target key end

     0   :  { %13 = vsyncpa [#allocation5], 0  ;;  %s17466_s0 = inlined_call_operand.vmem [shape: bf16[2,18,18,64], index: 0, kind: input, shape index: {}]   ;;  %s17467_s1 = inlined_call_operand.vmem [shape: f32[2,16,16,64], index: 1, kind: input, shape index: {}]   ;;  %s17468_s2 = inlined_call_operand.vmem [shape: bf16[576,64], index: 2, kind: input, shape index: {}]   ;;  %s17469_s3 = inlined_call_operand.vmem [shape: bf16[576,64], index: 3, kind: input, shape index: {}]   ;;  %s17470_s4 = inlined_call_operand.vmem [shape: f32[1,64], index: 4, kind: input, shape index: {}]   ;;  %s17471_s5 = inlined_call_operand.vmem [shape: f32[1,64], index: 5, kind: input, shape index: {}]   ;;  %s17472_s6 = inlined_call_operand.vmem [shape: f32[1,64], index: 6, kind: input, shape index: {}]   ;;  %s17473_s7 = inlined_call_operand.vmem [shape: f32[1,64], index: 7, kind: input, shape index: {}]   ;;  %s17474_s8 = inlined_call_operand.hbm [shape: f32[2,16,16,64], index: 8, kind: output, shape index: {}]  }
   0x1   :  { %15 = vsyncpa [#allocation5 + $0x1], 0  ;;  %s11772_s27 = smov 0   ;;  %s11774_s28 = smov 0  }
   0x2   :  { %s11776_s29 = smov 0   ;;  %s11778_s30 = smov 0  }
   0x3 LB: > { %s11793_s9 = sadd.s32 4294967295, %s11720_s30   ;;  %s10028_s10 = sadd.s32 4294967294, %s11720_s30   ;;  %s11720_s30 = sphi %s11778_s30, %s18003_s30   ;;  %s11716_s29 = sphi %s11776_s29, %s18002_s29   ;;  %s11712_s28 = sphi %s11774_s28, %s18001_s28   ;;  %s11708_s27 = sphi %s11772_s27, %s18000_s27  }
   0x4   : > { %s11797_s11 = sadd.s32 1, %s11720_s30   ;;  %s206_s12 = sadd.s32 1, %s11716_s29 }
   0x5   : > { %s203_s13 = ssub.s32 %s11720_s30, %s11797_s11  ;;  %p216_p0 = scmp.ne.s32.totalorder %s11716_s29, %s11712_s28 }
   0x6   : > { %p204_p1 = scmp.eq.s32.totalorder %s203_s13, 0  ;;  %p217_p2 = scmp.eq.s32.totalorder %s11793_s9, 1 }
   0x7   : > { %p222_p3 = scmp.ne.s32.totalorder %s11712_s28, %s11708_s27  ;;  %p223_p4 = scmp.eq.s32.totalorder %s10028_s10, 1 }
   0x8   : > { %s11808_s14 = scalar_select %p204_p1, %s11716_s29, %s206_s12  }
   0x9   : > { %p11810_p5 = por %p217_p2, %p216_p0  ;;  %p11814_p6 = por %p223_p4, %p222_p3 }
   0xa   : > { %p10031_p7 = scmp.ge.s32.totalorder %s11720_s30, 1  ;;  %p275_p8 = scmp.lt.s32.totalorder %s11720_s30, 3 }
   0xc   : > { %p276_p9 = pnand %p10031_p7, %p275_p8 }
   0xe   : > { %279 = sbr.rel (%p276_p9) target bundleno = 1831 (0x727), region = 52 }
  0x13   : > { %p314_p10 = scmp.lt.s32.totalorder %s11793_s9, 1  ;;  %vm438_vm0 = vsmask.f32 3328  ;;  %s11722_s22 = smov 64   ;;  %vm439_vm1 = vsmask.f32 7440 }
  0x14   : > { %vm11842_vm2 = vmor %vm438_vm0, %vm439_vm1  ;;  %vm1050_vm3 = vcmask 1042432   ;;  %vm1051_vm4 = vcmask 1046532   ;;  %vm17480_vm5 = vcmask 519168   ;;  %vm17478_vm7 = vcmask 1043968   ;;  %s311_s25 = sand.u32 1, %s11712_s28   ;;  %s11586_s20 = sshll.u32 %s11793_s9, 8 }
  0x15   : > { %s11822_s17 = scalar_select %p314_p10, %s11793_s9, 1  ;;  %vm12010_vm6 = vmor %vm1050_vm3, %vm1051_vm4  ;;  %vm17477_vm8 = vcmask 523264   ;;  %vm4853_vm9 = vcmask 516096   ;;  %vm4861_vm10 = vsmask.f32 256 }
  0x16   : > { %vm13568_vm11 = vmand %vm4853_vm9, %vm4861_vm10  ;;  %vm17479_vm12 = vsmask.f32 7938  ;;  %vm4993_vm3 = vsmask.f32 4368  ;;  %s9939_s26 = scalar_lea.sflag [#allocation5], %s311_s25 }
  0x17   : > { %s11603_s18 = smul.u32 216, %s11822_s17  ;;  %vm13581_vm13 = vmand %vm4853_vm9, %vm17479_vm12 }
  0x19   : > { %s11828_s21 = scalar_lea.vmem %s17466_s0, %s11603_s18 }
  0x1a   : > { %v10068_v0 = vld [vmem:[%s11828_s21 + $0x6c] sm:$0xf]  ;;  %v414_v1 = vld [vmem:[%s11828_s21 + $0x60] sm:$0xf]  ;;  %v415_v2 = vld [vmem:[%s11828_s21 + $0x64] sm:$0xf] }
  0x1b   : > { %1326 = vrot.lane.b32.xlu1 %v10068_v0, %s11722_s22  ;;  %v634_v3 = vshrl.u32 %v414_v1, 16  ;;  %v637_v4 = vshll.u32 %v414_v1, 16  ;;  %v418_v5 = vld [vmem:[%s11828_s21 + $0x70] sm:$0xf]  ;;  %v643_v6 = vshll.u32 %v415_v2, 16  ;;  %v647_v7 = vshrl.u32 %v415_v2, 16 }
  0x1c   : > { %v419_v8 = vld [vmem:[%s11828_s21 + $0x74] sm:$0x1]  ;;  %v667_v9 = vshll.u32 %v418_v5, 16  ;;  %v671_v10 = vshrl.u32 %v418_v5, 16  ;;  %v416_v13 = vld [vmem:[%s11828_s21 + $0x68] sm:$0x1] }
  0x1d   : > { %v636_v11 = vrot.slane %v634_v3, 4  ;;  %v639_v12 = vrot.slane %v637_v4, 5  ;;  %v649_v14 = vrot.slane %v647_v7, 4  ;;  %v677_v17 = vshll.u32 %v419_v8, 16  ;;  %v393_v18 = vld [vmem:[%s11828_s21 + $0xc] sm:$0xf] }
  0x1e   : > { %v11837_v15 = vrot.slane %v667_v9, 5  ;;  %v673_v16 = vrot.slane %v671_v10, 4  ;;  %v10069_v19 = vld [vmem:[%s11828_s21 + $0x70] sm:$0xf]  ;;  %v645_v21 = vrot.slane %v643_v6, 5  ;;  %v653_v22 = vshll.u32 %v416_v13, 16 }
  0x1f   : > { %v640_v20 = vor.u32 %v639_v12, %v636_v11  ;;  %v466_v25 = vshrl.u32 %v393_v18, 16  ;;  %v469_v26 = vshll.u32 %v393_v18, 16  ;;  %v390_v27 = vld [vmem:[%s11828_s21] sm:$0xf]  ;;  %v391_v28 = vld [vmem:[%s11828_s21 + $0x4] sm:$0xf] }
  0x20   : > { %v674_v24 = vor.u32 %v673_v16, %v11837_v15  ;;  %v650_v30 = vor.u32 %v649_v14, %v645_v21  ;;  %v679_v32 = vrot.slane %v677_v17, 5  ;;  %v417_v33 = vld [vmem:[%s11828_s21 + $0x6c] sm:$0xf]  ;;  %v11854_v35 = vld [vmem:[%s11828_s21 + $0x10] sm:$0xf]  ;;  %v442_v36 = vshrl.u32 %v390_v27, 16 }
  0x21   : > { %v641_v29 = vrot.slane %v640_v20, 4  ;;  %v445_v37 = vshll.u32 %v390_v27, 16  ;;  %v451_v38 = vshll.u32 %v391_v28, 16  ;;  %v655_v39 = vrot.slane %v653_v22, 5  ;;  %v421_v47 = vld [vmem:[%s11828_s21 + $0x7c] sm:$0xf] }
  0x22   : > { %v675_v31 = vrot.slane %v674_v24, 4  ;;  %v468_v40 = vrot.slane %v466_v25, 4  ;;  %v471_v41 = vrot.slane %v469_v26, 5  ;;  %v455_v42 = vshrl.u32 %v391_v28, 16  ;;  %v392_v51 = vld [vmem:[%s11828_s21 + $0x8] sm:$0x1] }
  0x23   : > { %1328 = vrot.lane.b32.xlu1 %v10069_v19, %s11722_s22  ;;  %v646_v34 = vsel %vm11842_vm2, %v641_v29, %v645_v21  ;;  %v651_v43 = vrot.slane %v650_v30, 4  ;;  %v444_v44 = vrot.slane %v442_v36, 4  ;;  %v447_v45 = vrot.slane %v445_v37, 5  ;;  %v422_v4 = vld [vmem:[%s11828_s21 + $0x80] sm:$0x1] }
  0x24   : > { %857 = vrot.lane.b32.xlu0 %v646_v34, %s11722_s22  ;;  %v658_v46 = vshrl.u32 %v417_v33, 16  ;;  %v475_v48 = vshll.u32 %v11854_v35, 16  ;;  %v457_v49 = vrot.slane %v455_v42, 4  ;;  %v661_v50 = vshll.u32 %v417_v33, 16  ;;  %v396_v10 = vld [vmem:[%s11828_s21 + $0x18] sm:$0xf] }
  0x25   : > { %v680_v52 = vsel %vm11842_vm2, %v675_v31, %v679_v32  ;;  %v448_v53 = vor.u32 %v447_v45, %v444_v44  ;;  %v453_v54 = vrot.slane %v451_v38, 5  ;;  %v472_v56 = vor.u32 %v471_v41, %v468_v40  ;;  %v420_v11 = vld [vmem:[%s11828_s21 + $0x78] sm:$0xf]  ;;  %v397_v26 = vld [vmem:[%s11828_s21 + $0x1c] sm:$0xf] }
  0x26   : > { %v660_v55 = vrot.slane %v658_v46, 4  ;;  %v663_v57 = vrot.slane %v661_v50, 5  ;;  %v691_v58 = vshll.u32 %v421_v47, 16  ;;  %v695_v59 = vshrl.u32 %v421_v47, 16  ;;  %v424_v30 = vld [vmem:[%s11828_s21 + $0x88] sm:$0xf] }
  0x27   : > { %v656_v60 = vsel %vm11842_vm2, %v651_v43, %v655_v39  ;;  %v449_v61 = vrot.slane %v448_v53, 4  ;;  %v458_v62 = vor.u32 %v457_v49, %v453_v54  ;;  %v461_v63 = vshll.u32 %v392_v51, 16  ;;  %v395_v32 = vld [vmem:[%s11828_s21 + $0x14] sm:$0x1]  ;;  %v10071_v38 = vld [vmem:[%s11828_s21 + $0x7c] sm:$0xf] }
  0x28   : > { %v664_v0 = vor.u32 %v663_v57, %v660_v55  ;;  %v473_v2 = vrot.slane %v472_v56, 4  ;;  %v477_v3 = vrot.slane %v475_v48, 5  ;;  %v11870_v5 = vrot.slane %v691_v58, 5  ;;  %v10070_v39 = vld [vmem:[%s11828_s21 + $0x78] sm:$0xf] }
  0x29   : > { %v454_v1 = vsel %vm11842_vm2, %v449_v61, %v453_v54  ;;  %v697_v6 = vrot.slane %v695_v59, 4  ;;  %v459_v8 = vrot.slane %v458_v62, 4  ;;  %v463_v9 = vrot.slane %v461_v63, 5  ;;  %v425_v45 = vld [vmem:[%s11828_s21 + $0x8c] sm:$0x1] }
  0x2a   : > { %825 = vrot.lane.b32.xlu2 %v454_v1, %s11722_s22  ;;  %v665_v7 = vrot.slane %v664_v0, 4  ;;  %v479_v12 = vshrl.u32 %v11854_v35, 16  ;;  %v701_v13 = vshll.u32 %v422_v4, 16  ;;  %v478_v14 = vsel %vm11842_vm2, %v473_v2, %v477_v3  ;;  %v399_v51 = vld [vmem:[%s11828_s21 + $0x24] sm:$0xf] }
  0x2b   : > { %863 = vrot.lane.b32.xlu1 %v680_v52, %s11722_s22  ;;  %v698_v16 = vor.u32 %v697_v6, %v11870_v5  ;;  %v490_v17 = vshrl.u32 %v396_v10, 16  ;;  %v493_v18 = vshll.u32 %v396_v10, 16  ;;  %v464_v20 = vsel %vm11842_vm2, %v459_v8, %v463_v9  ;;  %v423_v52 = vld [vmem:[%s11828_s21 + $0x84] sm:$0xf]  ;;  %v400_v1 = vld [vmem:[%s11828_s21 + $0x28] sm:$0xf] }
  0x2c   : > { %859 = vrot.lane.b32.xlu0 %v656_v60, %s11722_s22  ;;  %v670_v19 = vsel %vm11842_vm2, %v665_v7, %v11837_v15  ;;  %v682_v21 = vshrl.u32 %v420_v11, 16  ;;  %v685_v22 = vshll.u32 %v420_v11, 16  ;;  %v703_v25 = vrot.slane %v701_v13, 5  ;;  %v427_v6 = vld [vmem:[%s11828_s21 + $0x94] sm:$0xf] }
  0x2d   : > { %v699_v24 = vrot.slane %v698_v16, 4  ;;  %v492_v27 = vrot.slane %v490_v17, 4  ;;  %v495_v28 = vrot.slane %v493_v18, 5  ;;  %v481_v31 = vrot.slane %v479_v12, 4  ;;  %v398_v8 = vld [vmem:[%s11828_s21 + $0x20] sm:$0x1] }
  0x2e   : > { %v684_v15 = vrot.slane %v682_v21, 4  ;;  %v687_v29 = vrot.slane %v685_v22, 5  ;;  %v499_v33 = vshll.u32 %v397_v26, 16  ;;  %v715_v36 = vshll.u32 %v424_v30, 16  ;;  %v10072_v16 = vld [vmem:[%s11828_s21 + $0x84] sm:$0xf] }
  0x2f   : > { %v704_v34 = vsel %vm11842_vm2, %v699_v24, %v703_v25  ;;  %v496_v35 = vor.u32 %v495_v28, %v492_v27  ;;  %v719_v37 = vshrl.u32 %v424_v30, 16  ;;  %v482_v41 = vor.u32 %v481_v31, %v477_v3  ;;  %v428_v22 = vld [vmem:[%s11828_s21 + $0x98] sm:$0x1] }
  0x30   : > { %v688_v40 = vor.u32 %v687_v29, %v684_v15  ;;  %v485_v42 = vshll.u32 %v395_v32, 16  ;;  %v501_v44 = vrot.slane %v499_v33, 5  ;;  %v11897_v46 = vrot.slane %v715_v36, 5  ;;  %v402_v15 = vld [vmem:[%s11828_s21 + $0x30] sm:$0xf] }
  0x31   : > { %v497_v43 = vrot.slane %v496_v35, 4  ;;  %v721_v47 = vrot.slane %v719_v37, 4  ;;  %v483_v49 = vrot.slane %v482_v41, 4  ;;  %v503_v53 = vshrl.u32 %v397_v26, 16  ;;  %v426_v29 = vld [vmem:[%s11828_s21 + $0x90] sm:$0xf] }
  0x32   : > { %827 = vrot.lane.b32.xlu2 %v464_v20, %s11722_s22  ;;  %v689_v48 = vrot.slane %v688_v40, 4  ;;  %v487_v50 = vrot.slane %v485_v42, 5  ;;  %v725_v54 = vshll.u32 %v425_v45, 16  ;;  %v514_v57 = vshrl.u32 %v399_v51, 16  ;;  %v403_v42 = vld [vmem:[%s11828_s21 + $0x34] sm:$0xf] }
  0x33   : > { %829 = vrot.lane.b32.xlu1 %v478_v14, %s11722_s22  ;;  %v502_v55 = vsel %vm11842_vm2, %v497_v43, %v501_v44  ;;  %v722_v56 = vor.u32 %v721_v47, %v11897_v46  ;;  %v517_v58 = vshll.u32 %v399_v51, 16  ;;  %v706_v61 = vshrl.u32 %v423_v52, 16  ;;  %v10073_v14 = vld [vmem:[%s11828_s21 + $0x88] sm:$0xf]  ;;  %v430_v47 = vld [vmem:[%s11828_s21 + $0xa0] sm:$0xf] }
  0x34   : > { %861 = vrot.lane.b32.xlu0 %v670_v19, %s11722_s22  ;;  %v694_v59 = vsel %vm11842_vm2, %v689_v48, %v11870_v5  ;;  %v488_v60 = vsel %vm11842_vm2, %v483_v49, %v487_v50  ;;  %v709_v62 = vshll.u32 %v423_v52, 16  ;;  %v727_v0 = vrot.slane %v725_v54, 5  ;;  %v401_v49 = vld [vmem:[%s11828_s21 + $0x2c] sm:$0x1] }
  0x35   : > { %v723_v63 = vrot.slane %v722_v56, 4  ;;  %v516_v2 = vrot.slane %v514_v57, 4  ;;  %v519_v3 = vrot.slane %v517_v58, 5  ;;  %v708_v4 = vrot.slane %v706_v61, 4  ;;  %v10074_v56 = vld [vmem:[%s11828_s21 + $0x90] sm:$0xf] }
  0x36   : > { %v711_v5 = vrot.slane %v709_v62, 5  ;;  %v505_v7 = vrot.slane %v503_v53, 4  ;;  %v523_v9 = vshll.u32 %v400_v1, 16  ;;  %v739_v12 = vshll.u32 %v427_v6, 16  ;;  %v429_v61 = vld [vmem:[%s11828_s21 + $0x9c] sm:$0xf] }
  0x37   : > { %v728_v10 = vsel %vm11842_vm2, %v723_v63, %v727_v0  ;;  %v520_v11 = vor.u32 %v519_v3, %v516_v2  ;;  %v743_v13 = vshrl.u32 %v427_v6, 16  ;;  %v509_v19 = vshll.u32 %v398_v8, 16  ;;  %v11449_v2 = vld [vmem:[%s17468_s2 + $0x78] sm:$0xff] }
  0x38   : > { %v712_v17 = vor.u32 %v711_v5, %v708_v4  ;;  %v506_v18 = vor.u32 %v505_v7, %v501_v44  ;;  %v525_v21 = vrot.slane %v523_v9, 5  ;;  %v11923_v24 = vrot.slane %v739_v12, 5  ;;  %v431_v4 = vld [vmem:[%s11828_s21 + $0xa4] sm:$0x1]  ;;  %11595 = vmatpush.bf16.msra.mxu3 %v11449_v2  ;;  %4073 = vmatpush.bf16.msra.mxu1 %v11449_v2 }
  0x39   : > { %v521_v20 = vrot.slane %v520_v11, 4  ;;  %v745_v25 = vrot.slane %v743_v13, 4  ;;  %v511_v28 = vrot.slane %v509_v19, 5  ;;  %v527_v30 = vshrl.u32 %v400_v1, 16 }
  0x3a   : > { %1330 = vrot.lane.b32.xlu2 %v10070_v39, %s11722_s22  ;;  %v713_v26 = vrot.slane %v712_v17, 4  ;;  %v507_v27 = vrot.slane %v506_v18, 4  ;;  %v749_v31 = vshll.u32 %v428_v22, 16  ;;  %v541_v35 = vshll.u32 %v402_v15, 16  ;;  %v11441_v22 = vld [vmem:[%s17468_s2 + $0x38] sm:$0xff] }
  0x3b   : > { %867 = vrot.lane.b32.xlu1 %v704_v34, %s11722_s22  ;;  %v526_v32 = vsel %vm11842_vm2, %v521_v20, %v525_v21  ;;  %v746_v33 = vor.u32 %v745_v25, %v11923_v24  ;;  %v538_v34 = vshrl.u32 %v402_v15, 16  ;;  %v733_v39 = vshll.u32 %v426_v29, 16  ;;  %v11972_v25 = vld [vmem:[%s11828_s21 + $0x40] sm:$0xf]  ;;  %v433_v15 = vld [vmem:[%s11828_s21 + $0xac] sm:$0xf]  ;;  %3984 = vmatpush.bf16.msra.mxu0 %v11441_v22 }
  0x3c   : > { %1332 = vrot.lane.b32.xlu0 %v10071_v38, %s11722_s22  ;;  %v718_v36 = vsel %vm11842_vm2, %v713_v26, %v11897_v46  ;;  %v512_v37 = vsel %vm11842_vm2, %v507_v27, %v511_v28  ;;  %v730_v38 = vshrl.u32 %v426_v29, 16  ;;  %v751_v41 = vrot.slane %v749_v31, 5  ;;  %v11440_v29 = vld [vmem:[%s17468_s2 + $0x30] sm:$0xff]  ;;  %11587 = vmatpush.bf16.msra.mxu2 %v11441_v22  ;;  %v436_v22 = vld [vmem:[%s11828_s21 + $0xb8] sm:$0xf] }
  0x3d   : > { %v747_v40 = vrot.slane %v746_v33, 4  ;;  %v540_v43 = vrot.slane %v538_v34, 4  ;;  %v543_v44 = vrot.slane %v541_v35, 5  ;;  %v735_v46 = vrot.slane %v733_v39, 5  ;;  %v404_v34 = vld [vmem:[%s11828_s21 + $0x38] sm:$0x1] }
  0x3e   : > { %v732_v45 = vrot.slane %v730_v38, 4  ;;  %v529_v48 = vrot.slane %v527_v30, 4  ;;  %v547_v50 = vshll.u32 %v403_v42, 16  ;;  %v763_v53 = vshll.u32 %v430_v47, 16  ;;  %v11447_v30 = vld [vmem:[%s17468_s2 + $0x68] sm:$0xff] }
  0x3f   : > { %v752_v51 = vsel %vm11842_vm2, %v747_v40, %v751_v41  ;;  %v544_v52 = vor.u32 %v543_v44, %v540_v43  ;;  %v767_v54 = vshrl.u32 %v430_v47, 16  ;;  %v754_v9 = vshrl.u32 %v429_v61, 16  ;;  %v10077_v39 = vld [vmem:[%s11828_s21 + $0xa0] sm:$0xf]  ;;  %v10076_v40 = vld [vmem:[%s11828_s21 + $0x9c] sm:$0xf]  ;;  %3985 = vmatpush.bf16.msra.mxu0 %v11440_v29 }
  0x40   : > { %v736_v57 = vor.u32 %v735_v46, %v732_v45  ;;  %v530_v58 = vor.u32 %v529_v48, %v525_v21  ;;  %v11949_v63 = vrot.slane %v547_v50, 5  ;;  %v11952_v0 = vrot.slane %v763_v53, 5  ;;  %v11439_v46 = vld [vmem:[%s17468_s2 + $0x28] sm:$0xff]  ;;  %11588 = vmatpush.bf16.msra.mxu2 %v11440_v29  ;;  %v434_v47 = vld [vmem:[%s11828_s21 + $0xb0] sm:$0x1] }
  0x41   : > { %v545_v62 = vrot.slane %v544_v52, 4  ;;  %v769_v1 = vrot.slane %v767_v54, 4  ;;  %v551_v11 = vshrl.u32 %v403_v42, 16  ;;  %v756_v20 = vrot.slane %v754_v9, 4  ;;  %v408_v52 = vld [vmem:[%s11828_s21 + $0x48] sm:$0xf] }
  0x42   : > { %831 = vrot.lane.b32.xlu2 %v488_v60, %s11722_s22  ;;  %v405_v60 = vld [vmem:[%s11828_s21 + $0x3c] sm:$0xf]  ;;  %v737_v3 = vrot.slane %v736_v57, 4  ;;  %v531_v5 = vrot.slane %v530_v58, 4  ;;  %v787_v35 = vshll.u32 %v433_v15, 16  ;;  %v557_v41 = vshll.u32 %v404_v34, 16 }
  0x43   : > { %833 = vrot.lane.b32.xlu1 %v502_v55, %s11722_s22  ;;  %v10075_v55 = vld [vmem:[%s11828_s21 + $0x94] sm:$0xf]  ;;  %v562_v7 = vshrl.u32 %v405_v60, 16  ;;  %v565_v8 = vshll.u32 %v405_v60, 16  ;;  %v550_v12 = vsel %vm11842_vm2, %v545_v62, %v11949_v63  ;;  %v770_v13 = vor.u32 %v769_v1, %v11952_v0  ;;  %v432_v53 = vld [vmem:[%s11828_s21 + $0xa8] sm:$0xf]  ;;  %3986 = vmatpush.bf16.msra.mxu0 %v11439_v46 }
  0x44   : > { %865 = vrot.lane.b32.xlu0 %v694_v59, %s11722_s22  ;;  %v533_v59 = vshll.u32 %v401_v49, 16  ;;  %v553_v26 = vrot.slane %v551_v11, 4  ;;  %v575_v44 = vshrl.u32 %v11972_v25, 16  ;;  %v12001_v48 = vrot.slane %v787_v35, 5  ;;  %v979_v57 = vld [vmem:[%s11828_s21 + $0x64] sm:$0xf]  ;;  %11589 = vmatpush.bf16.msra.mxu2 %v11439_v46 }
  0x45   : > { %v564_v18 = vrot.slane %v562_v7, 4  ;;  %v567_v19 = vrot.slane %v565_v8, 5  ;;  %v771_v27 = vrot.slane %v770_v13, 4  ;;  %v559_v54 = vrot.slane %v557_v41, 5  ;;  %v325_v60 = vld [vmem:[%s11828_s21] sm:$0xf] }
  0x46   : > { %v535_v6 = vrot.slane %v533_v59, 5  ;;  %v1111_v59 = vrot.slane %v979_v57, 5  ;;  %v11445_v62 = vld [vmem:[%s17468_s2 + $0x58] sm:$0xff]  ;;  %v589_v1 = vshll.u32 %v408_v52, 16  ;;  %v778_v2 = vshrl.u32 %v432_v53, 16  ;;  %v11436_v29 = vld [vmem:[%s17468_s2 + $0x10] sm:$0xff] }
  0x47   : > { %v568_v31 = vor.u32 %v567_v19, %v564_v18  ;;  %358 = vst.msk [vmem:[#allocation2] sm:$0xf] %vm17480_vm5, %v325_v60  ;;  %v12038_v11 = vld [vmem:[%s11828_s21 + $0x4c] sm:$0xf]  ;;  %v11444_v19 = vld [vmem:[%s17468_s2 + $0x50] sm:$0xff] }
  0x48   : > { %v536_v17 = vsel %vm11842_vm2, %v531_v5, %v535_v6  ;;  %v797_v6 = vshll.u32 %v434_v47, 16  ;;  %v1113_v13 = vrot.slane %v1111_v59, 4  ;;  %v11443_v34 = vld [vmem:[%s17468_s2 + $0x48] sm:$0xff]  ;;  %v599_v41 = vshrl.u32 %v12038_v11, 16  ;;  %v11442_v47 = vld [vmem:[%s17468_s2 + $0x40] sm:$0xff] }
  0x49   : > { %v569_v42 = vrot.slane %v568_v31, 4  ;;  %v981_v57 = vld [vmem:[%s11828_s21 + $0x6c] sm:$0xe] }
  0x4a   : > { %1334 = vrot.lane.b32.xlu2 %v10072_v16, %s11722_s22  ;;  %v742_v16 = vsel %vm11842_vm2, %v737_v3, %v11923_v24  ;;  %v11448_v24 = vld [vmem:[%s17468_s2 + $0x70] sm:$0xff]  ;;  %v781_v3 = vshll.u32 %v432_v53, 16 }
  0x4b   : > { %871 = vrot.lane.b32.xlu1 %v728_v10, %s11722_s22  ;;  %v757_v10 = vshll.u32 %v429_v61, 16  ;;  %11596 = vmatpush.bf16.msra.mxu3 %v11448_v24  ;;  %v11438_v61 = vld [vmem:[%s17468_s2 + $0x20] sm:$0xff]  ;;  %v435_v53 = vld [vmem:[%s11828_s21 + $0xb4] sm:$0xf] }
  0x4c   : > { %1336 = vrot.lane.b32.xlu0 %v10073_v14, %s11722_s22  ;;  %v773_v14 = vshll.u32 %v431_v4, 16  ;;  %4074 = vmatpush.bf16.msra.mxu1 %v11448_v24  ;;  %v783_v18 = vrot.slane %v781_v3, 5  ;;  %v407_v24 = vld [vmem:[%s11828_s21 + $0x44] sm:$0x1] }
  0x4d   : > { %v759_v21 = vrot.slane %v757_v10, 5  ;;  %3987 = vmatpush.bf16.msra.mxu0 %v11438_v61  ;;  %v980_v10 = vld [vmem:[%s11828_s21 + $0x68] sm:$0x1]  ;;  %11590 = vmatpush.bf16.msra.mxu2 %v11438_v61  ;;  %v10045_v61 = vrot.slane %v981_v57, 9 }
  0x4e   : > { %v775_v28 = vrot.slane %v773_v14, 5  ;;  %v1114_v14 = vrot.slane %v980_v10, 5 }
  0x4f   : > { %v760_v33 = vor.u32 %v759_v21, %v756_v20  ;;  %11597 = vmatpush.bf16.msra.mxu3 %v11447_v30  ;;  %v799_v21 = vrot.slane %v797_v6, 5 }
  0x50   : > { %v776_v38 = vsel %vm11842_vm2, %v771_v27, %v775_v28  ;;  %4075 = vmatpush.bf16.msra.mxu1 %v11447_v30  ;;  %v341_v27 = vld [vmem:[%s11828_s21 + $0x60] sm:$0xf]  ;;  %v595_v28 = vshll.u32 %v12038_v11, 16 }
  0x51   : > { %v761_v45 = vrot.slane %v760_v33, 4  ;;  %374 = vst.msk [vmem:[#allocation2 + $0x140] sm:$0xf] %vm17480_vm5, %v341_v27  ;;  %v815_v33 = vshrl.u32 %v436_v22, 16 }
  0x52   : > { %835 = vrot.lane.b32.xlu2 %v512_v37, %s11722_s22  ;;  %v554_v37 = vor.u32 %v553_v26, %v11949_v63  ;;  %v586_v63 = vshrl.u32 %v408_v52, 16  ;;  %v1115_v26 = vsel %vm12010_vm6, %v1113_v13, %v1114_v14  ;;  %v411_v52 = vld [vmem:[%s11828_s21 + $0x54] sm:$0xf] }
  0x53   : > { %837 = vrot.lane.b32.xlu1 %v526_v32, %s11722_s22  ;;  %v571_v32 = vshll.u32 %v11972_v25, 16  ;;  %v766_v8 = vsel %vm11842_vm2, %v761_v45, %v11952_v0  ;;  %v577_v25 = vrot.slane %v575_v44, 4  ;;  %1214 = vst.msk [vmem:[#allocation2 + $0x158] sm:$0xf] %vm17480_vm5, %v1115_v26  ;;  %v817_v46 = vrot.slane %v815_v33, 4 }
  0x54   : > { %869 = vrot.lane.b32.xlu0 %v718_v36, %s11722_s22  ;;  %v791_v36 = vshrl.u32 %v433_v15, 16  ;;  %v555_v50 = vrot.slane %v554_v37, 4  ;;  %v588_v0 = vrot.slane %v586_v63, 4  ;;  %v326_v15 = vld [vmem:[%s11828_s21 + $0x4] sm:$0xf]  ;;  %v581_v37 = vshll.u32 %v407_v24, 16 }
  0x55   : > { %v11993_v43 = vrot.slane %v571_v32, 5  ;;  %v811_v32 = vshll.u32 %v436_v22, 16  ;;  %359 = vst.msk [vmem:[#allocation2 + $0x14] sm:$0xf] %vm17480_vm5, %v326_v15  ;;  %v11434_v63 = vld [vmem:[%s17468_s2] sm:$0xff]  ;;  %v613_v3 = vshll.u32 %v411_v52, 16 }
  0x56   : > { %v793_v49 = vrot.slane %v791_v36, 4  ;;  %v560_v9 = vsel %vm11842_vm2, %v555_v50, %v559_v54  ;;  %v344_v54 = vld [vmem:[%s11828_s21 + $0x70] sm:$0xf]  ;;  %v10080_v24 = vld [vmem:[%s11828_s21 + $0xb4] sm:$0xf] }
  0x57   : > { %v574_v4 = vsel %vm11842_vm2, %v569_v42, %v11993_v43  ;;  %v578_v36 = vor.u32 %v577_v25, %v11993_v43  ;;  %v11435_v42 = vld [vmem:[%s17468_s2 + $0x8] sm:$0xff]  ;;  %v12077_v45 = vrot.slane %v811_v32, 5  ;;  %377 = vst.msk [vmem:[#allocation2 + $0x17c] sm:$0xf] %vm17480_vm5, %v344_v54  ;;  %v12137_v32 = vld [vmem:[%s11828_s21 + $0x10] sm:$0xf] }
  0x58   : > { %v794_v5 = vor.u32 %v793_v49, %v12001_v48  ;;  %v437_v49 = vld [vmem:[%s11828_s21 + $0xbc] sm:$0x1] }
  0x59   : > { %v579_v50 = vrot.slane %v578_v36, 4  ;;  %v821_v60 = vshll.u32 %v437_v49, 16  ;;  %v984_v49 = vld [vmem:[%s11828_s21 + $0x78] sm:$0xe] }
  0x5a   : > { %1338 = vrot.lane.b32.xlu2 %v10074_v56, %s11722_s22  ;;  %v978_v56 = vld [vmem:[%s11828_s21 + $0x60] sm:$0xe]  ;;  %v795_v20 = vrot.slane %v794_v5, 4 }
  0x5b   : > { %875 = vrot.lane.b32.xlu1 %v752_v51, %s11722_s22  ;;  %v11446_v51 = vld [vmem:[%s17468_s2 + $0x60] sm:$0xff]  ;;  %v10044_v58 = vrot.slane %v978_v56, 9  ;;  %v823_v10 = vrot.slane %v821_v60, 5  ;;  %v10232_v60 = vld [vmem:[%s11828_s21 + $0x28] sm:$0xf] }
  0x5c   : > { %1340 = vrot.lane.b32.xlu0 %v10075_v55, %s11722_s22  ;;  %11598 = vmatpush.bf16.msra.mxu3 %v11446_v51  ;;  %v17501_v55 = vmov 0  ;;  %v800_v35 = vsel %vm11842_vm2, %v795_v20, %v799_v21  ;;  %v342_v56 = vld [vmem:[%s11828_s21 + $0x64] sm:$0xf]  ;;  %v343_v20 = vld [vmem:[%s11828_s21 + $0x6c] sm:$0xf] }
  0x5d   : > { %v17502_v55 = vsel %vm12010_vm6, 4294967295, %v17501_v55  ;;  %4076 = vmatpush.bf16.msra.mxu1 %v11446_v51  ;;  %v1112_v7 = vsel %vm12010_vm6, %v10044_v58, %v1111_v59  ;;  %v583_v51 = vrot.slane %v581_v37, 5  ;;  %v982_v58 = vld [vmem:[%s11828_s21 + $0x70] sm:$0xf]  ;;  %v818_v59 = vor.u32 %v817_v46, %v12077_v45  ;;  %375 = vst.msk [vmem:[#allocation2 + $0x154] sm:$0xf] %vm17480_vm5, %v342_v56 }
  0x5e   : > { %17503 = vst [vmem:[#allocation7_spill] sm:$0xff] %v17502_v55  ;;  %v10081_v21 = vld [vmem:[%s11828_s21 + $0xb8] sm:$0xf] }
  0x5f   : > { %1213 = vst.msk [vmem:[#allocation2 + $0x144] sm:$0xf] %vm17480_vm5, %v1112_v7  ;;  %v584_v6 = vsel %vm11842_vm2, %v579_v50, %v583_v51  ;;  %v805_v7 = vshll.u32 %v435_v53, 16  ;;  %v12155_v50 = vld [vmem:[%s11828_s21 + $0x7c] sm:$0xf] }
  0x60   : > { %11599 = vmatpush.bf16.msra.mxu3 %v11445_v62  ;;  %376 = vst.msk [vmem:[#allocation2 + $0x168] sm:$0xf] %vm17480_vm5, %v343_v20  ;;  %v1125_v54 = vrot.slane %v12155_v50, 5  ;;  %v11469_v56 = vld [vmem:[%s17468_s2 + $0x118] sm:$0xff]  ;;  %v10231_v50 = vld [vmem:[%s11828_s21 + $0x24] sm:$0xf] }
  0x61   : > { %4077 = vmatpush.bf16.msra.mxu1 %v11445_v62  ;;  %v1118_v62 = vrot.slane %v982_v58, 5  ;;  %v807_v14 = vrot.slane %v805_v7, 5  ;;  %v330_v20 = vld [vmem:[%s11828_s21 + $0x1c] sm:$0xf] }
  0x62   : > { %839 = vrot.lane.b32.xlu2 %v536_v17, %s11722_s22  ;;  %v780_v17 = vrot.slane %v778_v2, 4  ;;  %v610_v2 = vshrl.u32 %v411_v52, 16  ;;  %363 = vst.msk [vmem:[#allocation2 + $0x64] sm:$0xf] %vm17480_vm5, %v330_v20 }
  0x63   : > { %841 = vrot.lane.b32.xlu1 %v550_v12, %s11722_s22  ;;  %v11437_v12 = vld [vmem:[%s17468_s2 + $0x18] sm:$0xff]  ;;  %v1120_v33 = vrot.slane %v1118_v62, 4 }
  0x64   : > { %873 = vrot.lane.b32.xlu0 %v742_v16, %s11722_s22  ;;  %v591_v16 = vrot.slane %v589_v1, 5  ;;  %3988 = vmatpush.bf16.msra.mxu0 %v11437_v12  ;;  %v784_v31 = vor.u32 %v783_v18, %v780_v17  ;;  %v612_v11 = vrot.slane %v610_v2, 4  ;;  %v327_v17 = vld [vmem:[%s11828_s21 + $0xc] sm:$0xf] }
  0x65   : > { %11600 = vmatpush.bf16.msra.mxu3 %v11444_v19  ;;  %11591 = vmatpush.bf16.msra.mxu2 %v11437_v12  ;;  %v615_v12 = vrot.slane %v613_v3, 5  ;;  %360 = vst.msk [vmem:[#allocation2 + $0x28] sm:$0xf] %vm17480_vm5, %v327_v17 }
  0x66   : > { %4078 = vmatpush.bf16.msra.mxu1 %v11444_v19  ;;  %v592_v30 = vor.u32 %v591_v16, %v588_v0  ;;  %v785_v44 = vrot.slane %v784_v31, 4  ;;  %v410_v0 = vld [vmem:[%s11828_s21 + $0x50] sm:$0x1]  ;;  %v601_v16 = vrot.slane %v599_v41, 4  ;;  %v983_v31 = vld [vmem:[%s11828_s21 + $0x74] sm:$0x1] }
  0x67   : > { %v328_v19 = vld [vmem:[%s11828_s21 + $0x10] sm:$0xf]  ;;  %v616_v25 = vor.u32 %v615_v12, %v612_v11  ;;  %v605_v15 = vshll.u32 %v410_v0, 16  ;;  %v346_v41 = vld [vmem:[%s11828_s21 + $0x7c] sm:$0xf] }
  0x68   : > { %3989 = vmatpush.bf16.msra.mxu0 %v11436_v29  ;;  %v593_v43 = vrot.slane %v592_v30, 4  ;;  %v790_v5 = vsel %vm11842_vm2, %v785_v44, %v12001_v48  ;;  %v12112_v48 = vld [vmem:[%s11828_s21 + $0x58] sm:$0xf]  ;;  %361 = vst.msk [vmem:[#allocation2 + $0x3c] sm:$0xf] %vm17480_vm5, %v328_v19  ;;  %v2016_v44 = vrot.slane %v12137_v32, 5 }
  0x69   : > { %11601 = vmatpush.bf16.msra.mxu3 %v11443_v34  ;;  %11592 = vmatpush.bf16.msra.mxu2 %v11436_v29  ;;  %v619_v26 = vshll.u32 %v12112_v48, 16  ;;  %v11457_v29 = vld [vmem:[%s17468_s2 + $0xb8] sm:$0xff]  ;;  %v623_v52 = vshrl.u32 %v12112_v48, 16  ;;  %379 = vst.msk [vmem:[#allocation2 + $0x1a4] sm:$0xf] %vm17480_vm5, %v346_v41 }
  0x6a   : > { %1342 = vrot.lane.b32.xlu2 %v10076_v40, %s11722_s22  ;;  %v12070_v40 = vrot.slane %v595_v28, 5  ;;  %4079 = vmatpush.bf16.msra.mxu1 %v11443_v34  ;;  %v11465_v30 = vld [vmem:[%s17468_s2 + $0xf8] sm:$0xff]  ;;  %v1121_v34 = vrot.slane %v983_v31, 5  ;;  %v10083_v0 = vld [vmem:[%s11828_s21 + $0xc4] sm:$0xf] }
  0x6b   : > { %879 = vrot.lane.b32.xlu1 %v776_v38, %s11722_s22  ;;  %v10079_v38 = vld [vmem:[%s11828_s21 + $0xac] sm:$0xf]  ;;  %v12140_v36 = vrot.slane %v619_v26, 5  ;;  %v10228_v48 = vld [vmem:[%s11828_s21 + $0x18] sm:$0xf] }
  0x6c   : > { %1344 = vrot.lane.b32.xlu0 %v10077_v39, %s11722_s22  ;;  %v10078_v39 = vld [vmem:[%s11828_s21 + $0xa8] sm:$0xf]  ;;  %3990 = vmatpush.bf16.msra.mxu0 %v11435_v42  ;;  %v598_v1 = vsel %vm11842_vm2, %v593_v43, %v12070_v40  ;;  %v602_v28 = vor.u32 %v601_v16, %v12070_v40  ;;  %v607_v40 = vrot.slane %v605_v15, 5  ;;  %v10134_v43 = vld [vmem:[%s11828_s21 + $0x14] sm:$0x1]  ;;  %v1122_v46 = vsel %vm12010_vm6, %v1120_v33, %v1121_v34 }
  0x6d   : > { %11602 = vmatpush.bf16.msra.mxu3 %v11442_v47  ;;  %11593 = vmatpush.bf16.msra.mxu2 %v11435_v42  ;;  %1216 = vst.msk [vmem:[#allocation2 + $0x180] sm:$0xf] %vm17480_vm5, %v1122_v46  ;;  %v10082_v16 = vld [vmem:[%s11828_s21 + $0xc0] sm:$0xf]  ;;  %v11456_v15 = vld [vmem:[%s17468_s2 + $0xb0] sm:$0xff] }
  0x6e   : > { %4080 = vmatpush.bf16.msra.mxu1 %v11442_v47  ;;  %v12151_v47 = vld [vmem:[%s11828_s21 + $0x18] sm:$0xe]  ;;  %v10233_v31 = vld [vmem:[%s11828_s21 + $0x2c] sm:$0x1]  ;;  %v10230_v34 = vld [vmem:[%s11828_s21 + $0x20] sm:$0x1] }
  0x6f   : > { %v10181_v2 = vrot.slane %v12151_v47, 9  ;;  %v10234_v41 = vld [vmem:[%s11828_s21 + $0x30] sm:$0xf] }
  0x70   : > { %3991 = vmatpush.bf16.msra.mxu0 %v11434_v63 }
  0x71   : > { %11594 = vmatpush.bf16.msra.mxu2 %v11434_v63  ;;  %4251 = vmatpush.bf16.msrb.mxu3 %v11465_v30  ;;  %v2019_v63 = vrot.slane %v10134_v43, 5 }
  0x72   : > { %843 = vrot.lane.b32.xlu2 %v560_v9, %s11722_s22  ;;  %v819_v9 = vrot.slane %v818_v59, 4  ;;  %v12172_v59 = vld [vmem:[%s11828_s21 + $0x1c] sm:$0xf] }
  0x73   : > { %845 = vrot.lane.b32.xlu1 %v574_v4, %s11722_s22  ;;  %v802_v4 = vshrl.u32 %v435_v53, 16  ;;  %v10046_v53 = vrot.slane %v984_v49, 9  ;;  %v2023_v3 = vrot.slane %v12172_v59, 5 }
  0x74   : > { %877 = vrot.lane.b32.xlu0 %v766_v8, %s11722_s22  ;;  %v1119_v8 = vsel %vm12010_vm6, %v10045_v61, %v1118_v62  ;;  %v824_v22 = vsel %vm11842_vm2, %v819_v9, %v823_v10  ;;  %v10229_v61 = vld [vmem:[%s11828_s21 + $0x1c] sm:$0xf]  ;;  %4344 = vmatpush.bf16.msrb.mxu0 %v11469_v56 }
  0x75   : > { %1215 = vst.msk [vmem:[#allocation2 + $0x16c] sm:$0xf] %vm17480_vm5, %v1119_v8  ;;  %v804_v13 = vrot.slane %v802_v4, 4  ;;  %4162 = vmatpush.bf16.msrb.mxu2 %v11457_v29  ;;  %v1126_v62 = vsel %vm12010_vm6, %v10046_v53, %v1125_v54  ;;  %v2405_v8 = vshrl.u32 %v10232_v60, 16  ;;  %v413_v9 = vld [vmem:[%s11828_s21 + $0x5c] sm:$0x1]  ;;  %v2024_v53 = vsel %vm12010_vm6, %v10181_v2, %v2023_v3 }
  0x76   : > { %1217 = vst.msk [vmem:[#allocation2 + $0x194] sm:$0xf] %vm17480_vm5, %v1126_v62  ;;  %v2377_v10 = vshll.u32 %v10229_v61, 16  ;;  %v2381_v19 = vshrl.u32 %v10229_v61, 16  ;;  %v629_v26 = vshll.u32 %v413_v9, 16  ;;  %v11464_v29 = vld [vmem:[%s17468_s2 + $0xf0] sm:$0xff] }
  0x77   : > { %v808_v27 = vor.u32 %v807_v14, %v804_v13  ;;  %v329_v14 = vld [vmem:[%s11828_s21 + $0x18] sm:$0xf]  ;;  %v2407_v33 = vrot.slane %v2405_v8, 4  ;;  %4252 = vmatpush.bf16.msrb.mxu3 %v11464_v29  ;;  %v2411_v61 = vshll.u32 %v10233_v31, 16  ;;  %v2395_v8 = vshll.u32 %v10231_v50, 16 }
  0x78   : > { %362 = vst.msk [vmem:[#allocation2 + $0x50] sm:$0xf] %vm17480_vm5, %v329_v14  ;;  %v12250_v9 = vld [vmem:[%s11828_s21 + $0x34] sm:$0xf]  ;;  %v347_v31 = vld [vmem:[%s11828_s21 + $0x84] sm:$0xf] }
  0x79   : > { %4163 = vmatpush.bf16.msrb.mxu2 %v11456_v15  ;;  %v332_v15 = vld [vmem:[%s11828_s21 + $0x28] sm:$0xf]  ;;  %380 = vst.msk [vmem:[#allocation2 + $0x1b8] sm:$0xf] %vm17480_vm5, %v347_v31 }
  0x7a   : > { %1346 = vrot.lane.b32.xlu2 %v10078_v39, %s11722_s22  ;;  %v603_v39 = vrot.slane %v602_v28, 4  ;;  %v2371_v28 = vshll.u32 %v10228_v48, 16  ;;  %365 = vst.msk [vmem:[#allocation2 + $0x8c] sm:$0xf] %vm17480_vm5, %v332_v15 }
  0x7b   : > { %883 = vrot.lane.b32.xlu1 %v800_v35, %s11722_s22  ;;  %v617_v35 = vrot.slane %v616_v25, 4 }
  0x7c   : > { %1348 = vrot.lane.b32.xlu0 %v10079_v38, %s11722_s22  ;;  %v809_v38 = vrot.slane %v808_v27, 4  ;;  %v608_v58 = vsel %vm11842_vm2, %v603_v39, %v607_v40  ;;  %v2368_v27 = vshrl.u32 %v10228_v48, 16  ;;  %v631_v40 = vrot.slane %v629_v26, 5 }
  0x7d   : > { %v622_v51 = vsel %vm11842_vm2, %v617_v35, %v12140_v36  ;;  %v12215_v35 = vrot.slane %v2377_v10, 5  ;;  %v2373_v49 = vrot.slane %v2371_v28, 5 }
  0x7e   : > { %v814_v57 = vsel %vm11842_vm2, %v809_v38, %v12077_v45  ;;  %v2018_v45 = vrot.slane %v2016_v44, 4  ;;  %v1127_v38 = vrot.slane %v1125_v54, 4  ;;  %v2370_v47 = vrot.slane %v2368_v27, 4  ;;  %v331_v27 = vld [vmem:[%s11828_s21 + $0x24] sm:$0xf] }
  0x7f   : > { %364 = vst.msk [vmem:[#allocation2 + $0x78] sm:$0xf] %vm17480_vm5, %v331_v27 }
  0x82   : > { %847 = vrot.lane.b32.xlu2 %v584_v6, %s11722_s22  ;;  %v625_v6 = vrot.slane %v623_v52, 4 }
  0x83   : > { %849 = vrot.lane.b32.xlu1 %v598_v1, %s11722_s22  ;;  %v12183_v1 = vld [vmem:[%s11828_s21 + $0xc] sm:$0xe] }
  0x84   : > { %881 = vrot.lane.b32.xlu0 %v790_v5, %s11722_s22  ;;  %v826_v18 = vpop.permute.xlu2 %825  ;;  %v2401_v5 = vshll.u32 %v10232_v60, 16  ;;  %v626_v25 = vor.u32 %v625_v6, %v12140_v36  ;;  %v2383_v36 = vrot.slane %v2381_v19, 4  ;;  %v987_v60 = vld [vmem:[%s11828_s21 + $0x84] sm:$0xe]  ;;  %v2374_v6 = vor.u32 %v2373_v49, %v2370_v47 }
  0x85   : > { %922 = vst.msk [vmem:[#allocation2] sm:$0xf] %vm17478_vm7, %v826_v18  ;;  %v10180_v18 = vrot.slane %v12183_v1, 9  ;;  %v2419_v1 = vshll.u32 %v10234_v41, 16  ;;  %v10047_v2 = vrot.slane %v987_v60, 9  ;;  %v2025_v47 = vrot.slane %v2023_v3, 4 }
  0x86   : > { %v627_v39 = vrot.slane %v626_v25, 4  ;;  %v2384_v62 = vor.u32 %v2383_v36, %v12215_v35  ;;  %v2375_v19 = vrot.slane %v2374_v6, 4  ;;  %v10137_v36 = vld [vmem:[%s11828_s21 + $0x20] sm:$0x1]  ;;  %v990_v3 = vld [vmem:[%s11828_s21 + $0x90] sm:$0xe] }
  0x87   : > { %v2017_v54 = vsel %vm12010_vm6, %v10180_v18, %v2016_v44  ;;  %v2416_v44 = vshrl.u32 %v10234_v41, 16  ;;  %v2425_v18 = vshll.u32 %v12250_v9, 16  ;;  %v2429_v41 = vshrl.u32 %v12250_v9, 16 }
  0x88   : > { %v2026_v49 = vrot.slane %v10137_v36, 5 }
  0x89   : > { %v2418_v14 = vrot.slane %v2416_v44, 4 }
  0x8a   : > { %1350 = vrot.lane.b32.xlu2 %v10080_v24, %s11722_s22  ;;  %v345_v24 = vld [vmem:[%s11828_s21 + $0x78] sm:$0xf]  ;;  %v2027_v6 = vsel %vm12010_vm6, %v2025_v47, %v2026_v49 }
  0x8b   : > { %887 = vrot.lane.b32.xlu1 %v824_v22, %s11722_s22  ;;  %v12202_v22 = vrot.slane %v2401_v5, 5  ;;  %378 = vst.msk [vmem:[#allocation2 + $0x190] sm:$0xf] %vm17480_vm5, %v345_v24  ;;  %v632_v5 = vsel %vm11842_vm2, %v627_v39, %v631_v40  ;;  %v11463_v39 = vld [vmem:[%s17468_s2 + $0xe8] sm:$0xff]  ;;  %v12281_v40 = vrot.slane %v2425_v18, 5 }
  0x8c   : > { %1352 = vrot.lane.b32.xlu0 %v10081_v21, %s11722_s22  ;;  %v828_v42 = vpop.permute.xlu2 %827  ;;  %v10342_v4 = vld [vmem:[#allocation2] sm:$0xf]  ;;  %v2020_v21 = vsel %vm12010_vm6, %v2018_v45, %v2019_v63  ;;  %v2387_v45 = vshll.u32 %v10230_v34, 16  ;;  %v12240_v63 = vld [vmem:[%s11828_s21 + $0x88] sm:$0xf]  ;;  %v2380_v34 = vsel %vm11842_vm2, %v2375_v19, %v12215_v35  ;;  %4253 = vmatpush.bf16.msrb.mxu3 %v11463_v39 }
  0x8d   : > { %v1327_v37 = vpop.permute.xlu1 %1326  ;;  %923 = vst.msk [vmem:[#allocation2 + $0x14] sm:$0xf] %vm17478_vm7, %v828_v42  ;;  %v10237_v19 = vld [vmem:[%s11828_s21 + $0x3c] sm:$0xf] }
  0x8e   : > { %1406 = vst.msk [vmem:[#allocation2 + $0x144] sm:$0xf] %vm17478_vm7, %v1327_v37  ;;  %v986_v37 = vld [vmem:[%s11828_s21 + $0x80] sm:$0x1] }
  0x8f   : > { %v1128_v42 = vrot.slane %v986_v37, 5 }
  0x91   : > { %v1129_v32 = vsel %vm12010_vm6, %v1127_v38, %v1128_v42  ;;  %v11455_v38 = vld [vmem:[%s17468_s2 + $0xa8] sm:$0xff]  ;;  %v12285_v42 = vld [vmem:[%s11828_s21 + $0x34] sm:$0xf] }
  0x92   : > { %851 = vrot.lane.b32.xlu2 %v608_v58, %s11722_s22  ;;  %v348_v58 = vld [vmem:[%s11828_s21 + $0x88] sm:$0xf]  ;;  %1218 = vst.msk [vmem:[#allocation2 + $0x1a8] sm:$0xf] %vm17480_vm5, %v1129_v32  ;;  %4164 = vmatpush.bf16.msrb.mxu2 %v11455_v38  ;;  %v2440_v38 = vshrl.u32 %v10237_v19, 16 }
  0x93   : > { %853 = vrot.lane.b32.xlu1 %v622_v51, %s11722_s22  ;;  %381 = vst.msk [vmem:[#allocation2 + $0x1cc] sm:$0xf] %vm17480_vm5, %v348_v58 }
  0x94   : > { %885 = vrot.lane.b32.xlu0 %v814_v57, %s11722_s22  ;;  %v1331_v12 = vpop.permute.xlu2 %1330  ;;  %v11356_v13 = vld [vmem:[#allocation2 + $0x10] sm:$0xf0]  ;;  %v2408_v57 = vor.u32 %v2407_v33, %v12202_v22 }
  0x95   : > { %v1329_v7 = vpop.permute.xlu1 %1328  ;;  %v10343_v17 = vor.u32 %v11356_v13, %v10342_v4  ;;  %1408 = vst.msk [vmem:[#allocation2 + $0x16c] sm:$0xf] %vm17478_vm7, %v1331_v12  ;;  %v11394_v30 = vld [vmem:[#allocation2 + $0x144] sm:$0xf]  ;;  %v1132_v4 = vrot.slane %v12240_v63, 5  ;;  %v2385_v12 = vrot.slane %v2384_v62, 4 }
  0x96   : > { %1407 = vst.msk [vmem:[#allocation2 + $0x158] sm:$0xf] %vm17478_vm7, %v1329_v7  ;;  %v858_v11 = vpop.permute.xlu0 %857  ;;  %v2392_v7 = vshrl.u32 %v10231_v50, 16  ;;  %v2409_v48 = vrot.slane %v2408_v57, 4  ;;  %v2389_v13 = vrot.slane %v2387_v45, 5  ;;  %v2037_v62 = vrot.slane %v12285_v42, 5 }
  0x97   : > { %938 = vst.msk [vmem:[#allocation2 + $0x140] sm:$0xf] %vm17478_vm7, %v858_v11  ;;  %3992 = vmatmul.bf16.vlgmr.msra.gmra.mxu0 %v10343_v17  ;;  %v1133_v10 = vsel %vm12010_vm6, %v10047_v2, %v1132_v4  ;;  %v2413_v11 = vrot.slane %v2411_v61, 5  ;;  %v989_v50 = vld [vmem:[%s11828_s21 + $0x8c] sm:$0x1]  ;;  %v10048_v63 = vrot.slane %v990_v3, 9 }
  0x98   : > { %1219 = vst.msk [vmem:[#allocation2 + $0x1bc] sm:$0xf] %vm17480_vm5, %v1133_v10  ;;  %v2394_v20 = vrot.slane %v2392_v7, 4  ;;  %v2390_v33 = vsel %vm11842_vm2, %v2385_v12, %v2389_v13  ;;  %v1135_v57 = vrot.slane %v989_v50, 5  ;;  %v350_v61 = vld [vmem:[%s11828_s21 + $0x94] sm:$0xf] }
  0x99   : > { %v2414_v29 = vsel %vm11842_vm2, %v2409_v48, %v2413_v11  ;;  %v10241_v45 = vld [vmem:[%s11828_s21 + $0x4c] sm:$0xf]  ;;  %v12316_v2 = vld [vmem:[%s11828_s21 + $0x94] sm:$0xf]  ;;  %383 = vst.msk [vmem:[#allocation2 + $0x1f4] sm:$0xf] %vm17480_vm5, %v350_v61 }
  0x9a   : > { %1354 = vrot.lane.b32.xlu2 %v10082_v16, %s11722_s22  ;;  %v1139_v10 = vrot.slane %v12316_v2, 5  ;;  %v10140_v11 = vld [vmem:[%s11828_s21 + $0x2c] sm:$0x1]  ;;  %v2473_v12 = vshll.u32 %v10241_v45, 16  ;;  %v2477_v13 = vshrl.u32 %v10241_v45, 16  ;;  %v2442_v3 = vrot.slane %v2440_v38, 4 }
  0x9b   : > { %2128 = vrot.lane.b32.xlu1 %v2020_v21, %s11722_s22  ;;  %v2397_v21 = vrot.slane %v2395_v8, 5  ;;  %v10138_v8 = vld [vmem:[%s11828_s21 + $0x24] sm:$0xe]  ;;  %v10242_v50 = vld [vmem:[%s11828_s21 + $0x50] sm:$0x1] }
  0x9c   : > { %1356 = vrot.lane.b32.xlu0 %v10083_v0, %s11722_s22  ;;  %v832_v56 = vpop.permute.xlu2 %831  ;;  %v2421_v0 = vrot.slane %v2419_v1, 5  ;;  %v12313_v1 = vld [vmem:[%s11828_s21 + $0x3c] sm:$0xe]  ;;  %v11399_v48 = vld [vmem:[#allocation2 + $0x16c] sm:$0xf]  ;;  %v12353_v31 = vrot.slane %v2477_v13, 4 }
  0x9d   : > { %v864_v43 = vpop.permute.xlu1 %863  ;;  %v10504_v46 = vld [vmem:[#allocation2 + $0x154] sm:$0xf0]  ;;  %925 = vst.msk [vmem:[#allocation2 + $0x3c] sm:$0xf] %vm17478_vm7, %v832_v56  ;;  %v2398_v37 = vor.u32 %v2397_v21, %v2394_v20  ;;  %v12299_v56 = vld [vmem:[%s11828_s21 + $0x28] sm:$0xf] }
  0x9e   : > { %941 = vst.msk [vmem:[#allocation2 + $0x17c] sm:$0xf] %vm17478_vm7, %v864_v43  ;;  %v860_v51 = vpop.permute.xlu0 %859  ;;  %v10507_v52 = vor.u32 %v11394_v30, %v10504_v46  ;;  %v10502_v17 = vld [vmem:[#allocation2 + $0x140] sm:$0xf]  ;;  %v2422_v30 = vor.u32 %v2421_v0, %v2418_v14  ;;  %v12290_v43 = vld [vmem:[%s11828_s21 + $0x38] sm:$0x1] }
  0x9f   : > { %939 = vst.msk [vmem:[#allocation2 + $0x154] sm:$0xf] %vm17478_vm7, %v860_v51  ;;  %v1134_v51 = vrot.slane %v1132_v4, 4  ;;  %v2040_v44 = vrot.slane %v12290_v43, 5  ;;  %v2030_v9 = vrot.slane %v12299_v56, 5  ;;  %v10184_v21 = vrot.slane %v12313_v1, 9 }
  0xa0   : > { %4121 = vmatmul.bf16.vlgmr.msra.gmra.mxu3 %v10507_v52  ;;  %v2423_v46 = vrot.slane %v2422_v30, 4  ;;  %v10236_v0 = vld [vmem:[%s11828_s21 + $0x38] sm:$0x1]  ;;  %v12351_v30 = vrot.slane %v2473_v12, 5  ;;  %v11462_v56 = vld [vmem:[%s17468_s2 + $0xe0] sm:$0xff] }
  0xa1   : > { %v1136_v4 = vsel %vm12010_vm6, %v1134_v51, %v1135_v57  ;;  %v2435_v36 = vshll.u32 %v10236_v0, 16  ;;  %v10243_v51 = vld [vmem:[%s11828_s21 + $0x54] sm:$0xf]  ;;  %4254 = vmatpush.bf16.msrb.mxu3 %v11462_v56  ;;  %v352_v12 = vld [vmem:[%s11828_s21 + $0xa0] sm:$0xf]  ;;  %v1141_v0 = vrot.slane %v1139_v10, 4 }
  0xa2   : > { %855 = vrot.lane.b32.xlu2 %v632_v5, %s11722_s22  ;;  %v2428_v32 = vsel %vm11842_vm2, %v2423_v46, %v12281_v40  ;;  %v11468_v5 = vld [vmem:[%s17468_s2 + $0x110] sm:$0xff]  ;;  %1220 = vst.msk [vmem:[#allocation2 + $0x1d0] sm:$0xf] %vm17480_vm5, %v1136_v4  ;;  %v2491_v13 = vshll.u32 %v10243_v51, 16 }
  0xa3   : > { %2130 = vrot.lane.b32.xlu1 %v2024_v53, %s11722_s22  ;;  %4345 = vmatpush.bf16.msrb.mxu0 %v11468_v5  ;;  %v333_v46 = vld [vmem:[%s11828_s21 + $0x30] sm:$0xf]  ;;  %v2437_v61 = vrot.slane %v2435_v36, 5  ;;  %385 = vst.msk [vmem:[#allocation2 + $0x21c] sm:$0xf] %vm17480_vm5, %v352_v12 }
  0xa4   : > { %2126 = vrot.lane.b32.xlu0 %v2017_v54, %s11722_s22  ;;  %v1335_v24 = vpop.permute.xlu2 %1334  ;;  %v11361_v35 = vld [vmem:[#allocation2 + $0x38] sm:$0xf0]  ;;  %v2399_v54 = vrot.slane %v2398_v37, 4  ;;  %v10238_v37 = vld [vmem:[%s11828_s21 + $0x40] sm:$0xf] }
  0xa5   : > { %v830_v16 = vpop.permute.xlu1 %829  ;;  %1410 = vst.msk [vmem:[#allocation2 + $0x194] sm:$0xf] %vm17478_vm7, %v1335_v24  ;;  %v11401_v14 = vld [vmem:[#allocation2 + $0x178] sm:$0xf0]  ;;  %v2033_v24 = vrot.slane %v10140_v11, 5  ;;  %v2453_v43 = vshrl.u32 %v10238_v37, 16 }
  0xa6   : > { %924 = vst.msk [vmem:[#allocation2 + $0x28] sm:$0xf] %vm17478_vm7, %v830_v16  ;;  %v862_v25 = vpop.permute.xlu0 %861  ;;  %v11396_v26 = vld [vmem:[#allocation2 + $0x150] sm:$0xf0]  ;;  %v2404_v7 = vsel %vm11842_vm2, %v2399_v54, %v12202_v22  ;;  %v2039_v22 = vrot.slane %v2037_v62, 4  ;;  %v2431_v16 = vrot.slane %v2429_v41, 4 }
  0xa7   : > { %940 = vst.msk [vmem:[#allocation2 + $0x168] sm:$0xf] %vm17478_vm7, %v862_v25  ;;  %v10503_v28 = vor.u32 %v11396_v26, %v10502_v17  ;;  %v1140_v17 = vsel %vm12010_vm6, %v10048_v63, %v1139_v10  ;;  %v10182_v25 = vrot.slane %v10138_v8, 9  ;;  %v2032_v26 = vrot.slane %v2030_v9, 4  ;;  %v10141_v54 = vld [vmem:[%s11828_s21 + $0x30] sm:$0xe] }
  0xa8   : > { %1221 = vst.msk [vmem:[#allocation2 + $0x1e4] sm:$0xf] %vm17480_vm5, %v1140_v17  ;;  %v2041_v39 = vsel %vm12010_vm6, %v2039_v22, %v2040_v44  ;;  %v2432_v41 = vor.u32 %v2431_v16, %v12281_v40  ;;  %v11454_v40 = vld [vmem:[%s17468_s2 + $0xa0] sm:$0xff]  ;;  %v10183_v4 = vrot.slane %v10141_v54, 9  ;;  %v2455_v5 = vrot.slane %v2453_v43, 4 }
  0xa9   : > { %4032 = vmatmul.bf16.vlgmr.msra.gmra.mxu2 %v10503_v28  ;;  %v2031_v47 = vsel %vm12010_vm6, %v10182_v25, %v2030_v9  ;;  %v2034_v49 = vsel %vm12010_vm6, %v2032_v26, %v2033_v24  ;;  %366 = vst.msk [vmem:[#allocation2 + $0xa0] sm:$0xf] %vm17480_vm5, %v333_v46  ;;  %v10239_v63 = vld [vmem:[%s11828_s21 + $0x44] sm:$0x1]  ;;  %v2480_v9 = vor.u32 %v12353_v31, %v12351_v30  ;;  %v2488_v11 = vshrl.u32 %v10243_v51, 16 }
  0xaa   : > { %2751 = vrot.lane.b32.xlu2 %v2380_v34, %s11722_s22  ;;  %4165 = vmatpush.bf16.msrb.mxu2 %v11454_v40  ;;  %v2459_v22 = vshll.u32 %v10239_v63, 16  ;;  %v2038_v2 = vsel %vm12010_vm6, %v10183_v4, %v2037_v62  ;;  %v992_v25 = vld [vmem:[%s11828_s21 + $0x98] sm:$0x1]  ;;  %v2493_v62 = vrot.slane %v2491_v13, 5  ;;  %v10152_v13 = vld [vmem:[%s11828_s21 + $0x5c] sm:$0x1] }
  0xab   : > { %2757 = vrot.lane.b32.xlu1 %v2414_v29, %s11722_s22  ;;  %v12349_v29 = vld [vmem:[%s11828_s21 + $0x40] sm:$0xf]  ;;  %v2490_v31 = vrot.slane %v2488_v11, 4  ;;  %v11461_v63 = vld [vmem:[%s17468_s2 + $0xd8] sm:$0xff] }
  0xac   : > { %2753 = vrot.lane.b32.xlu0 %v2390_v33, %s11722_s22  ;;  %v836_v60 = vpop.permute.xlu2 %835  ;;  %v2044_v57 = vrot.slane %v12349_v29, 5  ;;  %v11404_v26 = vld [vmem:[#allocation2 + $0x194] sm:$0xf]  ;;  %v2461_v43 = vrot.slane %v2459_v22, 5  ;;  %4255 = vmatpush.bf16.msrb.mxu3 %v11461_v63  ;;  %v995_v22 = vld [vmem:[%s11828_s21 + $0xa4] sm:$0x1] }
  0xad   : > { %v868_v52 = vpop.permute.xlu1 %867  ;;  %v10362_v53 = vld [vmem:[#allocation2 + $0x28] sm:$0xf]  ;;  %927 = vst.msk [vmem:[#allocation2 + $0x64] sm:$0xf] %vm17478_vm7, %v836_v60  ;;  %v2449_v60 = vshll.u32 %v10238_v37, 16  ;;  %v2494_v56 = vor.u32 %v2493_v62, %v2490_v31  ;;  %v2061_v31 = vrot.slane %v10152_v13, 5 }
  0xae   : > { %943 = vst.msk [vmem:[#allocation2 + $0x1a4] sm:$0xf] %vm17478_vm7, %v868_v52  ;;  %v1333_v58 = vpop.permute.xlu0 %1332  ;;  %v10363_v59 = vor.u32 %v11361_v35, %v10362_v53  ;;  %v10522_v18 = vld [vmem:[#allocation2 + $0x168] sm:$0xf]  ;;  %v2443_v35 = vshll.u32 %v10237_v19, 16  ;;  %v2045_v16 = vsel %vm12010_vm6, %v10184_v21, %v2044_v57 }
  0xaf   : > { %1409 = vst.msk [vmem:[#allocation2 + $0x180] sm:$0xf] %vm17478_vm7, %v1333_v58  ;;  %v10523_v33 = vor.u32 %v11401_v14, %v10522_v18  ;;  %v334_v52 = vld [vmem:[%s11828_s21 + $0x34] sm:$0xf]  ;;  %v349_v53 = vld [vmem:[%s11828_s21 + $0x90] sm:$0xf] }
  0xb0   : > { %3997 = vmatmul.bf16.gmra.mxu0 %v10363_v59  ;;  %367 = vst.msk [vmem:[#allocation2 + $0xb4] sm:$0xf] %vm17480_vm5, %v334_v52  ;;  %v2433_v59 = vrot.slane %v2432_v41, 4  ;;  %v2445_v45 = vrot.slane %v2443_v35, 5  ;;  %v12390_v14 = vrot.slane %v2449_v60, 5 }
  0xb1   : > { %382 = vst.msk [vmem:[#allocation2 + $0x1e0] sm:$0xf] %vm17480_vm5, %v349_v53  ;;  %v993_v19 = vld [vmem:[%s11828_s21 + $0x9c] sm:$0xe]  ;;  %v10240_v37 = vld [vmem:[%s11828_s21 + $0x48] sm:$0xf] }
  0xb2   : > { %2132 = vrot.lane.b32.xlu2 %v2027_v6, %s11722_s22  ;;  %v2438_v17 = vsel %vm11842_vm2, %v2433_v59, %v2437_v61  ;;  %v2446_v18 = vor.u32 %v2445_v45, %v2442_v3  ;;  %v2456_v1 = vor.u32 %v2455_v5, %v12390_v14  ;;  %v10049_v10 = vrot.slane %v993_v19, 9  ;;  %v336_v53 = vld [vmem:[%s11828_s21 + $0x40] sm:$0xf]  ;;  %v351_v60 = vld [vmem:[%s11828_s21 + $0x9c] sm:$0xf] }
  0xb3   : > { %2759 = vrot.lane.b32.xlu1 %v2428_v32, %s11722_s22  ;;  %v2464_v54 = vshrl.u32 %v10240_v37, 16  ;;  %v10146_v61 = vld [vmem:[%s11828_s21 + $0x44] sm:$0x1]  ;;  %v11453_v45 = vld [vmem:[%s17468_s2 + $0x98] sm:$0xff]  ;;  %369 = vst.msk [vmem:[#allocation2 + $0xdc] sm:$0xf] %vm17480_vm5, %v336_v53 }
  0xb4   : > { %2755 = vrot.lane.b32.xlu0 %v2404_v7, %s11722_s22  ;;  %v1339_v15 = vpop.permute.xlu2 %1338  ;;  %v11366_v58 = vld [vmem:[#allocation2 + $0x60] sm:$0xf0]  ;;  %v2447_v41 = vrot.slane %v2446_v18, 4  ;;  %v2457_v35 = vrot.slane %v2456_v1, 4  ;;  %384 = vst.msk [vmem:[#allocation2 + $0x208] sm:$0xf] %vm17480_vm5, %v351_v60  ;;  %4166 = vmatpush.bf16.msrb.mxu2 %v11453_v45 }
  0xb5   : > { %v834_v20 = vpop.permute.xlu1 %833  ;;  %1412 = vst.msk [vmem:[#allocation2 + $0x1bc] sm:$0xf] %vm17478_vm7, %v1339_v15  ;;  %v11406_v42 = vld [vmem:[#allocation2 + $0x1a0] sm:$0xf0]  ;;  %v2481_v15 = vrot.slane %v2480_v9, 4  ;;  %v2466_v5 = vrot.slane %v2464_v54, 4 }
  0xb6   : > { %926 = vst.msk [vmem:[#allocation2 + $0x50] sm:$0xf] %vm17478_vm7, %v834_v20  ;;  %v866_v27 = vpop.permute.xlu0 %865  ;;  %v10524_v28 = vld [vmem:[#allocation2 + $0x17c] sm:$0xf0]  ;;  %v2452_v59 = vsel %vm11842_vm2, %v2447_v41, %v12390_v14  ;;  %v2462_v3 = vsel %vm11842_vm2, %v2457_v35, %v2461_v43  ;;  %v2046_v9 = vrot.slane %v2044_v57, 4 }
  0xb7   : > { %942 = vst.msk [vmem:[#allocation2 + $0x190] sm:$0xf] %vm17478_vm7, %v866_v27  ;;  %v10527_v34 = vor.u32 %v11399_v48, %v10524_v28  ;;  %v2483_v48 = vshll.u32 %v10242_v50, 16  ;;  %v12405_v20 = vld [vmem:[%s11828_s21 + $0xa0] sm:$0xf]  ;;  %v1142_v28 = vrot.slane %v992_v25, 5 }
  0xb8   : > { %v1146_v21 = vrot.slane %v12405_v20, 5  ;;  %v12416_v27 = vld [vmem:[%s11828_s21 + $0x58] sm:$0xf]  ;;  %v335_v50 = vld [vmem:[%s11828_s21 + $0x3c] sm:$0xf] }
  0xb9   : > { %4037 = vmatmul.bf16.gmra.mxu2 %v10523_v33  ;;  %4126 = vmatmul.bf16.gmra.mxu3 %v10527_v34  ;;  %v2485_v24 = vrot.slane %v2483_v48, 5  ;;  %v1143_v36 = vsel %vm12010_vm6, %v1141_v0, %v1142_v28  ;;  %368 = vst.msk [vmem:[#allocation2 + $0xc8] sm:$0xf] %vm17480_vm5, %v335_v50  ;;  %v2047_v48 = vrot.slane %v10146_v61, 5  ;;  %v354_v18 = vld [vmem:[%s11828_s21 + $0xac] sm:$0xf] }
  0xba   : > { %2134 = vrot.lane.b32.xlu2 %v2031_v47, %s11722_s22  ;;  %v1147_v33 = vsel %vm12010_vm6, %v10049_v10, %v1146_v21  ;;  %1222 = vst.msk [vmem:[#allocation2 + $0x1f8] sm:$0xf] %vm17480_vm5, %v1143_v36  ;;  %v1148_v0 = vrot.slane %v1146_v21, 4  ;;  %v996_v19 = vld [vmem:[%s11828_s21 + $0xa8] sm:$0xe] }
  0xbb   : > { %2140 = vrot.lane.b32.xlu1 %v2041_v39, %s11722_s22  ;;  %1223 = vst.msk [vmem:[#allocation2 + $0x20c] sm:$0xf] %vm17480_vm5, %v1147_v33  ;;  %v2497_v39 = vshll.u32 %v12416_v27, 16  ;;  %v2486_v40 = vsel %vm11842_vm2, %v2481_v15, %v2485_v24  ;;  %v12477_v10 = vld [vmem:[%s11828_s21 + $0xac] sm:$0xf]  ;;  %v10050_v20 = vrot.slane %v996_v19, 9 }
  0xbc   : > { %2136 = vrot.lane.b32.xlu0 %v2034_v49, %s11722_s22  ;;  %v840_v7 = vpop.permute.xlu2 %839  ;;  %v1153_v21 = vrot.slane %v12477_v10, 5  ;;  %v11467_v24 = vld [vmem:[%s17468_s2 + $0x108] sm:$0xff]  ;;  %387 = vst.msk [vmem:[#allocation2 + $0x244] sm:$0xf] %vm17480_vm5, %v354_v18 }
  0xbd   : > { %v872_v32 = vpop.permute.xlu1 %871  ;;  %v10382_v44 = vld [vmem:[#allocation2 + $0x50] sm:$0xf]  ;;  %929 = vst.msk [vmem:[#allocation2 + $0x8c] sm:$0xf] %vm17478_vm7, %v840_v7  ;;  %v2495_v7 = vrot.slane %v2494_v56, 4  ;;  %4346 = vmatpush.bf16.msrb.mxu0 %v11467_v24 }
  0xbe   : > { %945 = vst.msk [vmem:[#allocation2 + $0x1cc] sm:$0xf] %vm17478_vm7, %v872_v32  ;;  %v1337_v6 = vpop.permute.xlu0 %1336  ;;  %v10383_v8 = vor.u32 %v11366_v58, %v10382_v44  ;;  %v10542_v34 = vld [vmem:[#allocation2 + $0x190] sm:$0xf]  ;;  %v12439_v58 = vld [vmem:[%s11828_s21 + $0x58] sm:$0xf]  ;;  %v1154_v62 = vsel %vm12010_vm6, %v10050_v20, %v1153_v21 }
  0xbf   : > { %1411 = vst.msk [vmem:[#allocation2 + $0x1a8] sm:$0xf] %vm17478_vm7, %v1337_v6  ;;  %v10543_v51 = vor.u32 %v11406_v42, %v10542_v34  ;;  %v12455_v32 = vrot.slane %v2497_v39, 5  ;;  %v2501_v44 = vshrl.u32 %v12416_v27, 16  ;;  %v2467_v6 = vshll.u32 %v10240_v37, 16 }
  0xc0   : > { %4002 = vmatmul.bf16.gmra.mxu0 %v10383_v8  ;;  %v2058_v8 = vrot.slane %v12439_v58, 5  ;;  %v2048_v27 = vsel %vm12010_vm6, %v2046_v9, %v2047_v48  ;;  %v11409_v42 = vld [vmem:[#allocation2 + $0x1bc] sm:$0xf]  ;;  %v10149_v34 = vld [vmem:[%s11828_s21 + $0x50] sm:$0x1] }
  0xc1   : > { %v2469_v14 = vrot.slane %v2467_v6, 5  ;;  %v2500_v25 = vsel %vm11842_vm2, %v2495_v7, %v12455_v32  ;;  %1225 = vst.msk [vmem:[#allocation2 + $0x234] sm:$0xf] %vm17480_vm5, %v1154_v62  ;;  %v2054_v50 = vrot.slane %v10149_v34, 5  ;;  %v337_v53 = vld [vmem:[%s11828_s21 + $0x48] sm:$0xf] }
  0xc2   : > { %2761 = vrot.lane.b32.xlu2 %v2438_v17, %s11722_s22  ;;  %v10147_v17 = vld [vmem:[%s11828_s21 + $0x48] sm:$0xe]  ;;  %v2060_v15 = vrot.slane %v2058_v8, 4  ;;  %v338_v56 = vld [vmem:[%s11828_s21 + $0x4c] sm:$0xf] }
  0xc3   : > { %2142 = vrot.lane.b32.xlu1 %v2045_v16, %s11722_s22  ;;  %v2470_v1 = vor.u32 %v2469_v14, %v2466_v5  ;;  %v10185_v36 = vrot.slane %v10147_v17, 9  ;;  %v353_v45 = vld [vmem:[%s11828_s21 + $0xa8] sm:$0xf]  ;;  %370 = vst.msk [vmem:[#allocation2 + $0xf0] sm:$0xf] %vm17480_vm5, %v337_v53  ;;  %v11452_v5 = vld [vmem:[%s17468_s2 + $0x90] sm:$0xff] }
  0xc4   : > { %2138 = vrot.lane.b32.xlu0 %v2038_v2, %s11722_s22  ;;  %v1343_v49 = vpop.permute.xlu2 %1342  ;;  %v11371_v4 = vld [vmem:[#allocation2 + $0x88] sm:$0xf0]  ;;  %v2062_v60 = vsel %vm12010_vm6, %v2060_v15, %v2061_v31  ;;  %v12528_v7 = vld [vmem:[%s11828_s21 + $0x64] sm:$0xf]  ;;  %371 = vst.msk [vmem:[#allocation2 + $0x104] sm:$0xf] %vm17480_vm5, %v338_v56  ;;  %4167 = vmatpush.bf16.msrb.mxu2 %v11452_v5 }
  0xc5   : > { %v838_v38 = vpop.permute.xlu1 %837  ;;  %1414 = vst.msk [vmem:[#allocation2 + $0x1e4] sm:$0xf] %vm17478_vm7, %v1343_v49  ;;  %v10148_v2 = vld [vmem:[%s11828_s21 + $0x4c] sm:$0xf]  ;;  %v2471_v28 = vrot.slane %v2470_v1, 4 }
  0xc6   : > { %928 = vst.msk [vmem:[#allocation2 + $0x78] sm:$0xf] %vm17478_vm7, %v838_v38  ;;  %v870_v46 = vpop.permute.xlu0 %869  ;;  %v10544_v47 = vld [vmem:[#allocation2 + $0x1a4] sm:$0xf0]  ;;  %v2051_v37 = vrot.slane %v10148_v2, 5  ;;  %v2503_v38 = vrot.slane %v2501_v44, 4 }
  0xc7   : > { %944 = vst.msk [vmem:[#allocation2 + $0x1b8] sm:$0xf] %vm17478_vm7, %v870_v46  ;;  %v10547_v52 = vor.u32 %v11404_v26, %v10544_v47  ;;  %v1149_v26 = vrot.slane %v995_v22, 5  ;;  %v2476_v39 = vsel %vm11842_vm2, %v2471_v28, %v12351_v30  ;;  %v11411_v35 = vld [vmem:[#allocation2 + $0x1c8] sm:$0xf0] }
  0xc8   : > { %v10245_v46 = vld [vmem:[%s11828_s21 + $0x5c] sm:$0x1]  ;;  %v10246_v47 = vld [vmem:[%s11828_s21 + $0x60] sm:$0xf]  ;;  %v2053_v49 = vrot.slane %v2051_v37, 4  ;;  %v2052_v63 = vsel %vm12010_vm6, %v10185_v36, %v2051_v37 }
  0xc9   : > { %4042 = vmatmul.bf16.gmra.mxu2 %v10543_v51  ;;  %4131 = vmatmul.bf16.gmra.mxu3 %v10547_v52  ;;  %v1150_v33 = vsel %vm12010_vm6, %v1148_v0, %v1149_v26  ;;  %v2507_v61 = vshll.u32 %v10245_v46, 16  ;;  %v2515_v44 = vshll.u32 %v10246_v47, 16  ;;  %v10247_v9 = vld [vmem:[%s11828_s21 + $0x64] sm:$0xf]  ;;  %386 = vst.msk [vmem:[#allocation2 + $0x230] sm:$0xf] %vm17480_vm5, %v353_v45 }
  0xca   : > { %2763 = vrot.lane.b32.xlu2 %v2452_v59, %s11722_s22  ;;  %1224 = vst.msk [vmem:[#allocation2 + $0x220] sm:$0xf] %vm17480_vm5, %v1150_v33  ;;  %v2504_v59 = vor.u32 %v2503_v38, %v12455_v32  ;;  %v11460_v32 = vld [vmem:[%s17468_s2 + $0xd0] sm:$0xff]  ;;  %v2521_v17 = vshll.u32 %v10247_v9, 16  ;;  %v2525_v18 = vshrl.u32 %v10247_v9, 16  ;;  %v2065_v26 = vrot.slane %v12528_v7, 5 }
  0xcb   : > { %2769 = vrot.lane.b32.xlu1 %v2486_v40, %s11722_s22  ;;  %v998_v48 = vld [vmem:[%s11828_s21 + $0xb0] sm:$0x1]  ;;  %v2509_v13 = vrot.slane %v2507_v61, 5  ;;  %v10150_v0 = vld [vmem:[%s11828_s21 + $0x54] sm:$0xe]  ;;  %4256 = vmatpush.bf16.msrb.mxu3 %v11460_v32  ;;  %v11451_v32 = vld [vmem:[%s17468_s2 + $0x88] sm:$0xff] }
  0xcc   : > { %2765 = vrot.lane.b32.xlu0 %v2462_v3, %s11722_s22  ;;  %v844_v16 = vpop.permute.xlu2 %843  ;;  %v2512_v3 = vshrl.u32 %v10246_v47, 16  ;;  %v1156_v22 = vrot.slane %v998_v48, 5  ;;  %v10186_v19 = vrot.slane %v10150_v0, 9  ;;  %v10052_v1 = vld [vmem:[%s11828_s21 + $0xc] sm:$0xf]  ;;  %v2523_v36 = vrot.slane %v2521_v17, 5  ;;  %4168 = vmatpush.bf16.msrb.mxu2 %v11451_v32 }
  0xcd   : > { %v876_v11 = vpop.permute.xlu1 %875  ;;  %v10402_v12 = vld [vmem:[#allocation2 + $0x78] sm:$0xf]  ;;  %931 = vst.msk [vmem:[#allocation2 + $0xb4] sm:$0xf] %vm17478_vm7, %v844_v16  ;;  %v10155_v28 = vld [vmem:[%s11828_s21 + $0x68] sm:$0x1] }
  0xce   : > { %947 = vst.msk [vmem:[#allocation2 + $0x1f4] sm:$0xf] %vm17478_vm7, %v876_v11  ;;  %v1341_v29 = vpop.permute.xlu0 %1340  ;;  %v10403_v57 = vor.u32 %v11371_v4, %v10402_v12  ;;  %v10562_v41 = vld [vmem:[#allocation2 + $0x1b8] sm:$0xf]  ;;  %v2055_v4 = vsel %vm12010_vm6, %v2053_v49, %v2054_v50  ;;  %v1155_v11 = vrot.slane %v1153_v21, 4  ;;  %v2505_v12 = vrot.slane %v2504_v59, 4 }
  0xcf   : > { %1413 = vst.msk [vmem:[#allocation2 + $0x1d0] sm:$0xf] %vm17478_vm7, %v1341_v29  ;;  %v10563_v54 = vor.u32 %v11411_v35, %v10562_v41  ;;  %v2514_v14 = vrot.slane %v2512_v3, 4  ;;  %v356_v20 = vld [vmem:[%s11828_s21 + $0xb8] sm:$0xf]  ;;  %v2059_v33 = vsel %vm12010_vm6, %v10186_v19, %v2058_v8  ;;  %v2067_v58 = vrot.slane %v2065_v26, 4 }
  0xd0   : > { %4007 = vmatmul.bf16.gmra.mxu0 %v10403_v57  ;;  %v2517_v57 = vrot.slane %v2515_v44, 5  ;;  %v999_v21 = vld [vmem:[%s11828_s21 + $0xb4] sm:$0xe]  ;;  %v12545_v24 = vld [vmem:[%s11828_s21 + $0xb8] sm:$0xf]  ;;  %v2510_v31 = vsel %vm11842_vm2, %v2505_v12, %v2509_v13  ;;  %v2068_v41 = vrot.slane %v10155_v28, 5 }
  0xd1   : > { %v1160_v15 = vrot.slane %v12545_v24, 5  ;;  %389 = vst.msk [vmem:[#allocation2 + $0x26c] sm:$0xf] %vm17480_vm5, %v356_v20  ;;  %v10249_v34 = vld [vmem:[%s11828_s21 + $0x6c] sm:$0xf] }
  0xd2   : > { %2144 = vrot.lane.b32.xlu2 %v2048_v27, %s11722_s22  ;;  %v1157_v27 = vsel %vm12010_vm6, %v1155_v11, %v1156_v22  ;;  %v2518_v62 = vor.u32 %v2517_v57, %v2514_v14  ;;  %v10248_v38 = vld [vmem:[%s11828_s21 + $0x68] sm:$0x1]  ;;  %v11414_v46 = vld [vmem:[#allocation2 + $0x1e4] sm:$0xf]  ;;  %v339_v56 = vld [vmem:[%s11828_s21 + $0x54] sm:$0xf]  ;;  %v2069_v45 = vsel %vm12010_vm6, %v2067_v58, %v2068_v41 }
  0xd3   : > { %2771 = vrot.lane.b32.xlu1 %v2500_v25, %s11722_s22  ;;  %1226 = vst.msk [vmem:[#allocation2 + $0x248] sm:$0xf] %vm17480_vm5, %v1157_v27  ;;  %v2531_v8 = vshll.u32 %v10248_v38, 16  ;;  %v340_v61 = vld [vmem:[%s11828_s21 + $0x58] sm:$0xf]  ;;  %v1162_v19 = vrot.slane %v1160_v15, 4 }
  0xd4   : > { %2767 = vrot.lane.b32.xlu0 %v2476_v39, %s11722_s22  ;;  %v1347_v52 = vpop.permute.xlu2 %1346  ;;  %v11376_v6 = vld [vmem:[#allocation2 + $0xb0] sm:$0xf0]  ;;  %v2527_v39 = vrot.slane %v2525_v18, 4  ;;  %v2519_v50 = vrot.slane %v2518_v62, 4  ;;  %372 = vst.msk [vmem:[#allocation2 + $0x118] sm:$0xf] %vm17480_vm5, %v339_v56 }
  0xd5   : > { %v842_v43 = vpop.permute.xlu1 %841  ;;  %1416 = vst.msk [vmem:[#allocation2 + $0x20c] sm:$0xf] %vm17478_vm7, %v1347_v52  ;;  %v2533_v52 = vrot.slane %v2531_v8, 5  ;;  %v355_v44 = vld [vmem:[%s11828_s21 + $0xb4] sm:$0xf] }
  0xd6   : > { %930 = vst.msk [vmem:[#allocation2 + $0xa0] sm:$0xf] %vm17478_vm7, %v842_v43  ;;  %v874_v30 = vpop.permute.xlu0 %873  ;;  %v10564_v51 = vld [vmem:[#allocation2 + $0x1cc] sm:$0xf0]  ;;  %v11416_v43 = vld [vmem:[#allocation2 + $0x1f0] sm:$0xf0]  ;;  %v2528_v47 = vor.u32 %v2527_v39, %v2523_v36 }
  0xd7   : > { %946 = vst.msk [vmem:[#allocation2 + $0x1e0] sm:$0xf] %vm17478_vm7, %v874_v30  ;;  %v10567_v40 = vor.u32 %v11409_v42, %v10564_v51  ;;  %v10051_v42 = vrot.slane %v999_v21, 9  ;;  %v12573_v30 = vld [vmem:[%s11828_s21 + $0x70] sm:$0xf]  ;;  %v2536_v51 = vshrl.u32 %v10249_v34, 16 }
  0xd8   : > { %v2529_v3 = vrot.slane %v2528_v47, 4  ;;  %v2072_v48 = vrot.slane %v12573_v30, 5  ;;  %373 = vst.msk [vmem:[#allocation2 + $0x12c] sm:$0xf] %vm17480_vm5, %v340_v61  ;;  %v10085_v12 = vld [vmem:[%s11828_s21 + $0x10] sm:$0xf] }
  0xd9   : > { %4047 = vmatmul.bf16.gmra.mxu2 %v10563_v54  ;;  %4136 = vmatmul.bf16.gmra.mxu3 %v10567_v40  ;;  %v1161_v37 = vsel %vm12010_vm6, %v10051_v42, %v1160_v15  ;;  %v12595_v11 = vrot.slane %v2536_v51, 4  ;;  %388 = vst.msk [vmem:[#allocation2 + $0x258] sm:$0xf] %vm17480_vm5, %v355_v44  ;;  %v10086_v13 = vld [vmem:[%s11828_s21 + $0x14] sm:$0x1]  ;;  %v1480_v22 = vshll.u32 %v10085_v12, 16 }
  0xda   : > { %2146 = vrot.lane.b32.xlu2 %v2052_v63, %s11722_s22  ;;  %1227 = vst.msk [vmem:[#allocation2 + $0x25c] sm:$0xf] %vm17480_vm5, %v1161_v37  ;;  %v2539_v63 = vshll.u32 %v10249_v34, 16  ;;  %v2534_v5 = vsel %vm11842_vm2, %v2529_v3, %v2533_v52  ;;  %v1484_v0 = vshrl.u32 %v10085_v12, 16  ;;  %v12606_v18 = vld [vmem:[%s11828_s21 + $0x74] sm:$0x1] }
  0xdb   : > { %2152 = vrot.lane.b32.xlu1 %v2062_v60, %s11722_s22  ;;  %v10250_v27 = vld [vmem:[%s11828_s21 + $0x70] sm:$0xf]  ;;  %v12614_v28 = vrot.slane %v1480_v22, 5  ;;  %v11466_v37 = vld [vmem:[%s17468_s2 + $0x100] sm:$0xff]  ;;  %v2075_v8 = vrot.slane %v12606_v18, 5  ;;  %v2074_v47 = vrot.slane %v2072_v48, 4 }
  0xdc   : > { %2148 = vrot.lane.b32.xlu0 %v2055_v4, %s11722_s22  ;;  %v848_v10 = vpop.permute.xlu2 %847  ;;  %v2524_v4 = vsel %vm11842_vm2, %v2519_v50, %v2523_v36  ;;  %v2541_v14 = vrot.slane %v2539_v63, 5  ;;  %v1486_v42 = vrot.slane %v1484_v0, 4  ;;  %v2549_v62 = vshrl.u32 %v10250_v27, 16  ;;  %v10196_v36 = vld [vmem:[%s11828_s21 + $0x18] sm:$0xf]  ;;  %4347 = vmatpush.bf16.msrb.mxu0 %v11466_v37 }
  0xdd   : > { %v880_v29 = vpop.permute.xlu1 %879  ;;  %v10422_v16 = vld [vmem:[#allocation2 + $0xa0] sm:$0xf]  ;;  %933 = vst.msk [vmem:[#allocation2 + $0xdc] sm:$0xf] %vm17478_vm7, %v848_v10  ;;  %v2545_v58 = vshll.u32 %v10250_v27, 16 }
  0xde   : > { %949 = vst.msk [vmem:[#allocation2 + $0x21c] sm:$0xf] %vm17478_vm7, %v880_v29  ;;  %v1345_v2 = vpop.permute.xlu0 %1344  ;;  %v10423_v25 = vor.u32 %v11376_v6, %v10422_v16  ;;  %v10582_v35 = vld [vmem:[#allocation2 + $0x1e0] sm:$0xf]  ;;  %v11459_v6 = vld [vmem:[%s17468_s2 + $0xc8] sm:$0xff]  ;;  %v1490_v29 = vshll.u32 %v10086_v13, 16  ;;  %v2542_v39 = vor.u32 %v2541_v14, %v12595_v11  ;;  %v2076_v11 = vsel %vm12010_vm6, %v2074_v47, %v2075_v8 }
  0xdf   : > { %1415 = vst.msk [vmem:[#allocation2 + $0x1f8] sm:$0xf] %vm17478_vm7, %v1345_v2  ;;  %v10583_v60 = vor.u32 %v11416_v43, %v10582_v35  ;;  %v1001_v16 = vld [vmem:[%s11828_s21 + $0xbc] sm:$0x1]  ;;  %4257 = vmatpush.bf16.msrb.mxu3 %v11459_v6  ;;  %v10252_v43 = vld [vmem:[%s11828_s21 + $0x78] sm:$0xf] }
  0xe0   : > { %4012 = vmatmul.bf16.gmra.mxu0 %v10423_v25  ;;  %v1163_v2 = vrot.slane %v1001_v16, 5  ;;  %v10054_v25 = vld [vmem:[%s11828_s21 + $0x18] sm:$0xf]  ;;  %v1492_v34 = vrot.slane %v1490_v29, 5  ;;  %2287 = vst.msk [vmem:[#allocation2 + $0xc] sm:$0xf] %vm17480_vm5, %v10196_v36 }
  0xe1   : > { %v2551_v50 = vrot.slane %v2549_v62, 4  ;;  %v11419_v7 = vld [vmem:[#allocation2 + $0x20c] sm:$0xf]  ;;  %v10088_v51 = vld [vmem:[%s11828_s21 + $0x1c] sm:$0xf]  ;;  %v2547_v56 = vrot.slane %v2545_v58, 5 }
  0xe2   : > { %2773 = vrot.lane.b32.xlu2 %v2510_v31, %s11722_s22  ;;  %v10053_v31 = vld [vmem:[%s11828_s21 + $0x10] sm:$0xf]  ;;  %v1164_v24 = vsel %vm12010_vm6, %v1162_v19, %v1163_v2  ;;  %v1504_v32 = vshll.u32 %v10088_v51, 16  ;;  %v1508_v6 = vshrl.u32 %v10088_v51, 16  ;;  %v10089_v13 = vld [vmem:[%s11828_s21 + $0x20] sm:$0x1] }
  0xe3   : > { %1294 = vrot.lane.b32.xlu1 %v10052_v1, %s11722_s22  ;;  %v10153_v1 = vld [vmem:[%s11828_s21 + $0x60] sm:$0xe]  ;;  %1228 = vst.msk [vmem:[#allocation2 + $0x270] sm:$0xf] %vm17480_vm5, %v1164_v24  ;;  %v10084_v14 = vld [vmem:[%s11828_s21 + $0xc] sm:$0xf] }
  0xe4   : > { %2150 = vrot.lane.b32.xlu0 %v2059_v33, %s11722_s22  ;;  %v1351_v40 = vpop.permute.xlu2 %1350  ;;  %v11381_v9 = vld [vmem:[#allocation2 + $0xd8] sm:$0xf0]  ;;  %v10187_v15 = vrot.slane %v10153_v1, 9  ;;  %v1487_v33 = vor.u32 %v1486_v42, %v12614_v28  ;;  %v12658_v29 = vld [vmem:[%s11828_s21 + $0x80] sm:$0x1]  ;;  %v1506_v16 = vrot.slane %v1504_v32, 5 }
  0xe5   : > { %v846_v49 = vpop.permute.xlu1 %845  ;;  %1418 = vst.msk [vmem:[#allocation2 + $0x234] sm:$0xf] %vm17478_vm7, %v1351_v40  ;;  %v11421_v38 = vld [vmem:[#allocation2 + $0x218] sm:$0xf0]  ;;  %v2543_v40 = vrot.slane %v2542_v39, 4  ;;  %v1471_v1 = vshrl.u32 %v10084_v14, 16 }
  0xe6   : > { %932 = vst.msk [vmem:[#allocation2 + $0xc8] sm:$0xf] %vm17478_vm7, %v846_v49  ;;  %v878_v53 = vpop.permute.xlu0 %877  ;;  %v10584_v54 = vld [vmem:[#allocation2 + $0x1f4] sm:$0xf0]  ;;  %v2066_v41 = vsel %vm12010_vm6, %v10187_v15, %v2065_v26  ;;  %v1488_v35 = vrot.slane %v1487_v33, 4  ;;  %v2082_v47 = vrot.slane %v12658_v29, 5 }
  0xe7   : > { %948 = vst.msk [vmem:[#allocation2 + $0x208] sm:$0xf] %vm17478_vm7, %v878_v53  ;;  %v10587_v59 = vor.u32 %v11414_v46, %v10584_v54  ;;  %v10087_v49 = vld [vmem:[%s11828_s21 + $0x18] sm:$0xf]  ;;  %v2548_v22 = vsel %vm11842_vm2, %v2543_v40, %v2547_v56  ;;  %v12655_v0 = vld [vmem:[%s11828_s21 + $0x7c] sm:$0xf] }
  0xe8   : > { %v1493_v26 = vsel %vm11842_vm2, %v1488_v35, %v1492_v34  ;;  %v1495_v52 = vshrl.u32 %v10087_v49, 16  ;;  %v1498_v53 = vshll.u32 %v10087_v49, 16  ;;  %v10251_v18 = vld [vmem:[%s11828_s21 + $0x74] sm:$0x1]  ;;  %v12672_v24 = vld [vmem:[%s11828_s21 + $0x7c] sm:$0xf] }
  0xe9   : > { %4052 = vmatmul.bf16.gmra.mxu2 %v10583_v60  ;;  %4141 = vmatmul.bf16.gmra.mxu3 %v10587_v59  ;;  %1887 = vst.msk [vmem:[#allocation2 + $0x1c] sm:$0xf] %vm17480_vm5, %v1493_v26  ;;  %v2560_v60 = vshrl.u32 %v10252_v43, 16  ;;  %v2563_v59 = vshll.u32 %v10252_v43, 16  ;;  %v2555_v62 = vshll.u32 %v10251_v18, 16  ;;  %v1473_v34 = vrot.slane %v1471_v1, 4 }
  0xea   : > { %2775 = vrot.lane.b32.xlu2 %v2524_v4, %s11722_s22  ;;  %v1497_v44 = vrot.slane %v1495_v52, 4  ;;  %v1500_v4 = vrot.slane %v1498_v53, 5  ;;  %v10056_v8 = vld [vmem:[%s11828_s21 + $0x24] sm:$0xf]  ;;  %v10199_v51 = vld [vmem:[%s11828_s21 + $0x28] sm:$0xf] }
  0xeb   : > { %2156 = vrot.lane.b32.xlu1 %v2069_v45, %s11722_s22  ;;  %v12661_v19 = vrot.slane %v2560_v60, 4  ;;  %v2565_v15 = vrot.slane %v2563_v59, 5  ;;  %v2557_v58 = vrot.slane %v2555_v62, 5  ;;  %v2569_v52 = vshll.u32 %v12672_v24, 16  ;;  %2290 = vst.msk [vmem:[#allocation2 + $0x48] sm:$0xf] %vm17480_vm5, %v10199_v51 }
  0xec   : > { %2777 = vrot.lane.b32.xlu0 %v2534_v5, %s11722_s22  ;;  %v852_v20 = vpop.permute.xlu2 %851  ;;  %v1501_v12 = vor.u32 %v1500_v4, %v1497_v44  ;;  %v10197_v4 = vld [vmem:[%s11828_s21 + $0x1c] sm:$0xf]  ;;  %v10255_v18 = vld [vmem:[%s11828_s21 + $0x84] sm:$0xf]  ;;  %v12719_v1 = vld [vmem:[%s11828_s21 + $0x88] sm:$0xf] }
  0xed   : > { %v884_v57 = vpop.permute.xlu1 %883  ;;  %v10442_v17 = vld [vmem:[#allocation2 + $0xc8] sm:$0xf]  ;;  %935 = vst.msk [vmem:[#allocation2 + $0x104] sm:$0xf] %vm17478_vm7, %v852_v20  ;;  %v11458_v20 = vld [vmem:[%s17468_s2 + $0xc0] sm:$0xff]  ;;  %v2566_v40 = vor.u32 %v2565_v15, %v12661_v19  ;;  %v2086_v15 = vrot.slane %v12719_v1, 5 }
  0xee   : > { %951 = vst.msk [vmem:[#allocation2 + $0x244] sm:$0xf] %vm17478_vm7, %v884_v57  ;;  %v1349_v10 = vpop.permute.xlu0 %1348  ;;  %v10443_v21 = vor.u32 %v11381_v9, %v10442_v17  ;;  %v10602_v46 = vld [vmem:[#allocation2 + $0x208] sm:$0xf]  ;;  %v2552_v9 = vor.u32 %v2551_v50, %v2547_v56  ;;  %v1510_v57 = vrot.slane %v1508_v6, 4  ;;  %v1514_v17 = vshll.u32 %v10089_v13, 16  ;;  %4258 = vmatpush.bf16.msrb.mxu3 %v11458_v20 }
  0xef   : > { %1417 = vst.msk [vmem:[#allocation2 + $0x220] sm:$0xf] %vm17478_vm7, %v1349_v10  ;;  %v10603_v3 = vor.u32 %v11421_v38, %v10602_v46  ;;  %v1502_v2 = vrot.slane %v1501_v12, 4  ;;  %v1474_v10 = vshll.u32 %v10084_v14, 16  ;;  %v2079_v46 = vrot.slane %v12655_v0, 5 }
  0xf0   : > { %4017 = vmatmul.bf16.gmra.mxu0 %v10443_v21  ;;  %v1511_v27 = vor.u32 %v1510_v57, %v1506_v16  ;;  %v1516_v42 = vrot.slane %v1514_v17, 5  ;;  %v10055_v50 = vld [vmem:[%s11828_s21 + $0x1c] sm:$0xf]  ;;  %v12695_v56 = vld [vmem:[%s11828_s21 + $0x28] sm:$0xf]  ;;  %v2567_v13 = vrot.slane %v2566_v40, 4 }
  0xf1   : > { %v1507_v33 = vsel %vm11842_vm2, %v1502_v2, %v1506_v16  ;;  %v1476_v36 = vrot.slane %v1474_v10, 5  ;;  %v1528_v44 = vshll.u32 %v12695_v56, 16  ;;  %v10156_v6 = vld [vmem:[%s11828_s21 + $0x6c] sm:$0xe]  ;;  %2288 = vst.msk [vmem:[#allocation2 + $0x20] sm:$0xf] %vm17480_vm5, %v10197_v4 }
  0xf2   : > { %1296 = vrot.lane.b32.xlu2 %v10053_v31, %s11722_s22  ;;  %v2553_v31 = vrot.slane %v2552_v9, 4  ;;  %1888 = vst.msk [vmem:[#allocation2 + $0x30] sm:$0xf] %vm17480_vm5, %v1507_v33  ;;  %v1512_v39 = vrot.slane %v1511_v27, 4  ;;  %v2571_v14 = vrot.slane %v2569_v52, 5 }
  0xf3   : > { %1298 = vrot.lane.b32.xlu1 %v10054_v25, %s11722_s22  ;;  %v11450_v25 = vld [vmem:[%s17468_s2 + $0x80] sm:$0xff]  ;;  %v1477_v49 = vor.u32 %v1476_v36, %v1473_v34  ;;  %v10200_v62 = vld [vmem:[%s11828_s21 + $0x30] sm:$0xf]  ;;  %v10276_v52 = vld [vmem:[%s11828_s21 + $0x18] sm:$0xe] }
  0xf4   : > { %2154 = vrot.lane.b32.xlu0 %v2066_v41, %s11722_s22  ;;  %v1355_v63 = vpop.permute.xlu2 %1354  ;;  %v11386_v21 = vld [vmem:[#allocation2 + $0x100] sm:$0xf0]  ;;  %4169 = vmatpush.bf16.msrb.mxu2 %v11450_v25  ;;  %v2558_v26 = vsel %vm11842_vm2, %v2553_v31, %v2557_v58  ;;  %v12721_v25 = vrot.slane %v1528_v44, 5  ;;  %v2572_v20 = vsel %vm11842_vm2, %v2567_v13, %v2571_v14  ;;  %v2587_v31 = vshll.u32 %v10255_v18, 16  ;;  %v10254_v33 = vld [vmem:[%s11828_s21 + $0x80] sm:$0x1] }
  0xf5   : > { %v850_v54 = vpop.permute.xlu1 %849  ;;  %1420 = vst.msk [vmem:[#allocation2 + $0x25c] sm:$0xf] %vm17478_vm7, %v1355_v63  ;;  %v1478_v53 = vrot.slane %v1477_v49, 4  ;;  %v10058_v49 = vld [vmem:[%s11828_s21 + $0x30] sm:$0xf] }
  0xf6   : > { %934 = vst.msk [vmem:[#allocation2 + $0xf0] sm:$0xf] %vm17478_vm7, %v850_v54  ;;  %v882_v61 = vpop.permute.xlu0 %881  ;;  %v10604_v45 = vld [vmem:[#allocation2 + $0x21c] sm:$0xf0]  ;;  %v10090_v54 = vld [vmem:[%s11828_s21 + $0x24] sm:$0xf] }
  0xf7   : > { %950 = vst.msk [vmem:[#allocation2 + $0x230] sm:$0xf] %vm17478_vm7, %v882_v61  ;;  %v10607_v5 = vor.u32 %v11419_v7, %v10604_v45  ;;  %v1517_v7 = vsel %vm11842_vm2, %v1512_v39, %v1516_v42  ;;  %v1519_v60 = vshrl.u32 %v10090_v54, 16  ;;  %v1522_v59 = vshll.u32 %v10090_v54, 16  ;;  %v11426_v61 = vld [vmem:[#allocation2 + $0x240] sm:$0xf0] }
  0xf8   : > { %1889 = vst.msk [vmem:[#allocation2 + $0x44] sm:$0xf] %vm17480_vm5, %v1517_v7  ;;  %v2081_v45 = vrot.slane %v2079_v46, 4  ;;  %v1483_v63 = vsel %vm11842_vm2, %v1478_v53, %v12614_v28  ;;  %v10188_v28 = vrot.slane %v10156_v6, 9  ;;  %v2584_v42 = vshrl.u32 %v10255_v18, 16 }
  0xf9   : > { %4057 = vmatmul.bf16.gmra.mxu2 %v10603_v3  ;;  %4146 = vmatmul.bf16.gmra.mxu3 %v10607_v5  ;;  %v11424_v3 = vld [vmem:[#allocation2 + $0x234] sm:$0xf]  ;;  %1886 = vst.msk [vmem:[#allocation2 + $0x8] sm:$0xf] %vm17480_vm5, %v1483_v63  ;;  %v1521_v5 = vrot.slane %v1519_v60, 4  ;;  %v1524_v32 = vrot.slane %v1522_v59, 5 }
  0xfa   : > { %2779 = vrot.lane.b32.xlu2 %v2548_v22, %s11722_s22  ;;  %v2073_v17 = vsel %vm12010_vm6, %v10188_v28, %v2072_v48  ;;  %v2083_v30 = vsel %vm12010_vm6, %v2081_v45, %v2082_v47  ;;  %2291 = vst.msk [vmem:[#allocation2 + $0x5c] sm:$0xf] %vm17480_vm5, %v10200_v62  ;;  %v10057_v53 = vld [vmem:[%s11828_s21 + $0x28] sm:$0xf]  ;;  %v1532_v54 = vshrl.u32 %v12695_v56, 16 }
  0xfb   : > { %2160 = vrot.lane.b32.xlu1 %v2076_v11, %s11722_s22  ;;  %v2573_v11 = vshrl.u32 %v12672_v24, 16  ;;  %v1525_v22 = vor.u32 %v1524_v32, %v1521_v5  ;;  %v10201_v24 = vld [vmem:[%s11828_s21 + $0x34] sm:$0xf]  ;;  %v10277_v59 = vld [vmem:[%s11828_s21 + $0x1c] sm:$0xf] }
  0xfc   : > { %v856_v35 = vpop.permute.xlu2 %855  ;;  %2781 = vrot.lane.b32.xlu0 %v2558_v26, %s11722_s22  ;;  %2292 = vst.msk [vmem:[#allocation2 + $0x70] sm:$0xf] %vm17480_vm5, %v10201_v24  ;;  %v2088_v26 = vrot.slane %v2086_v15, 4  ;;  %v2977_v45 = vrot.slane %v10277_v59, 5  ;;  %v10094_v56 = vld [vmem:[%s11828_s21 + $0x34] sm:$0xf] }
  0xfd   : > { %v888_v37 = vpop.permute.xlu1 %887  ;;  %v10462_v38 = vld [vmem:[#allocation2 + $0xf0] sm:$0xf]  ;;  %937 = vst.msk [vmem:[#allocation2 + $0x12c] sm:$0xf] %vm17478_vm7, %v856_v35  ;;  %v1526_v10 = vrot.slane %v1525_v22, 4  ;;  %v2575_v48 = vrot.slane %v2573_v11, 4 }
  0xfe   : > { %953 = vst.msk [vmem:[#allocation2 + $0x26c] sm:$0xf] %vm17478_vm7, %v888_v37  ;;  %v1353_v41 = vpop.permute.xlu0 %1352  ;;  %v10463_v43 = vor.u32 %v11386_v21, %v10462_v38  ;;  %v10622_v9 = vld [vmem:[#allocation2 + $0x230] sm:$0xf]  ;;  %v12730_v21 = vld [vmem:[%s11828_s21 + $0x8c] sm:$0x1] }
  0xff   : > { %1419 = vst.msk [vmem:[#allocation2 + $0x248] sm:$0xf] %vm17478_vm7, %v1353_v41  ;;  %v10623_v19 = vor.u32 %v11426_v61, %v10622_v9  ;;  %v1531_v27 = vsel %vm11842_vm2, %v1526_v10, %v12721_v25  ;;  %v2576_v34 = vor.u32 %v2575_v48, %v2571_v14  ;;  %v2579_v37 = vshll.u32 %v10254_v33, 16  ;;  %v12744_v38 = vld [vmem:[%s11828_s21 + $0x88] sm:$0xf] }
 0x100   : > { %4022 = vmatmul.bf16.gmra.mxu0 %v10463_v43  ;;  %1890 = vst.msk [vmem:[#allocation2 + $0x58] sm:$0xf] %vm17480_vm5, %v1531_v27  ;;  %v2589_v35 = vrot.slane %v2587_v31, 5  ;;  %v2089_v51 = vrot.slane %v12730_v21, 5  ;;  %v2593_v40 = vshll.u32 %v12744_v38, 16  ;;  %v2597_v44 = vshrl.u32 %v12744_v38, 16 }
 0x101   : > { %v2577_v39 = vrot.slane %v2576_v34, 4  ;;  %v2581_v43 = vrot.slane %v2579_v37, 5  ;;  %v10278_v61 = vld [vmem:[%s11828_s21 + $0x20] sm:$0x1]  ;;  %v10095_v5 = vld [vmem:[%s11828_s21 + $0x38] sm:$0x1] }
 0x102   : > { %1300 = vrot.lane.b32.xlu2 %v10055_v50, %s11722_s22  ;;  %v2980_v4 = vrot.slane %v10278_v61, 5  ;;  %v11429_v6 = vld [vmem:[#allocation2 + $0x25c] sm:$0xf]  ;;  %v2979_v11 = vrot.slane %v2977_v45, 4  ;;  %v1552_v28 = vshll.u32 %v10094_v56, 16  ;;  %v12770_v22 = vrot.slane %v2593_v40, 5 }
 0x103   : > { %1302 = vrot.lane.b32.xlu1 %v10056_v8, %s11722_s22  ;;  %v2586_v8 = vrot.slane %v2584_v42, 4  ;;  %v2582_v60 = vsel %vm11842_vm2, %v2577_v39, %v2581_v43  ;;  %v10202_v13 = vld [vmem:[%s11828_s21 + $0x3c] sm:$0xf]  ;;  %v10159_v18 = vld [vmem:[%s11828_s21 + $0x78] sm:$0xe]  ;;  %v2090_v21 = vsel %vm12010_vm6, %v2088_v26, %v2089_v51 }
 0x104   : > { %v2752_v57 = vpop.permute.xlu2 %2751  ;;  %2158 = vrot.lane.b32.xlu0 %v2073_v17, %s11722_s22  ;;  %v11391_v36 = vld [vmem:[#allocation2 + $0x128] sm:$0xf0]  ;;  %2293 = vst.msk [vmem:[#allocation2 + $0x84] sm:$0xf] %vm17480_vm5, %v10202_v13  ;;  %v10198_v10 = vld [vmem:[%s11828_s21 + $0x24] sm:$0xf] }
 0x105   : > { %v854_v12 = vpop.permute.xlu1 %853  ;;  %2847 = vst.msk [vmem:[#allocation2 + $0xc] sm:$0xf] %vm17478_vm7, %v2752_v57  ;;  %v2590_v63 = vor.u32 %v2589_v35, %v2586_v8  ;;  %v11431_v32 = vld [vmem:[#allocation2 + $0x268] sm:$0xf0]  ;;  %v12776_v57 = vrot.slane %v1552_v28, 5 }
 0x106   : > { %936 = vst.msk [vmem:[#allocation2 + $0x118] sm:$0xf] %vm17478_vm7, %v854_v12  ;;  %v886_v29 = vpop.permute.xlu0 %885  ;;  %v10624_v16 = vld [vmem:[#allocation2 + $0x244] sm:$0xf0]  ;;  %v1556_v12 = vshrl.u32 %v10094_v56, 16 }
 0x107   : > { %952 = vst.msk [vmem:[#allocation2 + $0x258] sm:$0xf] %vm17478_vm7, %v886_v29  ;;  %v10627_v2 = vor.u32 %v11424_v3, %v10624_v16  ;;  %v10324_v3 = vrot.slane %v10276_v52, 9  ;;  %v1562_v29 = vshll.u32 %v10095_v5, 16  ;;  %v2981_v16 = vsel %vm12010_vm6, %v2979_v11, %v2980_v4  ;;  %v10258_v34 = vld [vmem:[%s11828_s21 + $0x90] sm:$0xf] }
 0x108   : > { %v1558_v17 = vrot.slane %v1556_v12, 4  ;;  %3120 = vst.msk [vmem:[#allocation2 + $0x24] sm:$0xf] %vm17480_vm5, %v2981_v16  ;;  %v2608_v38 = vshrl.u32 %v10258_v34, 16  ;;  %v2611_v39 = vshll.u32 %v10258_v34, 16 }
 0x109   : > { %4062 = vmatmul.bf16.gmra.mxu2 %v10623_v19  ;;  %4151 = vmatmul.bf16.gmra.mxu3 %v10627_v2  ;;  %v2978_v9 = vsel %vm12010_vm6, %v10324_v3, %v2977_v45  ;;  %v2591_v2 = vrot.slane %v2590_v63, 4  ;;  %v1564_v31 = vrot.slane %v1562_v29, 5  ;;  %2289 = vst.msk [vmem:[#allocation2 + $0x34] sm:$0xf] %vm17480_vm5, %v10198_v10  ;;  %v12805_v43 = vld [vmem:[%s11828_s21 + $0x94] sm:$0xf] }
 0x10a   : > { %2783 = vrot.lane.b32.xlu2 %v2572_v20, %s11722_s22  ;;  %3119 = vst.msk [vmem:[#allocation2 + $0x10] sm:$0xf] %vm17480_vm5, %v2978_v9  ;;  %v1559_v42 = vor.u32 %v1558_v17, %v12776_v57  ;;  %v12814_v52 = vld [vmem:[%s11828_s21 + $0x98] sm:$0x1]  ;;  %v10257_v4 = vld [vmem:[%s11828_s21 + $0x8c] sm:$0x1] }
 0x10b   : > { %2164 = vrot.lane.b32.xlu1 %v2083_v30, %s11722_s22  ;;  %v10189_v30 = vrot.slane %v10159_v18, 9  ;;  %v2596_v0 = vsel %vm11842_vm2, %v2591_v2, %v12770_v22  ;;  %v10060_v5 = vld [vmem:[%s11828_s21 + $0x3c] sm:$0xf]  ;;  %v2617_v28 = vshll.u32 %v12805_v43, 16  ;;  %v2603_v29 = vshll.u32 %v10257_v4, 16 }
 0x10c   : > { %v2133_v50 = vpop.permute.xlu2 %2132  ;;  %2785 = vrot.lane.b32.xlu0 %v2582_v60, %s11722_s22  ;;  %v1560_v37 = vrot.slane %v1559_v42, 4  ;;  %v10098_v60 = vld [vmem:[%s11828_s21 + $0x44] sm:$0x1]  ;;  %v2096_v18 = vrot.slane %v12814_v52, 5  ;;  %v2621_v2 = vshrl.u32 %v12805_v43, 16 }
 0x10d   : > { %v2129_v58 = vpop.permute.xlu1 %2128  ;;  %v10482_v41 = vld [vmem:[#allocation2 + $0x118] sm:$0xf]  ;;  %2225 = vst.msk [vmem:[#allocation2 + $0x44] sm:$0xf] %vm17478_vm7, %v2133_v50  ;;  %v2080_v33 = vsel %vm12010_vm6, %v10189_v30, %v2079_v46  ;;  %v12798_v46 = vld [vmem:[%s11828_s21 + $0x94] sm:$0xf] }
 0x10e   : > { %2223 = vst.msk [vmem:[#allocation2 + $0x1c] sm:$0xf] %vm17478_vm7, %v2129_v58  ;;  %v1357_v47 = vpop.permute.xlu0 %1356  ;;  %v10483_v7 = vor.u32 %v11391_v36, %v10482_v41  ;;  %v10642_v14 = vld [vmem:[#allocation2 + $0x258] sm:$0xf]  ;;  %v2599_v36 = vrot.slane %v2597_v44, 4  ;;  %v1534_v58 = vrot.slane %v1532_v54, 4  ;;  %v1565_v35 = vsel %vm11842_vm2, %v1560_v37, %v1564_v31 }
 0x10f   : > { %1421 = vst.msk [vmem:[#allocation2 + $0x270] sm:$0xf] %vm17478_vm7, %v1357_v47  ;;  %v10643_v62 = vor.u32 %v11431_v32, %v10642_v14  ;;  %v10096_v41 = vld [vmem:[%s11828_s21 + $0x3c] sm:$0xf]  ;;  %v2610_v47 = vrot.slane %v2608_v38, 4  ;;  %v1586_v11 = vshll.u32 %v10098_v60, 16 }
 0x110   : > { %4027 = vmatmul.bf16.gmra.mxu0 %v10483_v7  ;;  %1893 = vst.msk [vmem:[#allocation2 + $0x94] sm:$0xf] %vm17480_vm5, %v1565_v35  ;;  %v10097_v7 = vld [vmem:[%s11828_s21 + $0x40] sm:$0xf]  ;;  %v1567_v26 = vshrl.u32 %v10096_v41, 16  ;;  %v1570_v51 = vshll.u32 %v10096_v41, 16  ;;  %v2600_v59 = vor.u32 %v2599_v36, %v12770_v22  ;;  %v1535_v61 = vor.u32 %v1534_v58, %v12721_v25 }
 0x111   : > { %v10358_v8 = vld [vmem:[#allocation2 + $0x10] sm:$0xf]  ;;  %v1576_v54 = vshll.u32 %v10097_v7, 16  ;;  %v1580_v40 = vshrl.u32 %v10097_v7, 16  ;;  %v10092_v14 = vld [vmem:[%s11828_s21 + $0x2c] sm:$0x1] }
 0x112   : > { %1304 = vrot.lane.b32.xlu2 %v10057_v53, %s11722_s22  ;;  %v11358_v53 = vld [vmem:[#allocation2 + $0x20] sm:$0xf0]  ;;  %v1569_v63 = vrot.slane %v1567_v26, 4  ;;  %v1572_v44 = vrot.slane %v1570_v51, 5  ;;  %v2601_v22 = vrot.slane %v2600_v59, 4  ;;  %v1536_v16 = vrot.slane %v1535_v61, 4 }
 0x113   : > { %1306 = vrot.lane.b32.xlu1 %v10058_v49, %s11722_s22  ;;  %v2613_v49 = vrot.slane %v2611_v39, 5  ;;  %v10359_v45 = vor.u32 %v11358_v53, %v10358_v8  ;;  %v1578_v9 = vrot.slane %v1576_v54, 5  ;;  %v1582_v13 = vrot.slane %v1580_v40, 4  ;;  %v10279_v58 = vld [vmem:[%s11828_s21 + $0x24] sm:$0xe] }
 0x114   : > { %v2135_v27 = vpop.permute.xlu2 %2134  ;;  %2162 = vrot.lane.b32.xlu0 %v2080_v33, %s11722_s22  ;;  %v12808_v50 = vpop.f32.mrf.mxu0  ;;  %v1573_v12 = vor.u32 %v1572_v44, %v1569_v63  ;;  %v1538_v17 = vshll.u32 %v10092_v14, 16  ;;  %v2605_v42 = vrot.slane %v2603_v29, 5  ;;  %v12837_v34 = vrot.slane %v2617_v28, 5  ;;  %v10281_v52 = vld [vmem:[%s11828_s21 + $0x2c] sm:$0x1] }
 0x115   : > { %v2131_v19 = vpop.permute.xlu1 %2130  ;;  %2226 = vst.msk [vmem:[#allocation2 + $0x58] sm:$0xf] %vm17478_vm7, %v2135_v27  ;;  %v2614_v25 = vor.u32 %v2613_v49, %v2610_v47  ;;  %v1583_v30 = vor.u32 %v1582_v13, %v1578_v9  ;;  %v1588_v27 = vrot.slane %v1586_v11, 5  ;;  %v10325_v43 = vrot.slane %v10279_v58, 9  ;;  %v12862_v40 = vld [vmem:[%s11828_s21 + $0xa4] sm:$0x1] }
 0x116   : > { %2224 = vst.msk [vmem:[#allocation2 + $0x30] sm:$0xf] %vm17478_vm7, %v2131_v19  ;;  %v2127_v48 = vpop.permute.xlu0 %2126  ;;  %v10644_v20 = vld [vmem:[#allocation2 + $0x26c] sm:$0xf0]  ;;  %v10059_v19 = vld [vmem:[%s11828_s21 + $0x34] sm:$0xf]  ;;  %v2606_v38 = vsel %vm11842_vm2, %v2601_v22, %v2605_v42 }
 0x117   : > { %2222 = vst.msk [vmem:[#allocation2 + $0x8] sm:$0xf] %vm17478_vm7, %v2127_v48  ;;  %v10647_v24 = vor.u32 %v11429_v6, %v10644_v20  ;;  %v2093_v6 = vrot.slane %v12798_v46, 5  ;;  %v1574_v10 = vrot.slane %v1573_v12, 4  ;;  %v11357_v48 = vld [vmem:[#allocation2 + $0x18] sm:$0xf0] }
 0x118   : > { %v11355_v20 = vld [vmem:[#allocation2 + $0xc] sm:$0xf]  ;;  %v1540_v31 = vrot.slane %v1538_v17, 5  ;;  %v2615_v33 = vrot.slane %v2614_v25, 4  ;;  %v1584_v37 = vrot.slane %v1583_v30, 4  ;;  %v12854_v47 = vrot.slane %v2621_v2, 4 }
 0x119   : > { %4067 = vmatmul.bf16.gmra.mxu2 %v10643_v62  ;;  %4156 = vmatmul.bf16.gmra.mxu3 %v10647_v24  ;;  %v12834_v62 = vld [vmem:[%s11828_s21 + $0xa0] sm:$0xf]  ;;  %v1579_v36 = vsel %vm11842_vm2, %v1574_v10, %v1578_v9  ;;  %v2987_v59 = vrot.slane %v10281_v52, 5  ;;  %v10205_v61 = vld [vmem:[%s11828_s21 + $0x4c] sm:$0xf]  ;;  %v2103_v17 = vrot.slane %v12862_v40, 5 }
 0x11a   : > { %2787 = vrot.lane.b32.xlu2 %v2596_v0, %s11722_s22  ;;  %1894 = vst.msk [vmem:[#allocation2 + $0xa8] sm:$0xf] %vm17480_vm5, %v1579_v36  ;;  %v1541_v39 = vsel %vm11842_vm2, %v1536_v16, %v1540_v31  ;;  %v10280_v0 = vld [vmem:[%s11828_s21 + $0x28] sm:$0xf]  ;;  %v2100_v35 = vrot.slane %v12834_v62, 5  ;;  %v1589_v51 = vsel %vm11842_vm2, %v1584_v37, %v1588_v27  ;;  %v2624_v28 = vor.u32 %v12854_v47, %v12837_v34 }
 0x11b   : > { %2168 = vrot.lane.b32.xlu1 %v2090_v21, %s11722_s22  ;;  %v2095_v21 = vrot.slane %v2093_v6, 4  ;;  %1891 = vst.msk [vmem:[#allocation2 + $0x6c] sm:$0xf] %vm17480_vm5, %v1541_v39  ;;  %v2984_v60 = vrot.slane %v10280_v0, 5  ;;  %v10099_v63 = vld [vmem:[%s11828_s21 + $0x48] sm:$0xf] }
 0x11c   : > { %v2762_v32 = vpop.permute.xlu2 %2761  ;;  %v12849_v8 = vpop.f32.mrf.mxu0  ;;  %2789 = vrot.lane.b32.xlu0 %v2606_v38, %s11722_s22  ;;  %v12873_v44 = vld [vmem:[%s11828_s21 + $0x4c] sm:$0xf]  ;;  %1895 = vst.msk [vmem:[#allocation2 + $0xbc] sm:$0xf] %vm17480_vm5, %v1589_v51  ;;  %v10162_v25 = vld [vmem:[%s11828_s21 + $0x84] sm:$0xe] }
 0x11d   : > { %v2758_v3 = vpop.permute.xlu1 %2757  ;;  %2852 = vst.msk [vmem:[#allocation2 + $0x70] sm:$0xf] %vm17478_vm7, %v2762_v32  ;;  %v2985_v4 = vsel %vm12010_vm6, %v10325_v43, %v2984_v60  ;;  %v1594_v32 = vshll.u32 %v10099_v63, 16  ;;  %v1600_v11 = vshll.u32 %v12873_v44, 16  ;;  %v10190_v22 = vrot.slane %v10162_v25, 9 }
 0x11e   : > { %2850 = vst.msk [vmem:[#allocation2 + $0x48] sm:$0xf] %vm17478_vm7, %v2758_v3  ;;  %v2754_v56 = vpop.permute.xlu0 %2753  ;;  %v10350_v24 = vld [vmem:[#allocation2 + $0x8] sm:$0xf]  ;;  %v2097_v3 = vsel %vm12010_vm6, %v2095_v21, %v2096_v18  ;;  %v12890_v16 = vrot.slane %v2100_v35, 4  ;;  %v2625_v39 = vrot.slane %v2624_v28, 4 }
 0x11f   : > { %2848 = vst.msk [vmem:[#allocation2 + $0x20] sm:$0xf] %vm17478_vm7, %v2754_v56  ;;  %v10351_v53 = vor.u32 %v11357_v48, %v10350_v24  ;;  %v2986_v56 = vrot.slane %v2984_v60, 4  ;;  %v1596_v14 = vrot.slane %v1594_v32, 5  ;;  %v12898_v30 = vrot.slane %v1600_v11, 5 }
 0x120   : > { %10804 = vmatmul.msk.bf16.vlgmr.msrb.gmra.mxu0 %vm17477_vm8, %v10359_v45  ;;  %v2620_v45 = vsel %vm11842_vm2, %v2615_v33, %v12837_v34  ;;  %3121 = vst.msk [vmem:[#allocation2 + $0x38] sm:$0xf] %vm17480_vm5, %v2985_v4  ;;  %v2087_v48 = vsel %vm12010_vm6, %v10190_v22, %v2086_v15  ;;  %v10262_v21 = vld [vmem:[%s11828_s21 + $0xa0] sm:$0xf]  ;;  %v10062_v27 = vld [vmem:[%s11828_s21 + $0x48] sm:$0xf] }
 0x121   : > { %v2988_v12 = vsel %vm12010_vm6, %v2986_v56, %v2987_v59  ;;  %2296 = vst.msk [vmem:[#allocation2 + $0xc0] sm:$0xf] %vm17480_vm5, %v10205_v61  ;;  %v10206_v34 = vld [vmem:[%s11828_s21 + $0x54] sm:$0xf]  ;;  %v10061_v1 = vld [vmem:[%s11828_s21 + $0x40] sm:$0xf] }
 0x122   : > { %1308 = vrot.lane.b32.xlu2 %v10059_v19, %s11722_s22  ;;  %3122 = vst.msk [vmem:[#allocation2 + $0x4c] sm:$0xf] %vm17480_vm5, %v2988_v12  ;;  %v2641_v37 = vshll.u32 %v10262_v21, 16  ;;  %v2645_v38 = vshrl.u32 %v10262_v21, 16  ;;  %v10260_v51 = vld [vmem:[%s11828_s21 + $0x98] sm:$0x1] }
 0x123   : > { %1310 = vrot.lane.b32.xlu1 %v10060_v5, %s11722_s22  ;;  %v1591_v5 = vshrl.u32 %v10099_v63, 16  ;;  %v4122_v9 = vpop.f32.mrf.mxu3  ;;  %2297 = vst.msk [vmem:[#allocation2 + $0xd4] sm:$0xf] %vm17480_vm5, %v10206_v34  ;;  %v10370_v61 = vld [vmem:[#allocation2 + $0x30] sm:$0xf]  ;;  %v2627_v56 = vshll.u32 %v10260_v51, 16 }
 0x124   : > { %v2764_v7 = vpop.permute.xlu2 %2763  ;;  %2166 = vrot.lane.b32.xlu0 %v2087_v48, %s11722_s22  ;;  %v12924_v4 = vrot.slane %v2641_v37, 5  ;;  %v12931_v12 = vld [vmem:[%s11828_s21 + $0xac] sm:$0xf]  ;;  %v955_v46 = vld [vmem:[%s11828_s21 + $0x4] sm:$0xf] }
 0x125   : > { %v2760_v41 = vpop.permute.xlu1 %2759  ;;  %2853 = vst.msk [vmem:[#allocation2 + $0x84] sm:$0xf] %vm17478_vm7, %v2764_v7  ;;  %v1593_v13 = vrot.slane %v1591_v5, 4  ;;  %v10372_v36 = vld [vmem:[#allocation2 + $0x44] sm:$0xf0]  ;;  %v2629_v22 = vrot.slane %v2627_v56, 5 }
 0x126   : > { %2851 = vst.msk [vmem:[#allocation2 + $0x5c] sm:$0xf] %vm17478_vm7, %v2760_v41  ;;  %v10352_v49 = vld [vmem:[#allocation2 + $0x1c] sm:$0xf0]  ;;  %v2756_v26 = vpop.permute.xlu0 %2755  ;;  %v2107_v21 = vrot.slane %v12931_v12, 5 }
 0x127   : > { %v10355_v54 = vor.u32 %v11355_v20, %v10352_v49  ;;  %2849 = vst.msk [vmem:[#allocation2 + $0x34] sm:$0xf] %vm17478_vm7, %v2756_v26  ;;  %v1597_v10 = vor.u32 %v1596_v14, %v1593_v13  ;;  %v10261_v20 = vld [vmem:[%s11828_s21 + $0x9c] sm:$0xf]  ;;  %v10378_v43 = vld [vmem:[#allocation2 + $0x38] sm:$0xf]  ;;  %v2630_v48 = vsel %vm11842_vm2, %v2625_v39, %v2629_v22 }
 0x128   : > { %v2632_v24 = vshrl.u32 %v10261_v20, 16  ;;  %v2635_v33 = vshll.u32 %v10261_v20, 16  ;;  %v10207_v49 = vld [vmem:[%s11828_s21 + $0x58] sm:$0xf]  ;;  %v10093_v26 = vld [vmem:[%s11828_s21 + $0x30] sm:$0xf] }
 0x129   : > { %4170 = vmatmul.bf16.vlgmr.msrb.gmra.mxu2 %v10351_v53  ;;  %4259 = vmatmul.bf16.vlgmr.msrb.gmra.mxu3 %v10355_v54  ;;  %v1598_v15 = vrot.slane %v1597_v10, 4  ;;  %v11363_v52 = vld [vmem:[#allocation2 + $0x48] sm:$0xf0]  ;;  %2298 = vst.msk [vmem:[#allocation2 + $0xe8] sm:$0xf] %vm17480_vm5, %v10207_v49  ;;  %v1543_v53 = vshrl.u32 %v10093_v26, 16  ;;  %v2104_v10 = vsel %vm12010_vm6, %v12890_v16, %v2103_v17 }
 0x12a   : > { %2791 = vrot.lane.b32.xlu2 %v2620_v45, %s11722_s22  ;;  %v2634_v0 = vrot.slane %v2632_v24, 4  ;;  %v2637_v41 = vrot.slane %v2635_v33, 5  ;;  %v1546_v54 = vshll.u32 %v10093_v26, 16  ;;  %v10379_v63 = vor.u32 %v11363_v52, %v10378_v43  ;;  %v12944_v20 = vld [vmem:[%s11828_s21 + $0xb0] sm:$0x1] }
 0x12b   : > { %2172 = vrot.lane.b32.xlu1 %v2097_v3, %s11722_s22  ;;  %v1603_v47 = vsel %vm11842_vm2, %v1598_v15, %v12898_v30  ;;  %v4124_v60 = vpop.f32.mrf.mxu3  ;;  %v11362_v3 = vld [vmem:[#allocation2 + $0x40] sm:$0xf0]  ;;  %v1545_v25 = vrot.slane %v1543_v53, 4  ;;  %v10283_v16 = vld [vmem:[%s11828_s21 + $0x34] sm:$0xf]  ;;  %v12967_v43 = vrot.slane %v2107_v21, 4 }
 0x12c   : > { %v4033_v29 = vpop.f32.mrf.mxu2  ;;  %v2145_v42 = vpop.permute.xlu2 %2144  ;;  %1896 = vst.msk [vmem:[#allocation2 + $0xd0] sm:$0xf] %vm17480_vm5, %v1603_v47  ;;  %v2638_v7 = vor.u32 %v2637_v41, %v2634_v0  ;;  %v1548_v28 = vrot.slane %v1546_v54, 5  ;;  %v10284_v17 = vld [vmem:[%s11828_s21 + $0x38] sm:$0x1]  ;;  %2793 = vrot.lane.b32.xlu0 %v2630_v48, %s11722_s22  ;;  %v2991_v33 = vrot.slane %v10283_v16, 5 }
 0x12d   : > { %v12894_v18 = vadd.f32 %v4122_v9, %v4033_v29  ;;  %v2141_v19 = vpop.permute.xlu1 %2140  ;;  %v12896_v2 = vpop.f32.mrf.mxu0  ;;  %2231 = vst.msk [vmem:[#allocation2 + $0xbc] sm:$0xf] %vm17478_vm7, %v2145_v42  ;;  %v10371_v29 = vor.u32 %v11362_v3, %v10370_v61  ;;  %v12948_v42 = vrot.slane %v2645_v38, 4  ;;  %v2994_v34 = vrot.slane %v10284_v17, 5  ;;  %v10208_v54 = vld [vmem:[%s11828_s21 + $0x60] sm:$0xf] }
 0x12e   : > { %2229 = vst.msk [vmem:[#allocation2 + $0x94] sm:$0xf] %vm17478_vm7, %v2141_v19  ;;  %v2137_v31 = vpop.permute.xlu0 %2136  ;;  %v11360_v58 = vld [vmem:[#allocation2 + $0x34] sm:$0xf]  ;;  %v2639_v11 = vrot.slane %v2638_v7, 4  ;;  %v1549_v19 = vor.u32 %v1548_v28, %v1545_v25  ;;  %v1604_v41 = vshrl.u32 %v12873_v44, 16 }
 0x12f   : > { %2227 = vst.msk [vmem:[#allocation2 + $0x6c] sm:$0xf] %vm17478_vm7, %v2137_v31  ;;  %v10375_v45 = vor.u32 %v11360_v58, %v10372_v36  ;;  %v10103_v36 = vld [vmem:[%s11828_s21 + $0x58] sm:$0xf]  ;;  %v2993_v47 = vrot.slane %v2991_v33, 4  ;;  %v2648_v28 = vor.u32 %v12948_v42, %v12924_v4 }
 0x130   : > { %10805 = vmatmul.msk.bf16.gmra.mxu0 %vm17477_vm8, %v10379_v63  ;;  %v2644_v40 = vsel %vm11842_vm2, %v2639_v11, %v12924_v4  ;;  %v1550_v31 = vrot.slane %v1549_v19, 4  ;;  %v1624_v37 = vshll.u32 %v10103_v36, 16  ;;  %v1628_v38 = vshrl.u32 %v10103_v36, 16  ;;  %v10203_v3 = vld [vmem:[%s11828_s21 + $0x40] sm:$0xf] }
 0x131   : > { %v2995_v61 = vsel %vm12010_vm6, %v2993_v47, %v2994_v34  ;;  %v10165_v63 = vld [vmem:[%s11828_s21 + $0x90] sm:$0xe]  ;;  %v10264_v25 = vld [vmem:[%s11828_s21 + $0xa8] sm:$0xf]  ;;  %v10265_v22 = vld [vmem:[%s11828_s21 + $0xac] sm:$0xf] }
 0x132   : > { %1312 = vrot.lane.b32.xlu2 %v10061_v1, %s11722_s22  ;;  %v10104_v1 = vld [vmem:[%s11828_s21 + $0x5c] sm:$0x1]  ;;  %v1555_v15 = vsel %vm11842_vm2, %v1550_v31, %v12776_v57  ;;  %v2110_v57 = vrot.slane %v12944_v20, 5  ;;  %v12977_v52 = vrot.slane %v1624_v37, 5  ;;  %v1630_v53 = vrot.slane %v1628_v38, 4 }
 0x133   : > { %1314 = vrot.lane.b32.xlu1 %v10062_v27, %s11722_s22  ;;  %v10282_v27 = vld [vmem:[%s11828_s21 + $0x30] sm:$0xe]  ;;  %v1634_v39 = vshll.u32 %v10104_v1, 16  ;;  %1892 = vst.msk [vmem:[#allocation2 + $0x80] sm:$0xf] %vm17480_vm5, %v1555_v15  ;;  %v10191_v11 = vrot.slane %v10165_v63, 9 }
 0x134   : > { %v4035_v59 = vpop.f32.mrf.mxu2  ;;  %v2147_v13 = vpop.permute.xlu2 %2146  ;;  %v10326_v24 = vrot.slane %v10282_v27, 9  ;;  %v1631_v56 = vor.u32 %v1630_v53, %v12977_v52  ;;  %v2659_v19 = vshll.u32 %v10264_v25, 16  ;;  %3124 = vst.msk [vmem:[#allocation2 + $0x74] sm:$0xf] %vm17480_vm5, %v2995_v61  ;;  %v10390_v4 = vld [vmem:[#allocation2 + $0x58] sm:$0xf] }
 0x135   : > { %v12926_v5 = vadd.f32 %v4124_v60, %v4035_v59  ;;  %v2143_v32 = vpop.permute.xlu1 %2142  ;;  %v12928_v9 = vpop.f32.mrf.mxu0  ;;  %2232 = vst.msk [vmem:[#allocation2 + $0xd0] sm:$0xf] %vm17478_vm7, %v2147_v13  ;;  %v10064_v60 = vld [vmem:[%s11828_s21 + $0x54] sm:$0xf]  ;;  %v11365_v13 = vld [vmem:[#allocation2 + $0x5c] sm:$0xf]  ;;  %v2094_v27 = vsel %vm12010_vm6, %v10191_v11, %v2093_v6 }
 0x136   : > { %2230 = vst.msk [vmem:[#allocation2 + $0xa8] sm:$0xf] %vm17478_vm7, %v2143_v32  ;;  %v2139_v14 = vpop.permute.xlu0 %2138  ;;  %v2992_v51 = vsel %vm12010_vm6, %v10326_v24, %v2991_v33  ;;  %v1636_v32 = vrot.slane %v1634_v39, 5  ;;  %v1632_v48 = vrot.slane %v1631_v56, 4  ;;  %v11367_v42 = vld [vmem:[#allocation2 + $0x68] sm:$0xf0]  ;;  %2170 = vrot.lane.b32.xlu0 %v2094_v27, %s11722_s22 }
 0x137   : > { %17504 = vst [vmem:[#allocation8_spill] sm:$0xff] %v12926_v5  ;;  %v2661_v16 = vrot.slane %v2659_v19, 5  ;;  %v954_v17 = vld [vmem:[%s11828_s21] sm:$0xe]  ;;  %v2649_v33 = vrot.slane %v2648_v28, 4  ;;  %v2669_v15 = vshrl.u32 %v10265_v22, 16  ;;  %v10391_v56 = vor.u32 %v11367_v42, %v10390_v4 }
 0x138   : > { %2228 = vst.msk [vmem:[#allocation2 + $0x80] sm:$0xf] %vm17478_vm7, %v2139_v14  ;;  %v10392_v14 = vld [vmem:[#allocation2 + $0x6c] sm:$0xf0]  ;;  %v1637_v24 = vsel %vm11842_vm2, %v1632_v48, %v1636_v32  ;;  %v10036_v6 = vrot.slane %v954_v17, 9  ;;  %v1055_v37 = vrot.slane %v955_v46, 5  ;;  %v2111_v32 = vsel %vm12010_vm6, %v12967_v43, %v2110_v57 }
 0x139   : > { %4175 = vmatmul.bf16.gmra.mxu2 %v10371_v29  ;;  %4264 = vmatmul.bf16.gmra.mxu3 %v10375_v45  ;;  %3123 = vst.msk [vmem:[#allocation2 + $0x60] sm:$0xf] %vm17480_vm5, %v2992_v51  ;;  %v2656_v29 = vshrl.u32 %v10264_v25, 16  ;;  %v956_v38 = vld [vmem:[%s11828_s21 + $0x8] sm:$0x1] }
 0x13a   : > { %2795 = vrot.lane.b32.xlu2 %v2644_v40, %s11722_s22  ;;  %v2665_v40 = vshll.u32 %v10265_v22, 16  ;;  %2299 = vst.msk [vmem:[#allocation2 + $0xfc] sm:$0xf] %vm17480_vm5, %v10208_v54  ;;  %v1058_v51 = vrot.slane %v956_v38, 5  ;;  %v10263_v53 = vld [vmem:[%s11828_s21 + $0xa4] sm:$0x1] }
 0x13b   : > { %2176 = vrot.lane.b32.xlu1 %v2104_v10, %s11722_s22  ;;  %v10063_v10 = vld [vmem:[%s11828_s21 + $0x4c] sm:$0xf]  ;;  %v2658_v31 = vrot.slane %v2656_v29, 4  ;;  %2294 = vst.msk [vmem:[#allocation2 + $0x98] sm:$0xf] %vm17480_vm5, %v10203_v3  ;;  %v1057_v61 = vrot.slane %v1055_v37, 4 }
 0x13c   : > { %v4038_v58 = vpop.f32.mrf.mxu2  ;;  %v4127_v0 = vpop.f32.mrf.mxu3  ;;  %1899 = vst.msk [vmem:[#allocation2 + $0x10c] sm:$0xf] %vm17480_vm5, %v1637_v24  ;;  %v2651_v3 = vshll.u32 %v10263_v53, 16  ;;  %v11368_v11 = vld [vmem:[#allocation2 + $0x70] sm:$0xf0]  ;;  %v1606_v29 = vrot.slane %v1604_v41, 4 }
 0x13d   : > { %v12970_v49 = vadd.f32 %v4127_v0, %v4038_v58  ;;  %v2770_v7 = vpop.permute.xlu1 %2769  ;;  %v12973_v26 = vpop.f32.mrf.mxu0  ;;  %v2662_v1 = vor.u32 %v2661_v16, %v2658_v31  ;;  %v10395_v0 = vor.u32 %v11365_v13, %v10392_v14  ;;  %v1059_v25 = vsel %vm12010_vm6, %v1057_v61, %v1058_v51  ;;  %v10285_v57 = vld [vmem:[%s11828_s21 + $0x3c] sm:$0xe]  ;;  %v10286_v22 = vld [vmem:[%s11828_s21 + $0x40] sm:$0xf]  ;;  %v10287_v19 = vld [vmem:[%s11828_s21 + $0x44] sm:$0x1] }
 0x13e   : > { %2856 = vst.msk [vmem:[#allocation2 + $0xc0] sm:$0xf] %vm17478_vm7, %v2770_v7  ;;  %v2774_v59 = vpop.permute.xlu2 %2773  ;;  %v2766_v45 = vpop.permute.xlu0 %2765  ;;  %v13015_v7 = vrot.slane %v2665_v40, 5  ;;  %v2653_v28 = vrot.slane %v2651_v3, 5  ;;  %v2671_v13 = vrot.slane %v2669_v15, 4  ;;  %v2998_v48 = vrot.slane %v10286_v22, 5 }
 0x13f   : > { %2858 = vst.msk [vmem:[#allocation2 + $0xe8] sm:$0xf] %vm17478_vm7, %v2774_v59  ;;  %v1056_v59 = vsel %vm12010_vm6, %v10036_v6, %v1055_v37  ;;  %v10106_v27 = vld [vmem:[%s11828_s21 + $0x64] sm:$0xf]  ;;  %v3001_v42 = vrot.slane %v10287_v19, 5 }
 0x140   : > { %2854 = vst.msk [vmem:[#allocation2 + $0x98] sm:$0xf] %vm17478_vm7, %v2766_v45  ;;  %v10398_v45 = vld [vmem:[#allocation2 + $0x60] sm:$0xf]  ;;  %v2654_v43 = vsel %vm11842_vm2, %v2649_v33, %v2653_v28  ;;  %v10107_v44 = vld [vmem:[%s11828_s21 + $0x68] sm:$0x1]  ;;  %v2672_v31 = vor.u32 %v2671_v13, %v13015_v7 }
 0x141   : > { %1197 = vst.msk [vmem:[#allocation2 + $0x4] sm:$0xf] %vm17480_vm5, %v1056_v59  ;;  %v10399_v14 = vor.u32 %v11368_v11, %v10398_v45  ;;  %2797 = vrot.lane.b32.xlu0 %v2654_v43, %s11722_s22  ;;  %v1648_v41 = vshll.u32 %v10106_v27, 16  ;;  %v3000_v6 = vrot.slane %v2998_v48, 4  ;;  %v10210_v33 = vld [vmem:[%s11828_s21 + $0x6c] sm:$0xf] }
 0x142   : > { %1316 = vrot.lane.b32.xlu2 %v10063_v10, %s11722_s22  ;;  %1198 = vst.msk [vmem:[#allocation2 + $0x18] sm:$0xf] %vm17480_vm5, %v1059_v25  ;;  %v10327_v10 = vrot.slane %v10285_v57, 9  ;;  %v1652_v15 = vshrl.u32 %v10106_v27, 16  ;;  %v1658_v37 = vshll.u32 %v10107_v44, 16  ;;  %v13072_v45 = vrot.slane %v2672_v31, 4 }
 0x143   : > { %1318 = vrot.lane.b32.xlu1 %v10064_v60, %s11722_s22  ;;  %v2663_v60 = vrot.slane %v2662_v1, 4  ;;  %10806 = vmatmul.msk.bf16.gmra.mxu0 %vm17477_vm8, %v10399_v14  ;;  %v13059_v1 = vrot.slane %v1648_v41, 5  ;;  %v10204_v38 = vld [vmem:[%s11828_s21 + $0x48] sm:$0xf]  ;;  %v10168_v51 = vld [vmem:[%s11828_s21 + $0x9c] sm:$0xe] }
 0x144   : > { %v4040_v34 = vpop.f32.mrf.mxu2  ;;  %v4129_v36 = vpop.f32.mrf.mxu3  ;;  %v2999_v46 = vsel %vm12010_vm6, %v10327_v10, %v2998_v48  ;;  %v10267_v53 = vld [vmem:[%s11828_s21 + $0xb4] sm:$0xf]  ;;  %v1654_v61 = vrot.slane %v1652_v15, 4  ;;  %v10192_v3 = vrot.slane %v10168_v51, 9  ;;  %v13076_v11 = vld [vmem:[%s11828_s21 + $0xb8] sm:$0xf] }
 0x145   : > { %v13010_v39 = vadd.f32 %v4129_v36, %v4040_v34  ;;  %v2772_v58 = vpop.permute.xlu1 %2771  ;;  %v13013_v47 = vpop.f32.mrf.mxu0  ;;  %v2668_v20 = vsel %vm11842_vm2, %v2663_v60, %v13015_v7  ;;  %v10066_v34 = vld [vmem:[%s11828_s21 + $0x60] sm:$0xf]  ;;  %v3002_v7 = vsel %vm12010_vm6, %v3000_v6, %v3001_v42  ;;  %v11370_v60 = vld [vmem:[#allocation2 + $0x84] sm:$0xf]  ;;  %3125 = vst.msk [vmem:[#allocation2 + $0x88] sm:$0xf] %vm17480_vm5, %v2999_v46 }
 0x146   : > { %2857 = vst.msk [vmem:[#allocation2 + $0xd4] sm:$0xf] %vm17478_vm7, %v2772_v58  ;;  %v2776_v54 = vpop.permute.xlu2 %2775  ;;  %v13021_v63 = vpop.permute.xlu0 %2767  ;;  %v2683_v25 = vshll.u32 %v10267_v53, 16  ;;  %v10410_v28 = vld [vmem:[#allocation2 + $0x80] sm:$0xf]  ;;  %v2101_v14 = vsel %vm12010_vm6, %v10192_v3, %v2100_v35  ;;  %v2689_v43 = vshll.u32 %v13076_v11, 16 }
 0x147   : > { %17505 = vst [vmem:[#allocation9_spill] sm:$0xff] %v13010_v39  ;;  %v10412_v59 = vld [vmem:[#allocation2 + $0x94] sm:$0xf0]  ;;  %v11372_v13 = vld [vmem:[#allocation2 + $0x90] sm:$0xf0] }
 0x148   : > { %2859 = vst.msk [vmem:[#allocation2 + $0xfc] sm:$0xf] %vm17478_vm7, %v2776_v54  ;;  %v1607_v54 = vor.u32 %v1606_v29, %v12898_v30  ;;  %v1655_v30 = vor.u32 %v1654_v61, %v13059_v1  ;;  %v957_v57 = vld [vmem:[%s11828_s21 + $0xc] sm:$0xe]  ;;  %v2685_v22 = vrot.slane %v2683_v25, 5  ;;  %v13093_v35 = vrot.slane %v2689_v43, 5 }
 0x149   : > { %4180 = vmatmul.bf16.gmra.mxu2 %v10391_v56  ;;  %4269 = vmatmul.bf16.gmra.mxu3 %v10395_v0  ;;  %v10065_v0 = vld [vmem:[%s11828_s21 + $0x58] sm:$0xf]  ;;  %v2680_v56 = vshrl.u32 %v10267_v53, 16  ;;  %3126 = vst.msk [vmem:[#allocation2 + $0x9c] sm:$0xf] %vm17480_vm5, %v3002_v7  ;;  %v10037_v27 = vrot.slane %v957_v57, 9  ;;  %v10415_v44 = vor.u32 %v11370_v60, %v10412_v59 }
 0x14a   : > { %2799 = vrot.lane.b32.xlu2 %v2668_v20, %s11722_s22  ;;  %2301 = vst.msk [vmem:[#allocation2 + $0x124] sm:$0xf] %vm17480_vm5, %v10210_v33  ;;  %v958_v29 = vld [vmem:[%s11828_s21 + $0x10] sm:$0xf]  ;;  %v1608_v19 = vrot.slane %v1607_v54, 4  ;;  %v1656_v62 = vrot.slane %v1655_v30, 4  ;;  %2174 = vrot.lane.b32.xlu0 %v2101_v14, %s11722_s22 }
 0x14b   : > { %2180 = vrot.lane.b32.xlu1 %v2111_v32, %s11722_s22  ;;  %v1660_v32 = vrot.slane %v1658_v37, 5  ;;  %v2682_v20 = vrot.slane %v2680_v56, 4  ;;  %2295 = vst.msk [vmem:[#allocation2 + $0xac] sm:$0xf] %vm17480_vm5, %v10204_v38  ;;  %v10266_v46 = vld [vmem:[%s11828_s21 + $0xb0] sm:$0x1]  ;;  %v10411_v38 = vor.u32 %v11372_v13, %v10410_v28 }
 0x14c   : > { %v4043_v40 = vpop.f32.mrf.mxu2  ;;  %v4132_v4 = vpop.f32.mrf.mxu3  ;;  %2855 = vst.msk [vmem:[#allocation2 + $0xac] sm:$0xf] %vm17478_vm7, %v13021_v63  ;;  %v10101_v6 = vld [vmem:[%s11828_s21 + $0x50] sm:$0x1]  ;;  %v2675_v51 = vshll.u32 %v10266_v46, 16  ;;  %v2693_v54 = vshrl.u32 %v13076_v11, 16 }
 0x14d   : > { %v13050_v16 = vadd.f32 %v4132_v4, %v4043_v40  ;;  %v2153_v17 = vpop.permute.xlu1 %2152  ;;  %v13052_v24 = vpop.f32.mrf.mxu0  ;;  %v1062_v40 = vrot.slane %v958_v29, 5  ;;  %v2686_v31 = vor.u32 %v2685_v22, %v2682_v20  ;;  %v1661_v63 = vsel %vm11842_vm2, %v1656_v62, %v1660_v32  ;;  %v10288_v14 = vld [vmem:[%s11828_s21 + $0x48] sm:$0xe]  ;;  %v10289_v20 = vld [vmem:[%s11828_s21 + $0x4c] sm:$0xf] }
 0x14e   : > { %2235 = vst.msk [vmem:[#allocation2 + $0x10c] sm:$0xf] %vm17478_vm7, %v2153_v17  ;;  %v1297_v36 = vpop.permute.xlu2 %1296  ;;  %v13062_v58 = vpop.permute.xlu0 %2148  ;;  %v959_v17 = vld [vmem:[%s11828_s21 + $0x14] sm:$0x1]  ;;  %v1610_v59 = vshll.u32 %v10101_v6, 16  ;;  %v2677_v56 = vrot.slane %v2675_v51, 5 }
 0x14f   : > { %17506 = vst [vmem:[#allocation10_spill] sm:$0xff] %v13050_v16  ;;  %v1065_v15 = vrot.slane %v959_v17, 5  ;;  %v2687_v7 = vrot.slane %v2686_v31, 4  ;;  %v13129_v43 = vrot.slane %v2693_v54, 4  ;;  %v10328_v62 = vrot.slane %v10288_v14, 9 }
 0x150   : > { %1391 = vst.msk [vmem:[#allocation2 + $0x18] sm:$0xf] %vm17478_vm7, %v1297_v36  ;;  %v1064_v36 = vrot.slane %v1062_v40, 4  ;;  %v11373_v53 = vld [vmem:[#allocation2 + $0x98] sm:$0xf0]  ;;  %v1612_v32 = vrot.slane %v1610_v59, 5  ;;  %v2678_v25 = vsel %vm11842_vm2, %v13072_v45, %v2677_v56 }
 0x151   : > { %1901 = vst.msk [vmem:[#allocation2 + $0x134] sm:$0xf] %vm17480_vm5, %v1661_v63  ;;  %v2692_v3 = vsel %vm11842_vm2, %v2687_v7, %v13093_v35  ;;  %v10432_v31 = vld [vmem:[#allocation2 + $0xbc] sm:$0xf0]  ;;  %v10067_v17 = vld [vmem:[%s11828_s21 + $0x64] sm:$0xf] }
 0x152   : > { %1320 = vrot.lane.b32.xlu2 %v10065_v0, %s11722_s22  ;;  %v10418_v0 = vld [vmem:[#allocation2 + $0x88] sm:$0xf]  ;;  %v1066_v60 = vsel %vm12010_vm6, %v1064_v36, %v1065_v15  ;;  %2801 = vrot.lane.b32.xlu0 %v2678_v25, %s11722_s22  ;;  %v1613_v30 = vsel %vm11842_vm2, %v1608_v19, %v1612_v32  ;;  %v10109_v46 = vld [vmem:[%s11828_s21 + $0x70] sm:$0xf]  ;;  %v10110_v6 = vld [vmem:[%s11828_s21 + $0x74] sm:$0x1] }
 0x153   : > { %1322 = vrot.lane.b32.xlu1 %v10066_v34, %s11722_s22  ;;  %v1063_v34 = vsel %vm12010_vm6, %v10037_v27, %v1062_v40  ;;  %v10419_v61 = vor.u32 %v11373_v53, %v10418_v0  ;;  %1200 = vst.msk [vmem:[#allocation2 + $0x40] sm:$0xf] %vm17480_vm5, %v1066_v60  ;;  %v3005_v27 = vrot.slane %v10289_v20, 5  ;;  %v1676_v36 = vshrl.u32 %v10109_v46, 16  ;;  %v10430_v15 = vld [vmem:[#allocation2 + $0xa8] sm:$0xf] }
 0x154   : > { %v4045_v10 = vpop.f32.mrf.mxu2  ;;  %v4134_v48 = vpop.f32.mrf.mxu3  ;;  %1199 = vst.msk [vmem:[#allocation2 + $0x2c] sm:$0xf] %vm17480_vm5, %v1063_v34  ;;  %v1672_v34 = vshll.u32 %v10109_v46, 16  ;;  %v1682_v0 = vshll.u32 %v10110_v6, 16  ;;  %v10212_v7 = vld [vmem:[%s11828_s21 + $0x78] sm:$0xf] }
 0x155   : > { %v13095_v4 = vadd.f32 %v4134_v48, %v4045_v10  ;;  %v1295_v42 = vpop.permute.xlu1 %1294  ;;  %v13097_v41 = vpop.f32.mrf.mxu0  ;;  %10807 = vmatmul.msk.bf16.gmra.mxu0 %vm17477_vm8, %v10419_v61  ;;  %1897 = vst.msk [vmem:[#allocation2 + $0xe4] sm:$0xf] %vm17480_vm5, %v1613_v30  ;;  %v10290_v10 = vld [vmem:[%s11828_s21 + $0x50] sm:$0x1]  ;;  %v3006_v63 = vsel %vm12010_vm6, %v10328_v62, %v3005_v27  ;;  %v10171_v54 = vld [vmem:[%s11828_s21 + $0xa8] sm:$0xe] }
 0x156   : > { %1390 = vst.msk [vmem:[#allocation2 + $0x4] sm:$0xf] %vm17478_vm7, %v1295_v42  ;;  %v2780_v33 = vpop.permute.xlu2 %2779  ;;  %v13107_v37 = vpop.permute.xlu0 %2150  ;;  %v3008_v40 = vrot.slane %v10290_v10, 5  ;;  %v13152_v53 = vrot.slane %v1672_v34, 5  ;;  %v1684_v60 = vrot.slane %v1682_v0, 5  ;;  %v10193_v59 = vrot.slane %v10171_v54, 9 }
 0x157   : > { %17507 = vst [vmem:[#allocation11_spill] sm:$0xff] %v13095_v4  ;;  %v10344_v11 = vld [vmem:[#allocation2 + $0x14] sm:$0xf0]  ;;  %v10102_v61 = vld [vmem:[%s11828_s21 + $0x54] sm:$0xf] }
 0x158   : > { %2861 = vst.msk [vmem:[#allocation2 + $0x124] sm:$0xf] %vm17478_vm7, %v2780_v33  ;;  %v3007_v33 = vrot.slane %v3005_v27, 4  ;;  %v960_v30 = vld [vmem:[%s11828_s21 + $0x18] sm:$0xe] }
 0x159   : > { %4185 = vmatmul.bf16.gmra.mxu2 %v10411_v38  ;;  %4274 = vmatmul.bf16.gmra.mxu3 %v10415_v44  ;;  %v11375_v44 = vld [vmem:[#allocation2 + $0xac] sm:$0xf]  ;;  %2233 = vst.msk [vmem:[#allocation2 + $0xe4] sm:$0xf] %vm17478_vm7, %v13062_v58  ;;  %v11377_v38 = vld [vmem:[#allocation2 + $0xb8] sm:$0xf0] }
 0x15a   : > { %2803 = vrot.lane.b32.xlu2 %v2692_v3, %s11722_s22  ;;  %3127 = vst.msk [vmem:[#allocation2 + $0xb0] sm:$0xf] %vm17480_vm5, %v3006_v63  ;;  %v3009_v51 = vsel %vm12010_vm6, %v3007_v33, %v3008_v40  ;;  %v1678_v58 = vrot.slane %v1676_v36, 4  ;;  %v2696_v3 = vor.u32 %v13129_v43, %v13093_v35  ;;  %v961_v14 = vld [vmem:[%s11828_s21 + $0x1c] sm:$0xf]  ;;  %v2108_v35 = vsel %vm12010_vm6, %v10193_v59, %v2107_v21 }
 0x15b   : > { %2303 = vst.msk [vmem:[#allocation2 + $0x14c] sm:$0xf] %vm17480_vm5, %v10212_v7  ;;  %v10038_v43 = vrot.slane %v960_v30, 9  ;;  %v1069_v10 = vrot.slane %v961_v14, 5  ;;  %v10431_v62 = vor.u32 %v11377_v38, %v10430_v15  ;;  %2178 = vrot.lane.b32.xlu0 %v2108_v35, %s11722_s22  ;;  %v10293_v30 = vld [vmem:[%s11828_s21 + $0x5c] sm:$0x1] }
 0x15c   : > { %v4048_v28 = vpop.f32.mrf.mxu2  ;;  %v4137_v13 = vpop.f32.mrf.mxu3  ;;  %3128 = vst.msk [vmem:[#allocation2 + $0xc4] sm:$0xf] %vm17480_vm5, %v3009_v51  ;;  %v1679_v25 = vor.u32 %v1678_v58, %v13152_v53  ;;  %v2697_v63 = vrot.slane %v2696_v3, 4  ;;  %v10291_v3 = vld [vmem:[%s11828_s21 + $0x54] sm:$0xe] }
 0x15d   : > { %v13131_v57 = vadd.f32 %v4137_v13, %v4048_v28  ;;  %v2157_v22 = vpop.permute.xlu1 %2156  ;;  %v11354_v29 = vld [vmem:[#allocation2 + $0x4] sm:$0xf]  ;;  %v13133_v45 = vpop.f32.mrf.mxu0  ;;  %v1615_v28 = vshrl.u32 %v10102_v61, 16  ;;  %v1618_v13 = vshll.u32 %v10102_v61, 16  ;;  %v1070_v12 = vsel %vm12010_vm6, %v10038_v43, %v1069_v10  ;;  %v10314_v4 = vld [vmem:[%s11828_s21 + $0xb0] sm:$0x1] }
 0x15e   : > { %2237 = vst.msk [vmem:[#allocation2 + $0x134] sm:$0xf] %vm17478_vm7, %v2157_v22  ;;  %v10347_v48 = vor.u32 %v11354_v29, %v10344_v11  ;;  %v1301_v19 = vpop.permute.xlu2 %1300  ;;  %v13138_v42 = vpop.permute.xlu0 %2777  ;;  %v10435_v11 = vor.u32 %v11375_v44, %v10432_v31  ;;  %v1680_v27 = vrot.slane %v1679_v25, 4  ;;  %v10209_v61 = vld [vmem:[%s11828_s21 + $0x64] sm:$0xf]  ;;  %v10329_v35 = vrot.slane %v10291_v3, 9 }
 0x15f   : > { %17508 = vst [vmem:[#allocation12_spill] sm:$0xff] %v13131_v57  ;;  %v1617_v44 = vrot.slane %v1615_v28, 4  ;;  %v1620_v31 = vrot.slane %v1618_v13, 5 }
 0x160   : > { %1393 = vst.msk [vmem:[#allocation2 + $0x40] sm:$0xf] %vm17478_vm7, %v1301_v19  ;;  %4081 = vmatmul.bf16.vlgmr.msra.gmra.mxu1 %v10347_v48  ;;  %v962_v48 = vld [vmem:[%s11828_s21 + $0x20] sm:$0x1]  ;;  %v10269_v19 = vld [vmem:[%s11828_s21 + $0xbc] sm:$0x1]  ;;  %v1685_v6 = vsel %vm11842_vm2, %v1680_v27, %v1684_v60 }
 0x161   : > { %v1072_v21 = vrot.slane %v962_v48, 5  ;;  %v10438_v46 = vld [vmem:[#allocation2 + $0xb0] sm:$0xf]  ;;  %1201 = vst.msk [vmem:[#allocation2 + $0x54] sm:$0xf] %vm17480_vm5, %v1070_v12  ;;  %v2699_v33 = vshll.u32 %v10269_v19, 16  ;;  %v1621_v36 = vor.u32 %v1620_v31, %v1617_v44 }
 0x162   : > { %1324 = vrot.lane.b32.xlu2 %v10067_v17, %s11722_s22  ;;  %v1071_v17 = vrot.slane %v1069_v10, 4  ;;  %1903 = vst.msk [vmem:[#allocation2 + $0x15c] sm:$0xf] %vm17480_vm5, %v1685_v6  ;;  %v3015_v10 = vrot.slane %v10293_v30, 5  ;;  %v11380_v48 = vld [vmem:[#allocation2 + $0xd4] sm:$0xf] }
 0x163   : > { %v11378_v38 = vld [vmem:[#allocation2 + $0xc0] sm:$0xf0]  ;;  %v2701_v0 = vrot.slane %v2699_v33, 5  ;;  %v1622_v58 = vrot.slane %v1621_v36, 4  ;;  %2300 = vst.msk [vmem:[#allocation2 + $0x110] sm:$0xf] %vm17480_vm5, %v10209_v61 }
 0x164   : > { %v4050_v56 = vpop.f32.mrf.mxu2  ;;  %v4139_v32 = vpop.f32.mrf.mxu3  ;;  %v1073_v15 = vsel %vm12010_vm6, %v1071_v17, %v1072_v21  ;;  %v10439_v7 = vor.u32 %v11378_v38, %v10438_v46  ;;  %v10452_v19 = vld [vmem:[#allocation2 + $0xe4] sm:$0xf0]  ;;  %v10214_v17 = vld [vmem:[%s11828_s21 + $0x84] sm:$0xf]  ;;  %v10450_v21 = vld [vmem:[#allocation2 + $0xd0] sm:$0xf] }
 0x165   : > { %v13164_v20 = vadd.f32 %v4139_v32, %v4050_v56  ;;  %v1299_v22 = vpop.permute.xlu1 %1298  ;;  %v13166_v29 = vpop.f32.mrf.mxu0  ;;  %1202 = vst.msk [vmem:[#allocation2 + $0x68] sm:$0xf] %vm17480_vm5, %v1073_v15  ;;  %v2702_v59 = vsel %vm11842_vm2, %v2697_v63, %v2701_v0  ;;  %v10292_v56 = vld [vmem:[%s11828_s21 + $0x58] sm:$0xf]  ;;  %v1627_v28 = vsel %vm11842_vm2, %v1622_v58, %v12977_v52  ;;  %v10112_v52 = vld [vmem:[%s11828_s21 + $0x7c] sm:$0xf]  ;;  %v10455_v58 = vor.u32 %v11380_v48, %v10452_v19 }
 0x166   : > { %1392 = vst.msk [vmem:[#allocation2 + $0x2c] sm:$0xf] %vm17478_vm7, %v1299_v22  ;;  %v2784_v40 = vpop.permute.xlu2 %2783  ;;  %v13182_v34 = vpop.permute.xlu0 %2154  ;;  %10808 = vmatmul.msk.bf16.gmra.mxu0 %vm17477_vm8, %v10439_v7  ;;  %2805 = vrot.lane.b32.xlu0 %v2702_v59, %s11722_s22  ;;  %v3012_v43 = vrot.slane %v10292_v56, 5  ;;  %v1696_v44 = vshll.u32 %v10112_v52, 16  ;;  %v1700_v31 = vshrl.u32 %v10112_v52, 16 }
 0x167   : > { %17509 = vst [vmem:[#allocation13_spill] sm:$0xff] %v13164_v20  ;;  %v10364_v51 = vld [vmem:[#allocation2 + $0x3c] sm:$0xf0]  ;;  %v11382_v46 = vld [vmem:[#allocation2 + $0xe0] sm:$0xf0] }
 0x168   : > { %2863 = vst.msk [vmem:[#allocation2 + $0x14c] sm:$0xf] %vm17478_vm7, %v2784_v40  ;;  %v3013_v27 = vsel %vm12010_vm6, %v10329_v35, %v3012_v43  ;;  %v3014_v40 = vrot.slane %v3012_v43, 4  ;;  %v13218_v6 = vrot.slane %v1696_v44, 5  ;;  %v1702_v63 = vrot.slane %v1700_v31, 4 }
 0x169   : > { %4190 = vmatmul.bf16.gmra.mxu2 %v10431_v62  ;;  %4279 = vmatmul.bf16.gmra.mxu3 %v10435_v11  ;;  %1898 = vst.msk [vmem:[#allocation2 + $0xf8] sm:$0xf] %vm17480_vm5, %v1627_v28  ;;  %v10113_v62 = vld [vmem:[%s11828_s21 + $0x80] sm:$0x1]  ;;  %v10451_v35 = vor.u32 %v11382_v46, %v10450_v21 }
 0x16a   : > { %2234 = vst.msk [vmem:[#allocation2 + $0xf8] sm:$0xf] %vm17478_vm7, %v13107_v37  ;;  %v1706_v12 = vshll.u32 %v10113_v62, 16  ;;  %v3016_v37 = vsel %vm12010_vm6, %v3014_v40, %v3015_v10  ;;  %v10105_v33 = vld [vmem:[%s11828_s21 + $0x60] sm:$0xf] }
 0x16b   : > { %2860 = vst.msk [vmem:[#allocation2 + $0x110] sm:$0xf] %vm17478_vm7, %v13138_v42  ;;  %v1639_v38 = vshrl.u32 %v10105_v33, 16  ;;  %v1642_v0 = vshll.u32 %v10105_v33, 16  ;;  %v1703_v42 = vor.u32 %v1702_v63, %v13218_v6  ;;  %v964_v10 = vld [vmem:[%s11828_s21 + $0x28] sm:$0xf] }
 0x16c   : > { %v4053_v54 = vpop.f32.mrf.mxu2  ;;  %v4142_v60 = vpop.f32.mrf.mxu3  ;;  %3129 = vst.msk [vmem:[#allocation2 + $0xd8] sm:$0xf] %vm17480_vm5, %v3013_v27  ;;  %v1708_v15 = vrot.slane %v1706_v12, 5  ;;  %v1076_v62 = vrot.slane %v964_v10, 5  ;;  %v965_v27 = vld [vmem:[%s11828_s21 + $0x2c] sm:$0x1] }
 0x16d   : > { %v13194_v32 = vadd.f32 %v4142_v60, %v4053_v54  ;;  %v2161_v11 = vpop.permute.xlu1 %2160  ;;  %v11359_v25 = vld [vmem:[#allocation2 + $0x2c] sm:$0xf]  ;;  %v13199_v13 = vpop.f32.mrf.mxu0  ;;  %3130 = vst.msk [vmem:[#allocation2 + $0xec] sm:$0xf] %vm17480_vm5, %v3016_v37  ;;  %v10174_v54 = vld [vmem:[%s11828_s21 + $0xb4] sm:$0xe] }
 0x16e   : > { %2239 = vst.msk [vmem:[#allocation2 + $0x15c] sm:$0xf] %vm17478_vm7, %v2161_v11  ;;  %v10367_v14 = vor.u32 %v11359_v25, %v10364_v51  ;;  %v1305_v22 = vpop.permute.xlu2 %1304  ;;  %v13221_v36 = vpop.permute.xlu0 %2781  ;;  %v10175_v60 = vld [vmem:[%s11828_s21 + $0xb8] sm:$0xf]  ;;  %v1641_v56 = vrot.slane %v1639_v38, 4  ;;  %v1644_v11 = vrot.slane %v1642_v0, 5 }
 0x16f   : > { %17510 = vst [vmem:[#allocation14_spill] sm:$0xff] %v13194_v32  ;;  %v10194_v25 = vrot.slane %v10174_v54, 9  ;;  %v1704_v28 = vrot.slane %v1703_v42, 4  ;;  %v1079_v31 = vrot.slane %v965_v27, 5  ;;  %v10176_v12 = vld [vmem:[%s11828_s21 + $0xbc] sm:$0x1] }
 0x170   : > { %4086 = vmatmul.bf16.gmra.mxu1 %v10367_v14  ;;  %1395 = vst.msk [vmem:[#allocation2 + $0x68] sm:$0xf] %vm17478_vm7, %v1305_v22  ;;  %v2114_v14 = vrot.slane %v10175_v60, 5  ;;  %v963_v22 = vld [vmem:[%s11828_s21 + $0x24] sm:$0xe]  ;;  %v1645_v43 = vor.u32 %v1644_v11, %v1641_v56  ;;  %v1078_v46 = vrot.slane %v1076_v62, 4 }
 0x171   : > { %2305 = vst.msk [vmem:[#allocation2 + $0x174] sm:$0xf] %vm17480_vm5, %v10214_v17  ;;  %v10039_v48 = vrot.slane %v963_v22, 9  ;;  %v1709_v19 = vsel %vm11842_vm2, %v1704_v28, %v1708_v15  ;;  %v2117_v37 = vrot.slane %v10176_v12, 5  ;;  %v10211_v56 = vld [vmem:[%s11828_s21 + $0x70] sm:$0xf] }
 0x172   : > { %v2115_v52 = vsel %vm12010_vm6, %v10194_v25, %v2114_v14  ;;  %v2116_v40 = vrot.slane %v2114_v14, 4  ;;  %1905 = vst.msk [vmem:[#allocation2 + $0x184] sm:$0xf] %vm17480_vm5, %v1709_v19  ;;  %v1646_v44 = vrot.slane %v1645_v43, 4  ;;  %v10294_v28 = vld [vmem:[%s11828_s21 + $0x60] sm:$0xe] }
 0x173   : > { %v10458_v17 = vld [vmem:[#allocation2 + $0xd8] sm:$0xf]  ;;  %2182 = vrot.lane.b32.xlu0 %v2115_v52, %s11722_s22  ;;  %v1077_v21 = vsel %vm12010_vm6, %v10039_v48, %v1076_v62  ;;  %v10296_v14 = vld [vmem:[%s11828_s21 + $0x68] sm:$0x1]  ;;  %v10330_v22 = vrot.slane %v10294_v28, 9 }
 0x174   : > { %v4055_v7 = vpop.f32.mrf.mxu2  ;;  %v4144_v51 = vpop.f32.mrf.mxu3  ;;  %v11383_v33 = vld [vmem:[#allocation2 + $0xe8] sm:$0xf0]  ;;  %v1651_v38 = vsel %vm11842_vm2, %v1646_v44, %v13059_v1  ;;  %1203 = vst.msk [vmem:[#allocation2 + $0x7c] sm:$0xf] %vm17480_vm5, %v1077_v21  ;;  %v2118_v42 = vsel %vm12010_vm6, %v2116_v40, %v2117_v37  ;;  %v10271_v43 = vld [vmem:[%s11828_s21 + $0xc4] sm:$0xf] }
 0x175   : > { %v13228_v59 = vadd.f32 %v4144_v51, %v4055_v7  ;;  %v1303_v61 = vpop.permute.xlu1 %1302  ;;  %v13231_v3 = vpop.f32.mrf.mxu0  ;;  %v10459_v0 = vor.u32 %v11383_v33, %v10458_v17  ;;  %1900 = vst.msk [vmem:[#allocation2 + $0x120] sm:$0xf] %vm17480_vm5, %v1651_v38  ;;  %2184 = vrot.lane.b32.xlu1 %v2118_v42, %s11722_s22  ;;  %v10272_v19 = vld [vmem:[%s11828_s21 + $0xc8] sm:$0x1]  ;;  %v2713_v52 = vshll.u32 %v10271_v43, 16 }
 0x176   : > { %17512 = vst [vmem:[#allocation16_spill] sm:$0xff] %v13231_v3  ;;  %v2788_v30 = vpop.permute.xlu2 %2787  ;;  %v13247_v63 = vpop.permute.xlu0 %2158  ;;  %v10470_v62 = vld [vmem:[#allocation2 + $0xf8] sm:$0xf]  ;;  %v11387_v27 = vld [vmem:[#allocation2 + $0x108] sm:$0xf0]  ;;  %v2723_v12 = vshll.u32 %v10272_v19, 16 }
 0x177   : > { %17511 = vst [vmem:[#allocation15_spill] sm:$0xff] %v13228_v59  ;;  %v10384_v15 = vld [vmem:[#allocation2 + $0x64] sm:$0xf0]  ;;  %10809 = vmatmul.msk.bf16.gmra.mxu0 %vm17477_vm8, %v10459_v0  ;;  %v11385_v40 = vld [vmem:[#allocation2 + $0xfc] sm:$0xf] }
 0x178   : > { %1394 = vst.msk [vmem:[#allocation2 + $0x54] sm:$0xf] %vm17478_vm7, %v1303_v61  ;;  %v10472_v44 = vld [vmem:[#allocation2 + $0x10c] sm:$0xf0]  ;;  %v10115_v17 = vld [vmem:[%s11828_s21 + $0x88] sm:$0xf] }
 0x179   : > { %2865 = vst.msk [vmem:[#allocation2 + $0x174] sm:$0xf] %vm17478_vm7, %v2788_v30  ;;  %4195 = vmatmul.bf16.gmra.mxu2 %v10451_v35  ;;  %4284 = vmatmul.bf16.gmra.mxu3 %v10455_v58  ;;  %v1080_v58 = vsel %vm12010_vm6, %v1078_v46, %v1079_v31  ;;  %v10295_v30 = vld [vmem:[%s11828_s21 + $0x64] sm:$0xf]  ;;  %v3022_v35 = vrot.slane %v10296_v14, 5  ;;  %v2717_v31 = vshrl.u32 %v10271_v43, 16 }
 0x17a   : > { %2236 = vst.msk [vmem:[#allocation2 + $0x120] sm:$0xf] %vm17478_vm7, %v13182_v34  ;;  %v3019_v34 = vrot.slane %v10295_v30, 5  ;;  %v13284_v46 = vrot.slane %v2713_v52, 5  ;;  %v10116_v37 = vld [vmem:[%s11828_s21 + $0x8c] sm:$0x1] }
 0x17b   : > { %1204 = vst.msk [vmem:[#allocation2 + $0x90] sm:$0xf] %vm17480_vm5, %v1080_v58  ;;  %v1720_v33 = vshll.u32 %v10115_v17, 16  ;;  %v2725_v28 = vrot.slane %v2723_v12, 5  ;;  %v10309_v59 = vld [vmem:[%s11828_s21 + $0x9c] sm:$0xe] }
 0x17c   : > { %v4058_v7 = vpop.f32.mrf.mxu2  ;;  %v4147_v51 = vpop.f32.mrf.mxu3  ;;  %2302 = vst.msk [vmem:[#allocation2 + $0x138] sm:$0xf] %vm17480_vm5, %v10211_v56  ;;  %v3020_v10 = vsel %vm12010_vm6, %v10330_v22, %v3019_v34  ;;  %v3021_v48 = vrot.slane %v3019_v34, 4  ;;  %v10471_v34 = vor.u32 %v11387_v27, %v10470_v62  ;;  %v13305_v62 = vld [vmem:[%s11828_s21 + $0xc4] sm:$0xf] }
 0x17d   : > { %v13258_v54 = vadd.f32 %v4147_v51, %v4058_v7  ;;  %v2165_v60 = vpop.permute.xlu1 %2164  ;;  %v13263_v61 = vpop.f32.mrf.mxu0  ;;  %2862 = vst.msk [vmem:[#allocation2 + $0x138] sm:$0xf] %vm17478_vm7, %v13221_v36  ;;  %v2719_v36 = vrot.slane %v2717_v31, 4  ;;  %v1724_v7 = vshrl.u32 %v10115_v17, 16  ;;  %v1730_v51 = vshll.u32 %v10116_v37, 16 }
 0x17e   : > { %2241 = vst.msk [vmem:[#allocation2 + $0x184] sm:$0xf] %vm17478_vm7, %v2165_v60  ;;  %v1309_v25 = vpop.permute.xlu2 %1308  ;;  %v3023_v21 = vsel %vm12010_vm6, %v3021_v48, %v3022_v35  ;;  %v13292_v60 = vrot.slane %v1720_v33, 5  ;;  %v10475_v35 = vor.u32 %v11385_v40, %v10472_v44  ;;  %v10177_v31 = vld [vmem:[%s11828_s21 + $0xc0] sm:$0xe]  ;;  %v17475_v33 = vrot.slane %v13305_v62, 5 }
 0x17f   : > { %17513 = vst [vmem:[#allocation17_spill] sm:$0xff] %v13258_v54  ;;  %v11364_v1 = vld [vmem:[#allocation2 + $0x54] sm:$0xf]  ;;  %v1726_v30 = vrot.slane %v1724_v7, 4  ;;  %v1732_v43 = vrot.slane %v1730_v51, 5  ;;  %v10195_v27 = vrot.slane %v10177_v31, 9 }
 0x180   : > { %v10387_v11 = vor.u32 %v11364_v1, %v10384_v15  ;;  %1397 = vst.msk [vmem:[#allocation2 + $0x90] sm:$0xf] %vm17478_vm7, %v1309_v25  ;;  %v13287_v15 = vpop.permute.xlu0 %2785  ;;  %v10216_v1 = vld [vmem:[%s11828_s21 + $0x90] sm:$0xf]  ;;  %v2720_v25 = vor.u32 %v2719_v36, %v13284_v46 }
 0x181   : > { %3131 = vst.msk [vmem:[#allocation2 + $0x100] sm:$0xf] %vm17480_vm5, %v3020_v10  ;;  %v1727_v19 = vor.u32 %v1726_v30, %v13292_v60  ;;  %v966_v40 = vld [vmem:[%s11828_s21 + $0x30] sm:$0xe] }
 0x182   : > { %4091 = vmatmul.bf16.gmra.mxu1 %v10387_v11  ;;  %3132 = vst.msk [vmem:[#allocation2 + $0x114] sm:$0xf] %vm17480_vm5, %v3023_v21  ;;  %v10108_v11 = vld [vmem:[%s11828_s21 + $0x6c] sm:$0xf]  ;;  %v2721_v48 = vrot.slane %v2720_v25, 4  ;;  %v10040_v7 = vrot.slane %v966_v40, 9 }
 0x183   : > { %v1663_v22 = vshrl.u32 %v10108_v11, 16  ;;  %2307 = vst.msk [vmem:[#allocation2 + $0x19c] sm:$0xf] %vm17480_vm5, %v10216_v1  ;;  %v1666_v10 = vshll.u32 %v10108_v11, 16  ;;  %v1728_v37 = vrot.slane %v1727_v19, 4 }
 0x184   : > { %v4060_v38 = vpop.f32.mrf.mxu2  ;;  %v4149_v0 = vpop.f32.mrf.mxu3  ;;  %v2726_v21 = vsel %vm11842_vm2, %v2721_v48, %v2725_v28  ;;  %v2122_v28 = vsel %vm12010_vm6, %v10195_v27, %v17475_v33  ;;  %v10213_v40 = vld [vmem:[%s11828_s21 + $0x7c] sm:$0xf] }
 0x185   : > { %v13290_v58 = vadd.f32 %v4149_v0, %v4060_v38  ;;  %v1307_v42 = vpop.permute.xlu1 %1306  ;;  %v13295_v56 = vpop.f32.mrf.mxu0  ;;  %v1665_v52 = vrot.slane %v1663_v22, 4  ;;  %v1668_v17 = vrot.slane %v1666_v10, 5  ;;  %v967_v38 = vld [vmem:[%s11828_s21 + $0x34] sm:$0xf]  ;;  %2809 = vrot.lane.b32.xlu0 %v2726_v21, %s11722_s22  ;;  %v1733_v30 = vsel %vm11842_vm2, %v1728_v37, %v1732_v43  ;;  %2186 = vrot.lane.b32.xlu1 %v2122_v28, %s11722_s22  ;;  %2304 = vst.msk [vmem:[#allocation2 + $0x160] sm:$0xf] %vm17480_vm5, %v10213_v40 }
 0x186   : > { %17515 = vst [vmem:[#allocation19_spill] sm:$0xff] %v13295_v56  ;;  %v2792_v14 = vpop.permute.xlu2 %2791  ;;  %v1083_v51 = vrot.slane %v967_v38, 5  ;;  %v10299_v37 = vld [vmem:[%s11828_s21 + $0x74] sm:$0x1] }
 0x187   : > { %17514 = vst [vmem:[#allocation18_spill] sm:$0xff] %v13290_v58  ;;  %v10404_v12 = vld [vmem:[#allocation2 + $0x8c] sm:$0xf0]  ;;  %v1669_v36 = vor.u32 %v1668_v17, %v1665_v52 }
 0x188   : > { %1396 = vst.msk [vmem:[#allocation2 + $0x7c] sm:$0xf] %vm17478_vm7, %v1307_v42  ;;  %v10478_v44 = vld [vmem:[#allocation2 + $0x100] sm:$0xf]  ;;  %v968_v42 = vld [vmem:[%s11828_s21 + $0x38] sm:$0x1]  ;;  %v1084_v43 = vsel %vm12010_vm6, %v10040_v7, %v1083_v51  ;;  %v13338_v21 = vpop.permute.xlu0 %2162 }
 0x189   : > { %2867 = vst.msk [vmem:[#allocation2 + $0x19c] sm:$0xf] %vm17478_vm7, %v2792_v14  ;;  %4200 = vmatmul.bf16.gmra.mxu2 %v10471_v34  ;;  %4289 = vmatmul.bf16.gmra.mxu3 %v10475_v35  ;;  %v11388_v0 = vld [vmem:[#allocation2 + $0x110] sm:$0xf0]  ;;  %v1086_v14 = vrot.slane %v968_v42, 5  ;;  %v1670_v10 = vrot.slane %v1669_v36, 4 }
 0x18a   : > { %v10479_v1 = vor.u32 %v11388_v0, %v10478_v44  ;;  %1907 = vst.msk [vmem:[#allocation2 + $0x1ac] sm:$0xf] %vm17480_vm5, %v1733_v30  ;;  %v1085_v48 = vrot.slane %v1083_v51, 4  ;;  %v10297_v44 = vld [vmem:[%s11828_s21 + $0x6c] sm:$0xe]  ;;  %v3029_v0 = vrot.slane %v10299_v37, 5 }
 0x18b   : > { %v1675_v17 = vsel %vm11842_vm2, %v1670_v10, %v13152_v53  ;;  %1205 = vst.msk [vmem:[#allocation2 + $0xa4] sm:$0xf] %vm17480_vm5, %v1084_v43  ;;  %v10331_v53 = vrot.slane %v10297_v44, 9  ;;  %v10490_v36 = vld [vmem:[#allocation2 + $0x120] sm:$0xf] }
 0x18c   : > { %v4063_v11 = vpop.f32.mrf.mxu2  ;;  %v4152_v25 = vpop.f32.mrf.mxu3  ;;  %10810 = vmatmul.msk.bf16.gmra.mxu0 %vm17477_vm8, %v10479_v1  ;;  %v1087_v27 = vsel %vm12010_vm6, %v1085_v48, %v1086_v14  ;;  %1902 = vst.msk [vmem:[#allocation2 + $0x148] sm:$0xf] %vm17480_vm5, %v1675_v17  ;;  %v11392_v7 = vld [vmem:[#allocation2 + $0x130] sm:$0xf0]  ;;  %v11390_v51 = vld [vmem:[#allocation2 + $0x124] sm:$0xf] }
 0x18d   : > { %v13320_v22 = vadd.f32 %v4152_v25, %v4063_v11  ;;  %v2169_v34 = vpop.permute.xlu1 %2168  ;;  %v13326_v19 = vpop.f32.mrf.mxu0  ;;  %2238 = vst.msk [vmem:[#allocation2 + $0x148] sm:$0xf] %vm17478_vm7, %v13247_v63  ;;  %v10492_v42 = vld [vmem:[#allocation2 + $0x134] sm:$0xf0]  ;;  %v10273_v1 = vld [vmem:[%s11828_s21 + $0xcc] sm:$0xf] }
 0x18e   : > { %17517 = vst [vmem:[#allocation21_spill] sm:$0xff] %v13326_v19  ;;  %v1313_v31 = vpop.permute.xlu2 %1312  ;;  %v10274_v11 = vld [vmem:[%s11828_s21 + $0xd0] sm:$0xf]  ;;  %v2728_v30 = vshrl.u32 %v10273_v1, 16  ;;  %v2731_v28 = vshll.u32 %v10273_v1, 16  ;;  %v10491_v1 = vor.u32 %v11392_v7, %v10490_v36 }
 0x18f   : > { %17516 = vst [vmem:[#allocation20_spill] sm:$0xff] %v13320_v22  ;;  %v11369_v35 = vld [vmem:[#allocation2 + $0x7c] sm:$0xf]  ;;  %v2741_v10 = vshrl.u32 %v10274_v11, 16  ;;  %v10275_v43 = vld [vmem:[%s11828_s21 + $0xd4] sm:$0x1] }
 0x190   : > { %2243 = vst.msk [vmem:[#allocation2 + $0x1ac] sm:$0xf] %vm17478_vm7, %v2169_v34  ;;  %v10407_v52 = vor.u32 %v11369_v35, %v10404_v12  ;;  %v10298_v12 = vld [vmem:[%s11828_s21 + $0x70] sm:$0xf]  ;;  %v2737_v35 = vshll.u32 %v10274_v11, 16  ;;  %v2730_v17 = vrot.slane %v2728_v30, 4  ;;  %v10495_v11 = vor.u32 %v11390_v51, %v10492_v42 }
 0x191   : > { %v3026_v38 = vrot.slane %v10298_v12, 5  ;;  %1206 = vst.msk [vmem:[#allocation2 + $0xb8] sm:$0xf] %vm17480_vm5, %v1087_v27  ;;  %v2733_v27 = vrot.slane %v2731_v28, 5  ;;  %v10118_v44 = vld [vmem:[%s11828_s21 + $0x94] sm:$0xf] }
 0x192   : > { %4096 = vmatmul.bf16.gmra.mxu1 %v10407_v52  ;;  %1399 = vst.msk [vmem:[#allocation2 + $0xb8] sm:$0xf] %vm17478_vm7, %v1313_v31  ;;  %v2739_v40 = vrot.slane %v2737_v35, 5  ;;  %v2743_v12 = vrot.slane %v2741_v10, 4  ;;  %v2747_v37 = vshll.u32 %v10275_v43, 16 }
 0x193   : > { %v3028_v25 = vrot.slane %v3026_v38, 4  ;;  %v3027_v34 = vsel %vm12010_vm6, %v10331_v53, %v3026_v38  ;;  %2864 = vst.msk [vmem:[#allocation2 + $0x160] sm:$0xf] %vm17478_vm7, %v13287_v15  ;;  %v1744_v53 = vshll.u32 %v10118_v44, 16  ;;  %v2734_v15 = vor.u32 %v2733_v27, %v2730_v17  ;;  %v10218_v51 = vld [vmem:[%s11828_s21 + $0x9c] sm:$0xf] }
 0x194   : > { %v4065_v14 = vpop.f32.mrf.mxu2  ;;  %v4154_v63 = vpop.f32.mrf.mxu3  ;;  %3133 = vst.msk [vmem:[#allocation2 + $0x128] sm:$0xf] %vm17480_vm5, %v3027_v34  ;;  %v2749_v30 = vrot.slane %v2747_v37, 5  ;;  %v10111_v42 = vld [vmem:[%s11828_s21 + $0x78] sm:$0xf] }
 0x195   : > { %v13353_v48 = vadd.f32 %v4154_v63, %v4065_v14  ;;  %v1311_v52 = vpop.permute.xlu1 %1310  ;;  %v3030_v31 = vsel %vm12010_vm6, %v3028_v25, %v3029_v0  ;;  %v10119_v14 = vld [vmem:[%s11828_s21 + $0x98] sm:$0x1]  ;;  %v1748_v63 = vshrl.u32 %v10118_v44, 16  ;;  %v13363_v0 = vpop.f32.mrf.mxu0  ;;  %v2744_v25 = vor.u32 %v2743_v12, %v2739_v40  ;;  %2309 = vst.msk [vmem:[#allocation2 + $0x1c4] sm:$0xf] %vm17480_vm5, %v10218_v51 }
 0x196   : > { %1398 = vst.msk [vmem:[#allocation2 + $0xa4] sm:$0xf] %vm17478_vm7, %v1311_v52  ;;  %v2796_v38 = vpop.permute.xlu2 %2795  ;;  %v13366_v28 = vrot.slane %v1744_v53, 5  ;;  %v1754_v35 = vshll.u32 %v10119_v14, 16  ;;  %v2735_v36 = vrot.slane %v2734_v15, 4  ;;  %v13370_v34 = vpop.permute.xlu0 %2789  ;;  %v1687_v27 = vshrl.u32 %v10111_v42, 16 }
 0x197   : > { %17518 = vst [vmem:[#allocation22_spill] sm:$0xff] %v13353_v48  ;;  %v1750_v7 = vrot.slane %v1748_v63, 4  ;;  %v2745_v10 = vrot.slane %v2744_v25, 4  ;;  %v1690_v44 = vshll.u32 %v10111_v42, 16  ;;  %v10270_v12 = vld [vmem:[%s11828_s21 + $0xc0] sm:$0xf] }
 0x198   : > { %17519 = vst [vmem:[#allocation23_spill] sm:$0xff] %v13363_v0  ;;  %v1756_v43 = vrot.slane %v1754_v35, 5  ;;  %v2707_v15 = vshll.u32 %v10270_v12, 16  ;;  %v969_v14 = vld [vmem:[%s11828_s21 + $0x3c] sm:$0xe] }
 0x199   : > { %3134 = vst.msk [vmem:[#allocation2 + $0x13c] sm:$0xf] %vm17480_vm5, %v3030_v31  ;;  %4205 = vmatmul.bf16.gmra.mxu2 %v10491_v1  ;;  %4294 = vmatmul.bf16.gmra.mxu3 %v10495_v11  ;;  %v10424_v52 = vld [vmem:[#allocation2 + $0xb4] sm:$0xf0]  ;;  %v2740_v31 = vsel %vm11842_vm2, %v2735_v36, %v2739_v40  ;;  %v1751_v17 = vor.u32 %v1750_v7, %v13366_v28  ;;  %v2704_v11 = vshrl.u32 %v10270_v12, 16  ;;  %v1689_v36 = vrot.slane %v1687_v27, 4 }
 0x19a   : > { %2869 = vst.msk [vmem:[#allocation2 + $0x1c4] sm:$0xf] %vm17478_vm7, %v2796_v38  ;;  %2811 = vrot.lane.b32.xlu0 %v2740_v31, %s11722_s22  ;;  %v2750_v37 = vsel %vm11842_vm2, %v2745_v10, %v2749_v30  ;;  %v970_v63 = vld [vmem:[%s11828_s21 + $0x40] sm:$0xf]  ;;  %v1692_v7 = vrot.slane %v1690_v44, 5  ;;  %v2709_v30 = vrot.slane %v2707_v15, 5 }
 0x19b   : > { %2813 = vrot.lane.b32.xlu1 %v2750_v37, %s11722_s22  ;;  %v1752_v38 = vrot.slane %v1751_v17, 4  ;;  %v10498_v51 = vld [vmem:[#allocation2 + $0x128] sm:$0xf]  ;;  %v2706_v31 = vrot.slane %v2704_v11, 4  ;;  %v10041_v10 = vrot.slane %v969_v14, 9  ;;  %v1090_v37 = vrot.slane %v970_v63, 5 }
 0x19c   : > { %v4068_v53 = vpop.f32.mrf.mxu2  ;;  %v4157_v1 = vpop.f32.mrf.mxu3  ;;  %v1693_v22 = vor.u32 %v1692_v7, %v1689_v36  ;;  %v11397_v14 = vld [vmem:[#allocation2 + $0x158] sm:$0xf0] }
 0x19d   : > { %v13384_v40 = vadd.f32 %v4157_v1, %v4068_v53  ;;  %v2173_v25 = vpop.permute.xlu1 %2172  ;;  %v11374_v35 = vld [vmem:[#allocation2 + $0xa4] sm:$0xf]  ;;  %v1757_v12 = vsel %vm11842_vm2, %v1752_v38, %v1756_v43  ;;  %v13389_v1 = vpop.f32.mrf.mxu0  ;;  %v2710_v27 = vor.u32 %v2709_v30, %v2706_v31  ;;  %v1091_v11 = vsel %vm12010_vm6, %v10041_v10, %v1090_v37  ;;  %v10510_v43 = vld [vmem:[#allocation2 + $0x148] sm:$0xf]  ;;  %v11395_v38 = vld [vmem:[#allocation2 + $0x14c] sm:$0xf] }
 0x19e   : > { %v10427_v42 = vor.u32 %v11374_v35, %v10424_v52  ;;  %v1317_v33 = vpop.permute.xlu2 %1316  ;;  %v971_v53 = vld [vmem:[%s11828_s21 + $0x44] sm:$0x1]  ;;  %1909 = vst.msk [vmem:[#allocation2 + $0x1d4] sm:$0xf] %vm17480_vm5, %v1757_v12  ;;  %v1694_v44 = vrot.slane %v1693_v22, 4  ;;  %v1092_v15 = vrot.slane %v1090_v37, 4  ;;  %v13401_v35 = vpop.permute.xlu0 %2166 }
 0x19f   : > { %17520 = vst [vmem:[#allocation24_spill] sm:$0xff] %v13384_v40  ;;  %v1093_v52 = vrot.slane %v971_v53, 5  ;;  %v10512_v22 = vld [vmem:[#allocation2 + $0x15c] sm:$0xf0]  ;;  %v10215_v31 = vld [vmem:[%s11828_s21 + $0x88] sm:$0xf] }
 0x1a0   : > { %v11393_v48 = vld [vmem:[#allocation2 + $0x138] sm:$0xf0]  ;;  %2245 = vst.msk [vmem:[#allocation2 + $0x1d4] sm:$0xf] %vm17478_vm7, %v2173_v25  ;;  %v1699_v63 = vsel %vm11842_vm2, %v1694_v44, %v13218_v6  ;;  %v10300_v25 = vld [vmem:[%s11828_s21 + $0x78] sm:$0xe] }
 0x1a1   : > { %v10499_v17 = vor.u32 %v11393_v48, %v10498_v51  ;;  %v2711_v48 = vrot.slane %v2710_v27, 4  ;;  %1207 = vst.msk [vmem:[#allocation2 + $0xcc] sm:$0xf] %vm17480_vm5, %v1091_v11  ;;  %v10301_v6 = vld [vmem:[%s11828_s21 + $0x7c] sm:$0xf]  ;;  %v10332_v37 = vrot.slane %v10300_v25, 9  ;;  %v10515_v11 = vor.u32 %v11395_v38, %v10512_v22 }
 0x1a2   : > { %4101 = vmatmul.bf16.gmra.mxu1 %v10427_v42  ;;  %1904 = vst.msk [vmem:[#allocation2 + $0x170] sm:$0xf] %vm17480_vm5, %v1699_v63  ;;  %v1094_v42 = vsel %vm12010_vm6, %v1092_v15, %v1093_v52  ;;  %v10302_v30 = vld [vmem:[%s11828_s21 + $0x80] sm:$0x1]  ;;  %v10122_v52 = vld [vmem:[%s11828_s21 + $0xa4] sm:$0x1] }
 0x1a3   : > { %10811 = vmatmul.msk.bf16.gmra.mxu0 %vm17477_vm8, %v10499_v17  ;;  %v2716_v36 = vsel %vm11842_vm2, %v2711_v48, %v13284_v46  ;;  %2240 = vst.msk [vmem:[#allocation2 + $0x170] sm:$0xf] %vm17478_vm7, %v13338_v21  ;;  %v3033_v46 = vrot.slane %v10301_v6, 5  ;;  %v3036_v53 = vrot.slane %v10302_v30, 5  ;;  %v10511_v17 = vor.u32 %v11397_v14, %v10510_v43  ;;  %v10121_v27 = vld [vmem:[%s11828_s21 + $0xa0] sm:$0xf] }
 0x1a4   : > { %v4070_v7 = vpop.f32.mrf.mxu2  ;;  %v4159_v51 = vpop.f32.mrf.mxu3  ;;  %2807 = vrot.lane.b32.xlu2 %v2716_v36, %s11722_s22  ;;  %1208 = vst.msk [vmem:[#allocation2 + $0xe0] sm:$0xf] %vm17480_vm5, %v1094_v42  ;;  %v1768_v15 = vshll.u32 %v10121_v27, 16  ;;  %v1772_v48 = vshrl.u32 %v10121_v27, 16  ;;  %v1778_v25 = vshll.u32 %v10122_v52, 16  ;;  %v17522_v43 = vrot.slane %v13305_v62, 5 }
 0x1a5   : > { %v13415_v10 = vadd.f32 %v4159_v51, %v4070_v7  ;;  %v1315_v12 = vpop.permute.xlu1 %1314  ;;  %v3035_v21 = vrot.slane %v3033_v46, 4  ;;  %1401 = vst.msk [vmem:[#allocation2 + $0xe0] sm:$0xf] %vm17478_vm7, %v1317_v33  ;;  %v3034_v63 = vsel %vm12010_vm6, %v10332_v37, %v3033_v46  ;;  %v10220_v36 = vld [vmem:[%s11828_s21 + $0xa8] sm:$0xf]  ;;  %v13433_v51 = vpop.f32.mrf.mxu0 }
 0x1a6   : > { %1400 = vst.msk [vmem:[#allocation2 + $0xcc] sm:$0xf] %vm17478_vm7, %v1315_v12  ;;  %v2800_v44 = vpop.permute.xlu2 %2799  ;;  %v2123_v14 = vrot.slane %v17522_v43, 4  ;;  %v13430_v22 = vrot.slane %v1768_v15, 5  ;;  %v1774_v33 = vrot.slane %v1772_v48, 4  ;;  %v1780_v62 = vrot.slane %v1778_v25, 5  ;;  %v2794_v48 = vpop.permute.xlu0 %2793 }
 0x1a7   : > { %17521 = vst [vmem:[#allocation25_spill] sm:$0xff] %v13415_v10  ;;  %v3037_v38 = vsel %vm12010_vm6, %v3035_v21, %v3036_v53  ;;  %v10179_v7 = vld [vmem:[%s11828_s21 + $0xc8] sm:$0x1]  ;;  %v10114_v6 = vld [vmem:[%s11828_s21 + $0x84] sm:$0xf] }
 0x1a8   : > { %2306 = vst.msk [vmem:[#allocation2 + $0x188] sm:$0xf] %vm17480_vm5, %v10215_v31  ;;  %v2124_v42 = vrot.slane %v10179_v7, 5  ;;  %v1775_v31 = vor.u32 %v1774_v33, %v13430_v22  ;;  %v1711_v30 = vshrl.u32 %v10114_v6, 16  ;;  %v1714_v12 = vshll.u32 %v10114_v6, 16 }
 0x1a9   : > { %4210 = vmatmul.bf16.gmra.mxu2 %v10511_v17  ;;  %4299 = vmatmul.bf16.gmra.mxu3 %v10515_v11  ;;  %2866 = vst.msk [vmem:[#allocation2 + $0x188] sm:$0xf] %vm17478_vm7, %v13370_v34  ;;  %v972_v37 = vld [vmem:[%s11828_s21 + $0x48] sm:$0xe]  ;;  %v973_v17 = vld [vmem:[%s11828_s21 + $0x4c] sm:$0xf] }
 0x1aa   : > { %3135 = vst.msk [vmem:[#allocation2 + $0x150] sm:$0xf] %vm17480_vm5, %v3034_v63  ;;  %v2125_v34 = vsel %vm12010_vm6, %v2123_v14, %v2124_v42  ;;  %v10042_v27 = vrot.slane %v972_v37, 9  ;;  %v1776_v52 = vrot.slane %v1775_v31, 4  ;;  %v1713_v15 = vrot.slane %v1711_v30, 4 }
 0x1ab   : > { %3136 = vst.msk [vmem:[#allocation2 + $0x164] sm:$0xf] %vm17480_vm5, %v3037_v38  ;;  %v1716_v63 = vrot.slane %v1714_v12, 5  ;;  %v1097_v25 = vrot.slane %v973_v17, 5  ;;  %v974_v43 = vld [vmem:[%s11828_s21 + $0x50] sm:$0x1] }
 0x1ac   : > { %v13442_v46 = vpop.f32.mrf.mxu2  ;;  %v13444_v53 = vpop.f32.mrf.mxu3  ;;  %2311 = vst.msk [vmem:[#allocation2 + $0x1ec] sm:$0xf] %vm17480_vm5, %v10220_v36  ;;  %2188 = vrot.lane.b32.xlu2 %v2125_v34, %s11722_s22  ;;  %v1781_v38 = vsel %vm11842_vm2, %v1776_v52, %v1780_v62  ;;  %v10444_v14 = vld [vmem:[#allocation2 + $0xdc] sm:$0xf0]  ;;  %v1100_v33 = vrot.slane %v974_v43, 5 }
 0x1ad   : > { %v2177_v11 = vpop.permute.xlu1 %2176  ;;  %v11379_v21 = vld [vmem:[#allocation2 + $0xcc] sm:$0xf]  ;;  %2871 = vst.msk [vmem:[#allocation2 + $0x1ec] sm:$0xf] %vm17478_vm7, %v2800_v44  ;;  %v1717_v36 = vor.u32 %v1716_v63, %v1713_v15  ;;  %v1098_v6 = vsel %vm12010_vm6, %v10042_v27, %v1097_v25  ;;  %v1099_v31 = vrot.slane %v1097_v25, 4  ;;  %v13463_v27 = vpop.f32.mrf.mxu0 }
 0x1ae   : > { %v1321_v7 = vpop.permute.xlu2 %1320  ;;  %1911 = vst.msk [vmem:[#allocation2 + $0x1fc] sm:$0xf] %vm17480_vm5, %v1781_v38  ;;  %v10447_v42 = vor.u32 %v11379_v21, %v10444_v14  ;;  %v10530_v44 = vld [vmem:[#allocation2 + $0x170] sm:$0xf]  ;;  %v11402_v30 = vld [vmem:[#allocation2 + $0x180] sm:$0xf0] }
 0x1af   : > { %2247 = vst.msk [vmem:[#allocation2 + $0x1fc] sm:$0xf] %vm17478_vm7, %v2177_v11  ;;  %v1718_v62 = vrot.slane %v1717_v36, 4  ;;  %v1101_v37 = vsel %vm12010_vm6, %v1099_v31, %v1100_v33  ;;  %v11400_v34 = vld [vmem:[#allocation2 + $0x174] sm:$0xf] }
 0x1b0   : > { %1209 = vst.msk [vmem:[#allocation2 + $0xf4] sm:$0xf] %vm17480_vm5, %v1098_v6  ;;  %v10532_v17 = vld [vmem:[#allocation2 + $0x184] sm:$0xf0]  ;;  %v10217_v11 = vld [vmem:[%s11828_s21 + $0x94] sm:$0xf]  ;;  %v13478_v6 = vpop.permute.xlu0 %2170 }
 0x1b1   : > { %v10518_v12 = vld [vmem:[#allocation2 + $0x150] sm:$0xf]  ;;  %1210 = vst.msk [vmem:[#allocation2 + $0x108] sm:$0xf] %vm17480_vm5, %v1101_v37  ;;  %v1723_v15 = vsel %vm11842_vm2, %v1718_v62, %v13292_v60  ;;  %v10303_v43 = vld [vmem:[%s11828_s21 + $0x84] sm:$0xe]  ;;  %v10531_v60 = vor.u32 %v11402_v30, %v10530_v44 }
 0x1b2   : > { %4106 = vmatmul.bf16.gmra.mxu1 %v10447_v42  ;;  %v11398_v52 = vld [vmem:[#allocation2 + $0x160] sm:$0xf0]  ;;  %1403 = vst.msk [vmem:[#allocation2 + $0x108] sm:$0xf] %vm17478_vm7, %v1321_v7  ;;  %v10304_v38 = vld [vmem:[%s11828_s21 + $0x88] sm:$0xf] }
 0x1b3   : > { %v10519_v21 = vor.u32 %v11398_v52, %v10518_v12  ;;  %1906 = vst.msk [vmem:[#allocation2 + $0x198] sm:$0xf] %vm17480_vm5, %v1723_v15  ;;  %v10305_v33 = vld [vmem:[%s11828_s21 + $0x8c] sm:$0x1]  ;;  %v10333_v42 = vrot.slane %v10303_v43, 9  ;;  %v3040_v36 = vrot.slane %v10304_v38, 5  ;;  %v10535_v12 = vor.u32 %v11400_v34, %v10532_v17 }
 0x1b4   : > { %v13469_v63 = vpop.f32.mrf.mxu2  ;;  %v13471_v25 = vpop.f32.mrf.mxu3  ;;  %2242 = vst.msk [vmem:[#allocation2 + $0x198] sm:$0xf] %vm17478_vm7, %v13401_v35  ;;  %v3043_v31 = vrot.slane %v10305_v33, 5  ;;  %v10124_v7 = vld [vmem:[%s11828_s21 + $0xac] sm:$0xf] }
 0x1b5   : > { %v1319_v14 = vpop.permute.xlu1 %1318  ;;  %10812 = vmatmul.msk.bf16.gmra.mxu0 %vm17477_vm8, %v10519_v21  ;;  %v3041_v62 = vsel %vm12010_vm6, %v10333_v42, %v3040_v36  ;;  %v3042_v37 = vrot.slane %v3040_v36, 4  ;;  %v10125_v52 = vld [vmem:[%s11828_s21 + $0xb0] sm:$0x1]  ;;  %v1792_v15 = vshll.u32 %v10124_v7, 16  ;;  %2308 = vst.msk [vmem:[#allocation2 + $0x1b0] sm:$0xf] %vm17480_vm5, %v10217_v11 }
 0x1b6   : > { %1402 = vst.msk [vmem:[#allocation2 + $0xf4] sm:$0xf] %vm17478_vm7, %v1319_v14  ;;  %v1796_v43 = vshrl.u32 %v10124_v7, 16  ;;  %v1802_v21 = vshll.u32 %v10125_v52, 16  ;;  %v10222_v38 = vld [vmem:[%s11828_s21 + $0xb4] sm:$0xf]  ;;  %v2804_v30 = vpop.permute.xlu2 %2803 }
 0x1b7   : > { %2868 = vst.msk [vmem:[#allocation2 + $0x1b0] sm:$0xf] %vm17478_vm7, %v2794_v48  ;;  %v3044_v35 = vsel %vm12010_vm6, %v3042_v37, %v3043_v31  ;;  %v13493_v44 = vrot.slane %v1792_v15, 5  ;;  %v10117_v34 = vld [vmem:[%s11828_s21 + $0x90] sm:$0xf] }
 0x1b8   : > { %3137 = vst.msk [vmem:[#allocation2 + $0x178] sm:$0xf] %vm17480_vm5, %v3041_v62  ;;  %v1798_v17 = vrot.slane %v1796_v43, 4  ;;  %v1804_v11 = vrot.slane %v1802_v21, 5  ;;  %v1735_v14 = vshrl.u32 %v10117_v34, 16  ;;  %v1738_v33 = vshll.u32 %v10117_v34, 16  ;;  %v13508_v34 = vpop.f32.mrf.mxu0  ;;  %v2798_v58 = vpop.permute.xlu0 %2797 }
 0x1b9   : > { %4215 = vmatmul.bf16.gmra.mxu2 %v10531_v60  ;;  %4304 = vmatmul.bf16.gmra.mxu3 %v10535_v12  ;;  %3138 = vst.msk [vmem:[#allocation2 + $0x18c] sm:$0xf] %vm17480_vm5, %v3044_v35  ;;  %v10464_v42 = vld [vmem:[#allocation2 + $0x104] sm:$0xf0]  ;;  %v975_v36 = vld [vmem:[%s11828_s21 + $0x54] sm:$0xe] }
 0x1ba   : > { %v1799_v31 = vor.u32 %v1798_v17, %v13493_v44  ;;  %2313 = vst.msk [vmem:[#allocation2 + $0x214] sm:$0xf] %vm17480_vm5, %v10222_v38  ;;  %v1737_v7 = vrot.slane %v1735_v14, 4  ;;  %v1740_v12 = vrot.slane %v1738_v33, 5  ;;  %v976_v62 = vld [vmem:[%s11828_s21 + $0x58] sm:$0xf] }
 0x1bb   : > { %2873 = vst.msk [vmem:[#allocation2 + $0x214] sm:$0xf] %vm17478_vm7, %v2804_v30  ;;  %v10043_v52 = vrot.slane %v975_v36, 9  ;;  %v1104_v15 = vrot.slane %v976_v62, 5  ;;  %v977_v43 = vld [vmem:[%s11828_s21 + $0x5c] sm:$0x1] }
 0x1bc   : > { %v13499_v48 = vpop.f32.mrf.mxu2  ;;  %v13501_v60 = vpop.f32.mrf.mxu3  ;;  %v1800_v21 = vrot.slane %v1799_v31, 4  ;;  %v1741_v10 = vor.u32 %v1740_v12, %v1737_v7  ;;  %v1107_v40 = vrot.slane %v977_v43, 5  ;;  %v11405_v7 = vld [vmem:[#allocation2 + $0x19c] sm:$0xf]  ;;  %v10306_v62 = vld [vmem:[%s11828_s21 + $0x90] sm:$0xe] }
 0x1bd   : > { %v2181_v37 = vpop.permute.xlu1 %2180  ;;  %v11384_v35 = vld [vmem:[#allocation2 + $0xf4] sm:$0xf]  ;;  %v1105_v38 = vsel %vm12010_vm6, %v10043_v52, %v1104_v15  ;;  %v1106_v17 = vrot.slane %v1104_v15, 4 }
 0x1be   : > { %v10467_v54 = vor.u32 %v11384_v35, %v10464_v42  ;;  %v1805_v14 = vsel %vm11842_vm2, %v1800_v21, %v1804_v11  ;;  %v1742_v30 = vrot.slane %v1741_v10, 4  ;;  %1211 = vst.msk [vmem:[#allocation2 + $0x11c] sm:$0xf] %vm17480_vm5, %v1105_v38  ;;  %v10550_v11 = vld [vmem:[#allocation2 + $0x198] sm:$0xf]  ;;  %v1325_v15 = vpop.permute.xlu2 %1324 }
 0x1bf   : > { %v10538_v33 = vld [vmem:[#allocation2 + $0x178] sm:$0xf]  ;;  %1913 = vst.msk [vmem:[#allocation2 + $0x224] sm:$0xf] %vm17480_vm5, %v1805_v14  ;;  %v1108_v31 = vsel %vm12010_vm6, %v1106_v17, %v1107_v40  ;;  %v11407_v10 = vld [vmem:[#allocation2 + $0x1a8] sm:$0xf0] }
 0x1c0   : > { %v11403_v36 = vld [vmem:[#allocation2 + $0x188] sm:$0xf0]  ;;  %2249 = vst.msk [vmem:[#allocation2 + $0x224] sm:$0xf] %vm17478_vm7, %v2181_v37  ;;  %v1747_v42 = vsel %vm11842_vm2, %v1742_v30, %v13366_v28  ;;  %v10552_v12 = vld [vmem:[#allocation2 + $0x1ac] sm:$0xf0] }
 0x1c1   : > { %v10539_v52 = vor.u32 %v11403_v36, %v10538_v33  ;;  %1908 = vst.msk [vmem:[#allocation2 + $0x1c0] sm:$0xf] %vm17480_vm5, %v1747_v42  ;;  %v10307_v37 = vld [vmem:[%s11828_s21 + $0x94] sm:$0xf]  ;;  %v10334_v40 = vrot.slane %v10306_v62, 9  ;;  %v2175_v36 = vpop.permute.xlu0 %2174  ;;  %v10551_v42 = vor.u32 %v11407_v10, %v10550_v11  ;;  %v10555_v62 = vor.u32 %v11405_v7, %v10552_v12 }
 0x1c2   : > { %4111 = vmatmul.bf16.gmra.mxu1 %v10467_v54  ;;  %v10308_v54 = vld [vmem:[%s11828_s21 + $0x98] sm:$0x1]  ;;  %2244 = vst.msk [vmem:[#allocation2 + $0x1c0] sm:$0xf] %vm17478_vm7, %v13478_v6  ;;  %v3047_v21 = vrot.slane %v10307_v37, 5  ;;  %v10335_v12 = vrot.slane %v10309_v59, 9 }
 0x1c3   : > { %v3050_v35 = vrot.slane %v10308_v54, 5  ;;  %1212 = vst.msk [vmem:[#allocation2 + $0x130] sm:$0xf] %vm17480_vm5, %v1108_v31  ;;  %v10219_v17 = vld [vmem:[%s11828_s21 + $0xa0] sm:$0xf]  ;;  %v13541_v54 = vpop.f32.mrf.mxu0 }
 0x1c4   : > { %v13528_v28 = vpop.f32.mrf.mxu2  ;;  %v13530_v43 = vpop.f32.mrf.mxu3  ;;  %v10120_v14 = vld [vmem:[%s11828_s21 + $0x9c] sm:$0xf]  ;;  %v3049_v30 = vrot.slane %v3047_v21, 4  ;;  %1405 = vst.msk [vmem:[#allocation2 + $0x130] sm:$0xf] %vm17478_vm7, %v1325_v15  ;;  %v3048_v31 = vsel %vm12010_vm6, %v10334_v40, %v3047_v21 }
 0x1c5   : > { %v1323_v38 = vpop.permute.xlu1 %1322  ;;  %10813 = vmatmul.msk.bf16.gmra.mxu0 %vm17477_vm8, %v10539_v52  ;;  %v1759_v6 = vshrl.u32 %v10120_v14, 16  ;;  %v1762_v33 = vshll.u32 %v10120_v14, 16  ;;  %v10221_v37 = vld [vmem:[%s11828_s21 + $0xac] sm:$0xf]  ;;  %2310 = vst.msk [vmem:[#allocation2 + $0x1d8] sm:$0xf] %vm17480_vm5, %v10219_v17 }
 0x1c6   : > { %1404 = vst.msk [vmem:[#allocation2 + $0x11c] sm:$0xf] %vm17478_vm7, %v1323_v38  ;;  %v3051_v52 = vsel %vm12010_vm6, %v3049_v30, %v3050_v35  ;;  %v10310_v11 = vld [vmem:[%s11828_s21 + $0xa0] sm:$0xf]  ;;  %v10311_v10 = vld [vmem:[%s11828_s21 + $0xa4] sm:$0x1] }
 0x1c7   : > { %v1761_v38 = vrot.slane %v1759_v6, 4  ;;  %v1764_v14 = vrot.slane %v1762_v33, 5  ;;  %2870 = vst.msk [vmem:[#allocation2 + $0x1d8] sm:$0xf] %vm17478_vm7, %v2798_v58  ;;  %v3054_v15 = vrot.slane %v10310_v11, 5  ;;  %v3057_v40 = vrot.slane %v10311_v10, 5 }
 0x1c8   : > { %3139 = vst.msk [vmem:[#allocation2 + $0x1a0] sm:$0xf] %vm17480_vm5, %v3048_v31 }
 0x1c9   : > { %4220 = vmatmul.bf16.gmra.mxu2 %v10551_v42  ;;  %4309 = vmatmul.bf16.gmra.mxu3 %v10555_v62  ;;  %v1765_v7 = vor.u32 %v1764_v14, %v1761_v38  ;;  %3140 = vst.msk [vmem:[#allocation2 + $0x1b4] sm:$0xf] %vm17480_vm5, %v3051_v52  ;;  %v3055_v58 = vsel %vm12010_vm6, %v10335_v12, %v3054_v15  ;;  %v3056_v30 = vrot.slane %v3054_v15, 4  ;;  %v2802_v42 = vpop.permute.xlu0 %2801  ;;  %v4863_v62 = vld [vmem:[#allocation3 + $0xc] sm:$0x1] }
 0x1ca   : > { %2312 = vst.msk [vmem:[#allocation2 + $0x200] sm:$0xf] %vm17480_vm5, %v10221_v37  ;;  %v10123_v38 = vld [vmem:[%s11828_s21 + $0xa8] sm:$0xf] }
 0x1cb   : > { %v1766_v17 = vrot.slane %v1765_v7, 4  ;;  %3141 = vst.msk [vmem:[#allocation2 + $0x1c8] sm:$0xf] %vm17480_vm5, %v3055_v58  ;;  %v10484_v59 = vld [vmem:[#allocation2 + $0x12c] sm:$0xf0]  ;;  %v3058_v37 = vsel %vm12010_vm6, %v3056_v30, %v3057_v40  ;;  %v13573_v14 = vpop.f32.mrf.mxu0  ;;  %v1783_v11 = vshrl.u32 %v10123_v38, 16 }
 0x1cc   : > { %v13552_v21 = vpop.f32.mrf.mxu2  ;;  %v13554_v35 = vpop.f32.mrf.mxu3  ;;  %2872 = vst.msk [vmem:[#allocation2 + $0x200] sm:$0xf] %vm17478_vm7, %v2802_v42  ;;  %v1786_v7 = vshll.u32 %v10123_v38, 16  ;;  %v11412_v40 = vld [vmem:[#allocation2 + $0x1d0] sm:$0xf0] }
 0x1cd   : > { %v11389_v6 = vld [vmem:[#allocation2 + $0x11c] sm:$0xf]  ;;  %v1771_v33 = vsel %vm11842_vm2, %v1766_v17, %v13430_v22  ;;  %v4864_v22 = vsel %vm13568_vm11, 0, %v4863_v62  ;;  %v11410_v17 = vld [vmem:[#allocation2 + $0x1c4] sm:$0xf] }
 0x1ce   : > { %v10487_v31 = vor.u32 %v11389_v6, %v10484_v59  ;;  %1910 = vst.msk [vmem:[#allocation2 + $0x1e8] sm:$0xf] %vm17480_vm5, %v1771_v33  ;;  %v1788_v30 = vrot.slane %v1786_v7, 5  ;;  %v4913_v6 = vld [vmem:[#allocation3 + $0x14] sm:$0x1] }
 0x1cf   : > { %2246 = vst.msk [vmem:[#allocation2 + $0x1e8] sm:$0xf] %vm17478_vm7, %v2175_v36  ;;  %v10558_v10 = vld [vmem:[#allocation2 + $0x1a0] sm:$0xf]  ;;  %v1785_v36 = vrot.slane %v1783_v11, 4 }
 0x1d0   : > { %v11408_v15 = vld [vmem:[#allocation2 + $0x1b0] sm:$0xf0]  ;;  %3142 = vst.msk [vmem:[#allocation2 + $0x1dc] sm:$0xf] %vm17480_vm5, %v3058_v37  ;;  %v10570_v42 = vld [vmem:[#allocation2 + $0x1c0] sm:$0xf] }
 0x1d1   : > { %v10559_v58 = vor.u32 %v11408_v15, %v10558_v10  ;;  %4865 = vst [vmem:[#allocation3 + $0xc] sm:$0x1] %v4864_v22  ;;  %v10572_v62 = vld [vmem:[#allocation2 + $0x1d4] sm:$0xf0]  ;;  %v1789_v38 = vor.u32 %v1788_v30, %v1785_v36  ;;  %v10312_v11 = vld [vmem:[%s11828_s21 + $0xa8] sm:$0xe]  ;;  %v10571_v22 = vor.u32 %v11412_v40, %v10570_v42  ;;  %v2179_v57 = vpop.permute.xlu0 %2178 }
 0x1d2   : > { %4116 = vmatmul.bf16.gmra.mxu1 %v10487_v31  ;;  %v4914_v31 = vsel %vm13581_vm13, 0, %v4913_v6  ;;  %v10223_v37 = vld [vmem:[%s11828_s21 + $0xb8] sm:$0xf]  ;;  %v10313_v10 = vld [vmem:[%s11828_s21 + $0xac] sm:$0xf]  ;;  %v10575_v7 = vor.u32 %v11410_v17, %v10572_v62  ;;  %v10336_v32 = vrot.slane %v10312_v11, 9 }
 0x1d3   : > { %4915 = vst [vmem:[#allocation3 + $0x14] sm:$0x1] %v4914_v31  ;;  %v1790_v15 = vrot.slane %v1789_v38, 4  ;;  %v13597_v20 = vpop.f32.mrf.mxu0  ;;  %v3061_v6 = vrot.slane %v10313_v10, 5  ;;  %v4866_v40 = vld [vmem:[#allocation3 + $0x18] sm:$0x1] }
 0x1d4   : > { %v13586_v59 = vpop.f32.mrf.mxu2  ;;  %v13588_v33 = vpop.f32.mrf.mxu3  ;;  %2314 = vst.msk [vmem:[#allocation2 + $0x228] sm:$0xf] %vm17480_vm5, %v10223_v37  ;;  %v4867_v42 = vsel %vm13568_vm11, 0, %v4866_v40  ;;  %v10126_v62 = vld [vmem:[%s11828_s21 + $0xb4] sm:$0xf] }
 0x1d5   : > { %10814 = vmatmul.msk.bf16.gmra.mxu0 %vm17477_vm8, %v10559_v58  ;;  %v1795_v36 = vsel %vm11842_vm2, %v1790_v15, %v13493_v44  ;;  %v3064_v58 = vrot.slane %v10314_v4, 5  ;;  %v3062_v17 = vsel %vm12010_vm6, %v10336_v32, %v3061_v6  ;;  %v3063_v30 = vrot.slane %v3061_v6, 4  ;;  %v10127_v31 = vld [vmem:[%s11828_s21 + $0xb8] sm:$0xf]  ;;  %v10578_v11 = vld [vmem:[#allocation2 + $0x1c8] sm:$0xf] }
 0x1d6   : > { %1912 = vst.msk [vmem:[#allocation2 + $0x210] sm:$0xf] %vm17480_vm5, %v1795_v36  ;;  %v1807_v44 = vshrl.u32 %v10126_v62, 16  ;;  %v1810_v32 = vshll.u32 %v10126_v62, 16 }
 0x1d7   : > { %2248 = vst.msk [vmem:[#allocation2 + $0x210] sm:$0xf] %vm17478_vm7, %v2179_v57  ;;  %v3065_v4 = vsel %vm12010_vm6, %v3063_v30, %v3064_v58  ;;  %v10128_v57 = vld [vmem:[%s11828_s21 + $0xbc] sm:$0x1] }
 0x1d8   : > { %3143 = vst.msk [vmem:[#allocation2 + $0x1f0] sm:$0xf] %vm17480_vm5, %v3062_v17  ;;  %v1809_v6 = vrot.slane %v1807_v44, 4  ;;  %v1812_v36 = vrot.slane %v1810_v32, 5  ;;  %v1826_v58 = vshll.u32 %v10128_v57, 16 }
 0x1d9   : > { %4225 = vmatmul.bf16.gmra.mxu2 %v10571_v22  ;;  %4314 = vmatmul.bf16.gmra.mxu3 %v10575_v7  ;;  %3144 = vst.msk [vmem:[#allocation2 + $0x204] sm:$0xf] %vm17480_vm5, %v3065_v4  ;;  %v1816_v22 = vshll.u32 %v10127_v31, 16  ;;  %v1820_v7 = vshrl.u32 %v10127_v31, 16  ;;  %v11413_v40 = vld [vmem:[#allocation2 + $0x1d8] sm:$0xf0]  ;;  %v2806_v4 = vpop.permute.xlu0 %2805 }
 0x1da   : > { %4868 = vst [vmem:[#allocation3 + $0x18] sm:$0x1] %v4867_v42  ;;  %v4916_v17 = vld [vmem:[#allocation3 + $0x20] sm:$0x1]  ;;  %v1813_v0 = vor.u32 %v1812_v36, %v1809_v6  ;;  %v10315_v42 = vld [vmem:[%s11828_s21 + $0xb4] sm:$0xe]  ;;  %v10579_v57 = vor.u32 %v11413_v40, %v10578_v11 }
 0x1db   : > { %v1818_v30 = vrot.slane %v1816_v22, 5  ;;  %v1822_v62 = vrot.slane %v1820_v7, 4  ;;  %v13622_v5 = vpop.f32.mrf.mxu0  ;;  %v4917_v31 = vsel %vm13581_vm13, 0, %v4916_v17  ;;  %2874 = vst.msk [vmem:[#allocation2 + $0x228] sm:$0xf] %vm17478_vm7, %v2806_v4 }
 0x1dc   : > { %v13611_v38 = vpop.f32.mrf.mxu2  ;;  %v13613_v37 = vpop.f32.mrf.mxu3  ;;  %v10316_v32 = vld [vmem:[%s11828_s21 + $0xb8] sm:$0xf]  ;;  %4918 = vst [vmem:[#allocation3 + $0x20] sm:$0x1] %v4917_v31  ;;  %v1814_v7 = vrot.slane %v1813_v0, 4 }
 0x1dd   : > { %v4082_v10 = vpop.f32.mrf.mxu1  ;;  %v1823_v44 = vor.u32 %v1822_v62, %v1818_v30  ;;  %v3068_v56 = vrot.slane %v10316_v32, 5  ;;  %v10590_v17 = vld [vmem:[#allocation2 + $0x1e8] sm:$0xf]  ;;  %v11415_v62 = vld [vmem:[#allocation2 + $0x1ec] sm:$0xf] }
 0x1de   : > { %v4083_v15 = vadd.f32 %v4082_v10, %v12808_v50  ;;  %v1828_v50 = vrot.slane %v1826_v58, 5  ;;  %v10317_v10 = vld [vmem:[%s11828_s21 + $0xbc] sm:$0x1]  ;;  %v10592_v11 = vld [vmem:[#allocation2 + $0x1fc] sm:$0xf0] }
 0x1df   : > { %v1824_v19 = vrot.slane %v1823_v44, 4  ;;  %v3071_v16 = vrot.slane %v10317_v10, 5  ;;  %v3070_v40 = vrot.slane %v3068_v56, 4  ;;  %v10319_v31 = vld [vmem:[%s11828_s21 + $0xc4] sm:$0xf] }
 0x1e0   : > { %v4172_v39 = vadd.f32 %v13442_v46, %v4083_v15  ;;  %v10337_v46 = vrot.slane %v10315_v42, 9  ;;  %v11417_v15 = vld [vmem:[#allocation2 + $0x1f8] sm:$0xf0]  ;;  %v10224_v32 = vld [vmem:[%s11828_s21 + $0xc0] sm:$0xf]  ;;  %v3075_v10 = vrot.slane %v10319_v31, 5 }
 0x1e1   : > { %v10591_v42 = vor.u32 %v11417_v15, %v10590_v17  ;;  %v3072_v44 = vsel %vm12010_vm6, %v3070_v40, %v3071_v16  ;;  %2315 = vst.msk [vmem:[#allocation2 + $0x23c] sm:$0xf] %vm17480_vm5, %v10224_v32  ;;  %v10131_v31 = vld [vmem:[%s11828_s21 + $0xc8] sm:$0x1] }
 0x1e2   : > { %v4261_v22 = vadd.f32 %v13444_v53, %v4172_v39  ;;  %v1819_v39 = vsel %vm11842_vm2, %v1814_v7, %v1818_v30  ;;  %v1829_v53 = vsel %vm11842_vm2, %v1824_v19, %v1828_v50  ;;  %v10595_v30 = vor.u32 %v11415_v62, %v10592_v11  ;;  %v4869_v19 = vld [vmem:[#allocation3 + $0x24] sm:$0x1]  ;;  %3146 = vst.msk [vmem:[#allocation2 + $0x22c] sm:$0xf] %vm17480_vm5, %v3072_v44 }
 0x1e3   : > { %1914 = vst.msk [vmem:[#allocation2 + $0x238] sm:$0xf] %vm17480_vm5, %v1819_v39  ;;  %v10225_v50 = vld [vmem:[%s11828_s21 + $0xc4] sm:$0xf]  ;;  %v10598_v39 = vld [vmem:[#allocation2 + $0x1f0] sm:$0xf] }
 0x1e4   : > { %v13632_v6 = vadd.f32 %v13389_v1, %v4261_v22  ;;  %v13634_v36 = vpop.f32.mrf.mxu2  ;;  %v13636_v58 = vpop.f32.mrf.mxu3  ;;  %v3069_v1 = vsel %vm12010_vm6, %v10337_v46, %v3068_v56  ;;  %1915 = vst.msk [vmem:[#allocation2 + $0x24c] sm:$0xf] %vm17480_vm5, %v1829_v53  ;;  %v10129_v22 = vld [vmem:[%s11828_s21 + $0xc0] sm:$0xf]  ;;  %v1850_v44 = vshll.u32 %v10131_v31, 16  ;;  %v3077_v3 = vrot.slane %v3075_v10, 4 }
 0x1e5   : > { %v4084_v0 = vpop.f32.mrf.mxu1  ;;  %10815 = vmatmul.msk.bf16.gmra.mxu0 %vm17477_vm8, %v10579_v57  ;;  %3145 = vst.msk [vmem:[#allocation2 + $0x218] sm:$0xf] %vm17480_vm5, %v3069_v1  ;;  %v13661_v57 = vpop.f32.mrf.mxu0  ;;  %v1831_v7 = vshrl.u32 %v10129_v22, 16  ;;  %v1834_v46 = vshll.u32 %v10129_v22, 16 }
 0x1e6   : > { %17527 = vst [vmem:[#allocation26_spill] sm:$0xff] %v13632_v6  ;;  %v4085_v4 = vadd.f32 %v4084_v0, %v12849_v8  ;;  %v4870_v8 = vsel %vm13568_vm11, 0, %v4869_v19  ;;  %v2183_v53 = vpop.permute.xlu0 %2182  ;;  %v10320_v19 = vld [vmem:[%s11828_s21 + $0xc8] sm:$0x1] }
 0x1e7   : > { %4871 = vst [vmem:[#allocation3 + $0x24] sm:$0x1] %v4870_v8  ;;  %v1833_v1 = vrot.slane %v1831_v7, 4  ;;  %v1836_v40 = vrot.slane %v1834_v46, 5  ;;  %v4919_v8 = vld [vmem:[#allocation3 + $0x2c] sm:$0x1] }
 0x1e8   : > { %v4174_v56 = vadd.f32 %v13469_v63, %v4085_v4  ;;  %2316 = vst.msk [vmem:[#allocation2 + $0x250] sm:$0xf] %vm17480_vm5, %v10225_v50  ;;  %v10130_v63 = vld [vmem:[%s11828_s21 + $0xc4] sm:$0xf]  ;;  %v4920_v7 = vsel %vm13581_vm13, 0, %v4919_v8  ;;  %v1852_v46 = vrot.slane %v1850_v44, 5 }
 0x1e9   : > { %4230 = vmatmul.bf16.gmra.mxu2 %v10591_v42  ;;  %4319 = vmatmul.bf16.gmra.mxu3 %v10595_v30  ;;  %v1840_v15 = vshll.u32 %v10130_v63, 16  ;;  %v1844_v17 = vshrl.u32 %v10130_v63, 16  ;;  %2250 = vst.msk [vmem:[#allocation2 + $0x238] sm:$0xf] %vm17478_vm7, %v2183_v53  ;;  %v11418_v50 = vld [vmem:[#allocation2 + $0x200] sm:$0xf0]  ;;  %v1837_v32 = vor.u32 %v1836_v40, %v1833_v1 }
 0x1ea   : > { %v13659_v16 = vadd.f32 %v13471_v25, %v4174_v56  ;;  %v10318_v25 = vld [vmem:[%s11828_s21 + $0xc0] sm:$0xe]  ;;  %v2185_v56 = vpop.permute.xlu1 %2184  ;;  %4921 = vst [vmem:[#allocation3 + $0x2c] sm:$0x1] %v4920_v7  ;;  %v10599_v53 = vor.u32 %v11418_v50, %v10598_v39  ;;  %v11420_v40 = vld [vmem:[#allocation2 + $0x214] sm:$0xf] }
 0x1eb   : > { %v1842_v4 = vrot.slane %v1840_v15, 5  ;;  %v1846_v42 = vrot.slane %v1844_v17, 4  ;;  %v10338_v63 = vrot.slane %v10318_v25, 9  ;;  %2251 = vst.msk [vmem:[#allocation2 + $0x24c] sm:$0xf] %vm17478_vm7, %v2185_v56 }
 0x1ec   : > { %v13667_v62 = vpop.f32.mrf.mxu2  ;;  %v13669_v11 = vpop.f32.mrf.mxu3  ;;  %v10612_v44 = vld [vmem:[#allocation2 + $0x224] sm:$0xf0]  ;;  %v4872_v50 = vld [vmem:[#allocation3 + $0x30] sm:$0x1]  ;;  %v10226_v56 = vld [vmem:[%s11828_s21 + $0xcc] sm:$0xf] }
 0x1ed   : > { %v4087_v0 = vpop.f32.mrf.mxu1  ;;  %v1847_v22 = vor.u32 %v1846_v42, %v1842_v4  ;;  %v3076_v17 = vsel %vm12010_vm6, %v10338_v63, %v3075_v10  ;;  %v13683_v25 = vpop.f32.mrf.mxu0  ;;  %2317 = vst.msk [vmem:[#allocation2 + $0x264] sm:$0xf] %vm17480_vm5, %v10226_v56  ;;  %v11723_v63 = vmov 0  }
 0x1ee   : > { %v4088_v30 = vadd.f32 %v4087_v0, %v12896_v2  ;;  %v1838_v2 = vrot.slane %v1837_v32, 4  ;;  %v3078_v0 = vrot.slane %v10320_v19, 5  ;;  %3147 = vst.msk [vmem:[#allocation2 + $0x240] sm:$0xf] %vm17480_vm5, %v3076_v17  ;;  %v4873_v32 = vsel %vm13568_vm11, 0, %v4872_v50 }
 0x1ef   : > { %v1848_v15 = vrot.slane %v1847_v22, 4  ;;  %v10322_v22 = vld [vmem:[%s11828_s21 + $0xd0] sm:$0xf]  ;;  %4874 = vst [vmem:[#allocation3 + $0x30] sm:$0x1] %v4873_v32 }
 0x1f0   : > { %v4177_v6 = vadd.f32 %v13499_v48, %v4088_v30  ;;  %v11422_v48 = vld [vmem:[#allocation2 + $0x220] sm:$0xf0]  ;;  %v1843_v31 = vsel %vm11842_vm2, %v1838_v2, %v1842_v4  ;;  %v3079_v10 = vsel %vm12010_vm6, %v3077_v3, %v3078_v0  ;;  %v10610_v30 = vld [vmem:[#allocation2 + $0x210] sm:$0xf]  ;;  %4856 = vst.msk [vmem:[#allocation3 + $0xcc] sm:$0xf] %vm17480_vm5, %v11723_v63 }
 0x1f1   : > { %v1853_v42 = vsel %vm11842_vm2, %v1848_v15, %v1852_v46  ;;  %1916 = vst.msk [vmem:[#allocation2 + $0x260] sm:$0xf] %vm17480_vm5, %v1843_v31  ;;  %v10611_v3 = vor.u32 %v11422_v48, %v10610_v30  ;;  %v3082_v46 = vrot.slane %v10322_v22, 5  ;;  %v10323_v0 = vld [vmem:[%s11828_s21 + $0xd4] sm:$0x1] }
 0x1f2   : > { %v4266_v1 = vadd.f32 %v13501_v60, %v4177_v6  ;;  %1917 = vst.msk [vmem:[#allocation2 + $0x274] sm:$0xf] %vm17480_vm5, %v1853_v42  ;;  %v11423_v48 = vld [vmem:[#allocation2 + $0x228] sm:$0xf0]  ;;  %v4922_v42 = vld [vmem:[#allocation3 + $0x38] sm:$0x1] }
 0x1f3   : > { %3148 = vst.msk [vmem:[#allocation2 + $0x254] sm:$0xf] %vm17480_vm5, %v3079_v10  ;;  %v3084_v10 = vrot.slane %v3082_v46, 4  ;;  %v3085_v30 = vrot.slane %v10323_v0, 5 }
 0x1f4   : > { %v13693_v39 = vadd.f32 %v13463_v27, %v4266_v1  ;;  %v13695_v60 = vpop.f32.mrf.mxu2  ;;  %v13697_v6 = vpop.f32.mrf.mxu3  ;;  %v10615_v27 = vor.u32 %v11420_v40, %v10612_v44  ;;  %4851 = vst.msk [vmem:[#allocation3] sm:$0xf] %vm17480_vm5, %v11723_v63 }
 0x1f5   : > { %v4089_v4 = vpop.f32.mrf.mxu1  ;;  %10816 = vmatmul.msk.bf16.gmra.mxu0 %vm17477_vm8, %v10599_v53  ;;  %v13712_v7 = vpop.f32.mrf.mxu0  ;;  %4852 = vst.msk [vmem:[#allocation3 + $0x4] sm:$0xf] %vm17480_vm5, %v11723_v63 }
 0x1f6   : > { %v4090_v19 = vadd.f32 %v4089_v4, %v12928_v9  ;;  %4854 = vst.msk [vmem:[#allocation3 + $0x8] sm:$0x1] %vm4853_vm9, %v11723_v63 }
 0x1f7   : > { %v2810_v1 = vpop.permute.xlu0 %2809  ;;  %4857 = vst.msk [vmem:[#allocation3 + $0xd0] sm:$0xf] %vm17480_vm5, %v11723_v63  ;;  %v2187_v4 = vpop.permute.xlu1 %2186 }
 0x1f8   : > { %v4179_v8 = vadd.f32 %v13528_v28, %v4090_v19  ;;  %v10321_v28 = vld [vmem:[%s11828_s21 + $0xcc] sm:$0xe]  ;;  %2876 = vst.msk [vmem:[#allocation2 + $0x250] sm:$0xf] %vm17478_vm7, %v2810_v1  ;;  %v10227_v19 = vld [vmem:[%s11828_s21 + $0xd0] sm:$0xf] }
 0x1f9   : > { %4235 = vmatmul.bf16.gmra.mxu2 %v10611_v3  ;;  %4324 = vmatmul.bf16.gmra.mxu3 %v10615_v27  ;;  %2252 = vst.msk [vmem:[#allocation2 + $0x260] sm:$0xf] %vm17478_vm7, %v2187_v4 }
 0x1fa   : > { %v4268_v9 = vadd.f32 %v13530_v43, %v4179_v8  ;;  %v10618_v43 = vld [vmem:[#allocation2 + $0x218] sm:$0xf]  ;;  %4858 = vst.msk [vmem:[#allocation3 + $0xd4] sm:$0x1] %vm4853_vm9, %v11723_v63 }
 0x1fb   : > { %v10619_v3 = vor.u32 %v11423_v48, %v10618_v43  ;;  %2318 = vst.msk [vmem:[#allocation2 + $0x278] sm:$0xf] %vm17480_vm5, %v10227_v19 }
 0x1fc   : > { %v13717_v2 = vadd.f32 %v13508_v34, %v4268_v9  ;;  %v13719_v15 = vpop.f32.mrf.mxu2  ;;  %v13721_v17 = vpop.f32.mrf.mxu3  ;;  %v10339_v34 = vrot.slane %v10321_v28, 9  ;;  %v11427_v9 = vld [vmem:[#allocation2 + $0x248] sm:$0xf0] }
 0x1fd   : > { %v13739_v56 = vpop.f32.mrf.mxu0 }
 0x1fe   : > { %v2808_v31 = vpop.permute.xlu2 %2807  ;;  %v3083_v50 = vsel %vm12010_vm6, %v10339_v34, %v3082_v46  ;;  %v8020_v1 = vld [vmem:[#allocation3 + $0xd0] sm:$0xf] }
 0x1ff   : > { %v4092_v53 = vpop.f32.mrf.mxu1  ;;  %2875 = vst.msk [vmem:[#allocation2 + $0x23c] sm:$0xf] %vm17478_vm7, %v2808_v31  ;;  %v10632_v28 = vld [vmem:[#allocation2 + $0x24c] sm:$0xf0]  ;;  %v8177_v31 = vrot.slane %v8020_v1, 5 }
 0x200   : > { %v4093_v40 = vadd.f32 %v4092_v53, %v12973_v26  ;;  %v4923_v26 = vsel %vm13581_vm13, 0, %v4922_v42  ;;  %3149 = vst.msk [vmem:[#allocation2 + $0x268] sm:$0xf] %vm17480_vm5, %v3083_v50  ;;  %v8019_v53 = vld [vmem:[#allocation3 + $0xcc] sm:$0xe] }
 0x201   : > { %4924 = vst [vmem:[#allocation3 + $0x38] sm:$0x1] %v4923_v26  ;;  %v10867_v34 = vrot.slane %v8019_v53, 9  ;;  %v8021_v42 = vld [vmem:[#allocation3 + $0xd4] sm:$0x1] }
 0x202   : > { %v4182_v44 = vadd.f32 %v13552_v21, %v4093_v40  ;;  %v3086_v21 = vsel %vm12010_vm6, %v3084_v10, %v3085_v30  ;;  %v4875_v10 = vld [vmem:[#allocation3 + $0x3c] sm:$0x1]  ;;  %v8180_v4 = vrot.slane %v8021_v42, 5 }
 0x203   : > { %3150 = vst.msk [vmem:[#allocation2 + $0x27c] sm:$0xf] %vm17480_vm5, %v3086_v21 }
 0x204   : > { %v4271_v27 = vadd.f32 %v13554_v35, %v4182_v44  ;;  %v13747_v32 = vpop.f32.mrf.mxu2  ;;  %v13749_v22 = vpop.f32.mrf.mxu3  ;;  %v10630_v35 = vld [vmem:[#allocation2 + $0x238] sm:$0xf]  ;;  %v8179_v44 = vrot.slane %v8177_v31, 4 }
 0x205   : > { %10817 = vmatmul.msk.bf16.gmra.mxu0 %vm17477_vm8, %v10619_v3 }
 0x206   : > { %v13745_v8 = vadd.f32 %v13541_v54, %v4271_v27  ;;  %v2189_v0 = vpop.permute.xlu2 %2188  ;;  %v10631_v54 = vor.u32 %v11427_v9, %v10630_v35  ;;  %v11425_v43 = vld [vmem:[#allocation2 + $0x23c] sm:$0xf]  ;;  %v10638_v9 = vld [vmem:[#allocation2 + $0x240] sm:$0xf] }
 0x207   : > { %v4094_v63 = vpop.f32.mrf.mxu1  ;;  %2253 = vst.msk [vmem:[#allocation2 + $0x274] sm:$0xf] %vm17478_vm7, %v2189_v0  ;;  %v10635_v40 = vor.u32 %v11425_v43, %v10632_v28  ;;  %v13771_v50 = vld [vmem:[#allocation2 + $0x268] sm:$0xf]  ;;  %v11428_v28 = vld [vmem:[#allocation2 + $0x250] sm:$0xf0] }
 0x208   : > { %v4095_v46 = vadd.f32 %v4094_v63, %v13013_v47  ;;  %v8178_v47 = vsel %vm12010_vm6, %v10867_v34, %v8177_v31  ;;  %v4925_v0 = vld [vmem:[#allocation3 + $0x44] sm:$0x1]  ;;  %v10639_v53 = vor.u32 %v11428_v28, %v10638_v9  ;;  %v10650_v31 = vld [vmem:[#allocation2 + $0x260] sm:$0xf]  ;;  %v4878_v9 = vld [vmem:[#allocation3 + $0x48] sm:$0x1] }
 0x209   : > { %4240 = vmatmul.bf16.gmra.mxu2 %v10631_v54  ;;  %4329 = vmatmul.bf16.gmra.mxu3 %v10635_v40  ;;  %v13760_v19 = vpop.f32.mrf.mxu0  ;;  %8244 = vst.msk [vmem:[#allocation2 + $0x268] sm:$0xf] %vm17480_vm5, %v8178_v47  ;;  %v4926_v43 = vsel %vm13581_vm13, 0, %v4925_v0 }
 0x20a   : > { %v4184_v48 = vadd.f32 %v13586_v59, %v4095_v46  ;;  %v4876_v59 = vsel %vm13568_vm11, 0, %v4875_v10  ;;  %v13775_v35 = vld [vmem:[#allocation2 + $0x278] sm:$0xf0]  ;;  %4927 = vst [vmem:[#allocation3 + $0x44] sm:$0x1] %v4926_v43 }
 0x20b   : > { %4877 = vst [vmem:[#allocation3 + $0x3c] sm:$0x1] %v4876_v59 }
 0x20c   : > { %v4273_v30 = vadd.f32 %v13588_v33, %v4184_v48  ;;  %v13767_v3 = vpop.f32.mrf.mxu2  ;;  %v13769_v27 = vpop.f32.mrf.mxu3  ;;  %v8181_v33 = vsel %vm12010_vm6, %v8179_v44, %v8180_v4  ;;  %v7380_v48 = vld [vmem:[#allocation3 + $0xcc] sm:$0xf] }
 0x20d   : > { %8245 = vst.msk [vmem:[#allocation2 + $0x27c] sm:$0xf] %vm17480_vm5, %v8181_v33  ;;  %v2814_v46 = vpop.permute.xlu1 %2813 }
 0x20e   : > { %v13765_v26 = vadd.f32 %v13573_v14, %v4273_v30  ;;  %v2812_v14 = vpop.permute.xlu0 %2811  ;;  %2878 = vst.msk [vmem:[#allocation2 + $0x278] sm:$0xf] %vm17478_vm7, %v2814_v46  ;;  %v11432_v42 = vld [vmem:[#allocation2 + $0x270] sm:$0xf0] }
 0x20f   : > { %v4097_v21 = vpop.f32.mrf.mxu1  ;;  %2877 = vst.msk [vmem:[#allocation2 + $0x264] sm:$0xf] %vm17478_vm7, %v2812_v14  ;;  %v10651_v4 = vor.u32 %v11432_v42, %v10650_v31 }
 0x210   : > { %v4098_v63 = vadd.f32 %v4097_v21, %v13052_v24 }
 0x211   : > { %v13793_v10 = vpop.f32.mrf.mxu0 }
 0x212   : > { %v4187_v54 = vadd.f32 %v13611_v38, %v4098_v63  ;;  %v7381_v38 = vld [vmem:[#allocation3 + $0xd0] sm:$0xf] }
 0x214   : > { %v4276_v1 = vadd.f32 %v13613_v37, %v4187_v54  ;;  %v13789_v40 = vpop.f32.mrf.mxu2  ;;  %v13791_v34 = vpop.f32.mrf.mxu3  ;;  %v4887_v37 = vld [vmem:[#allocation3 + $0x6c] sm:$0x1]  ;;  %v4937_v54 = vld [vmem:[#allocation3 + $0x74] sm:$0x1] }
 0x215   : > { %10818 = vmatmul.msk.bf16.gmra.mxu0 %vm17477_vm8, %v10639_v53  ;;  %v4888_v59 = vsel %vm13568_vm11, 0, %v4887_v37 }
 0x216   : > { %v13787_v24 = vadd.f32 %v13597_v20, %v4276_v1  ;;  %v11430_v47 = vld [vmem:[#allocation2 + $0x264] sm:$0xf]  ;;  %v10652_v20 = vld [vmem:[#allocation2 + $0x274] sm:$0xf0]  ;;  %4889 = vst [vmem:[#allocation3 + $0x6c] sm:$0x1] %v4888_v59 }
 0x217   : > { %v4099_v30 = vpop.f32.mrf.mxu1  ;;  %7412 = vst.msk [vmem:[#allocation2 + $0x264] sm:$0xf] %vm17480_vm5, %v7380_v48  ;;  %v10655_v21 = vor.u32 %v11430_v47, %v10652_v20  ;;  %v4928_v1 = vld [vmem:[#allocation3 + $0x50] sm:$0x1]  ;;  %v4940_v20 = vld [vmem:[#allocation3 + $0x80] sm:$0x1] }
 0x218   : > { %v4100_v44 = vadd.f32 %v4099_v30, %v13097_v41  ;;  %7413 = vst.msk [vmem:[#allocation2 + $0x278] sm:$0xf] %vm17480_vm5, %v7381_v38  ;;  %v4879_v41 = vsel %vm13568_vm11, 0, %v4878_v9  ;;  %v4929_v31 = vsel %vm13581_vm13, 0, %v4928_v1  ;;  %v4931_v9 = vld [vmem:[#allocation3 + $0x5c] sm:$0x1] }
 0x219   : > { %4245 = vmatmul.bf16.gmra.mxu2 %v10651_v4  ;;  %4334 = vmatmul.bf16.gmra.mxu3 %v10655_v21  ;;  %4880 = vst [vmem:[#allocation3 + $0x48] sm:$0x1] %v4879_v41  ;;  %v4932_v41 = vsel %vm13581_vm13, 0, %v4931_v9  ;;  %v4934_v9 = vld [vmem:[#allocation3 + $0x68] sm:$0x1] }
 0x21a   : > { %v4189_v33 = vadd.f32 %v13634_v36, %v4100_v44  ;;  %4930 = vst [vmem:[#allocation3 + $0x50] sm:$0x1] %v4929_v31 }
 0x21b   : > { %4933 = vst [vmem:[#allocation3 + $0x5c] sm:$0x1] %v4932_v41 }
 0x21c   : > { %v4278_v63 = vadd.f32 %v13636_v58, %v4189_v33  ;;  %v13808_v28 = vpop.f32.mrf.mxu2  ;;  %v13810_v46 = vpop.f32.mrf.mxu3  ;;  %v4938_v58 = vsel %vm13581_vm13, 0, %v4937_v54  ;;  %v4941_v33 = vsel %vm13581_vm13, 0, %v4940_v20 }
 0x21d   : > { %4939 = vst [vmem:[#allocation3 + $0x74] sm:$0x1] %v4938_v58 }
 0x21e   : > { %v13806_v14 = vadd.f32 %v13622_v5, %v4278_v63  ;;  %v10659_v5 = vor.u32 %v13775_v35, %v13771_v50  ;;  %v4881_v35 = vld [vmem:[#allocation3 + $0x54] sm:$0x1]  ;;  %4942 = vst [vmem:[#allocation3 + $0x80] sm:$0x1] %v4941_v33 }
 0x21f   : > { %v4102_v0 = vpop.f32.mrf.mxu1  ;;  %v4882_v47 = vsel %vm13568_vm11, 0, %v4881_v35  ;;  %v4943_v35 = vld [vmem:[#allocation3 + $0x8c] sm:$0x1] }
 0x220   : > { %v4103_v36 = vadd.f32 %v4102_v0, %v13133_v45  ;;  %v13813_v43 = vpop.f32.mrf.mxu0  ;;  %4883 = vst [vmem:[#allocation3 + $0x54] sm:$0x1] %v4882_v47 }
 0x222   : > { %v4192_v53 = vadd.f32 %v13667_v62, %v4103_v36  ;;  %v4890_v62 = vld [vmem:[#allocation3 + $0x78] sm:$0x1] }
 0x223   : > { %v4891_v50 = vsel %vm13568_vm11, 0, %v4890_v62 }
 0x224   : > { %v4281_v48 = vadd.f32 %v13669_v11, %v4192_v53  ;;  %v13826_v42 = vpop.f32.mrf.mxu2  ;;  %v13828_v38 = vpop.f32.mrf.mxu3  ;;  %4892 = vst [vmem:[#allocation3 + $0x78] sm:$0x1] %v4891_v50 }
 0x225   : > { %10819 = vmatmul.msk.bf16.gmra.mxu0 %vm17477_vm8, %v10659_v5  ;;  %v4884_v5 = vld [vmem:[#allocation3 + $0x60] sm:$0x1] }
 0x226   : > { %v13824_v45 = vadd.f32 %v13661_v57, %v4281_v48  ;;  %v4885_v48 = vsel %vm13568_vm11, 0, %v4884_v5 }
 0x227   : > { %v4104_v30 = vpop.f32.mrf.mxu1  ;;  %4886 = vst [vmem:[#allocation3 + $0x60] sm:$0x1] %v4885_v48 }
 0x228   : > { %v13833_v11 = vpop.f32.mrf.mxu0 }
 0x22c   : > { %v4211_v57 = vpop.f32.mrf.mxu2  ;;  %v4300_v44 = vpop.f32.mrf.mxu3 }
 0x22d   : > { %v4212_v37 = vadd.f32 %v4211_v57, %v12894_v18  ;;  %v4944_v57 = vsel %vm13581_vm13, 0, %v4943_v35  ;;  %v4436_v35 = vsel %vm17477_vm8, %v13745_v8, 0.0 }
 0x22e   : > { %4945 = vst [vmem:[#allocation3 + $0x8c] sm:$0x1] %v4944_v57 }
 0x22f   : > { %v4301_v4 = vadd.f32 %v4300_v44, %v4212_v37  ;;  %v4107_v59 = vpop.f32.mrf.mxu1 }
 0x230   : > { %v4108_v21 = vadd.f32 %v4107_v59, %v13199_v13  ;;  %v4893_v13 = vld [vmem:[#allocation3 + $0x84] sm:$0x1] }
 0x232   : > { %v4197_v63 = vadd.f32 %v13719_v15, %v4108_v21  ;;  %v4389_v0 = vpop.f32.mrf.mxu0  ;;  %v4894_v15 = vsel %vm13568_vm11, 0, %v4893_v13 }
 0x233   : > { %v13844_v36 = vadd.f32 %v4389_v0, %v4301_v4  ;;  %4895 = vst [vmem:[#allocation3 + $0x84] sm:$0x1] %v4894_v15  ;;  %v13867_v4 = vadd.f32 %v13433_v51, %v13659_v16  ;;  %v17528_v16 = vld [vmem:[#allocation26_spill] sm:$0xff]  ;;  %v4432_v0 = vsel %vm17477_vm8, %v13693_v39, 0.0  ;;  %v4434_v15 = vsel %vm17477_vm8, %v13717_v2, 0.0 }
 0x234   : > { %v4286_v18 = vadd.f32 %v13721_v17, %v4197_v63  ;;  %v13847_v54 = vpop.f32.mrf.mxu2  ;;  %v13849_v58 = vpop.f32.mrf.mxu3 }
 0x235   : > { %v4430_v51 = vsel %vm17477_vm8, %v13867_v4, 0.0 }
 0x236   : > { %v13852_v53 = vadd.f32 %v13712_v7, %v4286_v18 }
 0x237   : > { %v4109_v1 = vpop.f32.mrf.mxu1 }
 0x23a   : > { %v13858_v31 = vpop.f32.mrf.mxu0 }
 0x23c   : > { %v4216_v17 = vpop.f32.mrf.mxu2  ;;  %v4305_v62 = vpop.f32.mrf.mxu3 }
 0x23d   : > { %v4217_v50 = vadd.f32 %v4216_v17, %v12970_v49 }
 0x23f   : > { %v4306_v7 = vadd.f32 %v4305_v62, %v4217_v50  ;;  %v4112_v47 = vpop.f32.mrf.mxu1  ;;  %v17530_v62 = vld [vmem:[#allocation10_spill] sm:$0xff] }
 0x240   : > { %v4113_v44 = vadd.f32 %v4112_v47, %v13263_v61  ;;  %v4935_v61 = vsel %vm13581_vm13, 0, %v4934_v9  ;;  %v4438_v47 = vsel %vm17477_vm8, %v13765_v26, 0.0  ;;  %v17532_v9 = vld [vmem:[#allocation21_spill] sm:$0xff] }
 0x241   : > { %4936 = vst [vmem:[#allocation3 + $0x68] sm:$0x1] %v4935_v61 }
 0x242   : > { %v4202_v37 = vadd.f32 %v13767_v3, %v4113_v44  ;;  %v4394_v20 = vpop.f32.mrf.mxu0  ;;  %v4105_v3 = vadd.f32 %v4104_v30, %v13166_v29  ;;  %v17529_v29 = vld [vmem:[#allocation16_spill] sm:$0xff] }
 0x243   : > { %v13869_v59 = vadd.f32 %v4394_v20, %v4306_v7  ;;  %v4110_v30 = vadd.f32 %v4109_v1, %v17529_v29  ;;  %v17531_v1 = vld [vmem:[#allocation19_spill] sm:$0xff] }
 0x244   : > { %v4291_v49 = vadd.f32 %v13769_v27, %v4202_v37  ;;  %v13872_v33 = vpop.f32.mrf.mxu2  ;;  %v13874_v21 = vpop.f32.mrf.mxu3  ;;  %v4429_v27 = vsel %vm17477_vm8, %v17528_v16, 0.0  ;;  %v4896_v37 = vld [vmem:[#allocation3 + $0x90] sm:$0x1] }
 0x245   : > { %v4431_v18 = vadd.f32 %v4430_v51, %v4429_v27  ;;  %v4199_v20 = vadd.f32 %v13747_v32, %v4110_v30  ;;  %v4946_v27 = vld [vmem:[#allocation3 + $0x98] sm:$0x1]  ;;  %v4442_v32 = vsel %vm17477_vm8, %v13806_v14, 0.0 }
 0x246   : > { %v13877_v63 = vadd.f32 %v13760_v19, %v4291_v49  ;;  %v4194_v19 = vadd.f32 %v13695_v60, %v4105_v3  ;;  %v4897_v3 = vsel %vm13568_vm11, 0, %v4896_v37 }
 0x247   : > { %v4114_v41 = vpop.f32.mrf.mxu1  ;;  %v4433_v17 = vadd.f32 %v4432_v0, %v4431_v18  ;;  %4898 = vst [vmem:[#allocation3 + $0x90] sm:$0x1] %v4897_v3  ;;  %v4440_v0 = vsel %vm17477_vm8, %v13787_v24, 0.0  ;;  %v4947_v18 = vsel %vm13581_vm13, 0, %v4946_v27  ;;  %v4288_v29 = vadd.f32 %v13749_v22, %v4199_v20 }
 0x248   : > { %v4283_v60 = vadd.f32 %v13697_v6, %v4194_v19  ;;  %v4115_v49 = vadd.f32 %v4114_v41, %v17531_v1  ;;  %4948 = vst [vmem:[#allocation3 + $0x98] sm:$0x1] %v4947_v18  ;;  %v4452_v27 = vsel %vm17477_vm8, %v13877_v63, 0.0 }
 0x249   : > { %v4435_v7 = vadd.f32 %v4434_v15, %v4433_v17 }
 0x24a   : > { %v13889_v13 = vpop.f32.mrf.mxu0  ;;  %v13913_v41 = vadd.f32 %v13683_v25, %v4283_v60  ;;  %v4204_v30 = vadd.f32 %v13789_v40, %v4115_v49  ;;  %v4899_v40 = vld [vmem:[#allocation3 + $0x9c] sm:$0x1] }
 0x24b   : > { %v4437_v51 = vadd.f32 %v4436_v35, %v4435_v7  ;;  %v17533_v60 = vld [vmem:[#allocation23_spill] sm:$0xff] }
 0x24c   : > { %v4221_v5 = vpop.f32.mrf.mxu2  ;;  %v4310_v48 = vpop.f32.mrf.mxu3  ;;  %v4446_v22 = vsel %vm17477_vm8, %v13913_v41, 0.0 }
 0x24d   : > { %v4222_v50 = vadd.f32 %v4221_v5, %v17530_v62  ;;  %v4439_v19 = vadd.f32 %v4438_v47, %v4437_v51  ;;  %v13930_v47 = vadd.f32 %v13739_v56, %v4288_v29 }
 0x24f   : > { %v4311_v57 = vadd.f32 %v4310_v48, %v4222_v50  ;;  %v4117_v44 = vpop.f32.mrf.mxu1  ;;  %v4441_v62 = vadd.f32 %v4440_v0, %v4439_v19  ;;  %v4444_v50 = vsel %vm17477_vm8, %v13824_v45, 0.0  ;;  %v4450_v56 = vsel %vm17477_vm8, %v13930_v47, 0.0 }
 0x250   : > { %v4118_v61 = vadd.f32 %v4117_v44, %v17532_v9  ;;  %v4900_v44 = vsel %vm13568_vm11, 0, %v4899_v40 }
 0x251   : > { %v4443_v35 = vadd.f32 %v4442_v32, %v4441_v62  ;;  %4901 = vst [vmem:[#allocation3 + $0x9c] sm:$0x1] %v4900_v44 }
 0x252   : > { %v4207_v6 = vadd.f32 %v13808_v28, %v4118_v61  ;;  %v4399_v15 = vpop.f32.mrf.mxu0 }
 0x253   : > { %v13917_v5 = vadd.f32 %v4399_v15, %v4311_v57  ;;  %v4445_v37 = vadd.f32 %v4444_v50, %v4443_v35 }
 0x254   : > { %v4296_v28 = vadd.f32 %v13810_v46, %v4207_v6  ;;  %v4223_v48 = vpop.f32.mrf.mxu2  ;;  %v13920_v17 = vpop.f32.mrf.mxu3  ;;  %v4293_v46 = vadd.f32 %v13791_v34, %v4204_v30  ;;  %v4949_v6 = vld [vmem:[#allocation3 + $0xa4] sm:$0x1] }
 0x255   : > { %v4447_v1 = vadd.f32 %v4446_v22, %v4445_v37 }
 0x256   : > { %v13925_v25 = vadd.f32 %v13813_v43, %v4296_v28  ;;  %v4448_v43 = vsel %vm17477_vm8, %v13852_v53, 0.0  ;;  %v13942_v9 = vadd.f32 %v13793_v10, %v4293_v46  ;;  %v4950_v10 = vsel %vm13581_vm13, 0, %v4949_v6 }
 0x257   : > { %v4119_v7 = vpop.f32.mrf.mxu1  ;;  %v4449_v51 = vadd.f32 %v4448_v43, %v4447_v1  ;;  %4951 = vst [vmem:[#allocation3 + $0xa4] sm:$0x1] %v4950_v10 }
 0x258   : > { %v4120_v57 = vadd.f32 %v4119_v7, %v17533_v60  ;;  %v4456_v15 = vsel %vm17477_vm8, %v13925_v25, 0.0  ;;  %v4902_v7 = vld [vmem:[#allocation3 + $0xa8] sm:$0x1] }
 0x259   : > { %v4451_v0 = vadd.f32 %v4450_v56, %v4449_v51  ;;  %v4903_v40 = vsel %vm13568_vm11, 0, %v4902_v7  ;;  %v17535_v60 = vld [vmem:[#allocation9_spill] sm:$0xff] }
 0x25a   : > { %v4209_v20 = vadd.f32 %v13826_v42, %v4120_v57  ;;  %v4401_v49 = vpop.f32.mrf.mxu0  ;;  %v4454_v42 = vsel %vm17477_vm8, %v13942_v9, 0.0  ;;  %4904 = vst [vmem:[#allocation3 + $0xa8] sm:$0x1] %v4903_v40  ;;  %v4219_v57 = vadd.f32 %v13872_v33, %v17535_v60  ;;  %v4464_v33 = vsel %vm17477_vm8, %v13869_v59, 0.0 }
 0x25b   : > { %v4453_v19 = vadd.f32 %v4452_v27, %v4451_v0  ;;  %v17536_v27 = vld [vmem:[#allocation11_spill] sm:$0xff] }
 0x25c   : > { %v4298_v34 = vadd.f32 %v13828_v38, %v4209_v20  ;;  %v4226_v61 = vpop.f32.mrf.mxu2  ;;  %v4315_v3 = vpop.f32.mrf.mxu3  ;;  %v17534_v38 = vld [vmem:[#allocation8_spill] sm:$0xff]  ;;  %v4308_v1 = vadd.f32 %v13874_v21, %v4219_v57  ;;  %v17540_v57 = vld [vmem:[#allocation15_spill] sm:$0xff] }
 0x25d   : > { %v4214_v32 = vadd.f32 %v13847_v54, %v17534_v38  ;;  %v4455_v29 = vadd.f32 %v4454_v42, %v4453_v19  ;;  %v4460_v54 = vsel %vm17477_vm8, %v13844_v36, 0.0 }
 0x25e   : > { %v13950_v18 = vadd.f32 %v13833_v11, %v4298_v34  ;;  %v4952_v34 = vld [vmem:[#allocation3 + $0xb0] sm:$0x1]  ;;  %v13979_v0 = vadd.f32 %v13889_v13, %v4308_v1  ;;  %v4468_v13 = vsel %vm17477_vm8, %v13917_v5, 0.0 }
 0x25f   : > { %v4457_v11 = vadd.f32 %v4456_v15, %v4455_v29  ;;  %v4303_v35 = vadd.f32 %v13849_v58, %v4214_v32  ;;  %v4953_v51 = vsel %vm13581_vm13, 0, %v4952_v34  ;;  %v17537_v32 = vld [vmem:[#allocation12_spill] sm:$0xff] }
 0x260   : > { %v4458_v28 = vsel %vm17477_vm8, %v13950_v18, 0.0  ;;  %4954 = vst [vmem:[#allocation3 + $0xb0] sm:$0x1] %v4953_v51  ;;  %v4466_v38 = vsel %vm17477_vm8, %v13979_v0, 0.0  ;;  %v4227_v15 = vadd.f32 %v4226_v61, %v17537_v32  ;;  %v17541_v51 = vld [vmem:[#allocation17_spill] sm:$0xff] }
 0x261   : > { %v4459_v22 = vadd.f32 %v4458_v28, %v4457_v11  ;;  %v13966_v46 = vadd.f32 %v13858_v31, %v4303_v35  ;;  %v4224_v31 = vadd.f32 %v4223_v48, %v17536_v27  ;;  %v4905_v48 = vld [vmem:[#allocation3 + $0xb4] sm:$0x1] }
 0x262   : > { %v4404_v30 = vpop.f32.mrf.mxu0  ;;  %v4906_v28 = vsel %vm13568_vm11, 0, %v4905_v48  ;;  %v4316_v35 = vadd.f32 %v4315_v3, %v4227_v15  ;;  %v17542_v15 = vld [vmem:[#allocation18_spill] sm:$0xff] }
 0x263   : > { %v4461_v44 = vadd.f32 %v4460_v54, %v4459_v22  ;;  %v4462_v58 = vsel %vm17477_vm8, %v13966_v46, 0.0  ;;  %v4313_v21 = vadd.f32 %v13920_v17, %v4224_v31  ;;  %4907 = vst [vmem:[#allocation3 + $0xb4] sm:$0x1] %v4906_v28  ;;  %v17538_v22 = vld [vmem:[#allocation13_spill] sm:$0xff]  ;;  %v17539_v17 = vld [vmem:[#allocation14_spill] sm:$0xff] }
 0x264   : > { %v4228_v62 = vpop.f32.mrf.mxu2  ;;  %v4317_v50 = vpop.f32.mrf.mxu3  ;;  %v4955_v31 = vld [vmem:[#allocation3 + $0xbc] sm:$0x1] }
 0x265   : > { %v4463_v56 = vadd.f32 %v4462_v58, %v4461_v44  ;;  %v13987_v11 = vadd.f32 %v4401_v49, %v4313_v21  ;;  %v4229_v7 = vadd.f32 %v4228_v62, %v17538_v22  ;;  %v13996_v49 = vadd.f32 %v4404_v30, %v4316_v35 }
 0x267   : > { %v4465_v6 = vadd.f32 %v4464_v33, %v4463_v56  ;;  %v4470_v1 = vsel %vm17477_vm8, %v13987_v11, 0.0  ;;  %v4318_v56 = vadd.f32 %v4317_v50, %v4229_v7  ;;  %v4472_v33 = vsel %vm17477_vm8, %v13996_v49, 0.0 }
 0x269   : > { %v4467_v29 = vadd.f32 %v4466_v38, %v4465_v6 }
 0x26a   : > { %v4406_v37 = vpop.f32.mrf.mxu0 }
 0x26b   : > { %v4469_v54 = vadd.f32 %v4468_v13, %v4467_v29  ;;  %v14003_v6 = vadd.f32 %v4406_v37, %v4318_v56 }
 0x26c   : > { %v4231_v43 = vpop.f32.mrf.mxu2  ;;  %v4320_v20 = vpop.f32.mrf.mxu3 }
 0x26d   : > { %v4232_v40 = vadd.f32 %v4231_v43, %v17539_v17  ;;  %v4471_v3 = vadd.f32 %v4470_v1, %v4469_v54  ;;  %v4956_v43 = vsel %vm13581_vm13, 0, %v4955_v31  ;;  %v4474_v29 = vsel %vm17477_vm8, %v14003_v6, 0.0 }
 0x26e   : > { %4957 = vst [vmem:[#allocation3 + $0xbc] sm:$0x1] %v4956_v43 }
 0x26f   : > { %v4321_v34 = vadd.f32 %v4320_v20, %v4232_v40  ;;  %v4473_v21 = vadd.f32 %v4472_v33, %v4471_v3 }
 0x271   : > { %v4475_v37 = vadd.f32 %v4474_v29, %v4473_v21 }
 0x272   : > { %v4409_v42 = vpop.f32.mrf.mxu0 }
 0x274   : > { %v4233_v10 = vpop.f32.mrf.mxu2  ;;  %v4322_v19 = vpop.f32.mrf.mxu3 }
 0x275   : > { %v4234_v61 = vadd.f32 %v4233_v10, %v17540_v57  ;;  %v14005_v10 = vadd.f32 %v4409_v42, %v4321_v34  ;;  %v4908_v42 = vld [vmem:[#allocation3 + $0xc0] sm:$0x1] }
 0x276   : > { %v4909_v22 = vsel %vm13568_vm11, 0, %v4908_v42 }
 0x277   : > { %v4323_v62 = vadd.f32 %v4322_v19, %v4234_v61  ;;  %v4476_v48 = vsel %vm17477_vm8, %v14005_v10, 0.0  ;;  %4910 = vst [vmem:[#allocation3 + $0xc0] sm:$0x1] %v4909_v22 }
 0x278   : > { %v4477_v7 = vadd.f32 %v4476_v48, %v4475_v37 }
 0x27a   : > { %v4411_v60 = vpop.f32.mrf.mxu0 }
 0x27b   : > { %v14007_v20 = vadd.f32 %v4411_v60, %v4323_v62  ;;  %v17544_v62 = vld [vmem:[#allocation22_spill] sm:$0xff] }
 0x27c   : > { %v4236_v44 = vpop.f32.mrf.mxu2  ;;  %v4325_v58 = vpop.f32.mrf.mxu3 }
 0x27d   : > { %v4237_v27 = vadd.f32 %v4236_v44, %v17541_v51  ;;  %v4478_v13 = vsel %vm17477_vm8, %v14007_v20, 0.0  ;;  %v17543_v44 = vld [vmem:[#allocation20_spill] sm:$0xff] }
 0x27e   : > { %v4479_v40 = vadd.f32 %v4478_v13, %v4477_v7 }
 0x27f   : > { %v4326_v30 = vadd.f32 %v4325_v58, %v4237_v27 }
 0x282   : > { %v4414_v50 = vpop.f32.mrf.mxu0 }
 0x283   : > { %v14014_v28 = vadd.f32 %v4414_v50, %v4326_v30 }
 0x284   : > { %v4238_v38 = vpop.f32.mrf.mxu2  ;;  %v4327_v32 = vpop.f32.mrf.mxu3 }
 0x285   : > { %v4239_v19 = vadd.f32 %v4238_v38, %v17542_v15  ;;  %v4480_v17 = vsel %vm17477_vm8, %v14014_v28, 0.0 }
 0x286   : > { %v4481_v61 = vadd.f32 %v4480_v17, %v4479_v40  ;;  %v17546_v17 = vld [vmem:[#allocation25_spill] sm:$0xff] }
 0x287   : > { %v4328_v35 = vadd.f32 %v4327_v32, %v4239_v19  ;;  %v17545_v19 = vld [vmem:[#allocation24_spill] sm:$0xff] }
 0x28a   : > { %v4416_v54 = vpop.f32.mrf.mxu0 }
 0x28b   : > { %v4417_v60 = vadd.f32 %v4416_v54, %v4328_v35  ;;  %v11724_v54 = vmov 256.0  }
 0x28c   : > { %v4241_v57 = vpop.f32.mrf.mxu2  ;;  %v4330_v1 = vpop.f32.mrf.mxu3  ;;  %11652 = vrcp.f32 %v11724_v54 }
 0x28d   : > { %v4242_v58 = vadd.f32 %v4241_v57, %v17543_v44  ;;  %v4482_v56 = vsel %vm17477_vm8, %v4417_v60, 0.0 }
 0x28e   : > { %v4483_v34 = vadd.f32 %v4482_v56, %v4481_v61 }
 0x28f   : > { %v4331_v51 = vadd.f32 %v4330_v1, %v4242_v58 }
 0x292   : > { %v4419_v27 = vpop.f32.mrf.mxu0  ;;  %v11653_v1 = vpop.eup %11652 }
 0x293   : > { %v4420_v3 = vadd.f32 %v4419_v27, %v4331_v51  ;;  %v4499_v27 = vmul.f32 256.0, %v11653_v1  ;;  %vm4503_vm14 = vweird.f32 %v11653_v1 }
 0x294   : > { %v4243_v31 = vpop.f32.mrf.mxu2  ;;  %v4332_v33 = vpop.f32.mrf.mxu3 }
 0x295   : > { %v4244_v43 = vadd.f32 %v4243_v31, %v17544_v62  ;;  %v4484_v30 = vsel %vm17477_vm8, %v4420_v3, 0.0 }
 0x296   : > { %v4485_v21 = vadd.f32 %v4484_v30, %v4483_v34 }
 0x297   : > { %v4333_v50 = vadd.f32 %v4332_v33, %v4244_v43  ;;  %v4500_v43 = vsub.f32 1.0, %v4499_v27 }
 0x29a   : > { %v4421_v38 = vpop.f32.mrf.mxu0 }
 0x29b   : > { %v4422_v32 = vadd.f32 %v4421_v38, %v4333_v50 }
 0x29c   : > { %v4246_v15 = vpop.f32.mrf.mxu2  ;;  %v4335_v48 = vpop.f32.mrf.mxu3 }
 0x29d   : > { %v4247_v29 = vadd.f32 %v4246_v15, %v17545_v19  ;;  %v4486_v37 = vsel %vm17477_vm8, %v4422_v32, 0.0 }
 0x29e   : > { %v4487_v42 = vadd.f32 %v4486_v37, %v4485_v21  ;;  %v4501_v21 = vmul.f32 %v11653_v1, %v4500_v43 }
 0x29f   : > { %v4336_v13 = vadd.f32 %v4335_v48, %v4247_v29 }
 0x2a0   : > { %v4502_v15 = vadd.f32 %v11653_v1, %v4501_v21 }
 0x2a2   : > { %v4424_v35 = vpop.f32.mrf.mxu0  ;;  %v14031_v29 = vsel %vm4503_vm14, %v11653_v1, %v4502_v15 }
 0x2a3   : > { %v4425_v22 = vadd.f32 %v4424_v35, %v4336_v13  ;;  %17547 = vst [vmem:[#allocation26_spill] sm:$0xff] %v14031_v29 }
 0x2a4   : > { %v4248_v7 = vpop.f32.mrf.mxu2  ;;  %v4337_v44 = vpop.f32.mrf.mxu3 }
 0x2a5   : > { %v4249_v40 = vadd.f32 %v4248_v7, %v17546_v17  ;;  %v4488_v57 = vsel %vm17477_vm8, %v4425_v22, 0.0 }
 0x2a6   : > { %v4489_v61 = vadd.f32 %v4488_v57, %v4487_v42 }
 0x2a7   : > { %v4338_v58 = vadd.f32 %v4337_v44, %v4249_v40 }
 0x2aa   : > { %v4426_v56 = vpop.f32.mrf.mxu0 }
 0x2ab   : > { %v4427_v34 = vadd.f32 %v4426_v56, %v4338_v58 }
 0x2ad   : > { %v4490_v51 = vsel %vm17477_vm8, %v4427_v34, 0.0 }
 0x2ae   : > { %v4491_v31 = vadd.f32 %v4490_v51, %v4489_v61 }
 0x2b0   : > { %v4492_v62 = vrot.slane %v4491_v31, 4 }
 0x2b2   : > { %v4493_v33 = vadd.f32 %v4492_v62, %v4491_v31 }
 0x2b4   : > { %v4494_v30 = vrot.slane %v4493_v33, 2 }
 0x2b6   : > { %v4495_v50 = vadd.f32 %v4494_v30, %v4493_v33 }
 0x2b8   : > { %v4496_v38 = vrot.slane %v4495_v50, 1 }
 0x2ba   : > { %v4497_v19 = vadd.f32 %v4496_v38, %v4495_v50 }
 0x2bc   : > { %v14034_v48 = vmul.f32 %v14031_v29, %v4497_v19 }
 0x2be   : > { %v14038_v37 = vsub.f32 %v14014_v28, %v14034_v48  ;;  %v14041_v42 = vsub.f32 %v4417_v60, %v14034_v48  ;;  %v14044_v13 = vsub.f32 %v4420_v3, %v14034_v48  ;;  %v14047_v35 = vsub.f32 %v4422_v32, %v14034_v48 }
 0x2bf   : > { %v14050_v7 = vsub.f32 %v4425_v22, %v14034_v48  ;;  %v14053_v17 = vsub.f32 %v4427_v34, %v14034_v48  ;;  %v14057_v40 = vsub.f32 %v17528_v16, %v14034_v48  ;;  %v14061_v28 = vsub.f32 %v13867_v4, %v14034_v48 }
 0x2c0   : > { %v14065_v60 = vsub.f32 %v13693_v39, %v14034_v48  ;;  %v14069_v3 = vsub.f32 %v13717_v2, %v14034_v48  ;;  %v14077_v16 = vsub.f32 %v13745_v8, %v14034_v48  ;;  %v14083_v39 = vsub.f32 %v13765_v26, %v14034_v48 }
 0x2c1   : > { %v4538_v32 = vmul.f32 %v14057_v40, %v14057_v40  ;;  %v4539_v22 = vmul.f32 %v14061_v28, %v14061_v28  ;;  %v14091_v44 = vsub.f32 %v13787_v24, %v14034_v48  ;;  %v14098_v26 = vsub.f32 %v13806_v14, %v14034_v48 }
 0x2c2   : > { %v4540_v4 = vmul.f32 %v14065_v60, %v14065_v60  ;;  %v4541_v2 = vmul.f32 %v14069_v3, %v14069_v3  ;;  %v4542_v8 = vmul.f32 %v14077_v16, %v14077_v16  ;;  %v4543_v56 = vmul.f32 %v14083_v39, %v14083_v39 }
 0x2c3   : > { %v4570_v54 = vsel %vm17477_vm8, %v4538_v32, 0.0  ;;  %v4571_v57 = vsel %vm17477_vm8, %v4539_v22, 0.0  ;;  %v14105_v24 = vsub.f32 %v13824_v45, %v14034_v48  ;;  %v4544_v27 = vmul.f32 %v14091_v44, %v14091_v44 }
 0x2c4   : > { %v4572_v61 = vadd.f32 %v4571_v57, %v4570_v54  ;;  %v4573_v58 = vsel %vm17477_vm8, %v4540_v4, 0.0  ;;  %v4575_v34 = vsel %vm17477_vm8, %v4541_v2, 0.0  ;;  %v4577_v31 = vsel %vm17477_vm8, %v4542_v8, 0.0 }
 0x2c5   : > { %v14112_v14 = vsub.f32 %v13913_v41, %v14034_v48  ;;  %v4545_v43 = vmul.f32 %v14098_v26, %v14098_v26  ;;  %v4579_v33 = vsel %vm17477_vm8, %v4543_v56, 0.0  ;;  %v14119_v45 = vsub.f32 %v13852_v53, %v14034_v48 }
 0x2c6   : > { %v4574_v1 = vadd.f32 %v4573_v58, %v4572_v61  ;;  %v4546_v21 = vmul.f32 %v14105_v24, %v14105_v24  ;;  %v4581_v50 = vsel %vm17477_vm8, %v4544_v27, 0.0  ;;  %v14126_v41 = vsub.f32 %v13930_v47, %v14034_v48 }
 0x2c7   : > { %v4547_v15 = vmul.f32 %v14112_v14, %v14112_v14  ;;  %v4583_v19 = vsel %vm17477_vm8, %v4545_v43, 0.0  ;;  %v14133_v53 = vsub.f32 %v13877_v63, %v14034_v48  ;;  %v4548_v22 = vmul.f32 %v14119_v45, %v14119_v45 }
 0x2c8   : > { %v4576_v51 = vadd.f32 %v4575_v34, %v4574_v1  ;;  %v4585_v4 = vsel %vm17477_vm8, %v4546_v21, 0.0  ;;  %v14140_v47 = vsub.f32 %v13942_v9, %v14034_v48  ;;  %v4549_v54 = vmul.f32 %v14126_v41, %v14126_v41 }
 0x2c9   : > { %v4587_v57 = vsel %vm17477_vm8, %v4547_v15, 0.0  ;;  %v14147_v63 = vsub.f32 %v13925_v25, %v14034_v48  ;;  %v4550_v8 = vmul.f32 %v14133_v53, %v14133_v53  ;;  %v4589_v58 = vsel %vm17477_vm8, %v4548_v22, 0.0 }
 0x2ca   : > { %v4578_v62 = vadd.f32 %v4577_v31, %v4576_v51  ;;  %v14154_v9 = vsub.f32 %v13950_v18, %v14034_v48  ;;  %v4551_v56 = vmul.f32 %v14140_v47, %v14140_v47  ;;  %v4591_v34 = vsel %vm17477_vm8, %v4549_v54, 0.0 }
 0x2cb   : > { %v14161_v25 = vsub.f32 %v13844_v36, %v14034_v48  ;;  %v4552_v27 = vmul.f32 %v14147_v63, %v14147_v63  ;;  %v4593_v31 = vsel %vm17477_vm8, %v4550_v8, 0.0  ;;  %v14168_v18 = vsub.f32 %v13966_v46, %v14034_v48 }
 0x2cc   : > { %v4580_v30 = vadd.f32 %v4579_v33, %v4578_v62  ;;  %v4553_v43 = vmul.f32 %v14154_v9, %v14154_v9  ;;  %v4595_v33 = vsel %vm17477_vm8, %v4551_v56, 0.0  ;;  %v14175_v36 = vsub.f32 %v13869_v59, %v14034_v48 }
 0x2cd   : > { %v4554_v21 = vmul.f32 %v14161_v25, %v14161_v25  ;;  %v14182_v46 = vsub.f32 %v13979_v0, %v14034_v48  ;;  %v4555_v15 = vmul.f32 %v14168_v18, %v14168_v18  ;;  %v14189_v59 = vsub.f32 %v13917_v5, %v14034_v48 }
 0x2ce   : > { %v4582_v38 = vadd.f32 %v4581_v50, %v4580_v30  ;;  %v4597_v50 = vsel %vm17477_vm8, %v4552_v27, 0.0  ;;  %v4556_v22 = vmul.f32 %v14175_v36, %v14175_v36  ;;  %v14196_v0 = vsub.f32 %v13987_v11, %v14034_v48 }
 0x2cf   : > { %v4557_v54 = vmul.f32 %v14182_v46, %v14182_v46  ;;  %v14203_v5 = vsub.f32 %v13996_v49, %v14034_v48  ;;  %v4558_v8 = vmul.f32 %v14189_v59, %v14189_v59  ;;  %v14210_v11 = vsub.f32 %v14003_v6, %v14034_v48 }
 0x2d0   : > { %v4584_v32 = vadd.f32 %v4583_v19, %v4582_v38  ;;  %v4599_v19 = vsel %vm17477_vm8, %v4553_v43, 0.0  ;;  %v4559_v56 = vmul.f32 %v14196_v0, %v14196_v0  ;;  %v14217_v49 = vsub.f32 %v14005_v10, %v14034_v48 }
 0x2d1   : > { %v4560_v27 = vmul.f32 %v14203_v5, %v14203_v5  ;;  %v14224_v6 = vsub.f32 %v14007_v20, %v14034_v48  ;;  %v4561_v43 = vmul.f32 %v14210_v11, %v14210_v11  ;;  %v4564_v20 = vmul.f32 %v14038_v37, %v14038_v37 }
 0x2d2   : > { %v4586_v2 = vadd.f32 %v4585_v4, %v4584_v32  ;;  %v4601_v4 = vsel %vm17477_vm8, %v4554_v21, 0.0  ;;  %v4562_v10 = vmul.f32 %v14217_v49, %v14217_v49 }
 0x2d3   : > { %v4613_v21 = vsel %vm17477_vm8, %v4560_v27, 0.0  ;;  %v4569_v27 = vmul.f32 %v14053_v17, %v14053_v17 }
 0x2d4   : > { %v4588_v61 = vadd.f32 %v4587_v57, %v4586_v2  ;;  %v4603_v57 = vsel %vm17477_vm8, %v4555_v15, 0.0  ;;  %v4615_v15 = vsel %vm17477_vm8, %v4561_v43, 0.0  ;;  %v4617_v48 = vsel %vm17477_vm8, %v4562_v10, 0.0 }
 0x2d6   : > { %v4590_v1 = vadd.f32 %v4589_v58, %v4588_v61  ;;  %v4605_v58 = vsel %vm17477_vm8, %v4556_v22, 0.0  ;;  %v4565_v22 = vmul.f32 %v14041_v42, %v14041_v42 }
 0x2d8   : > { %v4592_v51 = vadd.f32 %v4591_v34, %v4590_v1  ;;  %v4607_v34 = vsel %vm17477_vm8, %v4557_v54, 0.0  ;;  %v4566_v54 = vmul.f32 %v14044_v13, %v14044_v13 }
 0x2da   : > { %v4594_v62 = vadd.f32 %v4593_v31, %v4592_v51  ;;  %v4609_v31 = vsel %vm17477_vm8, %v4558_v8, 0.0  ;;  %v4567_v8 = vmul.f32 %v14047_v35, %v14047_v35 }
 0x2dc   : > { %v4596_v30 = vadd.f32 %v4595_v33, %v4594_v62  ;;  %v4611_v33 = vsel %vm17477_vm8, %v4559_v56, 0.0  ;;  %v4568_v56 = vmul.f32 %v14050_v7, %v14050_v7 }
 0x2de   : > { %v4598_v38 = vadd.f32 %v4597_v50, %v4596_v30  ;;  %v4629_v43 = vsel %vm17477_vm8, %v4568_v56, 0.0 }
 0x2e0   : > { %v4600_v32 = vadd.f32 %v4599_v19, %v4598_v38  ;;  %v4563_v38 = vmul.f32 %v14224_v6, %v14224_v6 }
 0x2e2   : > { %v4602_v2 = vadd.f32 %v4601_v4, %v4600_v32  ;;  %v4619_v4 = vsel %vm17477_vm8, %v4563_v38, 0.0 }
 0x2e4   : > { %v4604_v61 = vadd.f32 %v4603_v57, %v4602_v2  ;;  %v4621_v57 = vsel %vm17477_vm8, %v4564_v20, 0.0 }
 0x2e6   : > { %v4606_v1 = vadd.f32 %v4605_v58, %v4604_v61  ;;  %v4623_v58 = vsel %vm17477_vm8, %v4565_v22, 0.0 }
 0x2e8   : > { %v4608_v51 = vadd.f32 %v4607_v34, %v4606_v1  ;;  %v4625_v34 = vsel %vm17477_vm8, %v4566_v54, 0.0 }
 0x2ea   : > { %v4610_v62 = vadd.f32 %v4609_v31, %v4608_v51  ;;  %v4627_v31 = vsel %vm17477_vm8, %v4567_v8, 0.0 }
 0x2ec   : > { %v4612_v30 = vadd.f32 %v4611_v33, %v4610_v62 }
 0x2ee   : > { %v4614_v50 = vadd.f32 %v4613_v21, %v4612_v30  ;;  %v4631_v30 = vsel %vm17477_vm8, %v4569_v27, 0.0 }
 0x2f0   : > { %v4616_v19 = vadd.f32 %v4615_v15, %v4614_v50 }
 0x2f2   : > { %v4618_v32 = vadd.f32 %v4617_v48, %v4616_v19  ;;  %v4958_v48 = vld [vmem:[#allocation3 + $0xc8] sm:$0x1] }
 0x2f4   : > { %v4620_v2 = vadd.f32 %v4619_v4, %v4618_v32  ;;  %v4959_v32 = vsel %vm13581_vm13, 0, %v4958_v48  ;;  %v5494_v4 = vld [vmem:[#allocation3 + $0x4] sm:$0xf]  ;;  %vm14340_vm13 = vmor %vm4861_vm10, %vm4993_vm3 }
 0x2f5   : > { %4960 = vst [vmem:[#allocation3 + $0xc8] sm:$0x1] %v4959_v32  ;;  %v5551_v54 = vshll.u32 %v5494_v4, 16 }
 0x2f6   : > { %v4622_v61 = vadd.f32 %v4621_v57, %v4620_v2  ;;  %v5555_v57 = vshrl.u32 %v5494_v4, 16 }
 0x2f8   : > { %v4624_v1 = vadd.f32 %v4623_v58, %v4622_v61  ;;  %v14258_v61 = vrot.slane %v5551_v54, 5  ;;  %v5557_v8 = vrot.slane %v5555_v57, 4  ;;  %v5495_v58 = vld [vmem:[#allocation3 + $0x8] sm:$0x1] }
 0x2f9   : > { %v5561_v56 = vshll.u32 %v5495_v58, 16 }
 0x2fa   : > { %v4626_v51 = vadd.f32 %v4625_v34, %v4624_v1  ;;  %v5558_v1 = vor.u32 %v5557_v8, %v14258_v61 }
 0x2fc   : > { %v4628_v62 = vadd.f32 %v4627_v31, %v4626_v51  ;;  %v5559_v34 = vrot.slane %v5558_v1, 4  ;;  %v5563_v51 = vrot.slane %v5561_v56, 5 }
 0x2fe   : > { %v4630_v33 = vadd.f32 %v4629_v43, %v4628_v62  ;;  %v5564_v12 = vsel %vm11842_vm2, %v5559_v34, %v5563_v51 }
 0x2ff   : > { %5927 = vrot.lane.b32.xlu0 %v5564_v12, %s11722_s22 }
 0x300   : > { %v4632_v10 = vadd.f32 %v4631_v30, %v4630_v33 }
 0x302   : > { %v4633_v21 = vrot.slane %v4632_v10, 4 }
 0x304   : > { %v4634_v50 = vadd.f32 %v4633_v21, %v4632_v10  ;;  %v14267_v10 = vld [vmem:[%s17470_s4] ss:$0 sm:$0xff] }
 0x306   : > { %v4635_v38 = vrot.slane %v4634_v50, 2 }
 0x308   : > { %v4636_v15 = vadd.f32 %v4635_v38, %v4634_v50  ;;  %v14274_v50 = vld [vmem:[%s17471_s5] ss:$0 sm:$0xff] }
 0x30a   : > { %v4637_v19 = vrot.slane %v4636_v15, 1 }
 0x30c   : > { %v4638_v20 = vadd.f32 %v4637_v19, %v4636_v15 }
 0x30e   : > { %v4639_v22 = vmul.f32 %v4638_v20, %v14031_v29 }
 0x310   : > { %v4640_v2 = vadd.f32 1e-05, %v4639_v22 }
 0x312   : > { %11654 = vrsqrt.f32 %v4640_v2  ;;  %vm4647_vm0 = vweird.f32 %v4640_v2 }
 0x318   : > { %v11655_v27 = vpop.eup %11654 }
 0x319   : > { %v4642_v31 = vmul.f32 %v11655_v27, %v4640_v2  ;;  %vm4648_vm15 = vweird.f32 %v11655_v27 }
 0x31a   : > { %vm4649_vm1 = vmor %vm4647_vm0, %vm4648_vm15 }
 0x31b   : > { %v4643_v62 = vmul.f32 %v11655_v27, %v4642_v31 }
 0x31d   : > { %v4644_v43 = vmul.f32 0.5, %v4643_v62 }
 0x31f   : > { %v4645_v33 = vsub.f32 1.5, %v4644_v43 }
 0x321   : > { %v4646_v30 = vmul.f32 %v11655_v27, %v4645_v33 }
 0x323   : > { %v14269_v21 = vsel %vm4649_vm1, %v11655_v27, %v4646_v30 }
 0x324   : > { %v4681_v38 = vmul.f32 %v14269_v21, %v14050_v7  ;;  %v4682_v15 = vmul.f32 %v14269_v21, %v14053_v17  ;;  %v14286_v22 = vmul.f32 %v14269_v21, %v14057_v40  ;;  %v14290_v17 = vmul.f32 %v14269_v21, %v14061_v28 }
 0x325   : > { %v14294_v2 = vmul.f32 %v14269_v21, %v14065_v60  ;;  %v14298_v54 = vmul.f32 %v14269_v21, %v14069_v3  ;;  %v14302_v40 = vmul.f32 %v14269_v21, %v14077_v16  ;;  %v14306_v58 = vmul.f32 %v14269_v21, %v14083_v39 }
 0x326   : > { %v4717_v19 = vmul.f32 %v14267_v10, %v4681_v38  ;;  %v4718_v20 = vmul.f32 %v14267_v10, %v4682_v15  ;;  %v14310_v28 = vmul.f32 %v14269_v21, %v14091_v44  ;;  %v4663_v3 = vmul.f32 %v14269_v21, %v14133_v53 }
 0x327   : > { %v4664_v56 = vmul.f32 %v14269_v21, %v14140_v47  ;;  %v4665_v16 = vmul.f32 %v14269_v21, %v14147_v63  ;;  %v4666_v34 = vmul.f32 %v14269_v21, %v14154_v9  ;;  %v4667_v39 = vmul.f32 %v14269_v21, %v14161_v25 }
 0x328   : > { %v4753_v48 = vadd.f32 %v14274_v50, %v4717_v19  ;;  %v4754_v32 = vadd.f32 %v14274_v50, %v4718_v20  ;;  %v4668_v44 = vmul.f32 %v14269_v21, %v14168_v18  ;;  %v4669_v53 = vmul.f32 %v14269_v21, %v14175_v36 }
 0x329   : > { %v4670_v47 = vmul.f32 %v14269_v21, %v14182_v46  ;;  %v4671_v63 = vmul.f32 %v14269_v21, %v14189_v59  ;;  %v4672_v9 = vmul.f32 %v14269_v21, %v14196_v0  ;;  %v4673_v25 = vmul.f32 %v14269_v21, %v14203_v5  ;;  %v5426_v59 = vld [vmem:[#allocation3 + $0xc8] sm:$0x1] }
 0x32a   : > { %vm4785_vm4 = vcmp.gt.f32.partialorder %v4753_v48, 0.0  ;;  %vm4786_vm9 = vcmp.gt.f32.partialorder %v4754_v32, 0.0  ;;  %v4817_v4 = vmul.f32 0.2, %v4753_v48  ;;  %v4818_v7 = vmul.f32 0.2, %v4754_v32 }
 0x32b   : > { %v4674_v18 = vmul.f32 %v14269_v21, %v14210_v11  ;;  %v4675_v36 = vmul.f32 %v14269_v21, %v14217_v49  ;;  %v4676_v0 = vmul.f32 %v14269_v21, %v14224_v6  ;;  %v4677_v5 = vmul.f32 %v14269_v21, %v14038_v37 }
 0x32c   : > { %v4849_v57 = vsel %vm4785_vm4, %v4753_v48, %v4817_v4  ;;  %v4850_v8 = vsel %vm4786_vm9, %v4754_v32, %v4818_v7  ;;  %v4678_v11 = vmul.f32 %v14269_v21, %v14041_v42  ;;  %v4679_v43 = vmul.f32 %v14269_v21, %v14044_v13 }
 0x32d   : > { %v4991_v60 = vpack.c.bf16 %v4849_v57, %v4849_v57  ;;  %v4992_v1 = vpack.c.bf16 %v4850_v8, %v4850_v8  ;;  %v4680_v38 = vmul.f32 %v14269_v21, %v14047_v35  ;;  %v4699_v19 = vmul.f32 %v14267_v10, %v4663_v3 }
 0x32e   : > { %v4700_v6 = vmul.f32 %v14267_v10, %v4664_v56  ;;  %v4701_v20 = vmul.f32 %v14267_v10, %v4665_v16  ;;  %v4702_v13 = vmul.f32 %v14267_v10, %v4666_v34  ;;  %v4703_v48 = vmul.f32 %v14267_v10, %v4667_v39 }
 0x32f   : > { %v5251_v51 = vshrl.u32 %v4991_v60, 16  ;;  %v5259_v27 = vshrl.u32 %v4992_v1, 16  ;;  %v5262_v62 = vshll.u32 %v4992_v1, 16  ;;  %v5254_v15 = vshll.u32 %v4991_v60, 16 }
 0x330   : > { %v4704_v35 = vmul.f32 %v14267_v10, %v4668_v44  ;;  %v4705_v32 = vmul.f32 %v14267_v10, %v4669_v53  ;;  %v4706_v4 = vmul.f32 %v14267_v10, %v4670_v47  ;;  %v4707_v7 = vmul.f32 %v14267_v10, %v4671_v63 }
 0x331   : > { %v5253_v12 = vrot.slane %v5251_v51, 7  ;;  %v5261_v31 = vrot.slane %v5259_v27, 7  ;;  %v4708_v57 = vmul.f32 %v14267_v10, %v4672_v9  ;;  %v4709_v8 = vmul.f32 %v14267_v10, %v4673_v25 }
 0x332   : > { %v4710_v60 = vmul.f32 %v14267_v10, %v4674_v18  ;;  %v4711_v1 = vmul.f32 %v14267_v10, %v4675_v36  ;;  %v4712_v3 = vmul.f32 %v14267_v10, %v4676_v0  ;;  %v4713_v56 = vmul.f32 %v14267_v10, %v4677_v5 }
 0x333   : > { %v5257_v49 = vrot.slane %v5253_v12, 4  ;;  %v5264_v33 = vor.u32 %v5262_v62, %v5261_v31  ;;  %v5266_v30 = vrot.slane %v5261_v31, 4  ;;  %v4714_v16 = vmul.f32 %v14267_v10, %v4678_v11 }
 0x334   : > { %v4715_v34 = vmul.f32 %v14267_v10, %v4679_v43  ;;  %v4658_v39 = vmul.f32 %v14269_v21, %v14098_v26  ;;  %v4659_v44 = vmul.f32 %v14269_v21, %v14105_v24  ;;  %v4716_v51 = vmul.f32 %v14267_v10, %v4680_v38 }
 0x335   : > { %v5265_v37 = vsel %vm14340_vm13, %v5257_v49, %v5264_v33  ;;  %v5427_v42 = vsel %vm13568_vm11, %v5266_v30, %v5426_v59  ;;  %v14381_v27 = vor.u32 %v5254_v15, %v5253_v12  ;;  %v4660_v53 = vmul.f32 %v14269_v21, %v14112_v14 }
 0x336   : > { %5425 = vst.msk [vmem:[#allocation3 + $0xc4] sm:$0xf] %vm17480_vm5, %v5265_v37  ;;  %v4661_v47 = vmul.f32 %v14269_v21, %v14119_v45  ;;  %v4662_v63 = vmul.f32 %v14269_v21, %v14126_v41  ;;  %v4687_v9 = vmul.f32 %v14267_v10, %v14286_v22  ;;  %v4688_v26 = vmul.f32 %v14267_v10, %v14290_v17 }
 0x337   : > { %5428 = vst [vmem:[#allocation3 + $0xc8] sm:$0x1] %v5427_v42  ;;  %v4689_v24 = vmul.f32 %v14267_v10, %v14294_v2  ;;  %v4690_v25 = vmul.f32 %v14267_v10, %v14298_v54  ;;  %v4691_v14 = vmul.f32 %v14267_v10, %v14302_v40  ;;  %v4692_v45 = vmul.f32 %v14267_v10, %v14306_v58 }
 0x338   : > { %v4693_v41 = vmul.f32 %v14267_v10, %v14310_v28  ;;  %v14404_v21 = vadd.f32 %v14274_v50, %v4699_v19  ;;  %v14407_v22 = vadd.f32 %v14274_v50, %v4700_v6  ;;  %v14410_v17 = vadd.f32 %v14274_v50, %v4701_v20 }
 0x339   : > { %v14413_v2 = vadd.f32 %v14274_v50, %v4702_v13  ;;  %v14416_v54 = vadd.f32 %v14274_v50, %v4703_v48  ;;  %v14419_v40 = vadd.f32 %v14274_v50, %v4704_v35  ;;  %v14422_v58 = vadd.f32 %v14274_v50, %v4705_v32 }
 0x33a   : > { %v14425_v28 = vadd.f32 %v14274_v50, %v4706_v4  ;;  %v14428_v18 = vadd.f32 %v14274_v50, %v4707_v7  ;;  %v14431_v12 = vadd.f32 %v14274_v50, %v4708_v57  ;;  %v14434_v31 = vadd.f32 %v14274_v50, %v4709_v8 }
 0x33b   : > { %v14437_v62 = vadd.f32 %v14274_v50, %v4710_v60  ;;  %v14440_v36 = vadd.f32 %v14274_v50, %v4711_v1  ;;  %v14443_v59 = vadd.f32 %v14274_v50, %v4712_v3  ;;  %v14446_v0 = vadd.f32 %v14274_v50, %v4713_v56 }
 0x33c   : > { %v14449_v5 = vadd.f32 %v14274_v50, %v4714_v16  ;;  %v14452_v11 = vadd.f32 %v14274_v50, %v4715_v34  ;;  %v14455_v43 = vadd.f32 %v14274_v50, %v4716_v51  ;;  %v4694_v49 = vmul.f32 %v14267_v10, %v4658_v39 }
 0x33d   : > { %v4695_v33 = vmul.f32 %v14267_v10, %v4659_v44  ;;  %v4696_v30 = vmul.f32 %v14267_v10, %v4660_v53  ;;  %v4697_v38 = vmul.f32 %v14267_v10, %v4661_v47  ;;  %v4698_v15 = vmul.f32 %v14267_v10, %v4662_v63 }
 0x33e   : > { %v4723_v19 = vadd.f32 %v14274_v50, %v4687_v9  ;;  %v4724_v6 = vadd.f32 %v14274_v50, %v4688_v26  ;;  %v4725_v20 = vadd.f32 %v14274_v50, %v4689_v24  ;;  %v14466_v37 = vadd.f32 %v14274_v50, %v4690_v25 }
 0x33f   : > { %v14469_v42 = vadd.f32 %v14274_v50, %v4691_v14  ;;  %v14472_v13 = vadd.f32 %v14274_v50, %v4692_v45  ;;  %v14475_v48 = vadd.f32 %v14274_v50, %v4693_v41  ;;  %v14478_v10 = vadd.f32 %v14274_v50, %v4694_v49 }
 0x340   : > { %v14481_v35 = vadd.f32 %v14274_v50, %v4695_v33  ;;  %v14484_v32 = vadd.f32 %v14274_v50, %v4696_v30  ;;  %v14487_v4 = vadd.f32 %v14274_v50, %v4697_v38  ;;  %v14490_v7 = vadd.f32 %v14274_v50, %v4698_v15 }
 0x341   : > { %vm4755_vm10 = vcmp.gt.f32.partialorder %v4723_v19, 0.0  ;;  %vm4756_vm14 = vcmp.gt.f32.partialorder %v4724_v6, 0.0  ;;  %vm4759_vm1 = vcmp.gt.f32.partialorder %v14469_v42, 0.0  ;;  %v4787_v57 = vmul.f32 0.2, %v4723_v19 }
 0x342   : > { %vm4764_vm7 = vcmp.gt.f32.partialorder %v14484_v32, 0.0  ;;  %v4788_v50 = vmul.f32 0.2, %v4724_v6  ;;  %vm4769_vm3 = vcmp.gt.f32.partialorder %v14410_v17, 0.0  ;;  %v4789_v8 = vmul.f32 0.2, %v4725_v20 }
 0x343   : > { %v4790_v60 = vmul.f32 0.2, %v14466_v37  ;;  %v4791_v1 = vmul.f32 0.2, %v14469_v42  ;;  %vm4774_vm15 = vcmp.gt.f32.partialorder %v14425_v28, 0.0  ;;  %vm4779_vm4 = vcmp.gt.f32.partialorder %v14440_v36, 0.0 }
 0x344   : > { %v4792_v3 = vmul.f32 0.2, %v14472_v13  ;;  %v4793_v56 = vmul.f32 0.2, %v14475_v48  ;;  %v4794_v16 = vmul.f32 0.2, %v14478_v10  ;;  %v4819_v51 = vsel %vm4755_vm10, %v4723_v19, %v4787_v57 }
 0x345   : > { %vm4780_vm5 = vcmp.gt.f32.partialorder %v14443_v59, 0.0  ;;  %v4795_v34 = vmul.f32 0.2, %v14481_v35  ;;  %v4796_v39 = vmul.f32 0.2, %v14484_v32  ;;  %vm4781_vm12 = vcmp.gt.f32.partialorder %v14446_v0, 0.0 }
 0x346   : > { %v4797_v44 = vmul.f32 0.2, %v14487_v4  ;;  %vm4782_vm0 = vcmp.gt.f32.partialorder %v14449_v5, 0.0  ;;  %v4798_v53 = vmul.f32 0.2, %v14490_v7  ;;  %v4820_v9 = vsel %vm4756_vm14, %v4724_v6, %v4788_v50 }
 0x347   : > { %v4799_v47 = vmul.f32 0.2, %v14404_v21  ;;  %v4800_v63 = vmul.f32 0.2, %v14407_v22  ;;  %v4801_v26 = vmul.f32 0.2, %v14410_v17  ;;  %v4823_v19 = vsel %vm4759_vm1, %v14469_v42, %v4791_v1 }
 0x348   : > { %v4802_v24 = vmul.f32 0.2, %v14413_v2  ;;  %v4803_v25 = vmul.f32 0.2, %v14416_v54  ;;  %vm17550_vm10 = vcmp.gt.f32.partialorder %v4725_v20, 0.0  ;;  %vm17551_vm9 = vcmp.gt.f32.partialorder %v14466_v37, 0.0 }
 0x349   : > { %v4821_v14 = vsel %vm17550_vm10, %v4725_v20, %v4789_v8  ;;  %v4804_v45 = vmul.f32 0.2, %v14419_v40  ;;  %v4805_v41 = vmul.f32 0.2, %v14422_v58  ;;  %v4806_v49 = vmul.f32 0.2, %v14425_v28 }
 0x34a   : > { %v4822_v33 = vsel %vm17551_vm9, %v14466_v37, %v4790_v60  ;;  %v4807_v30 = vmul.f32 0.2, %v14428_v18  ;;  %v4808_v38 = vmul.f32 0.2, %v14431_v12  ;;  %v4809_v15 = vmul.f32 0.2, %v14434_v31 }
 0x34b   : > { %v4810_v6 = vmul.f32 0.2, %v14437_v62  ;;  %v4811_v20 = vmul.f32 0.2, %v14440_v36  ;;  %v4812_v57 = vmul.f32 0.2, %v14443_v59 }
 0x34c   : > { %vm17552_vm14 = vcmp.gt.f32.partialorder %v14472_v13, 0.0  ;;  %v4813_v50 = vmul.f32 0.2, %v14446_v0  ;;  %v4814_v8 = vmul.f32 0.2, %v14449_v5  ;;  %vm17553_vm9 = vcmp.gt.f32.partialorder %v14475_v48, 0.0 }
 0x34d   : > { %v4824_v37 = vsel %vm17552_vm14, %v14472_v13, %v4792_v3  ;;  %v4815_v60 = vmul.f32 0.2, %v14452_v11  ;;  %v4825_v42 = vsel %vm17553_vm9, %v14475_v48, %v4793_v56  ;;  %v4816_v1 = vmul.f32 0.2, %v14455_v43 }
 0x34e   : > { %vm17554_vm1 = vcmp.gt.f32.partialorder %v14478_v10, 0.0  ;;  %vm17555_vm10 = vcmp.gt.f32.partialorder %v14481_v35, 0.0  ;;  %v4828_v3 = vsel %vm4764_vm7, %v14484_v32, %v4796_v39  ;;  %vm17556_vm14 = vcmp.gt.f32.partialorder %v14487_v4, 0.0 }
 0x34f   : > { %v4826_v29 = vsel %vm17554_vm1, %v14478_v10, %v4794_v16  ;;  %v4827_v13 = vsel %vm17555_vm10, %v14481_v35, %v4795_v34  ;;  %v4829_v55 = vsel %vm17556_vm14, %v14487_v4, %v4797_v44  ;;  %vm17557_vm9 = vcmp.gt.f32.partialorder %v14490_v7, 0.0 }
 0x350   : > { %v4830_v48 = vsel %vm17557_vm9, %v14490_v7, %v4798_v53  ;;  %vm17558_vm8 = vcmp.gt.f32.partialorder %v14404_v21, 0.0  ;;  %vm17559_vm1 = vcmp.gt.f32.partialorder %v14407_v22, 0.0  ;;  %v4833_v32 = vsel %vm4769_vm3, %v14410_v17, %v4801_v26 }
 0x351   : > { %v4831_v10 = vsel %vm17558_vm8, %v14404_v21, %v4799_v47  ;;  %v4832_v35 = vsel %vm17559_vm1, %v14407_v22, %v4800_v63  ;;  %vm17560_vm7 = vcmp.gt.f32.partialorder %v14413_v2, 0.0  ;;  %vm17561_vm10 = vcmp.gt.f32.partialorder %v14416_v54, 0.0 }
 0x352   : > { %v4834_v4 = vsel %vm17560_vm7, %v14413_v2, %v4802_v24  ;;  %v4835_v7 = vsel %vm17561_vm10, %v14416_v54, %v4803_v25  ;;  %vm17562_vm14 = vcmp.gt.f32.partialorder %v14419_v40, 0.0  ;;  %vm17563_vm8 = vcmp.gt.f32.partialorder %v14422_v58, 0.0 }
 0x353   : > { %v4836_v21 = vsel %vm17562_vm14, %v14419_v40, %v4804_v45  ;;  %v4837_v22 = vsel %vm17563_vm8, %v14422_v58, %v4805_v41  ;;  %v4838_v17 = vsel %vm4774_vm15, %v14425_v28, %v4806_v49  ;;  %vm17564_vm3 = vcmp.gt.f32.partialorder %v14428_v18, 0.0 }
 0x354   : > { %v4839_v2 = vsel %vm17564_vm3, %v14428_v18, %v4807_v30  ;;  %vm17565_vm9 = vcmp.gt.f32.partialorder %v14431_v12, 0.0  ;;  %vm17566_vm1 = vcmp.gt.f32.partialorder %v14434_v31, 0.0  ;;  %vm17567_vm7 = vcmp.gt.f32.partialorder %v14437_v62, 0.0 }
 0x355   : > { %v4840_v54 = vsel %vm17565_vm9, %v14431_v12, %v4808_v38  ;;  %v4841_v40 = vsel %vm17566_vm1, %v14434_v31, %v4809_v15  ;;  %v4842_v58 = vsel %vm17567_vm7, %v14437_v62, %v4810_v6  ;;  %v4843_v28 = vsel %vm4779_vm4, %v14440_v36, %v4811_v20 }
 0x356   : > { %v4844_v18 = vsel %vm4780_vm5, %v14443_v59, %v4812_v57  ;;  %v4845_v12 = vsel %vm4781_vm12, %v14446_v0, %v4813_v50  ;;  %v4846_v31 = vsel %vm4782_vm0, %v14449_v5, %v4814_v8  ;;  %vm17568_vm15 = vcmp.gt.f32.partialorder %v14452_v11, 0.0 }
 0x357   : > { %v4847_v62 = vsel %vm17568_vm15, %v14452_v11, %v4815_v60  ;;  %vm17569_vm10 = vcmp.gt.f32.partialorder %v14455_v43, 0.0  ;;  %v14630_v56 = vpack.c.bf16 %v4819_v51, %v4819_v51  ;;  %v4962_v16 = vpack.c.bf16 %v4820_v9, %v4820_v9 }
 0x358   : > { %v4848_v36 = vsel %vm17569_vm10, %v14455_v43, %v4816_v1  ;;  %v14632_v59 = vpack.c.bf16 %v4821_v14, %v4821_v14  ;;  %v4964_v34 = vpack.c.bf16 %v4822_v33, %v4822_v33  ;;  %v14634_v39 = vpack.c.bf16 %v4823_v19, %v4823_v19 }
 0x359   : > { %v4966_v0 = vpack.c.bf16 %v4824_v37, %v4824_v37  ;;  %v14636_v44 = vpack.c.bf16 %v4825_v42, %v4825_v42  ;;  %v14638_v5 = vpack.c.bf16 %v4826_v29, %v4826_v29  ;;  %v14640_v53 = vpack.c.bf16 %v4827_v13, %v4827_v13 }
 0x35a   : > { %v14642_v11 = vpack.c.bf16 %v4828_v3, %v4828_v3  ;;  %v14644_v47 = vpack.c.bf16 %v4829_v55, %v4829_v55  ;;  %v14646_v43 = vpack.c.bf16 %v4830_v48, %v4830_v48  ;;  %v14648_v51 = vpack.c.bf16 %v4831_v10, %v4831_v10 }
 0x35b   : > { %v14650_v63 = vpack.c.bf16 %v4832_v35, %v4832_v35  ;;  %v14652_v9 = vpack.c.bf16 %v4833_v32, %v4833_v32  ;;  %v14654_v26 = vpack.c.bf16 %v4834_v4, %v4834_v4  ;;  %v14656_v24 = vpack.c.bf16 %v4835_v7, %v4835_v7 }
 0x35c   : > { %v14658_v29 = vpack.c.bf16 %v4836_v21, %v4836_v21  ;;  %v14660_v25 = vpack.c.bf16 %v4837_v22, %v4837_v22  ;;  %v14662_v14 = vpack.c.bf16 %v4838_v17, %v4838_v17  ;;  %v14664_v55 = vpack.c.bf16 %v4839_v2, %v4839_v2 }
 0x35d   : > { %v14666_v45 = vpack.c.bf16 %v4840_v54, %v4840_v54  ;;  %v4996_v41 = vshrl.u32 %v14630_v56, 16  ;;  %v5004_v49 = vshrl.u32 %v4962_v16, 16  ;;  %v14669_v33 = vpack.c.bf16 %v4841_v40, %v4841_v40 }
 0x35e   : > { %v14671_v30 = vpack.c.bf16 %v4842_v58, %v4842_v58  ;;  %v5013_v38 = vshrl.u32 %v14632_v59, 16  ;;  %v5021_v15 = vshrl.u32 %v4964_v34, 16  ;;  %v5007_v20 = vshll.u32 %v4962_v16, 16 }
 0x35f   : > { %v4998_v19 = vrot.slane %v4996_v41, 7  ;;  %v14674_v6 = vrot.slane %v5004_v49, 7  ;;  %v5030_v57 = vshrl.u32 %v14634_v39, 16  ;;  %v5024_v8 = vshll.u32 %v4964_v34, 16 }
 0x360   : > { %v5015_v37 = vrot.slane %v5013_v38, 7  ;;  %v14677_v50 = vrot.slane %v5021_v15, 7  ;;  %v5038_v60 = vshrl.u32 %v4966_v0, 16  ;;  %v14679_v42 = vpack.c.bf16 %v4843_v28, %v4843_v28 }
 0x361   : > { %v14681_v1 = vpack.c.bf16 %v4844_v18, %v4844_v18  ;;  %v5002_v13 = vrot.slane %v4998_v19, 4  ;;  %v5009_v3 = vor.u32 %v5007_v20, %v14674_v6  ;;  %v14684_v48 = vpack.c.bf16 %v4845_v12, %v4845_v12 }
 0x362   : > { %v14686_v10 = vpack.c.bf16 %v4846_v31, %v4846_v31  ;;  %v5019_v35 = vrot.slane %v5015_v37, 4  ;;  %v5026_v32 = vor.u32 %v5024_v8, %v14677_v50  ;;  %v5032_v7 = vrot.slane %v5030_v57, 7 }
 0x363   : > { %v5010_v4 = vsel %vm14340_vm13, %v5002_v13, %v5009_v3  ;;  %v14691_v21 = vrot.slane %v5038_v60, 7  ;;  %v5041_v22 = vshll.u32 %v4966_v0, 16  ;;  %v14693_v17 = vpack.c.bf16 %v4847_v62, %v4847_v62  ;;  %v14862_v3 = vld [vmem:[#allocation3 + $0x6c] sm:$0xf] }
 0x364   : > { %v5027_v2 = vsel %vm14340_vm13, %v5019_v35, %v5026_v32  ;;  %v5047_v54 = vshrl.u32 %v14636_v44, 16  ;;  %v5055_v40 = vshrl.u32 %v14638_v5, 16  ;;  %vm17570_vm5 = vcmask 519168  }
 0x365   : > { %5320 = vst.msk [vmem:[#allocation3 + $0x10] sm:$0xf] %vm17570_vm5, %v5010_v4  ;;  %v14700_v58 = vpack.c.bf16 %v4848_v36, %v4848_v36  ;;  %v4999_v28 = vshll.u32 %v14630_v56, 16  ;;  %v5036_v18 = vrot.slane %v5032_v7, 4  ;;  %v5043_v12 = vor.u32 %v5041_v22, %v14691_v21  ;;  %vm17571_vm12 = vmmov %vm17570_vm5 }
 0x366   : > { %5327 = vst.msk [vmem:[#allocation3 + $0x1c] sm:$0xf] %vm17571_vm12, %v5027_v2  ;;  %v5049_v31 = vrot.slane %v5047_v54, 7  ;;  %v14705_v62 = vrot.slane %v5055_v40, 7  ;;  %v5058_v16 = vshll.u32 %v14638_v5, 16  ;;  %v5064_v34 = vshrl.u32 %v14640_v53, 16  ;;  %vm17572_vm0 = vmmov %vm17570_vm5 }
 0x367   : > { %v5016_v0 = vshll.u32 %v14632_v59, 16  ;;  %v5033_v41 = vshll.u32 %v14634_v39, 16  ;;  %v5044_v36 = vsel %vm14340_vm13, %v5036_v18, %v5043_v12  ;;  %v5072_v56 = vshrl.u32 %v14642_v11, 16  ;;  %vm17573_vm4 = vmmov %vm17572_vm0  ;;  %v5342_v18 = vld [vmem:[#allocation3 + $0x38] sm:$0x1] }
 0x368   : > { %v14714_v49 = vor.u32 %v4999_v28, %v4998_v19  ;;  %v5011_v38 = vrot.slane %v14674_v6, 4  ;;  %v5053_v15 = vrot.slane %v5049_v31, 4  ;;  %v5060_v20 = vor.u32 %v5058_v16, %v14705_v62  ;;  %5334 = vst.msk [vmem:[#allocation3 + $0x28] sm:$0xf] %vm17572_vm0, %v5044_v36  ;;  %vm17574_vm14 = vmmov %vm17572_vm0 }
 0x369   : > { %v5066_v5 = vrot.slane %v5064_v34, 7  ;;  %v14719_v57 = vrot.slane %v5072_v56, 7  ;;  %v5075_v59 = vshll.u32 %v14642_v11, 16  ;;  %v5081_v39 = vshrl.u32 %v14644_v47, 16  ;;  %vm17575_vm8 = vmmov %vm17572_vm0 }
 0x36a   : > { %v14723_v8 = vor.u32 %v5016_v0, %v5015_v37  ;;  %v5061_v19 = vsel %vm14340_vm13, %v5053_v15, %v5060_v20  ;;  %v5089_v60 = vshrl.u32 %v14646_v43, 16  ;;  %v5098_v13 = vshrl.u32 %v14648_v51, 16  ;;  %vm17576_vm3 = vmmov %vm17572_vm0 }
 0x36b   : > { %v5050_v35 = vshll.u32 %v14636_v44, 16  ;;  %v5070_v32 = vrot.slane %v5066_v5, 4  ;;  %v5077_v4 = vor.u32 %v5075_v59, %v14719_v57  ;;  %5341 = vst.msk [vmem:[#allocation3 + $0x34] sm:$0xf] %vm17573_vm4, %v5061_v19  ;;  %v5083_v11 = vrot.slane %v5081_v39, 7  ;;  %vm17577_vm9 = vmmov %vm17572_vm0 }
 0x36c   : > { %v14733_v22 = vrot.slane %v5089_v60, 7  ;;  %v5092_v37 = vshll.u32 %v14646_v43, 16  ;;  %v5100_v2 = vrot.slane %v5098_v13, 7  ;;  %v14736_v54 = vor.u32 %v5033_v41, %v5032_v7  ;;  %vm17578_vm1 = vmmov %vm17572_vm0 }
 0x36d   : > { %v5078_v40 = vsel %vm14340_vm13, %v5070_v32, %v5077_v4  ;;  %v5106_v28 = vshrl.u32 %v14650_v63, 16  ;;  %v5115_v44 = vshrl.u32 %v14652_v9, 16  ;;  %v5067_v12 = vshll.u32 %v14640_v53, 16  ;;  %vm17579_vm7 = vmmov %vm17572_vm0 }
 0x36e   : > { %v5087_v16 = vrot.slane %v5083_v11, 4  ;;  %v5094_v34 = vor.u32 %v5092_v37, %v14733_v22  ;;  %5348 = vst.msk [vmem:[#allocation3 + $0x40] sm:$0xf] %vm17574_vm14, %v5078_v40  ;;  %v5104_v43 = vrot.slane %v5100_v2, 4  ;;  %v5109_v7 = vshll.u32 %v14650_v63, 16  ;;  %vm17580_vm15 = vmmov %vm17572_vm0 }
 0x36f   : > { %v14746_v0 = vrot.slane %v5106_v28, 7  ;;  %v5117_v41 = vrot.slane %v5115_v44, 7  ;;  %v14749_v36 = vor.u32 %v5050_v35, %v5049_v31  ;;  %v5123_v53 = vshrl.u32 %v14654_v26, 16  ;;  %vm17581_vm10 = vmmov %vm17572_vm0 }
 0x370   : > { %v5095_v15 = vsel %vm14340_vm13, %v5087_v16, %v5094_v34  ;;  %v14755_v20 = vor.u32 %v5067_v12, %v5066_v5  ;;  %v5084_v59 = vshll.u32 %v14644_v47, 16  ;;  %v5132_v19 = vshrl.u32 %v14656_v24, 16  ;;  %vm17583_vm12 = vmmov %vm17572_vm0 }
 0x371   : > { %v5111_v39 = vor.u32 %v5109_v7, %v14746_v0  ;;  %5355 = vst.msk [vmem:[#allocation3 + $0x4c] sm:$0xf] %vm17575_vm8, %v5095_v15  ;;  %v5121_v63 = vrot.slane %v5117_v41, 4  ;;  %v14761_v31 = vrot.slane %v5123_v53, 7  ;;  %v5126_v60 = vshll.u32 %v14654_v26, 16  ;;  %vm17586_vm4 = vmmov %vm17578_vm1 }
 0x372   : > { %v5140_v13 = vshrl.u32 %v14658_v29, 16  ;;  %v5134_v32 = vrot.slane %v5132_v19, 7  ;;  %v5149_v47 = vshrl.u32 %v14660_v25, 16  ;;  %v5101_v4 = vshll.u32 %v14648_v51, 16  ;;  %vm17604_vm14 = vmmov %vm17578_vm1 }
 0x373   : > { %v5112_v5 = vsel %vm14340_vm13, %v5104_v43, %v5111_v39  ;;  %v5128_v37 = vor.u32 %v5126_v60, %v14761_v31  ;;  %v5143_v28 = vshll.u32 %v14658_v29, 16  ;;  %v14775_v26 = vor.u32 %v5084_v59, %v5083_v11  ;;  %vm17607_vm8 = vmmov %vm17578_vm1 }
 0x374   : > { %v14771_v40 = vrot.slane %v5140_v13, 7  ;;  %5362 = vst.msk [vmem:[#allocation3 + $0x58] sm:$0xf] %vm17576_vm3, %v5112_v5  ;;  %v5138_v44 = vrot.slane %v5134_v32, 4  ;;  %v5151_v12 = vrot.slane %v5149_v47, 7  ;;  %v5157_v16 = vshrl.u32 %v14662_v14, 16  ;;  %vm17608_vm3 = vmmov %vm17578_vm1 }
 0x375   : > { %v5118_v43 = vshll.u32 %v14652_v9, 16  ;;  %v5129_v51 = vsel %vm14340_vm13, %v5121_v63, %v5128_v37  ;;  %v5160_v29 = vshll.u32 %v14662_v14, 16  ;;  %v5166_v11 = vshrl.u32 %v14664_v55, 16 }
 0x376   : > { %v5145_v7 = vor.u32 %v5143_v28, %v14771_v40  ;;  %v5155_v15 = vrot.slane %v5151_v12, 4  ;;  %v14783_v53 = vrot.slane %v5157_v16, 7  ;;  %5369 = vst.msk [vmem:[#allocation3 + $0x64] sm:$0xf] %vm17577_vm9, %v5129_v51  ;;  %v14788_v59 = vor.u32 %v5101_v4, %v5100_v2  ;;  %vm17609_vm9 = vmmov %vm17578_vm1 }
 0x377   : > { %v5174_v19 = vshrl.u32 %v14666_v45, 16  ;;  %v14794_v63 = vor.u32 %v5118_v43, %v5117_v41  ;;  %v5168_v13 = vrot.slane %v5166_v11, 7  ;;  %v5183_v14 = vshrl.u32 %v14669_v33, 16 }
 0x378   : > { %v5146_v9 = vsel %vm14340_vm13, %v5138_v44, %v5145_v7  ;;  %v5162_v60 = vor.u32 %v5160_v29, %v14783_v53  ;;  %v5135_v5 = vshll.u32 %v14656_v24, 16  ;;  %v5177_v47 = vshll.u32 %v14666_v45, 16 }
 0x379   : > { %5376 = vst.msk [vmem:[#allocation3 + $0x70] sm:$0xf] %vm17578_vm1, %v5146_v9  ;;  %v14800_v2 = vrot.slane %v5174_v19, 7  ;;  %v5191_v4 = vshrl.u32 %v14671_v30, 16  ;;  %v5172_v28 = vrot.slane %v5168_v13, 4  ;;  %v5185_v44 = vrot.slane %v5183_v14, 7 }
 0x37a   : > { %v5163_v41 = vsel %vm14340_vm13, %v5155_v15, %v5162_v60  ;;  %v5194_v51 = vshll.u32 %v14671_v30, 16  ;;  %v5200_v24 = vshrl.u32 %v14679_v42, 16  ;;  %v14813_v45 = vor.u32 %v5135_v5, %v5134_v32  ;;  %v5335_v15 = vld [vmem:[#allocation3 + $0x2c] sm:$0x1] }
 0x37b   : > { %v5179_v16 = vor.u32 %v5177_v47, %v14800_v2  ;;  %v14808_v43 = vrot.slane %v5191_v4, 7  ;;  %5383 = vst.msk [vmem:[#allocation3 + $0x7c] sm:$0xf] %vm17579_vm7, %v5163_v41  ;;  %v5152_v7 = vshll.u32 %v14660_v25, 16  ;;  %v5189_v29 = vrot.slane %v5185_v44, 4  ;;  %vm17610_vm7 = vmmov %vm17578_vm1 }
 0x37c   : > { %v5208_v11 = vshrl.u32 %v14681_v1, 16  ;;  %v5202_v60 = vrot.slane %v5200_v24, 7  ;;  %v5211_v32 = vshll.u32 %v14681_v1, 16  ;;  %v5217_v5 = vshrl.u32 %v14684_v48, 16  ;;  %v5317_v25 = vld [vmem:[#allocation3 + $0xc] sm:$0xf] }
 0x37d   : > { %v5180_v9 = vsel %vm14340_vm13, %v5172_v28, %v5179_v16  ;;  %v5196_v19 = vor.u32 %v5194_v51, %v14808_v43  ;;  %v14821_v30 = vor.u32 %v5152_v7, %v5151_v12  ;;  %v5321_v47 = vld [vmem:[#allocation3 + $0x14] sm:$0x1]  ;;  %v5324_v4 = vld [vmem:[#allocation3 + $0x18] sm:$0xf]  ;;  %v5169_v41 = vshll.u32 %v14664_v55, 16 }
 0x37e   : > { %v14823_v14 = vrot.slane %v5208_v11, 7  ;;  %5390 = vst.msk [vmem:[#allocation3 + $0x88] sm:$0xf] %vm17580_vm15, %v5180_v9  ;;  %v5206_v16 = vrot.slane %v5202_v60, 4  ;;  %v5225_v12 = vshrl.u32 %v14686_v10, 16  ;;  %v5186_v1 = vshll.u32 %v14669_v33, 16  ;;  %vm17611_vm15 = vmmov %vm17578_vm1 }
 0x37f   : > { %v5197_v28 = vsel %vm14340_vm13, %v5189_v29, %v5196_v19  ;;  %v5328_v51 = vld [vmem:[#allocation3 + $0x20] sm:$0x1]  ;;  %v5219_v11 = vrot.slane %v5217_v5, 7  ;;  %vm17582_vm5 = vsmask.f32 7938  ;;  %v5228_v19 = vshll.u32 %v14686_v10, 16 }
 0x380   : > { %v5213_v7 = vor.u32 %v5211_v32, %v14823_v14  ;;  %5397 = vst.msk [vmem:[#allocation3 + $0x94] sm:$0xf] %vm17581_vm10, %v5197_v28  ;;  %vm14838_vm0 = vmand %vm17583_vm12, %vm17582_vm5  ;;  %v5331_v29 = vld [vmem:[#allocation3 + $0x24] sm:$0xf]  ;;  %v14842_v9 = vrot.slane %v5225_v12, 7  ;;  %v5234_v24 = vshrl.u32 %v14693_v17, 16  ;;  %v14851_v28 = vor.u32 %v5169_v41, %v5168_v13 }
 0x381   : > { %v5242_v33 = vshrl.u32 %v14700_v58, 16  ;;  %v14847_v32 = vld [vmem:[#allocation3 + $0x30] sm:$0xf]  ;;  %v14849_v5 = vld [vmem:[#allocation3 + $0x3c] sm:$0xf]  ;;  %v14853_v37 = vor.u32 %v5186_v1, %v5185_v44  ;;  %v5223_v12 = vrot.slane %v5219_v11, 4  ;;  %vm17612_vm10 = vmmov %vm17578_vm1 }
 0x382   : > { %v5214_v39 = vsel %vm14340_vm13, %v5206_v16, %v5213_v7  ;;  %v5230_v34 = vor.u32 %v5228_v19, %v14842_v9  ;;  %v5236_v10 = vrot.slane %v5234_v24, 7  ;;  %v5245_v56 = vshll.u32 %v14700_v58, 16  ;;  %v14864_v13 = vld [vmem:[#allocation3 + $0x48] sm:$0xf]  ;;  %v14866_v44 = vld [vmem:[#allocation3 + $0x54] sm:$0xf]  ;;  %vm17614_vm12 = vmmov %vm17578_vm1 }
 0x383   : > { %v14858_v35 = vrot.slane %v5242_v33, 7  ;;  %5404 = vst.msk [vmem:[#allocation3 + $0xa0] sm:$0xf] %vm17586_vm4, %v5214_v39  ;;  %v5203_v41 = vshll.u32 %v14679_v42, 16  ;;  %v5318_v16 = vsel %vm14838_vm0, %v14714_v49, %v5317_v25  ;;  %v5322_v58 = vsel %vm13568_vm11, %v5011_v38, %v5321_v47  ;;  %v14879_v24 = vld [vmem:[#allocation3 + $0x78] sm:$0xf] }
 0x384   : > { %v5325_v39 = vsel %vm14838_vm0, %v14723_v8, %v5324_v4  ;;  %v14881_v1 = vld [vmem:[#allocation3 + $0x84] sm:$0xf]  ;;  %v14885_v42 = vsel %vm14340_vm13, %v5223_v12, %v5230_v34  ;;  %v5240_v7 = vrot.slane %v5236_v10, 4  ;;  %5319 = vst [vmem:[#allocation3 + $0xc] sm:$0xf] %v5318_v16  ;;  %v17587_v6 = vrot.slane %v14677_v50, 4 }
 0x385   : > { %v5247_v49 = vor.u32 %v5245_v56, %v14858_v35  ;;  %v5349_v25 = vld [vmem:[#allocation3 + $0x44] sm:$0x1]  ;;  %v14892_v47 = vld [vmem:[#allocation3 + $0x60] sm:$0xf]  ;;  %v5220_v8 = vshll.u32 %v14684_v48, 16  ;;  %v5237_v4 = vshll.u32 %v14693_v17, 16  ;;  %v5332_v34 = vsel %vm14838_vm0, %v14736_v54, %v5331_v29 }
 0x386   : > { %v5329_v38 = vsel %vm13568_vm11, %v17587_v6, %v5328_v51  ;;  %5323 = vst [vmem:[#allocation3 + $0x14] sm:$0x1] %v5322_v58  ;;  %v5339_v50 = vsel %vm14838_vm0, %v14749_v36, %v14847_v32  ;;  %v14903_v56 = vld [vmem:[#allocation3 + $0x90] sm:$0xf]  ;;  %v14905_v51 = vld [vmem:[#allocation3 + $0x9c] sm:$0xf]  ;;  %v14907_v19 = vor.u32 %v5203_v41, %v5202_v60  ;;  %v5346_v36 = vsel %vm14838_vm0, %v14755_v20, %v14849_v5 }
 0x387   : > { %v14911_v48 = vsel %vm14340_vm13, %v5240_v7, %v5247_v49  ;;  %5326 = vst [vmem:[#allocation3 + $0x18] sm:$0xf] %v5325_v39  ;;  %v17588_v17 = vrot.slane %v14691_v21, 4  ;;  %v5356_v29 = vld [vmem:[#allocation3 + $0x50] sm:$0x1]  ;;  %v14925_v32 = vor.u32 %v5220_v8, %v5219_v11  ;;  %v14927_v46 = vor.u32 %v5237_v4, %v5236_v10  ;;  %vm17601_vm13 = vmmov %vm17578_vm1 }
 0x388   : > { %v14921_v33 = vld [vmem:[#allocation3 + $0xa8] sm:$0xf]  ;;  %v14923_v60 = vld [vmem:[#allocation3 + $0xb4] sm:$0xf]  ;;  %5330 = vst [vmem:[#allocation3 + $0x20] sm:$0x1] %v5329_v38  ;;  %v5353_v21 = vsel %vm14838_vm0, %v14775_v26, %v14864_v13  ;;  %v5360_v20 = vsel %vm14838_vm0, %v14788_v59, %v14866_v44  ;;  %v5367_v26 = vsel %vm14838_vm0, %v14794_v63, %v14892_v47  ;;  %v5374_v59 = vsel %vm14838_vm0, %v14813_v45, %v14862_v3 }
 0x389   : > { %v5336_v54 = vsel %vm13568_vm11, %v17588_v17, %v5335_v15  ;;  %v5363_v15 = vld [vmem:[#allocation3 + $0x5c] sm:$0x1]  ;;  %v14937_v5 = vld [vmem:[#allocation3 + $0xc0] sm:$0xf]  ;;  %v5181_v12 = vrot.slane %v14800_v2, 4  ;;  %v17589_v11 = vrot.slane %v14705_v62, 4  ;;  %v5388_v63 = vsel %vm14838_vm0, %v14851_v28, %v14881_v1 }
 0x38a   : > { %5333 = vst [vmem:[#allocation3 + $0x24] sm:$0xf] %v5332_v34  ;;  %v11557_v13 = vld [vmem:[%s17469_s3 + $0x38] sm:$0xff]  ;;  %v5198_v44 = vrot.slane %v14808_v43, 4  ;;  %v5493_v41 = vld [vmem:[#allocation3] sm:$0xf]  ;;  %v17596_v43 = vsel %vm14838_vm0, %v14853_v37, %v14903_v56 }
 0x38b   : > { %v5343_v10 = vsel %vm13568_vm11, %v17589_v11, %v5342_v18  ;;  %5337 = vst [vmem:[#allocation3 + $0x2c] sm:$0x1] %v5336_v54  ;;  %v5381_v18 = vsel %vm14838_vm0, %v14821_v30, %v14879_v24  ;;  %v5377_v16 = vld [vmem:[#allocation3 + $0x74] sm:$0x1]  ;;  %v5370_v58 = vld [vmem:[#allocation3 + $0x68] sm:$0x1]  ;;  %9078 = vmatpush.bf16.msrb.mxu1 %v11557_v13 }
 0x38c   : > { %5340 = vst [vmem:[#allocation3 + $0x30] sm:$0xf] %v5339_v50  ;;  %v17590_v39 = vrot.slane %v14719_v57, 4  ;;  %v14977_v38 = vld [vmem:[#allocation3 + $0x1c] sm:$0xf]  ;;  %v11556_v34 = vld [vmem:[%s17469_s3 + $0x30] sm:$0xff] }
 0x38d   : > { %v5497_v47 = vld [vmem:[#allocation3 + $0x10] sm:$0xf]  ;;  %5344 = vst [vmem:[#allocation3 + $0x38] sm:$0x1] %v5343_v10  ;;  %v17591_v50 = vrot.slane %v14733_v22, 4  ;;  %v5542_v11 = vshrl.u32 %v5493_v41, 16 }
 0x38e   : > { %v5350_v7 = vsel %vm13568_vm11, %v17590_v39, %v5349_v25  ;;  %5347 = vst [vmem:[#allocation3 + $0x3c] sm:$0xf] %v5346_v36  ;;  %v5545_v10 = vshll.u32 %v5493_v41, 16  ;;  %v5496_v39 = vld [vmem:[#allocation3 + $0xc] sm:$0xf]  ;;  %v17592_v25 = vrot.slane %v14746_v0, 4 }
 0x38f   : > { %v5357_v17 = vsel %vm13568_vm11, %v17591_v50, %v5356_v29  ;;  %v5503_v4 = vld [vmem:[#allocation3 + $0x28] sm:$0xf]  ;;  %v5384_v57 = vld [vmem:[#allocation3 + $0x80] sm:$0x1]  ;;  %5351 = vst [vmem:[#allocation3 + $0x44] sm:$0x1] %v5350_v7  ;;  %9079 = vmatpush.bf16.msrb.mxu1 %v11556_v34 }
 0x390   : > { %v5364_v22 = vsel %vm13568_vm11, %v17592_v25, %v5363_v15  ;;  %v5499_v36 = vld [vmem:[#allocation3 + $0x18] sm:$0xf]  ;;  %v5599_v29 = vshll.u32 %v14977_v38, 16  ;;  %v5575_v50 = vshll.u32 %v5497_v47, 16  ;;  %5354 = vst [vmem:[#allocation3 + $0x48] sm:$0xf] %v5353_v21 }
 0x391   : > { %v5544_v8 = vrot.slane %v5542_v11, 4  ;;  %v5547_v6 = vrot.slane %v5545_v10, 5  ;;  %v5590_v54 = vshrl.u32 %v5499_v36, 16  ;;  %v5593_v13 = vshll.u32 %v5499_v36, 16  ;;  %5358 = vst [vmem:[#allocation3 + $0x50] sm:$0x1] %v5357_v17 }
 0x392   : > { %v17593_v41 = vrot.slane %v14761_v31, 4  ;;  %v17594_v0 = vrot.slane %v14771_v40, 4  ;;  %v5603_v25 = vshrl.u32 %v14977_v38, 16  ;;  %v5498_v62 = vld [vmem:[#allocation3 + $0x14] sm:$0x1]  ;;  %v15014_v49 = vrot.slane %v5575_v50, 5 }
 0x393   : > { %5361 = vst [vmem:[#allocation3 + $0x54] sm:$0xf] %v5360_v20  ;;  %v5548_v21 = vor.u32 %v5547_v6, %v5544_v8  ;;  %v5592_v11 = vrot.slane %v5590_v54, 4  ;;  %v5595_v17 = vrot.slane %v5593_v13, 5  ;;  %v5579_v10 = vshrl.u32 %v5497_v47, 16  ;;  %v11555_v31 = vld [vmem:[%s17469_s3 + $0x28] sm:$0xff] }
 0x394   : > { %v5371_v7 = vsel %vm13568_vm11, %v17593_v41, %v5370_v58  ;;  %v5378_v15 = vsel %vm13568_vm11, %v17594_v0, %v5377_v16  ;;  %v5391_v58 = vld [vmem:[#allocation3 + $0x8c] sm:$0x1]  ;;  %5365 = vst [vmem:[#allocation3 + $0x5c] sm:$0x1] %v5364_v22  ;;  %v5585_v40 = vshll.u32 %v5498_v62, 16  ;;  %v5566_v36 = vshrl.u32 %v5496_v39, 16  ;;  %9080 = vmatpush.bf16.msrb.mxu1 %v11555_v31 }
 0x395   : > { %v5569_v16 = vshll.u32 %v5496_v39, 16  ;;  %v5623_v41 = vshll.u32 %v5503_v4, 16  ;;  %5368 = vst [vmem:[#allocation3 + $0x60] sm:$0xf] %v5367_v26  ;;  %v17595_v38 = vrot.slane %v14783_v53, 4  ;;  %v5549_v6 = vrot.slane %v5548_v21, 4 }
 0x396   : > { %v5596_v8 = vor.u32 %v5595_v17, %v5592_v11  ;;  %v5581_v34 = vrot.slane %v5579_v10, 4  ;;  %v5504_v47 = vld [vmem:[#allocation3 + $0x2c] sm:$0x1]  ;;  %v5398_v54 = vld [vmem:[#allocation3 + $0x98] sm:$0x1]  ;;  %v15023_v50 = vrot.slane %v5599_v29, 5 }
 0x397   : > { %v5385_v20 = vsel %vm13568_vm11, %v17595_v38, %v5384_v57  ;;  %5372 = vst [vmem:[#allocation3 + $0x68] sm:$0x1] %v5371_v7  ;;  %v5568_v13 = vrot.slane %v5566_v36, 4  ;;  %v5571_v22 = vrot.slane %v5569_v16, 5  ;;  %v15025_v62 = vrot.slane %v5623_v41, 5  ;;  %v11554_v3 = vld [vmem:[%s17469_s3 + $0x20] sm:$0xff] }
 0x398   : > { %5375 = vst [vmem:[#allocation3 + $0x6c] sm:$0xf] %v5374_v59  ;;  %v5554_v53 = vsel %vm11842_vm2, %v5549_v6, %v14258_v61  ;;  %v5597_v26 = vrot.slane %v5596_v8, 4  ;;  %v5582_v57 = vor.u32 %v5581_v34, %v15014_v49  ;;  %v5627_v39 = vshrl.u32 %v5503_v4, 16  ;;  %v5502_v29 = vld [vmem:[#allocation3 + $0x24] sm:$0xf]  ;;  %9081 = vmatpush.bf16.msrb.mxu1 %v11554_v3 }
 0x399   : > { %v5405_v7 = vld [vmem:[#allocation3 + $0xa4] sm:$0x1]  ;;  %5379 = vst [vmem:[#allocation3 + $0x74] sm:$0x1] %v5378_v15  ;;  %5925 = vrot.lane.b32.xlu2 %v5554_v53, %s11722_s22  ;;  %v5587_v0 = vrot.slane %v5585_v40, 5  ;;  %v5572_v21 = vor.u32 %v5571_v22, %v5568_v13  ;;  %v5614_v11 = vshrl.u32 %v5502_v29, 16  ;;  %v5392_v61 = vsel %vm13568_vm11, %v5181_v12, %v5391_v58 }
 0x39a   : > { %v5617_v17 = vshll.u32 %v5502_v29, 16  ;;  %5382 = vst [vmem:[#allocation3 + $0x78] sm:$0xf] %v5381_v18  ;;  %v5602_v45 = vsel %vm11842_vm2, %v5597_v26, %v15023_v50  ;;  %v5583_v59 = vrot.slane %v5582_v57, 4  ;;  %v5629_v4 = vrot.slane %v5627_v39, 4 }
 0x39b   : > { %v5501_v15 = vld [vmem:[#allocation3 + $0x20] sm:$0x1]  ;;  %5386 = vst [vmem:[#allocation3 + $0x80] sm:$0x1] %v5385_v20  ;;  %5933 = vrot.lane.b32.xlu0 %v5602_v45, %s11722_s22  ;;  %v5573_v10 = vrot.slane %v5572_v21, 4  ;;  %v5633_v31 = vshll.u32 %v5504_v47, 16  ;;  %v5399_v2 = vsel %vm13568_vm11, %v5198_v44, %v5398_v54 }
 0x39c   : > { %v5616_v40 = vrot.slane %v5614_v11, 4  ;;  %v5619_v30 = vrot.slane %v5617_v17, 5  ;;  %v5412_v24 = vld [vmem:[#allocation3 + $0xb0] sm:$0x1]  ;;  %5389 = vst [vmem:[#allocation3 + $0x84] sm:$0xf] %v5388_v63  ;;  %v5630_v12 = vor.u32 %v5629_v4, %v15025_v62  ;;  %v5588_v63 = vsel %vm11842_vm2, %v5583_v59, %v5587_v0 }
 0x39d   : > { %v5605_v18 = vrot.slane %v5603_v25, 4  ;;  %v5609_v58 = vshll.u32 %v5501_v15, 16  ;;  %v5508_v36 = vld [vmem:[#allocation3 + $0x3c] sm:$0xf]  ;;  %5393 = vst [vmem:[#allocation3 + $0x8c] sm:$0x1] %v5392_v61  ;;  %v5578_v16 = vsel %vm11842_vm2, %v5573_v10, %v15014_v49 }
 0x39e   : > { %v5662_v41 = vshrl.u32 %v5508_v36, 16  ;;  %v5665_v38 = vshll.u32 %v5508_v36, 16  ;;  %v5506_v28 = vld [vmem:[#allocation3 + $0x34] sm:$0xf]  ;;  %5396 = vst [vmem:[#allocation3 + $0x90] sm:$0xf] %v17596_v43  ;;  %5929 = vrot.lane.b32.xlu1 %v5578_v16, %s11722_s22  ;;  %v5620_v47 = vor.u32 %v5619_v30, %v5616_v40  ;;  %v17605_v30 = vsel %vm14838_vm0, %v14381_v27, %v14937_v5 }
 0x39f   : > { %v17597_v1 = vrot.slane %v14823_v14, 4  ;;  %v5631_v49 = vrot.slane %v5630_v12, 4  ;;  %v5606_v25 = vor.u32 %v5605_v18, %v15023_v50  ;;  %v5509_v20 = vld [vmem:[#allocation3 + $0x40] sm:$0xf]  ;;  %v5419_v6 = vld [vmem:[#allocation3 + $0xbc] sm:$0x1]  ;;  %v17598_v14 = vsel %vm14838_vm0, %v14907_v19, %v14905_v51 }
 0x3a0   : > { %5400 = vst [vmem:[#allocation3 + $0x98] sm:$0x1] %v5399_v2  ;;  %v5664_v8 = vrot.slane %v5662_v41, 4  ;;  %v5667_v34 = vrot.slane %v5665_v38, 5  ;;  %v5512_v37 = vld [vmem:[#allocation3 + $0x4c] sm:$0xf]  ;;  %v17600_v51 = vsel %vm14838_vm0, %v14925_v32, %v14921_v33 }
 0x3a1   : > { %v5406_v44 = vsel %vm13568_vm11, %v17597_v1, %v5405_v7  ;;  %5403 = vst [vmem:[#allocation3 + $0x9c] sm:$0xf] %v17598_v14  ;;  %v5635_v56 = vrot.slane %v5633_v31, 5  ;;  %v5611_v54 = vrot.slane %v5609_v58, 5  ;;  %v5647_v13 = vshll.u32 %v5506_v28, 16  ;;  %5931 = vrot.lane.b32.xlu2 %v5588_v63, %s11722_s22 }
 0x3a2   : > { %5407 = vst [vmem:[#allocation3 + $0xa4] sm:$0x1] %v5406_v44  ;;  %v17599_v22 = vrot.slane %v14842_v9, 4  ;;  %v5607_v53 = vrot.slane %v5606_v25, 4  ;;  %v5651_v26 = vshrl.u32 %v5506_v28, 16  ;;  %v5668_v39 = vor.u32 %v5667_v34, %v5664_v8  ;;  %v11553_v28 = vld [vmem:[%s17469_s3 + $0x18] sm:$0xff] }
 0x3a3   : > { %v5505_v57 = vld [vmem:[#allocation3 + $0x30] sm:$0xf]  ;;  %5410 = vst [vmem:[#allocation3 + $0xa8] sm:$0xf] %v17600_v51  ;;  %v5636_v19 = vsel %vm11842_vm2, %v5631_v49, %v5635_v56  ;;  %v5671_v7 = vshll.u32 %v5509_v20, 16  ;;  %v5649_v0 = vrot.slane %v5647_v13, 5  ;;  %9082 = vmatpush.bf16.msrb.mxu1 %v11553_v28 }
 0x3a4   : > { %v5413_v50 = vsel %vm13568_vm11, %v17599_v22, %v5412_v24  ;;  %v5638_v29 = vshrl.u32 %v5505_v57, 16  ;;  %v5641_v9 = vshll.u32 %v5505_v57, 16  ;;  %5411 = vst.msk [vmem:[#allocation3 + $0xac] sm:$0xf] %vm17601_vm13, %v14885_v42  ;;  %5939 = vrot.lane.b32.xlu0 %v5636_v19, %s11722_s22  ;;  %v5653_v21 = vrot.slane %v5651_v26, 4 }
 0x3a5   : > { %v5695_v11 = vshll.u32 %v5512_v37, 16  ;;  %5414 = vst [vmem:[#allocation3 + $0xb0] sm:$0x1] %v5413_v50  ;;  %v17602_v17 = vrot.slane %v14858_v35, 4  ;;  %v5621_v32 = vrot.slane %v5620_v47, 4  ;;  %v17603_v42 = vsel %vm14838_vm0, %v14927_v46, %v14923_v60  ;;  %vm17615_vm0 = vmmov %vm17578_vm1 }
 0x3a6   : > { %v5640_v3 = vrot.slane %v5638_v29, 4  ;;  %v5643_v61 = vrot.slane %v5641_v9, 5  ;;  %5417 = vst [vmem:[#allocation3 + $0xb4] sm:$0xf] %v17603_v42  ;;  %v5612_v45 = vsel %vm11842_vm2, %v5607_v53, %v5611_v54  ;;  %v5675_v59 = vshrl.u32 %v5509_v20, 16  ;;  %vm17616_vm4 = vmmov %vm17615_vm0 }
 0x3a7   : > { %v5420_v33 = vsel %vm13568_vm11, %v17602_v17, %v5419_v6  ;;  %v5699_v4 = vshrl.u32 %v5512_v37, 16  ;;  %v5511_v15 = vld [vmem:[#allocation3 + $0x48] sm:$0xf]  ;;  %5418 = vst.msk [vmem:[#allocation3 + $0xb8] sm:$0xf] %vm17604_vm14, %v14911_v48  ;;  %5935 = vrot.lane.b32.xlu1 %v5612_v45, %s11722_s22  ;;  %v5669_v52 = vrot.slane %v5668_v39, 4  ;;  %v5654_v60 = vor.u32 %v5653_v21, %v5649_v0  ;;  %vm17606_vm11 = vmmov %vm17578_vm1 }
 0x3a8   : > { %v5507_v35 = vld [vmem:[#allocation3 + $0x38] sm:$0x1]  ;;  %v5644_v10 = vor.u32 %v5643_v61, %v5640_v3  ;;  %v15113_v31 = vrot.slane %v5695_v11, 5  ;;  %5421 = vst [vmem:[#allocation3 + $0xbc] sm:$0x1] %v5420_v33  ;;  %v5673_v40 = vrot.slane %v5671_v7, 5  ;;  %v5626_v48 = vsel %vm11842_vm2, %v5621_v32, %v15025_v62  ;;  %vm17617_vm13 = vmmov %vm17615_vm0 }
 0x3a9   : > { %v5701_v46 = vrot.slane %v5699_v4, 4  ;;  %5424 = vst [vmem:[#allocation3 + $0xc0] sm:$0xf] %v17605_v30  ;;  %v5513_v24 = vld [vmem:[#allocation3 + $0x50] sm:$0x1]  ;;  %v5686_v2 = vshrl.u32 %v5511_v15, 16  ;;  %5937 = vrot.lane.b32.xlu2 %v5626_v48, %s11722_s22  ;;  %vm17618_vm14 = vmmov %vm17615_vm0 }
 0x3aa   : > { %v5689_v12 = vshll.u32 %v5511_v15, 16  ;;  %v5657_v18 = vshll.u32 %v5507_v35, 16  ;;  %v5645_v58 = vrot.slane %v5644_v10, 4  ;;  %v5677_v36 = vrot.slane %v5675_v59, 4  ;;  %v5517_v16 = vld [vmem:[#allocation3 + $0x60] sm:$0xf] }
 0x3ab   : > { %v5674_v55 = vsel %vm11842_vm2, %v5669_v52, %v5673_v40  ;;  %v5702_v41 = vor.u32 %v5701_v46, %v15113_v31  ;;  %v5734_v27 = vshrl.u32 %v5517_v16, 16  ;;  %v5737_v5 = vshll.u32 %v5517_v16, 16  ;;  %v5510_v44 = vld [vmem:[#allocation3 + $0x44] sm:$0x1]  ;;  %v5514_v63 = vld [vmem:[#allocation3 + $0x54] sm:$0xf] }
 0x3ac   : > { %5945 = vrot.lane.b32.xlu0 %v5674_v55, %s11722_s22  ;;  %v5655_v38 = vrot.slane %v5654_v60, 4  ;;  %v5705_v62 = vshll.u32 %v5513_v24, 16  ;;  %v5688_v43 = vrot.slane %v5686_v2, 4  ;;  %v5691_v1 = vrot.slane %v5689_v12, 5  ;;  %v5515_v20 = vld [vmem:[#allocation3 + $0x58] sm:$0xf] }
 0x3ad   : > { %v5650_v49 = vsel %vm11842_vm2, %v5645_v58, %v5649_v0  ;;  %v5678_v25 = vor.u32 %v5677_v36, %v5673_v40  ;;  %v5659_v6 = vrot.slane %v5657_v18, 5  ;;  %v5703_v8 = vrot.slane %v5702_v41, 4  ;;  %v5521_v13 = vld [vmem:[#allocation3 + $0x70] sm:$0xf]  ;;  %v5518_v53 = vld [vmem:[#allocation3 + $0x64] sm:$0xf] }
 0x3ae   : > { %v5736_v34 = vrot.slane %v5734_v27, 4  ;;  %v5739_v37 = vrot.slane %v5737_v5, 5  ;;  %v5707_v14 = vrot.slane %v5705_v62, 5  ;;  %v5681_v56 = vshll.u32 %v5510_v44, 16  ;;  %v5520_v45 = vld [vmem:[#allocation3 + $0x6c] sm:$0xf] }
 0x3af   : > { %5941 = vrot.lane.b32.xlu1 %v5650_v49, %s11722_s22  ;;  %v5710_v47 = vshrl.u32 %v5514_v63, 16  ;;  %v5713_v54 = vshll.u32 %v5514_v63, 16  ;;  %v5660_v22 = vsel %vm11842_vm2, %v5655_v38, %v5659_v6  ;;  %v5692_v50 = vor.u32 %v5691_v1, %v5688_v43  ;;  %v5516_v4 = vld [vmem:[#allocation3 + $0x5c] sm:$0x1]  ;;  %v5526_v10 = vld [vmem:[#allocation3 + $0x84] sm:$0xf] }
 0x3b0   : > { %v5719_v26 = vshll.u32 %v5515_v20, 16  ;;  %v5723_v57 = vshrl.u32 %v5515_v20, 16  ;;  %v5679_v51 = vrot.slane %v5678_v25, 4  ;;  %v5708_v29 = vsel %vm11842_vm2, %v5703_v8, %v5707_v14  ;;  %v5522_v46 = vld [vmem:[#allocation3 + $0x74] sm:$0x1] }
 0x3b1   : > { %5943 = vrot.lane.b32.xlu2 %v5660_v22, %s11722_s22  ;;  %v5712_v19 = vrot.slane %v5710_v47, 4  ;;  %v5715_v39 = vrot.slane %v5713_v54, 5  ;;  %v5740_v9 = vor.u32 %v5739_v37, %v5736_v34  ;;  %v5767_v7 = vshll.u32 %v5521_v13, 16  ;;  %v11552_v18 = vld [vmem:[%s17469_s3 + $0x10] sm:$0xff]  ;;  %v5523_v55 = vld [vmem:[#allocation3 + $0x78] sm:$0xf] }
 0x3b2   : > { %v5771_v0 = vshrl.u32 %v5521_v13, 16  ;;  %v5683_v21 = vrot.slane %v5681_v56, 5  ;;  %v5743_v11 = vshll.u32 %v5518_v53, 16  ;;  %v5693_v17 = vrot.slane %v5692_v50, 4  ;;  %9083 = vmatpush.bf16.msrb.mxu1 %v11552_v18  ;;  %v5519_v62 = vld [vmem:[#allocation3 + $0x68] sm:$0x1] }
 0x3b3   : > { %v5721_v33 = vrot.slane %v5719_v26, 5  ;;  %v5725_v32 = vrot.slane %v5723_v57, 4  ;;  %v5747_v61 = vshrl.u32 %v5518_v53, 16  ;;  %v5716_v42 = vor.u32 %v5715_v39, %v5712_v19  ;;  %v5524_v1 = vld [vmem:[#allocation3 + $0x7c] sm:$0xf] }
 0x3b4   : > { %5951 = vrot.lane.b32.xlu0 %v5708_v29, %s11722_s22  ;;  %v5684_v3 = vsel %vm11842_vm2, %v5679_v51, %v5683_v21  ;;  %v5741_v59 = vrot.slane %v5740_v9, 4  ;;  %v15143_v15 = vrot.slane %v5767_v7, 5  ;;  %v5773_v52 = vrot.slane %v5771_v0, 4  ;;  %v5530_v37 = vld [vmem:[#allocation3 + $0x94] sm:$0xf] }
 0x3b5   : > { %v5745_v35 = vrot.slane %v5743_v11, 5  ;;  %v5698_v40 = vsel %vm11842_vm2, %v5693_v17, %v15113_v31  ;;  %v5726_v60 = vor.u32 %v5725_v32, %v5721_v33  ;;  %v5758_v30 = vshrl.u32 %v5520_v45, 16  ;;  %v5527_v47 = vld [vmem:[#allocation3 + $0x88] sm:$0xf]  ;;  %v5432_v21 = vld [vmem:[#allocation3 + $0x10] sm:$0xf] }
 0x3b6   : > { %v5761_v48 = vshll.u32 %v5520_v45, 16  ;;  %v5729_v24 = vshll.u32 %v5516_v4, 16  ;;  %v5717_v2 = vrot.slane %v5716_v42, 4  ;;  %v5749_v12 = vrot.slane %v5747_v61, 4  ;;  %v5529_v32 = vld [vmem:[#allocation3 + $0x90] sm:$0xf] }
 0x3b7   : > { %5947 = vrot.lane.b32.xlu1 %v5684_v3, %s11722_s22  ;;  %v5746_v58 = vsel %vm11842_vm2, %v5741_v59, %v5745_v35  ;;  %v5774_v36 = vor.u32 %v5773_v52, %v15143_v15  ;;  %v5806_v16 = vshrl.u32 %v5526_v10, 16  ;;  %v5809_v31 = vshll.u32 %v5526_v10, 16  ;;  %5464 = vst.msk [vmem:[#allocation2 + $0x3c] sm:$0xf] %vm17606_vm11, %v5432_v21  ;;  %v5525_v61 = vld [vmem:[#allocation3 + $0x80] sm:$0x1]  ;;  %vm17619_vm11 = vmmov %vm17615_vm0 }
 0x3b8   : > { %v5777_v41 = vshll.u32 %v5522_v46, 16  ;;  %v5727_v27 = vrot.slane %v5726_v60, 4  ;;  %v5760_v5 = vrot.slane %v5758_v30, 4  ;;  %v5763_v38 = vrot.slane %v5761_v48, 5  ;;  %v5535_v4 = vld [vmem:[#allocation3 + $0xa8] sm:$0xf] }
 0x3b9   : > { %5949 = vrot.lane.b32.xlu2 %v5698_v40, %s11722_s22  ;;  %v5722_v28 = vsel %vm11842_vm2, %v5717_v2, %v5721_v33  ;;  %v5750_v43 = vor.u32 %v5749_v12, %v5745_v35  ;;  %v5782_v44 = vshrl.u32 %v5523_v55, 16  ;;  %v5785_v63 = vshll.u32 %v5523_v55, 16  ;;  %v5531_v10 = vld [vmem:[#allocation3 + $0x98] sm:$0x1] }
 0x3ba   : > { %v5731_v49 = vrot.slane %v5729_v24, 5  ;;  %v5775_v25 = vrot.slane %v5774_v36, 4  ;;  %v5808_v20 = vrot.slane %v5806_v16, 4  ;;  %v5811_v6 = vrot.slane %v5809_v31, 5  ;;  %v11551_v24 = vld [vmem:[%s17469_s3 + $0x8] sm:$0xff] }
 0x3bb   : > { %v5779_v8 = vrot.slane %v5777_v41, 5  ;;  %v5753_v34 = vshll.u32 %v5519_v62, 16  ;;  %v5764_v56 = vor.u32 %v5763_v38, %v5760_v5  ;;  %v5791_v54 = vshll.u32 %v5524_v1, 16  ;;  %v5435_v36 = vld [vmem:[#allocation3 + $0x24] sm:$0xf]  ;;  %9084 = vmatpush.bf16.msrb.mxu1 %v11551_v24 }
 0x3bc   : > { %5957 = vrot.lane.b32.xlu0 %v5746_v58, %s11722_s22  ;;  %v5732_v14 = vsel %vm11842_vm2, %v5727_v27, %v5731_v49  ;;  %v5795_v13 = vshrl.u32 %v5524_v1, 16  ;;  %v5751_v22 = vrot.slane %v5750_v43, 4  ;;  %v5784_v50 = vrot.slane %v5782_v44, 4  ;;  %v5532_v58 = vld [vmem:[#allocation3 + $0x9c] sm:$0xf] }
 0x3bd   : > { %v5787_v53 = vrot.slane %v5785_v63, 5  ;;  %v5780_v26 = vsel %vm11842_vm2, %v5775_v25, %v5779_v8  ;;  %v5812_v57 = vor.u32 %v5811_v6, %v5808_v20  ;;  %v5839_v51 = vshll.u32 %v5530_v37, 16  ;;  %5467 = vst.msk [vmem:[#allocation2 + $0x78] sm:$0xf] %vm17607_vm8, %v5435_v36  ;;  %v5528_v27 = vld [vmem:[#allocation3 + $0x8c] sm:$0x1]  ;;  %vm17621_vm8 = vmmov %vm17615_vm0 }
 0x3be   : > { %v5843_v19 = vshrl.u32 %v5530_v37, 16  ;;  %v5755_v39 = vrot.slane %v5753_v34, 5  ;;  %v5815_v29 = vshll.u32 %v5527_v47, 16  ;;  %v5765_v9 = vrot.slane %v5764_v56, 4  ;;  %v5533_v62 = vld [vmem:[#allocation3 + $0xa0] sm:$0xf] }
 0x3bf   : > { %5953 = vrot.lane.b32.xlu1 %v5722_v28, %s11722_s22  ;;  %v5793_v7 = vrot.slane %v5791_v54, 5  ;;  %v5797_v0 = vrot.slane %v5795_v13, 4  ;;  %v5819_v17 = vshrl.u32 %v5527_v47, 16  ;;  %v5788_v33 = vor.u32 %v5787_v53, %v5784_v50  ;;  %v5438_v25 = vld [vmem:[#allocation3 + $0x34] sm:$0xf] }
 0x3c0   : > { %v5756_v11 = vsel %vm11842_vm2, %v5751_v22, %v5755_v39  ;;  %v5813_v3 = vrot.slane %v5812_v57, 4  ;;  %v15169_v42 = vrot.slane %v5839_v51, 5  ;;  %v5845_v45 = vrot.slane %v5843_v19, 4  ;;  %v5539_v8 = vld [vmem:[#allocation3 + $0xb8] sm:$0xf] }
 0x3c1   : > { %5955 = vrot.lane.b32.xlu2 %v5732_v14, %s11722_s22  ;;  %v5817_v59 = vrot.slane %v5815_v29, 5  ;;  %v5770_v52 = vsel %vm11842_vm2, %v5765_v9, %v15143_v15  ;;  %v5798_v35 = vor.u32 %v5797_v0, %v5793_v7  ;;  %v5830_v40 = vshrl.u32 %v5529_v32, 16  ;;  %5470 = vst.msk [vmem:[#allocation2 + $0xb4] sm:$0xf] %vm17608_vm3, %v5438_v25  ;;  %v5536_v14 = vld [vmem:[#allocation3 + $0xac] sm:$0xf]  ;;  %vm17622_vm3 = vmmov %vm17615_vm0 }
 0x3c2   : > { %v5833_v60 = vshll.u32 %v5529_v32, 16  ;;  %v5801_v46 = vshll.u32 %v5525_v61, 16  ;;  %v5789_v30 = vrot.slane %v5788_v33, 4  ;;  %v5821_v48 = vrot.slane %v5819_v17, 4  ;;  %v5429_v50 = vld [vmem:[#allocation3] sm:$0xf] }
 0x3c3   : > { %v5818_v2 = vsel %vm11842_vm2, %v5813_v3, %v5817_v59  ;;  %v5846_v12 = vor.u32 %v5845_v45, %v15169_v42  ;;  %v5878_v18 = vshrl.u32 %v5535_v4, 16  ;;  %v5881_v15 = vshll.u32 %v5535_v4, 16  ;;  %5461 = vst.msk [vmem:[#allocation2] sm:$0xf] %vm17609_vm9, %v5429_v50  ;;  %v5538_v0 = vld [vmem:[#allocation3 + $0xb4] sm:$0xf]  ;;  %vm17623_vm9 = vmmov %vm17615_vm0 }
 0x3c4   : > { %5963 = vrot.lane.b32.xlu0 %v5780_v26, %s11722_s22  ;;  %v5849_v16 = vshll.u32 %v5531_v10, 16  ;;  %v5799_v31 = vrot.slane %v5798_v35, 4  ;;  %v5832_v55 = vrot.slane %v5830_v40, 4  ;;  %v5835_v41 = vrot.slane %v5833_v60, 5  ;;  %v5433_v33 = vld [vmem:[#allocation3 + $0x18] sm:$0xf] }
 0x3c5   : > { %v5794_v5 = vsel %vm11842_vm2, %v5789_v30, %v5793_v7  ;;  %v5822_v38 = vor.u32 %v5821_v48, %v5817_v59  ;;  %v5854_v28 = vshrl.u32 %v5532_v58, 16  ;;  %v5857_v43 = vshll.u32 %v5532_v58, 16  ;;  %v5441_v32 = vld [vmem:[#allocation3 + $0x48] sm:$0xf]  ;;  %5465 = vst.msk [vmem:[#allocation2 + $0x50] sm:$0xf] %vm17578_vm1, %v5433_v33  ;;  %vm17624_vm1 = vmmov %vm17615_vm0 }
 0x3c6   : > { %v5803_v1 = vrot.slane %v5801_v46, 5  ;;  %v5847_v44 = vrot.slane %v5846_v12, 4  ;;  %v5880_v63 = vrot.slane %v5878_v18, 4  ;;  %v5883_v49 = vrot.slane %v5881_v15, 5  ;;  %v5534_v4 = vld [vmem:[#allocation3 + $0xa4] sm:$0x1] }
 0x3c7   : > { %5959 = vrot.lane.b32.xlu1 %v5756_v11, %s11722_s22  ;;  %v5851_v20 = vrot.slane %v5849_v16, 5  ;;  %v5825_v6 = vshll.u32 %v5528_v27, 16  ;;  %v5836_v37 = vor.u32 %v5835_v41, %v5832_v55  ;;  %v5863_v56 = vshll.u32 %v5533_v62, 16  ;;  %5473 = vst.msk [vmem:[#allocation2 + $0xf0] sm:$0xf] %vm17610_vm7, %v5441_v32  ;;  %v11550_v55 = vld [vmem:[%s17469_s3] sm:$0xff]  ;;  %vm17625_vm7 = vmmov %vm17615_vm0 }
 0x3c8   : > { %v5804_v34 = vsel %vm11842_vm2, %v5799_v31, %v5803_v1  ;;  %v5867_v47 = vshrl.u32 %v5533_v62, 16  ;;  %v5823_v54 = vrot.slane %v5822_v38, 4  ;;  %v5856_v13 = vrot.slane %v5854_v28, 4  ;;  %v5540_v10 = vld [vmem:[#allocation3 + $0xbc] sm:$0x1]  ;;  %9085 = vmatpush.bf16.msrb.mxu1 %v11550_v55 }
 0x3c9   : > { %5961 = vrot.lane.b32.xlu2 %v5770_v52, %s11722_s22  ;;  %v5859_v22 = vrot.slane %v5857_v43, 5  ;;  %v5852_v53 = vsel %vm11842_vm2, %v5847_v44, %v5851_v20  ;;  %v5884_v26 = vor.u32 %v5883_v49, %v5880_v63  ;;  %v5911_v57 = vshll.u32 %v5539_v8, 16  ;;  %v5431_v46 = vld [vmem:[#allocation3 + $0xc] sm:$0xf]  ;;  %v5430_v24 = vld [vmem:[#allocation3 + $0x4] sm:$0xf] }
 0x3ca   : > { %v5915_v51 = vshrl.u32 %v5539_v8, 16  ;;  %v5827_v19 = vrot.slane %v5825_v6, 5  ;;  %v5887_v39 = vshll.u32 %v5536_v14, 16  ;;  %v5837_v29 = vrot.slane %v5836_v37, 4  ;;  %5463 = vst.msk [vmem:[#allocation2 + $0x28] sm:$0xf] %vm17611_vm15, %v5431_v46  ;;  %vm17626_vm15 = vmmov %vm17615_vm0 }
 0x3cb   : > { %v5865_v9 = vrot.slane %v5863_v56, 5  ;;  %v5869_v7 = vrot.slane %v5867_v47, 4  ;;  %v5891_v11 = vshrl.u32 %v5536_v14, 16  ;;  %v5860_v17 = vor.u32 %v5859_v22, %v5856_v13  ;;  %5462 = vst.msk [vmem:[#allocation2 + $0x14] sm:$0xf] %vm17612_vm10, %v5430_v24  ;;  %v11565_v6 = vld [vmem:[%s17469_s3 + $0x78] sm:$0xff] }
 0x3cc   : > { %5969 = vrot.lane.b32.xlu0 %v5818_v2, %s11722_s22  ;;  %v5828_v21 = vsel %vm11842_vm2, %v5823_v54, %v5827_v19  ;;  %v5885_v3 = vrot.slane %v5884_v26, 4  ;;  %v15197_v61 = vrot.slane %v5911_v57, 5  ;;  %v5917_v45 = vrot.slane %v5915_v51, 4  ;;  %v5928_v2 = vpop.permute.xlu0 %5927  ;;  %v5436_v62 = vld [vmem:[#allocation3 + $0x28] sm:$0xf]  ;;  %9167 = vmatpush.bf16.msra.mxu2 %v11565_v6  ;;  %v11573_v50 = vld [vmem:[%s17469_s3 + $0xb8] sm:$0xff] }
 0x3cd   : > { %v5889_v59 = vrot.slane %v5887_v39, 5  ;;  %v5842_v52 = vsel %vm11842_vm2, %v5837_v29, %v15169_v42  ;;  %v5870_v35 = vor.u32 %v5869_v7, %v5865_v9  ;;  %v5902_v40 = vshrl.u32 %v5538_v0, 16  ;;  %v5537_v42 = vld [vmem:[#allocation3 + $0xb0] sm:$0x1]  ;;  %v7415_v43 = vld [vmem:[#allocation3 + $0x1c] sm:$0xf]  ;;  %9256 = vmatpush.bf16.msra.mxu3 %v11573_v50 }
 0x3ce   : > { %v5905_v60 = vshll.u32 %v5538_v0, 16  ;;  %v5861_v30 = vrot.slane %v5860_v17, 4  ;;  %v5893_v48 = vrot.slane %v5891_v11, 4  ;;  %v5873_v18 = vshll.u32 %v5534_v4, 16  ;;  %5468 = vst.msk [vmem:[#allocation2 + $0x8c] sm:$0xf] %vm17614_vm12, %v5436_v62  ;;  %vm17629_vm12 = vmmov %vm17615_vm0 }
 0x3cf   : > { %5965 = vrot.lane.b32.xlu1 %v5794_v5, %s11722_s22  ;;  %v5890_v12 = vsel %vm11842_vm2, %v5885_v3, %v5889_v59  ;;  %v5918_v15 = vor.u32 %v5917_v45, %v15197_v61  ;;  %vm17613_vm5 = vcmask 1043968   ;;  %v5871_v58 = vrot.slane %v5870_v35, 4  ;;  %v5444_v49 = vld [vmem:[#allocation3 + $0x58] sm:$0xf]  ;;  %v5434_v25 = vld [vmem:[#allocation3 + $0x1c] sm:$0xf] }
 0x3d0   : > { %6022 = vst.msk [vmem:[#allocation2 + $0x14] sm:$0xf] %vm17613_vm5, %v5928_v2  ;;  %v5921_v36 = vshll.u32 %v5540_v10, 16  ;;  %v5904_v16 = vrot.slane %v5902_v40, 4  ;;  %v5907_v31 = vrot.slane %v5905_v60, 5  ;;  %v5866_v41 = vsel %vm11842_vm2, %v5861_v30, %v5865_v9  ;;  %v11585_v35 = vld [vmem:[%s17469_s3 + $0x118] sm:$0xff]  ;;  %vm17627_vm10 = vmmov %vm17613_vm5 }
 0x3d1   : > { %5967 = vrot.lane.b32.xlu2 %v5804_v34, %s11722_s22  ;;  %v5894_v27 = vor.u32 %v5893_v48, %v5889_v59  ;;  %v5875_v5 = vrot.slane %v5873_v18, 5  ;;  %v5919_v38 = vrot.slane %v5918_v15, 4  ;;  %v5897_v28 = vshll.u32 %v5537_v42, 16  ;;  %5476 = vst.msk [vmem:[#allocation2 + $0x12c] sm:$0xf] %vm17615_vm0, %v5444_v49  ;;  %9438 = vmatpush.bf16.msra.mxu1 %v11585_v35  ;;  %vm17628_vm5 = vmmov %vm17615_vm0 }
 0x3d2   : > { %v5923_v44 = vrot.slane %v5921_v36, 5  ;;  %v5908_v63 = vor.u32 %v5907_v31, %v5904_v16  ;;  %v7013_v34 = vld [vmem:[#allocation3 + $0xc] sm:$0xe]  ;;  %v7472_v37 = vshll.u32 %v7415_v43, 16  ;;  %v7476_v14 = vshrl.u32 %v7415_v43, 16 }
 0x3d3   : > { %v5876_v1 = vsel %vm11842_vm2, %v5871_v58, %v5875_v5  ;;  %v5895_v20 = vrot.slane %v5894_v27, 4  ;;  %5466 = vst.msk [vmem:[#allocation2 + $0x64] sm:$0xf] %vm17616_vm4, %v5434_v25  ;;  %v5899_v56 = vrot.slane %v5897_v28, 5  ;;  %v7014_v47 = vld [vmem:[#allocation3 + $0x10] sm:$0xf]  ;;  %vm17630_vm4 = vmmov %vm17615_vm0 }
 0x3d4   : > { %5975 = vrot.lane.b32.xlu0 %v5852_v53, %s11722_s22  ;;  %v5924_v8 = vsel %vm11842_vm2, %v5919_v38, %v5923_v44  ;;  %v5439_v54 = vld [vmem:[#allocation3 + $0x3c] sm:$0xf]  ;;  %v5909_v13 = vrot.slane %v5908_v63, 4  ;;  %v7414_v22 = vld [vmem:[#allocation3 + $0x18] sm:$0xf]  ;;  %v10836_v51 = vrot.slane %v7013_v34, 9 }
 0x3d5   : > { %5471 = vst.msk [vmem:[#allocation2 + $0xc8] sm:$0xf] %vm17617_vm13, %v5439_v54  ;;  %v5900_v53 = vsel %vm11842_vm2, %v5895_v20, %v5899_v56  ;;  %v5447_v26 = vld [vmem:[#allocation3 + $0x6c] sm:$0xf]  ;;  %v5437_v57 = vld [vmem:[#allocation3 + $0x30] sm:$0xf]  ;;  %vm17631_vm13 = vmmov %vm17615_vm0 }
 0x3d6   : > { %v7111_v19 = vrot.slane %v7014_v47, 5  ;;  %v15237_v39 = vrot.slane %v7472_v37, 5  ;;  %v7478_v29 = vrot.slane %v7476_v14, 4  ;;  %5479 = vst.msk [vmem:[#allocation2 + $0x168] sm:$0xf] %vm17618_vm14, %v5447_v26  ;;  %v7463_v9 = vshrl.u32 %v7414_v22, 16  ;;  %vm17632_vm14 = vmmov %vm17615_vm0 }
 0x3d7   : > { %5971 = vrot.lane.b32.xlu1 %v5828_v21, %s11722_s22  ;;  %5469 = vst.msk [vmem:[#allocation2 + $0xa0] sm:$0xf] %vm17619_vm11, %v5437_v57  ;;  %v5914_v7 = vsel %vm11842_vm2, %v5909_v13, %v15197_v61  ;;  %v7466_v0 = vshll.u32 %v7414_v22, 16  ;;  %v7416_v21 = vld [vmem:[#allocation3 + $0x20] sm:$0x1]  ;;  %vm17633_vm11 = vmmov %vm17627_vm10 }
 0x3d8   : > { %v5442_v11 = vld [vmem:[#allocation3 + $0x4c] sm:$0xf]  ;;  %v7112_v33 = vsel %vm12010_vm6, %v10836_v51, %v7111_v19  ;;  %v7479_v32 = vor.u32 %v7478_v29, %v15237_v39  ;;  %v5450_v3 = vld [vmem:[#allocation3 + $0x7c] sm:$0xf]  ;;  %v7465_v45 = vrot.slane %v7463_v9, 4  ;;  %v7482_v4 = vshll.u32 %v7416_v21, 16 }
 0x3d9   : > { %5973 = vrot.lane.b32.xlu2 %v5842_v52, %s11722_s22  ;;  %5474 = vst.msk [vmem:[#allocation2 + $0x104] sm:$0xf] %vm17621_vm8, %v5442_v11  ;;  %v5440_v59 = vld [vmem:[#allocation3 + $0x40] sm:$0xf]  ;;  %v7468_v61 = vrot.slane %v7466_v0, 5  ;;  %v11581_v52 = vld [vmem:[%s17469_s3 + $0xf8] sm:$0xff]  ;;  %vm17634_vm8 = vmmov %vm17615_vm0 }
 0x3da   : > { %5482 = vst.msk [vmem:[#allocation2 + $0x1a4] sm:$0xf] %vm17622_vm3, %v5450_v3  ;;  %v6325_v10 = vld [vmem:[#allocation3 + $0xc] sm:$0xf]  ;;  %v6326_v40 = vld [vmem:[#allocation3 + $0x10] sm:$0xf]  ;;  %9345 = vmatpush.bf16.msra.mxu0 %v11581_v52  ;;  %vm17635_vm3 = vmmov %vm17615_vm0 }
 0x3db   : > { %5472 = vst.msk [vmem:[#allocation2 + $0xdc] sm:$0xf] %vm17623_vm9, %v5440_v59  ;;  %v7480_v60 = vrot.slane %v7479_v32, 4  ;;  %v7418_v46 = vld [vmem:[#allocation3 + $0x28] sm:$0xf]  ;;  %v7469_v2 = vor.u32 %v7468_v61, %v7465_v45  ;;  %v7113_v15 = vrot.slane %v7111_v19, 4  ;;  %vm17636_vm9 = vmmov %vm17615_vm0 }
 0x3dc   : > { %5981 = vrot.lane.b32.xlu0 %v5890_v12, %s11722_s22  ;;  %v5445_v30 = vld [vmem:[#allocation3 + $0x60] sm:$0xf]  ;;  %v5453_v48 = vld [vmem:[#allocation3 + $0x90] sm:$0xf]  ;;  %v5443_v24 = vld [vmem:[#allocation3 + $0x54] sm:$0xf] }
 0x3dd   : > { %5477 = vst.msk [vmem:[#allocation2 + $0x140] sm:$0xf] %vm17624_vm1, %v5445_v30  ;;  %v7484_v12 = vrot.slane %v7482_v4, 5  ;;  %v7015_v18 = vld [vmem:[#allocation3 + $0x14] sm:$0x1]  ;;  %v7496_v36 = vshll.u32 %v7418_v46, 16  ;;  %vm17637_vm1 = vmmov %vm17627_vm10 }
 0x3de   : > { %5485 = vst.msk [vmem:[#allocation2 + $0x1e0] sm:$0xf] %vm17625_vm7, %v5453_v48  ;;  %v7016_v58 = vld [vmem:[#allocation3 + $0x18] sm:$0xe]  ;;  %v7500_v16 = vshrl.u32 %v7418_v46, 16  ;;  %v7114_v55 = vrot.slane %v7015_v18, 5  ;;  %vm17638_vm7 = vmmov %vm17615_vm0 }
 0x3df   : > { %5977 = vrot.lane.b32.xlu1 %v5866_v41, %s11722_s22  ;;  %5475 = vst.msk [vmem:[#allocation2 + $0x118] sm:$0xf] %vm17626_vm15, %v5443_v24  ;;  %v7485_v42 = vsel %vm11842_vm2, %v7480_v60, %v7484_v12  ;;  %v7017_v41 = vld [vmem:[#allocation3 + $0x1c] sm:$0xf]  ;;  %v5448_v27 = vld [vmem:[#allocation3 + $0x70] sm:$0xf]  ;;  %vm17639_vm15 = vmmov %vm17615_vm0 }
 0x3e0   : > { %v7470_v5 = vrot.slane %v7469_v2, 4  ;;  %v5456_v38 = vld [vmem:[#allocation3 + $0xa0] sm:$0xf]  ;;  %v7115_v62 = vsel %vm12010_vm6, %v7113_v15, %v7114_v55  ;;  %v7417_v28 = vld [vmem:[#allocation3 + $0x24] sm:$0xf]  ;;  %v7118_v44 = vrot.slane %v7017_v41, 5 }
 0x3e1   : > { %5979 = vrot.lane.b32.xlu2 %v5876_v1, %s11722_s22  ;;  %5480 = vst.msk [vmem:[#allocation2 + $0x17c] sm:$0xf] %vm17628_vm5, %v5448_v27  ;;  %v5446_v43 = vld [vmem:[#allocation3 + $0x64] sm:$0xf]  ;;  %v10837_v1 = vrot.slane %v7016_v58, 9  ;;  %v15271_v63 = vrot.slane %v7496_v36, 5  ;;  %vm17641_vm5 = vmmov %vm17615_vm0 }
 0x3e2   : > { %v7502_v49 = vrot.slane %v7500_v16, 4  ;;  %5488 = vst.msk [vmem:[#allocation2 + $0x21c] sm:$0xf] %vm17629_vm12, %v5456_v38  ;;  %v7419_v25 = vld [vmem:[#allocation3 + $0x2c] sm:$0x1]  ;;  %v7475_v20 = vsel %vm11842_vm2, %v7470_v5, %v15237_v39  ;;  %v7490_v34 = vshll.u32 %v7417_v28, 16  ;;  %vm17642_vm12 = vmmov %vm17637_vm1 }
 0x3e3   : > { %5478 = vst.msk [vmem:[#allocation2 + $0x154] sm:$0xf] %vm17615_vm0, %v5446_v43  ;;  %v11472_v6 = vld [vmem:[#allocation2 + $0x10] sm:$0xf0]  ;;  %v5451_v37 = vld [vmem:[#allocation3 + $0x84] sm:$0xf]  ;;  %v7119_v47 = vsel %vm12010_vm6, %v10837_v1, %v7118_v44 }
 0x3e4   : > { %5987 = vrot.lane.b32.xlu0 %v5924_v8, %s11722_s22  ;;  %v7487_v8 = vshrl.u32 %v7417_v28, 16  ;;  %5483 = vst.msk [vmem:[#allocation2 + $0x1b8] sm:$0xf] %vm17630_vm4, %v5451_v37  ;;  %v5459_v14 = vld [vmem:[#allocation3 + $0xb4] sm:$0xf]  ;;  %v7503_v54 = vor.u32 %v7502_v49, %v15271_v63  ;;  %v7492_v26 = vrot.slane %v7490_v34, 5  ;;  %vm17644_vm4 = vmmov %vm17635_vm3 }
 0x3e5   : > { %v5449_v56 = vld [vmem:[#allocation3 + $0x78] sm:$0xf]  ;;  %5491 = vst.msk [vmem:[#allocation2 + $0x258] sm:$0xf] %vm17631_vm13, %v5459_v14  ;;  %v7506_v57 = vshll.u32 %v7419_v25, 16  ;;  %v11564_v59 = vld [vmem:[%s17469_s3 + $0x70] sm:$0xff]  ;;  %vm17645_vm13 = vmmov %vm17635_vm3 }
 0x3e6   : > { %5481 = vst.msk [vmem:[#allocation2 + $0x190] sm:$0xf] %vm17632_vm14, %v5449_v56  ;;  %v6327_v51 = vld [vmem:[#allocation3 + $0x18] sm:$0xf]  ;;  %v7504_v19 = vrot.slane %v7503_v54, 4  ;;  %9168 = vmatpush.bf16.msra.mxu2 %v11564_v59  ;;  %v11572_v30 = vld [vmem:[%s17469_s3 + $0xb0] sm:$0xff] }
 0x3e7   : > { %5983 = vrot.lane.b32.xlu1 %v5900_v53, %s11722_s22  ;;  %v7489_v53 = vrot.slane %v7487_v8, 4  ;;  %v7421_v39 = vld [vmem:[#allocation3 + $0x34] sm:$0xf]  ;;  %v7018_v9 = vld [vmem:[#allocation3 + $0x20] sm:$0x1]  ;;  %v7508_v11 = vrot.slane %v7506_v57, 5  ;;  %9257 = vmatpush.bf16.msra.mxu3 %v11572_v30 }
 0x3e8   : > { %v5454_v29 = vld [vmem:[#allocation3 + $0x94] sm:$0xf]  ;;  %v6328_v0 = vld [vmem:[#allocation3 + $0x1c] sm:$0xf]  ;;  %v7019_v32 = vld [vmem:[#allocation3 + $0x24] sm:$0xe] }
 0x3e9   : > { %5985 = vrot.lane.b32.xlu2 %v5914_v7, %s11722_s22  ;;  %5486 = vst.msk [vmem:[#allocation2 + $0x1f4] sm:$0xf] %vm17634_vm8, %v5454_v29  ;;  %v5452_v7 = vld [vmem:[#allocation3 + $0x88] sm:$0xf]  ;;  %v7493_v21 = vor.u32 %v7492_v26, %v7489_v53  ;;  %v7520_v3 = vshll.u32 %v7421_v39, 16  ;;  %v7524_v45 = vshrl.u32 %v7421_v39, 16  ;;  %v7509_v61 = vsel %vm11842_vm2, %v7504_v19, %v7508_v11 }
 0x3ea   : > { %5484 = vst.msk [vmem:[#allocation2 + $0x1cc] sm:$0xf] %vm17635_vm3, %v5452_v7  ;;  %v7121_v4 = vrot.slane %v7018_v9, 5  ;;  %v7020_v52 = vld [vmem:[#allocation3 + $0x28] sm:$0xf]  ;;  %v10838_v18 = vrot.slane %v7019_v32, 9 }
 0x3eb   : > { %v5457_v35 = vld [vmem:[#allocation3 + $0xa8] sm:$0xf]  ;;  %v7350_v60 = vld [vmem:[#allocation3 + $0x18] sm:$0xf]  ;;  %v7494_v46 = vrot.slane %v7493_v21, 4  ;;  %v15304_v2 = vrot.slane %v7520_v3, 5 }
 0x3ec   : > { %7221 = vrot.lane.b32.xlu0 %v7112_v33, %s11722_s22  ;;  %v7120_v33 = vrot.slane %v7118_v44, 4  ;;  %5489 = vst.msk [vmem:[#allocation2 + $0x230] sm:$0xf] %vm17636_vm9, %v5457_v35  ;;  %v5455_v48 = vld [vmem:[#allocation3 + $0x9c] sm:$0xf]  ;;  %v7526_v12 = vrot.slane %v7524_v45, 4 }
 0x3ed   : > { %7382 = vst.msk [vmem:[#allocation2 + $0xc] sm:$0xf] %vm17638_vm7, %v7350_v60  ;;  %v7125_v15 = vrot.slane %v7020_v52, 5  ;;  %v7422_v58 = vld [vmem:[#allocation3 + $0x38] sm:$0x1]  ;;  %v7499_v16 = vsel %vm11842_vm2, %v7494_v46, %v15271_v63  ;;  %v11580_v25 = vld [vmem:[%s17469_s3 + $0xf0] sm:$0xff] }
 0x3ee   : > { %v7122_v24 = vsel %vm12010_vm6, %v7120_v33, %v7121_v4  ;;  %5487 = vst.msk [vmem:[#allocation2 + $0x208] sm:$0xf] %vm17639_vm15, %v5455_v48  ;;  %v5460_v36 = vld [vmem:[#allocation3 + $0xb8] sm:$0xf]  ;;  %v7527_v55 = vor.u32 %v7526_v12, %v15304_v2  ;;  %v15315_v41 = vld [vmem:[#allocation3 + $0x10] sm:$0xf]  ;;  %9346 = vmatpush.bf16.msra.mxu0 %v11580_v25 }
 0x3ef   : > { %6389 = vrot.lane.b32.xlu1 %v6325_v10, %s11722_s22  ;;  %v6058_v27 = vld [vmem:[#allocation3 + $0x14] sm:$0x1]  ;;  %v7126_v5 = vsel %vm12010_vm6, %v10838_v18, %v7125_v15  ;;  %v6158_v28 = vrot.slane %v15315_v41, 5  ;;  %v5458_v43 = vld [vmem:[#allocation3 + $0xac] sm:$0xf] }
 0x3f0   : > { %v7021_v44 = vld [vmem:[#allocation3 + $0x2c] sm:$0x1]  ;;  %v7424_v63 = vld [vmem:[#allocation3 + $0x40] sm:$0xf]  ;;  %5490 = vst.msk [vmem:[#allocation2 + $0x244] sm:$0xf] %vm17641_vm5, %v5458_v43 }
 0x3f1   : > { %6391 = vrot.lane.b32.xlu2 %v6326_v40, %s11722_s22  ;;  %v7420_v40 = vld [vmem:[#allocation3 + $0x30] sm:$0xf]  ;;  %v6329_v8 = vld [vmem:[#allocation3 + $0x24] sm:$0xf]  ;;  %v7528_v37 = vrot.slane %v7527_v55, 4  ;;  %v7544_v53 = vshll.u32 %v7424_v63, 16 }
 0x3f2   : > { %v6330_v14 = vld [vmem:[#allocation3 + $0x28] sm:$0xf]  ;;  %v6518_v54 = vld [vmem:[#allocation3 + $0x10] sm:$0xf]  ;;  %v6517_v39 = vld [vmem:[#allocation3 + $0xc] sm:$0xf] }
 0x3f3   : > { %v5926_v31 = vpop.permute.xlu2 %5925  ;;  %v6575_v19 = vshll.u32 %v6518_v54, 16  ;;  %v7022_v29 = vld [vmem:[#allocation3 + $0x30] sm:$0xe]  ;;  %v6566_v9 = vshrl.u32 %v6517_v39, 16  ;;  %v6569_v7 = vshll.u32 %v6517_v39, 16  ;;  %v6579_v33 = vshrl.u32 %v6518_v54, 16 }
 0x3f4   : > { %7848 = vrot.lane.b32.xlu0 %v7485_v42, %s11722_s22  ;;  %6021 = vst.msk [vmem:[#allocation2] sm:$0xf] %vm17627_vm10, %v5926_v31  ;;  %v7511_v42 = vshrl.u32 %v7420_v40, 16  ;;  %v7514_v31 = vshll.u32 %v7420_v40, 16  ;;  %vm17640_vm10 = vmmov %vm17615_vm0  ;;  %v7023_v21 = vld [vmem:[#allocation3 + $0x34] sm:$0xf] }
 0x3f5   : > { %5492 = vst.msk [vmem:[#allocation2 + $0x26c] sm:$0xf] %vm17640_vm10, %v5460_v36  ;;  %vm17643_vm0 = vmmov %vm17637_vm1  ;;  %v7423_v11 = vld [vmem:[#allocation3 + $0x3c] sm:$0xf]  ;;  %v6568_v45 = vrot.slane %v6566_v9, 4  ;;  %v6571_v59 = vrot.slane %v6569_v7, 5 }
 0x3f6   : > { %v7513_v38 = vrot.slane %v7511_v42, 4  ;;  %v7516_v49 = vrot.slane %v7514_v31, 5  ;;  %vm17646_vm14 = vmmov %vm17643_vm0  ;;  %v15342_v4 = vrot.slane %v7544_v53, 5  ;;  %v6577_v35 = vrot.slane %v6575_v19, 5  ;;  %v15346_v12 = vld [vmem:[#allocation3 + $0x1c] sm:$0xf] }
 0x3f7   : > { %7223 = vrot.lane.b32.xlu1 %v7115_v62, %s11722_s22  ;;  %v7530_v62 = vshll.u32 %v7422_v58, 16  ;;  %v10839_v40 = vrot.slane %v7022_v29, 9  ;;  %v7132_v60 = vrot.slane %v7023_v21, 5  ;;  %v7535_v46 = vshrl.u32 %v7423_v11, 16  ;;  %vm17648_vm8 = vmmov %vm17643_vm0  ;;  %v6061_v42 = vld [vmem:[#allocation3 + $0x20] sm:$0x1] }
 0x3f8   : > { %v7517_v57 = vor.u32 %v7516_v49, %v7513_v38  ;;  %v6572_v30 = vor.u32 %v6571_v59, %v6568_v45  ;;  %v7538_v48 = vshll.u32 %v7423_v11, 16  ;;  %v6581_v18 = vrot.slane %v6579_v33, 4  ;;  %v7351_v36 = vld [vmem:[#allocation3 + $0x1c] sm:$0xf]  ;;  %vm17649_vm9 = vmmov %vm17643_vm0  ;;  %v15367_v54 = vld [vmem:[#allocation3 + $0x40] sm:$0xf] }
 0x3f9   : > { %7846 = vrot.lane.b32.xlu2 %v7475_v20, %s11722_s22  ;;  %v6160_v20 = vrot.slane %v6158_v28, 4  ;;  %v6165_v58 = vrot.slane %v15346_v12, 5  ;;  %7383 = vst.msk [vmem:[#allocation2 + $0x20] sm:$0xf] %vm17635_vm3, %v7351_v36  ;;  %v7537_v49 = vrot.slane %v7535_v46, 4  ;;  %vm17651_vm7 = vmmov %vm17643_vm0  ;;  %v11563_v59 = vld [vmem:[%s17469_s3 + $0x68] sm:$0xff] }
 0x3fa   : > { %v6582_v38 = vor.u32 %v6581_v18, %v6577_v35  ;;  %v7426_v53 = vld [vmem:[#allocation3 + $0x48] sm:$0xf]  ;;  %vm17653_vm10 = vmmov %vm17643_vm0  ;;  %v7354_v19 = vld [vmem:[#allocation3 + $0x30] sm:$0xf]  ;;  %9169 = vmatpush.bf16.msra.mxu2 %v11563_v59 }
 0x3fb   : > { %v5932_v13 = vpop.permute.xlu2 %5931  ;;  %v10870_v22 = vld [vmem:[#allocation2] sm:$0xf]  ;;  %v6520_v39 = vld [vmem:[#allocation3 + $0x18] sm:$0xf]  ;;  %v15374_v9 = vld [vmem:[#allocation3 + $0x3c] sm:$0xe] }
 0x3fc   : > { %7225 = vrot.lane.b32.xlu0 %v7119_v47, %s11722_s22  ;;  %6024 = vst.msk [vmem:[#allocation2 + $0x3c] sm:$0xf] %vm17633_vm11, %v5932_v13  ;;  %v10871_v50 = vor.u32 %v11472_v6, %v10870_v22  ;;  %v6161_v6 = vrot.slane %v6058_v27, 5  ;;  %v7352_v47 = vld [vmem:[#allocation3 + $0x24] sm:$0xf]  ;;  %v7532_v13 = vrot.slane %v7530_v62, 5  ;;  %vm17647_vm11 = vmmov %vm17643_vm0 }
 0x3fd   : > { %v7127_v22 = vrot.slane %v7125_v15, 4  ;;  %7384 = vst.msk [vmem:[#allocation2 + $0x34] sm:$0xf] %vm17645_vm13, %v7352_v47  ;;  %v6573_v15 = vrot.slane %v6572_v30, 4  ;;  %v6583_v25 = vrot.slane %v6582_v38, 4  ;;  %v6593_v21 = vshll.u32 %v6520_v39, 16  ;;  %vm17657_vm13 = vmmov %vm17643_vm0 }
 0x3fe   : > { %9086 = vmatmul.bf16.vlgmr.msrb.gmra.mxu1 %v10871_v50  ;;  %v6162_v56 = vsel %vm12010_vm6, %v6160_v20, %v6161_v6  ;;  %v7128_v50 = vrot.slane %v7021_v44, 5  ;;  %v6519_v44 = vld [vmem:[#allocation3 + $0x14] sm:$0x1]  ;;  %v6521_v7 = vld [vmem:[#allocation3 + $0x1c] sm:$0xf]  ;;  %v7562_v18 = vshll.u32 %v7426_v53, 16 }
 0x3ff   : > { %6393 = vrot.lane.b32.xlu1 %v6327_v51, %s11722_s22  ;;  %6296 = vst.msk [vmem:[#allocation2 + $0x40] sm:$0xf] %vm17644_vm4, %v6162_v56  ;;  %v7548_v51 = vshrl.u32 %v7424_v63, 16  ;;  %v6578_v43 = vsel %vm11842_vm2, %v6573_v15, %v6577_v35  ;;  %v7133_v63 = vsel %vm12010_vm6, %v10839_v40, %v7132_v60  ;;  %v6585_v20 = vshll.u32 %v6519_v44, 16  ;;  %v6056_v30 = vld [vmem:[#allocation3 + $0xc] sm:$0xe]  ;;  %vm17656_vm4 = vmmov %vm17643_vm0 }
 0x400   : > { %v7129_v3 = vsel %vm12010_vm6, %v7127_v22, %v7128_v50  ;;  %v7024_v50 = vld [vmem:[#allocation3 + $0x38] sm:$0x1]  ;;  %v6599_v45 = vshll.u32 %v6521_v7, 16  ;;  %v6603_v35 = vshrl.u32 %v6521_v7, 16  ;;  %v15387_v15 = vld [vmem:[#allocation3 + $0x50] sm:$0x1] }
 0x401   : > { %6395 = vrot.lane.b32.xlu2 %v6328_v0, %s11722_s22  ;;  %v7533_v0 = vsel %vm11842_vm2, %v7528_v37, %v7532_v13  ;;  %v7550_v52 = vrot.slane %v7548_v51, 4  ;;  %v6587_v13 = vrot.slane %v6585_v20, 5  ;;  %v7135_v40 = vrot.slane %v7024_v50, 5  ;;  %v7429_v41 = vld [vmem:[#allocation3 + $0x54] sm:$0xf] }
 0x402   : > { %v10821_v36 = vrot.slane %v6056_v30, 9  ;;  %v15410_v20 = vrot.slane %v7562_v18, 5 }
 0x403   : > { %v5938_v10 = vpop.permute.xlu2 %5937  ;;  %v11477_v27 = vld [vmem:[#allocation2 + $0x38] sm:$0xf0]  ;;  %v6588_v51 = vsel %vm11842_vm2, %v6583_v25, %v6587_v13  ;;  %v15408_v25 = vld [vmem:[#allocation3 + $0x44] sm:$0x1]  ;;  %v6055_v13 = vld [vmem:[#allocation3 + $0x8] sm:$0x1] }
 0x404   : > { %7852 = vrot.lane.b32.xlu0 %v7509_v61, %s11722_s22  ;;  %6027 = vst.msk [vmem:[#allocation2 + $0x78] sm:$0xf] %vm17637_vm1, %v5938_v10  ;;  %v7518_v61 = vrot.slane %v7517_v57, 4  ;;  %vm17650_vm1 = vmmov %vm17635_vm3  ;;  %v6332_v57 = vld [vmem:[#allocation3 + $0x34] sm:$0xf] }
 0x405   : > { %6981 = vst.msk [vmem:[#allocation2 + $0x8] sm:$0xf] %vm17650_vm1, %v6578_v43  ;;  %vm17652_vm15 = vmmov %vm17650_vm1  ;;  %v6601_v43 = vrot.slane %v6599_v45, 5  ;;  %v11584_v45 = vld [vmem:[%s17469_s3 + $0x110] sm:$0xff] }
 0x406   : > { %vm17654_vm5 = vmmov %vm17650_vm1  ;;  %9439 = vmatpush.bf16.msra.mxu1 %v11584_v45  ;;  %v15494_v45 = vld [vmem:[#allocation3 + $0x54] sm:$0xe] }
 0x407   : > { %7227 = vrot.lane.b32.xlu1 %v7122_v24, %s11722_s22  ;;  %v7425_v24 = vld [vmem:[#allocation3 + $0x44] sm:$0x1]  ;;  %6982 = vst.msk [vmem:[#allocation2 + $0x1c] sm:$0xf] %vm17654_vm5, %v6588_v51  ;;  %v6064_v51 = vld [vmem:[#allocation3 + $0x2c] sm:$0x1]  ;;  %vm17661_vm3 = vmmov %vm17650_vm1 }
 0x408   : > { %v7554_v37 = vshll.u32 %v7425_v24, 16  ;;  %vm17667_vm5 = vmmov %vm17661_vm3 }
 0x409   : > { %7850 = vrot.lane.b32.xlu2 %v7499_v16, %s11722_s22  ;;  %v7523_v16 = vsel %vm11842_vm2, %v7518_v61, %v15304_v2  ;;  %v6168_v2 = vrot.slane %v6061_v42, 5 }
 0x40a   : > { %v7556_v33 = vrot.slane %v7554_v37, 5 }
 0x40b   : > { %v5944_v1 = vpop.permute.xlu2 %5943 }
 0x40c   : > { %7229 = vrot.lane.b32.xlu0 %v7126_v5, %s11722_s22  ;;  %6030 = vst.msk [vmem:[#allocation2 + $0xb4] sm:$0xf] %vm17642_vm12, %v5944_v1  ;;  %v7551_v5 = vor.u32 %v7550_v52, %v15342_v4  ;;  %v6167_v1 = vrot.slane %v6165_v58, 4  ;;  %vm17655_vm12 = vmmov %vm17650_vm1  ;;  %v6595_v52 = vrot.slane %v6593_v21, 5  ;;  %v7583_v21 = vshrl.u32 %v7429_v41, 16 }
 0x40d   : > { %v5934_v34 = vpop.permute.xlu0 %5933  ;;  %7386 = vst.msk [vmem:[#allocation2 + $0x5c] sm:$0xf] %vm17655_vm12, %v7354_v19  ;;  %v7353_v19 = vld [vmem:[#allocation3 + $0x28] sm:$0xf]  ;;  %vm17668_vm12 = vmmov %vm17661_vm3 }
 0x40e   : > { %6025 = vst.msk [vmem:[#allocation2 + $0x50] sm:$0xf] %vm17643_vm0, %v5934_v34  ;;  %v7540_v34 = vrot.slane %v7538_v48, 5  ;;  %v6169_v56 = vsel %vm12010_vm6, %v6167_v1, %v6168_v2  ;;  %v7552_v47 = vrot.slane %v7551_v5, 4  ;;  %v11571_v5 = vld [vmem:[%s17469_s3 + $0xa8] sm:$0xff]  ;;  %v6159_v1 = vsel %vm12010_vm6, %v10821_v36, %v6158_v28 }
 0x40f   : > { %6397 = vrot.lane.b32.xlu1 %v6329_v8, %s11722_s22  ;;  %v6331_v8 = vld [vmem:[#allocation3 + $0x30] sm:$0xf]  ;;  %6298 = vst.msk [vmem:[#allocation2 + $0x68] sm:$0xf] %vm17652_vm15, %v6169_v56  ;;  %v6605_v2 = vrot.slane %v6603_v35, 4  ;;  %9258 = vmatpush.bf16.msra.mxu3 %v11571_v5  ;;  %vm17665_vm15 = vmmov %vm17661_vm3 }
 0x410   : > { %v5930_v26 = vpop.permute.xlu1 %5929  ;;  %v7541_v29 = vor.u32 %v7540_v34, %v7537_v49  ;;  %7385 = vst.msk [vmem:[#allocation2 + $0x48] sm:$0xf] %vm17661_vm3, %v7353_v19 }
 0x411   : > { %6399 = vrot.lane.b32.xlu2 %v6330_v14, %s11722_s22  ;;  %6023 = vst.msk [vmem:[#allocation2 + $0x28] sm:$0xf] %vm17646_vm14, %v5930_v26  ;;  %v7134_v14 = vrot.slane %v7132_v60, 4  ;;  %v7427_v26 = vld [vmem:[#allocation3 + $0x4c] sm:$0xf]  ;;  %vm17658_vm14 = vmmov %vm17650_vm1 }
 0x412   : > { %v7568_v60 = vshll.u32 %v7427_v26, 16  ;;  %v7572_v46 = vshrl.u32 %v7427_v26, 16  ;;  %v7542_v24 = vrot.slane %v7541_v29, 4  ;;  %6295 = vst.msk [vmem:[#allocation2 + $0x2c] sm:$0xf] %vm17658_vm14, %v6159_v1  ;;  %vm17671_vm14 = vmmov %vm17643_vm0 }
 0x413   : > { %v5950_v32 = vpop.permute.xlu2 %5949  ;;  %v6333_v29 = vld [vmem:[#allocation3 + $0x3c] sm:$0xf]  ;;  %v6523_v1 = vld [vmem:[#allocation3 + $0x24] sm:$0xf] }
 0x414   : > { %7856 = vrot.lane.b32.xlu0 %v7533_v0, %s11722_s22  ;;  %6033 = vst.msk [vmem:[#allocation2 + $0xf0] sm:$0xf] %vm17647_vm11, %v5950_v32  ;;  %v6590_v0 = vshrl.u32 %v6520_v39, 16  ;;  %v7139_v32 = vrot.slane %v15367_v54, 5  ;;  %v7574_v49 = vrot.slane %v7572_v46, 4  ;;  %vm17659_vm11 = vmmov %vm17650_vm1 }
 0x415   : > { %v10910_v37 = vld [vmem:[#allocation2 + $0x50] sm:$0xf]  ;;  %v15426_v54 = vld [vmem:[#allocation3 + $0x4] sm:$0xf]  ;;  %vm17663_vm1 = vmmov %vm17643_vm0 }
 0x416   : > { %v5940_v10 = vpop.permute.xlu0 %5939  ;;  %v6592_v61 = vrot.slane %v6590_v0, 4  ;;  %v6151_v26 = vrot.slane %v15426_v54, 5  ;;  %v6522_v0 = vld [vmem:[#allocation3 + $0x20] sm:$0x1] }
 0x417   : > { %7231 = vrot.lane.b32.xlu1 %v7129_v3, %s11722_s22  ;;  %6028 = vst.msk [vmem:[#allocation2 + $0x8c] sm:$0xf] %vm17648_vm8, %v5940_v10  ;;  %v7559_v3 = vshrl.u32 %v7426_v53, 16  ;;  %v7557_v10 = vsel %vm11842_vm2, %v7552_v47, %v7556_v33  ;;  %vm17660_vm8 = vmmov %vm17643_vm0  ;;  %v15424_v47 = vld [vmem:[#allocation3 + $0x4c] sm:$0xf]  ;;  %v6609_v35 = vshll.u32 %v6522_v0, 16 }
 0x418   : > { %v10890_v55 = vld [vmem:[#allocation2 + $0x28] sm:$0xf]  ;;  %v6596_v42 = vor.u32 %v6595_v52, %v6592_v61  ;;  %v15431_v53 = vld [vmem:[#allocation3 + $0x58] sm:$0xf]  ;;  %v6153_v33 = vrot.slane %v6151_v26, 4  ;;  %v6175_v61 = vrot.slane %v6064_v51, 5 }
 0x419   : > { %v5936_v31 = vpop.permute.xlu1 %5935  ;;  %7854 = vrot.lane.b32.xlu2 %v7523_v16, %s11722_s22  ;;  %v10891_v62 = vor.u32 %v11477_v27, %v10890_v55  ;;  %v7136_v16 = vsel %vm12010_vm6, %v7134_v14, %v7135_v40  ;;  %v15393_v55 = vrot.slane %v7559_v3, 4  ;;  %v15395_v27 = vrot.slane %v7139_v32, 4  ;;  %v15420_v14 = vld [vmem:[#allocation3 + $0x28] sm:$0xf] }
 0x41a   : > { %6026 = vst.msk [vmem:[#allocation2 + $0x64] sm:$0xf] %vm17649_vm9, %v5936_v31  ;;  %v10840_v31 = vrot.slane %v15374_v9, 9  ;;  %v7142_v9 = vrot.slane %v15408_v25, 5  ;;  %v6172_v7 = vrot.slane %v15420_v14, 5  ;;  %vm17662_vm9 = vmmov %vm17643_vm0  ;;  %v7146_v46 = vrot.slane %v15424_v47, 5 }
 0x41b   : > { %v5956_v6 = vpop.permute.xlu2 %5955  ;;  %9091 = vmatmul.bf16.gmra.mxu1 %v10891_v62  ;;  %v6597_v62 = vrot.slane %v6596_v42, 4  ;;  %v7565_v36 = vor.u32 %v15410_v20, %v15393_v55  ;;  %v6524_v55 = vld [vmem:[#allocation3 + $0x28] sm:$0xf]  ;;  %v15512_v47 = vld [vmem:[#allocation3 + $0x34] sm:$0xf] }
 0x41c   : > { %7233 = vrot.lane.b32.xlu0 %v7133_v63, %s11722_s22  ;;  %6036 = vst.msk [vmem:[#allocation2 + $0x12c] sm:$0xf] %vm17651_vm7, %v5956_v6  ;;  %v15406_v63 = vrot.slane %v7568_v60, 5  ;;  %v7578_v6 = vshll.u32 %v15387_v15, 16  ;;  %v6174_v59 = vrot.slane %v6172_v7, 4  ;;  %vm17664_vm7 = vmmov %vm17661_vm3  ;;  %v6611_v15 = vrot.slane %v6609_v35, 5 }
 0x41d   : > { %v6602_v28 = vsel %vm11842_vm2, %v6597_v62, %v6601_v43  ;;  %v7143_v20 = vsel %vm12010_vm6, %v15395_v27, %v7142_v9  ;;  %v15481_v27 = vrot.slane %v7146_v46, 4  ;;  %v7432_v9 = vld [vmem:[#allocation3 + $0x60] sm:$0xf]  ;;  %v6337_v14 = vld [vmem:[#allocation3 + $0x54] sm:$0xf] }
 0x41e   : > { %v5946_v22 = vpop.permute.xlu0 %5945  ;;  %6983 = vst.msk [vmem:[#allocation2 + $0x30] sm:$0xf] %vm17659_vm11, %v6602_v28  ;;  %v7575_v50 = vor.u32 %v7574_v49, %v15406_v63  ;;  %v7580_v60 = vrot.slane %v7578_v6, 5  ;;  %v6176_v18 = vsel %vm12010_vm6, %v6174_v59, %v6175_v61  ;;  %v6617_v49 = vshll.u32 %v6523_v1, 16  ;;  %v6059_v28 = vld [vmem:[#allocation3 + $0x18] sm:$0xe]  ;;  %vm17672_vm11 = vmmov %vm17661_vm3 }
 0x41f   : > { %6401 = vrot.lane.b32.xlu1 %v6331_v8, %s11722_s22  ;;  %6031 = vst.msk [vmem:[#allocation2 + $0xc8] sm:$0xf] %vm17653_vm10, %v5946_v22  ;;  %v7547_v8 = vsel %vm11842_vm2, %v7542_v24, %v15342_v4  ;;  %v6606_v22 = vor.u32 %v6605_v2, %v6601_v43  ;;  %v7140_v4 = vsel %vm12010_vm6, %v10840_v31, %v7139_v32  ;;  %v11579_v32 = vld [vmem:[%s17469_s3 + $0xe8] sm:$0xff]  ;;  %v7596_v24 = vshrl.u32 %v15431_v53, 16  ;;  %vm17666_vm10 = vmmov %vm17643_vm0  ;;  %v7356_v43 = vld [vmem:[#allocation3 + $0x3c] sm:$0xf] }
 0x420   : > { %v7576_v40 = vrot.slane %v7575_v50, 4  ;;  %9347 = vmatpush.bf16.msra.mxu0 %v11579_v32  ;;  %v7585_v31 = vrot.slane %v7583_v21, 4  ;;  %6300 = vst.msk [vmem:[#allocation2 + $0x90] sm:$0xf] %vm17665_vm15, %v6176_v18  ;;  %v6623_v6 = vshll.u32 %v6524_v55, 16  ;;  %v11562_v35 = vld [vmem:[%s17469_s3 + $0x60] sm:$0xff] }
 0x421   : > { %v5942_v11 = vpop.permute.xlu1 %5941  ;;  %6403 = vrot.lane.b32.xlu2 %v6332_v57, %s11722_s22  ;;  %v11482_v44 = vld [vmem:[#allocation2 + $0x60] sm:$0xf0]  ;;  %v6154_v57 = vrot.slane %v6055_v13, 5  ;;  %v6607_v52 = vrot.slane %v6606_v22, 4  ;;  %7388 = vst.msk [vmem:[#allocation2 + $0x84] sm:$0xf] %vm17668_vm12, %v7356_v43  ;;  %9170 = vmatpush.bf16.msra.mxu2 %v11562_v35  ;;  %vm17680_vm12 = vmmov %vm17643_vm0 }
 0x422   : > { %6029 = vst.msk [vmem:[#allocation2 + $0xa0] sm:$0xf] %vm17643_vm0, %v5942_v11  ;;  %v10911_v56 = vor.u32 %v11482_v44, %v10910_v37  ;;  %v7586_v11 = vshll.u32 %v7429_v41, 16  ;;  %v7581_v2 = vsel %vm11842_vm2, %v7576_v40, %v7580_v60  ;;  %v6614_v44 = vshrl.u32 %v6523_v1, 16  ;;  %v10930_v32 = vld [vmem:[#allocation2 + $0x78] sm:$0xf] }
 0x423   : > { %v5962_v48 = vpop.permute.xlu2 %5961  ;;  %v6155_v30 = vsel %vm12010_vm6, %v6153_v33, %v6154_v57  ;;  %v6612_v62 = vsel %vm11842_vm2, %v6607_v52, %v6611_v15  ;;  %v6627_v41 = vshrl.u32 %v6524_v55, 16  ;;  %v6619_v37 = vrot.slane %v6617_v49, 5  ;;  %v11487_v57 = vld [vmem:[#allocation2 + $0x88] sm:$0xf0]  ;;  %v15502_v52 = vld [vmem:[#allocation3 + $0x58] sm:$0xf] }
 0x424   : > { %7860 = vrot.lane.b32.xlu0 %v7557_v10, %s11722_s22  ;;  %6039 = vst.msk [vmem:[#allocation2 + $0x168] sm:$0xf] %vm17656_vm4, %v5962_v48  ;;  %v6334_v10 = vld [vmem:[#allocation3 + $0x40] sm:$0xf]  ;;  %v7592_v48 = vshll.u32 %v15431_v53, 16  ;;  %v7588_v5 = vrot.slane %v7586_v11, 5  ;;  %vm17669_vm4 = vmmov %vm17643_vm0  ;;  %v10931_v12 = vor.u32 %v11487_v57, %v10930_v32 }
 0x425   : > { %6294 = vst.msk [vmem:[#allocation2 + $0x18] sm:$0xf] %vm17664_vm7, %v6155_v30  ;;  %v15477_v53 = vld [vmem:[#allocation3 + $0x50] sm:$0x1]  ;;  %v7598_v19 = vrot.slane %v7596_v24, 4  ;;  %v6625_v0 = vrot.slane %v6623_v6, 5  ;;  %vm17676_vm7 = vmmov %vm17643_vm0 }
 0x426   : > { %v5952_v38 = vpop.permute.xlu0 %5951  ;;  %6984 = vst.msk [vmem:[#allocation2 + $0x44] sm:$0xf] %vm17667_vm5, %v6612_v62  ;;  %v7589_v51 = vor.u32 %v7588_v5, %v7585_v31  ;;  %v6629_v21 = vrot.slane %v6627_v41, 4  ;;  %v7607_v60 = vshrl.u32 %v7432_v9, 16  ;;  %v6335_v24 = vld [vmem:[#allocation3 + $0x48] sm:$0xf] }
 0x427   : > { %7235 = vrot.lane.b32.xlu1 %v7136_v16, %s11722_s22  ;;  %6034 = vst.msk [vmem:[#allocation2 + $0x104] sm:$0xf] %vm17657_vm13, %v5952_v38  ;;  %v7028_v16 = vld [vmem:[#allocation3 + $0x48] sm:$0xe]  ;;  %v7431_v38 = vld [vmem:[#allocation3 + $0x5c] sm:$0x1]  ;;  %vm17670_vm13 = vmmov %vm17661_vm3 }
 0x428   : > { %v10841_v22 = vrot.slane %v7028_v16, 9  ;;  %v7602_v50 = vshll.u32 %v7431_v38, 16  ;;  %v7610_v18 = vshll.u32 %v7432_v9, 16  ;;  %v6179_v15 = vrot.slane %v15512_v47, 5  ;;  %v15518_v5 = vld [vmem:[#allocation3 + $0x68] sm:$0x1] }
 0x429   : > { %v5948_v34 = vpop.permute.xlu1 %5947  ;;  %7858 = vrot.lane.b32.xlu2 %v7547_v8, %s11722_s22  ;;  %v7566_v8 = vrot.slane %v7565_v36, 4  ;;  %v6630_v36 = vor.u32 %v6629_v21, %v6625_v0  ;;  %v10842_v62 = vrot.slane %v15494_v45, 9  ;;  %v11561_v43 = vld [vmem:[%s17469_s3 + $0x58] sm:$0xff]  ;;  %v6525_v49 = vld [vmem:[#allocation3 + $0x2c] sm:$0x1]  ;;  %v11578_v57 = vld [vmem:[%s17469_s3 + $0xe0] sm:$0xff] }
 0x42a   : > { %6032 = vst.msk [vmem:[#allocation2 + $0xdc] sm:$0xf] %vm17660_vm8, %v5948_v34  ;;  %v6616_v34 = vrot.slane %v6614_v44, 4  ;;  %v7604_v61 = vrot.slane %v7602_v50, 5  ;;  %vm17673_vm8 = vmmov %vm17643_vm0  ;;  %v6181_v1 = vrot.slane %v6179_v15, 4  ;;  %v7153_v44 = vrot.slane %v15502_v52, 5  ;;  %9171 = vmatpush.bf16.msra.mxu2 %v11561_v43  ;;  %9348 = vmatpush.bf16.msra.mxu0 %v11578_v57 }
 0x42b   : > { %v5968_v39 = vpop.permute.xlu2 %5967  ;;  %9096 = vmatmul.bf16.gmra.mxu1 %v10911_v56  ;;  %v10822_v56 = vrot.slane %v6059_v28, 9  ;;  %v7571_v11 = vsel %vm11842_vm2, %v7566_v8, %v15406_v63  ;;  %v7433_v63 = vld [vmem:[#allocation3 + $0x64] sm:$0xf]  ;;  %v6631_v41 = vrot.slane %v6630_v36, 4  ;;  %v6633_v28 = vshll.u32 %v6525_v49, 16  ;;  %v11575_v57 = vld [vmem:[%s17469_s3 + $0xc8] sm:$0xff] }
 0x42c   : > { %7237 = vrot.lane.b32.xlu0 %v7140_v4, %s11722_s22  ;;  %6042 = vst.msk [vmem:[#allocation2 + $0x1a4] sm:$0xf] %vm17662_vm9, %v5968_v39  ;;  %v15475_v4 = vrot.slane %v7592_v48, 5  ;;  %v6620_v39 = vor.u32 %v6619_v37, %v6616_v34  ;;  %v6067_v48 = vld [vmem:[#allocation3 + $0x38] sm:$0x1]  ;;  %v7616_v16 = vshll.u32 %v7433_v63, 16  ;;  %vm17674_vm9 = vmmov %vm17643_vm0 }
 0x42d   : > { %v7620_v31 = vshrl.u32 %v7433_v63, 16  ;;  %v15534_v34 = vrot.slane %v7610_v18, 5  ;;  %v11570_v50 = vld [vmem:[%s17469_s3 + $0xa0] sm:$0xff]  ;;  %v15555_v9 = vld [vmem:[#allocation3 + $0x34] sm:$0xf] }
 0x42e   : > { %v5958_v3 = vpop.permute.xlu0 %5957  ;;  %v6621_v59 = vrot.slane %v6620_v39, 4  ;;  %v7599_v40 = vor.u32 %v7598_v19, %v15475_v4  ;;  %v15536_v37 = vrot.slane %v7616_v16, 5  ;;  %v7358_v39 = vld [vmem:[#allocation3 + $0x48] sm:$0xf]  ;;  %9259 = vmatpush.bf16.msra.mxu3 %v11570_v50  ;;  %v6647_v32 = vshll.u32 %v15555_v9, 16 }
 0x42f   : > { %6405 = vrot.lane.b32.xlu1 %v6333_v29, %s11722_s22  ;;  %6037 = vst.msk [vmem:[#allocation2 + $0x140] sm:$0xf] %vm17663_vm1, %v5958_v3  ;;  %v6166_v29 = vsel %vm12010_vm6, %v10822_v56, %v6165_v58  ;;  %v7149_v3 = vrot.slane %v15477_v53, 5  ;;  %v7147_v58 = vsel %vm12010_vm6, %v10841_v22, %v7146_v46  ;;  %v15538_v56 = vrot.slane %v7620_v31, 4  ;;  %vm17675_vm1 = vmmov %vm17661_vm3  ;;  %v11560_v22 = vld [vmem:[%s17469_s3 + $0x50] sm:$0xff]  ;;  %v11567_v50 = vld [vmem:[%s17469_s3 + $0x88] sm:$0xff] }
 0x430   : > { %6297 = vst.msk [vmem:[#allocation2 + $0x54] sm:$0xf] %vm17670_vm13, %v6166_v29  ;;  %v6626_v30 = vsel %vm11842_vm2, %v6621_v59, %v6625_v0  ;;  %v7600_v55 = vrot.slane %v7599_v40, 4  ;;  %v6526_v29 = vld [vmem:[#allocation3 + $0x30] sm:$0xf]  ;;  %vm17677_vm15 = vmmov %vm17675_vm1  ;;  %9172 = vmatpush.bf16.msra.mxu2 %v11560_v22  ;;  %v15601_v54 = vrot.slane %v6647_v32, 5 }
 0x431   : > { %v5954_v42 = vpop.permute.xlu1 %5953  ;;  %6407 = vrot.lane.b32.xlu2 %v6334_v10, %s11722_s22  ;;  %v15507_v10 = vrot.slane %v7589_v51, 4  ;;  %6985 = vst.msk [vmem:[#allocation2 + $0x58] sm:$0xf] %vm17672_vm11, %v6626_v30  ;;  %v6635_v51 = vrot.slane %v6633_v28, 5  ;;  %v6053_v59 = vld [vmem:[#allocation3] sm:$0xe]  ;;  %vm17679_vm5 = vmmov %vm17675_vm1 }
 0x432   : > { %6035 = vst.msk [vmem:[#allocation2 + $0x118] sm:$0xf] %vm17666_vm10, %v5954_v42  ;;  %v7355_v42 = vld [vmem:[#allocation3 + $0x34] sm:$0xf]  ;;  %v7605_v19 = vsel %vm11842_vm2, %v7600_v55, %v7604_v61  ;;  %vm17678_vm10 = vmmov %vm17643_vm0  ;;  %v7150_v61 = vsel %vm12010_vm6, %v15481_v27, %v7149_v3  ;;  %v15574_v35 = vld [vmem:[#allocation3 + $0x5c] sm:$0x1] }
 0x433   : > { %v5974_v25 = vpop.permute.xlu2 %5973  ;;  %7387 = vst.msk [vmem:[#allocation2 + $0x70] sm:$0xf] %vm17661_vm3, %v7355_v42  ;;  %v6636_v21 = vsel %vm11842_vm2, %v6631_v41, %v6635_v51  ;;  %v10820_v40 = vrot.slane %v6053_v59, 9  ;;  %v10950_v53 = vld [vmem:[#allocation2 + $0xa0] sm:$0xf]  ;;  %v11576_v55 = vld [vmem:[%s17469_s3 + $0xd0] sm:$0xff] }
 0x434   : > { %7864 = vrot.lane.b32.xlu0 %v7581_v2, %s11722_s22  ;;  %6045 = vst.msk [vmem:[#allocation2 + $0x1e0] sm:$0xf] %vm17643_vm0, %v5974_v25  ;;  %v6182_v2 = vrot.slane %v6067_v48, 5  ;;  %v6336_v25 = vld [vmem:[#allocation3 + $0x4c] sm:$0xf]  ;;  %vm17681_vm0 = vmmov %vm17675_vm1 }
 0x435   : > { %7390 = vst.msk [vmem:[#allocation2 + $0xac] sm:$0xf] %vm17677_vm15, %v7358_v39  ;;  %v15584_v3 = vld [vmem:[#allocation3 + $0x60] sm:$0xe]  ;;  %v15588_v18 = vld [vmem:[#allocation3 + $0x64] sm:$0xf]  ;;  %v6152_v42 = vsel %vm12010_vm6, %v10820_v40, %v6151_v26  ;;  %vm17682_vm13 = vmmov %vm17681_vm0 }
 0x436   : > { %v5964_v13 = vpop.permute.xlu0 %5963  ;;  %v6183_v6 = vsel %vm12010_vm6, %v6181_v1, %v6182_v2  ;;  %6986 = vst.msk [vmem:[#allocation2 + $0x6c] sm:$0xf] %vm17679_vm5, %v6636_v21  ;;  %v15594_v36 = vld [vmem:[#allocation3 + $0x6c] sm:$0xf]  ;;  %v11492_v1 = vld [vmem:[#allocation2 + $0xb0] sm:$0xf0]  ;;  %vm17684_vm11 = vmmov %vm17681_vm0 }
 0x437   : > { %7239 = vrot.lane.b32.xlu1 %v7143_v20, %s11722_s22  ;;  %6040 = vst.msk [vmem:[#allocation2 + $0x17c] sm:$0xf] %vm17669_vm4, %v5964_v13  ;;  %v15530_v20 = vrot.slane %v7607_v60, 4  ;;  %v7626_v13 = vshll.u32 %v15518_v5, 16  ;;  %v11577_v60 = vld [vmem:[%s17469_s3 + $0xd8] sm:$0xff]  ;;  %v10951_v26 = vor.u32 %v11492_v1, %v10950_v53  ;;  %v11568_v2 = vld [vmem:[%s17469_s3 + $0x90] sm:$0xff]  ;;  %vm17686_vm3 = vmmov %vm17681_vm0 }
 0x438   : > { %6302 = vst.msk [vmem:[#allocation2 + $0xb8] sm:$0xf] %vm17675_vm1, %v6183_v6  ;;  %9349 = vmatpush.bf16.msra.mxu0 %v11577_v60  ;;  %v7156_v6 = vrot.slane %v15574_v35, 5  ;;  %v7436_v5 = vld [vmem:[#allocation3 + $0x70] sm:$0xf]  ;;  %vm17688_vm1 = vmmov %vm17669_vm4 }
 0x439   : > { %v5960_v33 = vpop.permute.xlu1 %5959  ;;  %7862 = vrot.lane.b32.xlu2 %v7571_v11, %s11722_s22  ;;  %v6638_v11 = vshrl.u32 %v6526_v29, 16  ;;  %v7613_v27 = vor.u32 %v15534_v34, %v15530_v20  ;;  %6293 = vst.msk [vmem:[#allocation2 + $0x4] sm:$0xf] %vm17681_vm0, %v6152_v42  ;;  %v15630_v20 = vrot.slane %v7153_v44, 4  ;;  %v6651_v34 = vshrl.u32 %v15555_v9, 16  ;;  %vm17690_vm15 = vmmov %vm17688_vm1 }
 0x43a   : > { %6038 = vst.msk [vmem:[#allocation2 + $0x154] sm:$0xf] %vm17671_vm14, %v5960_v33  ;;  %v6641_v33 = vshll.u32 %v6526_v29, 16  ;;  %vm17683_vm14 = vmmov %vm17669_vm4  ;;  %v15645_v22 = vld [vmem:[#allocation3 + $0x74] sm:$0x1]  ;;  %v7640_v39 = vshll.u32 %v7436_v5, 16 }
 0x43b   : > { %v5980_v46 = vpop.permute.xlu2 %5979  ;;  %9101 = vmatmul.bf16.gmra.mxu1 %v10931_v12  ;;  %v11559_v12 = vld [vmem:[%s17469_s3 + $0x48] sm:$0xff]  ;;  %v6640_v30 = vrot.slane %v6638_v11, 4  ;;  %v6338_v51 = vld [vmem:[#allocation3 + $0x58] sm:$0xf]  ;;  %v6070_v29 = vld [vmem:[#allocation3 + $0x44] sm:$0x1] }
 0x43c   : > { %7241 = vrot.lane.b32.xlu0 %v7147_v58, %s11722_s22  ;;  %6048 = vst.msk [vmem:[#allocation2 + $0x21c] sm:$0xf] %vm17673_vm8, %v5980_v46  ;;  %v11569_v58 = vld [vmem:[%s17469_s3 + $0x98] sm:$0xff]  ;;  %v6643_v48 = vrot.slane %v6641_v33, 5  ;;  %v6062_v46 = vld [vmem:[#allocation3 + $0x24] sm:$0xe]  ;;  %9173 = vmatpush.bf16.msra.mxu2 %v11559_v12  ;;  %vm17685_vm8 = vmmov %vm17669_vm4 }
 0x43d   : > { %9260 = vmatpush.bf16.msra.mxu3 %v11569_v58  ;;  %v10823_v31 = vrot.slane %v6062_v46, 9  ;;  %9350 = vmatpush.bf16.msra.mxu0 %v11576_v55  ;;  %v7644_v9 = vshrl.u32 %v7436_v5, 16  ;;  %v7357_v11 = vld [vmem:[#allocation3 + $0x40] sm:$0xf]  ;;  %v6189_v32 = vrot.slane %v6070_v29, 5  ;;  %v6653_v12 = vrot.slane %v6651_v34, 4  ;;  %vm17692_vm5 = vmmov %vm17681_vm0 }
 0x43e   : > { %v5970_v38 = vpop.permute.xlu0 %5969  ;;  %v6644_v16 = vor.u32 %v6643_v48, %v6640_v30  ;;  %7389 = vst.msk [vmem:[#allocation2 + $0x98] sm:$0xf] %vm17686_vm3, %v7357_v11  ;;  %v6528_v59 = vld [vmem:[#allocation3 + $0x38] sm:$0x1]  ;;  %v7650_v53 = vshll.u32 %v15645_v22, 16  ;;  %vm17699_vm3 = vmmov %vm17688_vm1 }
 0x43f   : > { %6409 = vrot.lane.b32.xlu1 %v6335_v24, %s11722_s22  ;;  %6043 = vst.msk [vmem:[#allocation2 + $0x1b8] sm:$0xf] %vm17674_vm9, %v5970_v38  ;;  %v7623_v24 = vor.u32 %v15538_v56, %v15536_v37  ;;  %v7595_v38 = vsel %vm11842_vm2, %v15507_v10, %v15475_v4  ;;  %v7154_v4 = vsel %vm12010_vm6, %v10842_v62, %v7153_v44  ;;  %v11558_v10 = vld [vmem:[%s17469_s3 + $0x40] sm:$0xff]  ;;  %v7628_v62 = vrot.slane %v7626_v13, 5  ;;  %vm17687_vm9 = vmmov %vm17669_vm4  ;;  %v10970_v35 = vld [vmem:[#allocation2 + $0xc8] sm:$0xf] }
 0x440   : > { %v6645_v49 = vrot.slane %v6644_v16, 4  ;;  %v6173_v45 = vsel %vm12010_vm6, %v10823_v31, %v6172_v7  ;;  %v10843_v7 = vrot.slane %v15584_v3, 9  ;;  %v7631_v44 = vshrl.u32 %v15594_v36, 16  ;;  %9174 = vmatpush.bf16.msra.mxu2 %v11558_v10  ;;  %v15643_v56 = vld [vmem:[#allocation3 + $0x40] sm:$0xf] }
 0x441   : > { %v5966_v8 = vpop.permute.xlu1 %5965  ;;  %6411 = vrot.lane.b32.xlu2 %v6336_v25, %s11722_s22  ;;  %v15624_v25 = vrot.slane %v7613_v27, 4  ;;  %6299 = vst.msk [vmem:[#allocation2 + $0x7c] sm:$0xf] %vm17682_vm13, %v6173_v45  ;;  %v7624_v28 = vrot.slane %v7623_v24, 4  ;;  %9261 = vmatpush.bf16.msra.mxu3 %v11568_v2  ;;  %v6186_v21 = vrot.slane %v15643_v56, 5  ;;  %v6657_v60 = vshll.u32 %v6528_v59, 16  ;;  %vm17695_vm13 = vmmov %vm17688_vm1 }
 0x442   : > { %6041 = vst.msk [vmem:[#allocation2 + $0x190] sm:$0xf] %vm17676_vm7, %v5966_v8  ;;  %v7160_v8 = vrot.slane %v15588_v18, 5  ;;  %v6650_v52 = vsel %vm11842_vm2, %v6645_v49, %v15601_v54  ;;  %9351 = vmatpush.bf16.msra.mxu0 %v11575_v57  ;;  %v7633_v30 = vrot.slane %v7631_v44, 4  ;;  %v6654_v27 = vor.u32 %v6653_v12, %v15601_v54  ;;  %v11497_v31 = vld [vmem:[#allocation2 + $0xd8] sm:$0xf0]  ;;  %vm17689_vm7 = vmmov %vm17681_vm0 }
 0x443   : > { %v5986_v0 = vpop.permute.xlu2 %5985  ;;  %6987 = vst.msk [vmem:[#allocation2 + $0x80] sm:$0xf] %vm17684_vm11, %v6650_v52  ;;  %v7629_v58 = vsel %vm11842_vm2, %v7624_v28, %v7628_v62  ;;  %v6188_v40 = vrot.slane %v6186_v21, 4  ;;  %v15676_v24 = vrot.slane %v7640_v39, 5  ;;  %v7646_v42 = vrot.slane %v7644_v9, 4  ;;  %vm17697_vm11 = vmmov %vm17688_vm1 }
 0x444   : > { %7868 = vrot.lane.b32.xlu0 %v7605_v19, %s11722_s22  ;;  %6051 = vst.msk [vmem:[#allocation2 + $0x258] sm:$0xf] %vm17678_vm10, %v5986_v0  ;;  %v7634_v19 = vshll.u32 %v15594_v36, 16  ;;  %v15657_v0 = vld [vmem:[#allocation3 + $0x78] sm:$0xf]  ;;  %v6659_v1 = vrot.slane %v6657_v60, 5  ;;  %v7157_v54 = vsel %vm12010_vm6, %v15630_v20, %v7156_v6  ;;  %v7619_v2 = vsel %vm11842_vm2, %v15624_v25, %v15536_v37  ;;  %vm17691_vm10 = vmmov %vm17681_vm0 }
 0x445   : > { %9262 = vmatpush.bf16.msra.mxu3 %v11567_v50  ;;  %v7655_v36 = vshrl.u32 %v15657_v0, 16  ;;  %v6190_v16 = vsel %vm12010_vm6, %v6188_v40, %v6189_v32  ;;  %v6529_v10 = vld [vmem:[#allocation3 + $0x3c] sm:$0xf]  ;;  %v7036_v55 = vld [vmem:[#allocation3 + $0x68] sm:$0x1]  ;;  %v7658_v52 = vshll.u32 %v15657_v0, 16  ;;  %v10971_v22 = vor.u32 %v11497_v31, %v10970_v35 }
 0x446   : > { %v5976_v63 = vpop.permute.xlu0 %5975  ;;  %v7636_v48 = vrot.slane %v7634_v19, 5  ;;  %6304 = vst.msk [vmem:[#allocation2 + $0xe0] sm:$0xf] %vm17689_vm7, %v6190_v16  ;;  %v6530_v45 = vld [vmem:[#allocation3 + $0x40] sm:$0xf]  ;;  %v6662_v62 = vshrl.u32 %v6529_v10, 16  ;;  %v7161_v19 = vsel %vm12010_vm6, %v10843_v7, %v7160_v8  ;;  %vm17701_vm7 = vmmov %vm17681_vm0 }
 0x447   : > { %7243 = vrot.lane.b32.xlu1 %v7150_v61, %s11722_s22  ;;  %6046 = vst.msk [vmem:[#allocation2 + $0x1f4] sm:$0xf] %vm17680_vm12, %v5976_v63  ;;  %v11566_v61 = vld [vmem:[%s17469_s3 + $0x80] sm:$0xff]  ;;  %v6665_v20 = vshll.u32 %v6529_v10, 16  ;;  %v6671_v37 = vshll.u32 %v6530_v45, 16  ;;  %v6675_v25 = vshrl.u32 %v6530_v45, 16  ;;  %vm17693_vm12 = vmmov %vm17688_vm1 }
 0x448   : > { %v11574_v63 = vld [vmem:[%s17469_s3 + $0xc0] sm:$0xff]  ;;  %v7637_v6 = vor.u32 %v7636_v48, %v7633_v30  ;;  %v6065_v28 = vld [vmem:[#allocation3 + $0x30] sm:$0xe]  ;;  %v6664_v44 = vrot.slane %v6662_v62, 4  ;;  %v7162_v39 = vrot.slane %v7160_v8, 4  ;;  %v7652_v59 = vrot.slane %v7650_v53, 5 }
 0x449   : > { %v5972_v43 = vpop.permute.xlu1 %5971  ;;  %7866 = vrot.lane.b32.xlu2 %v7595_v38, %s11722_s22  ;;  %9263 = vmatpush.bf16.msra.mxu3 %v11566_v61  ;;  %v15682_v38 = vld [vmem:[#allocation3 + $0x7c] sm:$0xf]  ;;  %v6667_v34 = vrot.slane %v6665_v20, 5  ;;  %v6673_v57 = vrot.slane %v6671_v37, 5  ;;  %v7440_v29 = vld [vmem:[#allocation3 + $0x80] sm:$0x1] }
 0x44a   : > { %6044 = vst.msk [vmem:[#allocation2 + $0x1cc] sm:$0xf] %vm17669_vm4, %v5972_v43  ;;  %v6655_v43 = vrot.slane %v6654_v27, 4  ;;  %9352 = vmatpush.bf16.msra.mxu0 %v11574_v63  ;;  %v7664_v50 = vshll.u32 %v15682_v38, 16  ;;  %v15720_v32 = vrot.slane %v7637_v6, 4  ;;  %v7163_v7 = vrot.slane %v7036_v55, 5  ;;  %vm17694_vm4 = vmmov %vm17688_vm1 }
 0x44b   : > { %v6392_v41 = vpop.permute.xlu2 %6391  ;;  %9106 = vmatmul.bf16.gmra.mxu1 %v10951_v26  ;;  %v6668_v9 = vor.u32 %v6667_v34, %v6664_v44  ;;  %v7657_v47 = vrot.slane %v7655_v36, 4  ;;  %v7660_v8 = vrot.slane %v7658_v52, 5  ;;  %v7674_v63 = vshll.u32 %v7440_v29, 16  ;;  %v6340_v30 = vld [vmem:[#allocation3 + $0x64] sm:$0xf] }
 0x44c   : > { %7245 = vrot.lane.b32.xlu0 %v7154_v4, %s11722_s22  ;;  %6486 = vst.msk [vmem:[#allocation2 + $0x18] sm:$0xf] %vm17683_vm14, %v6392_v41  ;;  %v7360_v4 = vld [vmem:[#allocation3 + $0x54] sm:$0xf]  ;;  %v6660_v49 = vsel %vm11842_vm2, %v6655_v43, %v6659_v1  ;;  %v7647_v41 = vor.u32 %v7646_v42, %v15676_v24  ;;  %v15728_v61 = vrot.slane %v7664_v50, 5  ;;  %vm17696_vm14 = vmmov %vm17681_vm0 }
 0x44d   : > { %6988 = vst.msk [vmem:[#allocation2 + $0x94] sm:$0xf] %vm17691_vm10, %v6660_v49  ;;  %v6669_v40 = vrot.slane %v6668_v9, 4  ;;  %v15732_v48 = vld [vmem:[#allocation3 + $0x74] sm:$0x1]  ;;  %v7661_v43 = vor.u32 %v7660_v8, %v7657_v47  ;;  %v15753_v6 = vrot.slane %v7674_v63, 5  ;;  %vm17703_vm10 = vmmov %vm17688_vm1 }
 0x44e   : > { %v5982_v13 = vpop.permute.xlu0 %5981  ;;  %7392 = vst.msk [vmem:[#allocation2 + $0xd4] sm:$0xf] %vm17692_vm5, %v7360_v4  ;;  %v7648_v3 = vrot.slane %v7647_v41, 4  ;;  %v7441_v53 = vld [vmem:[#allocation3 + $0x84] sm:$0xf]  ;;  %v7170_v37 = vrot.slane %v15732_v48, 5  ;;  %vm17704_vm5 = vmmov %vm17688_vm1 }
 0x44f   : > { %6413 = vrot.lane.b32.xlu1 %v6337_v14, %s11722_s22  ;;  %6049 = vst.msk [vmem:[#allocation2 + $0x230] sm:$0xf] %vm17685_vm8, %v5982_v13  ;;  %v15699_v14 = vld [vmem:[#allocation3 + $0x70] sm:$0xf]  ;;  %v10824_v13 = vrot.slane %v6065_v28, 9  ;;  %v7679_v4 = vshrl.u32 %v7441_v53, 16  ;;  %vm17698_vm8 = vmmov %vm17681_vm0 }
 0x450   : > { %v7167_v18 = vrot.slane %v15699_v14, 5  ;;  %v15734_v27 = vld [vmem:[#allocation3 + $0x88] sm:$0xf]  ;;  %v15738_v42 = vld [vmem:[#allocation3 + $0x4c] sm:$0xf]  ;;  %v7682_v10 = vshll.u32 %v7441_v53, 16  ;;  %v7653_v55 = vsel %vm11842_vm2, %v7648_v3, %v7652_v59  ;;  %v7643_v3 = vsel %vm11842_vm2, %v15720_v32, %v15676_v24 }
 0x451   : > { %v5978_v33 = vpop.permute.xlu1 %5977  ;;  %6415 = vrot.lane.b32.xlu2 %v6338_v51, %s11722_s22  ;;  %v6677_v51 = vrot.slane %v6675_v25, 4  ;;  %v6180_v0 = vsel %vm12010_vm6, %v10824_v13, %v6179_v15  ;;  %v7668_v15 = vshrl.u32 %v15682_v38, 16  ;;  %v6073_v36 = vld [vmem:[#allocation3 + $0x50] sm:$0x1]  ;;  %v7359_v16 = vld [vmem:[#allocation3 + $0x4c] sm:$0xf]  ;;  %v7164_v38 = vsel %vm12010_vm6, %v7162_v39, %v7163_v7 }
 0x452   : > { %6047 = vst.msk [vmem:[#allocation2 + $0x208] sm:$0xf] %vm17687_vm9, %v5978_v33  ;;  %v6339_v33 = vld [vmem:[#allocation3 + $0x60] sm:$0xf]  ;;  %v6196_v62 = vrot.slane %v6073_v36, 5  ;;  %v15757_v41 = vrot.slane %v7167_v18, 4  ;;  %vm17700_vm9 = vmmov %vm17681_vm0 }
 0x453   : > { %v7847_v46 = vpop.permute.xlu2 %7846  ;;  %6301 = vst.msk [vmem:[#allocation2 + $0xa4] sm:$0xf] %vm17681_vm0, %v6180_v0  ;;  %v6678_v60 = vor.u32 %v6677_v51, %v6673_v57  ;;  %v7670_v1 = vrot.slane %v7668_v15, 4  ;;  %v15761_v28 = vrot.slane %v7661_v43, 4  ;;  %v7692_v52 = vshrl.u32 %v15734_v27, 16 }
 0x454   : > { %7872 = vrot.lane.b32.xlu0 %v7629_v58, %s11722_s22  ;;  %7942 = vst.msk [vmem:[#allocation2 + $0xc] sm:$0xf] %vm17688_vm1, %v7847_v46  ;;  %v15726_v58 = vld [vmem:[#allocation3 + $0x6c] sm:$0xe]  ;;  %v6674_v46 = vsel %vm11842_vm2, %v6669_v40, %v6673_v57  ;;  %v11502_v13 = vld [vmem:[#allocation2 + $0x100] sm:$0xf0] }
 0x455   : > { %6989 = vst.msk [vmem:[#allocation2 + $0xa8] sm:$0xf] %vm17696_vm14, %v6674_v46  ;;  %v10844_v49 = vrot.slane %v15726_v58, 9  ;;  %v15768_v50 = vld [vmem:[#allocation3 + $0x7c] sm:$0xf]  ;;  %v7681_v57 = vrot.slane %v7679_v4, 4 }
 0x456   : > { %v5988_v26 = vpop.permute.xlu0 %5987  ;;  %7391 = vst.msk [vmem:[#allocation2 + $0xc0] sm:$0xf] %vm17698_vm8, %v7359_v16  ;;  %v7684_v51 = vrot.slane %v7682_v10, 5  ;;  %v10990_v39 = vld [vmem:[#allocation2 + $0xf0] sm:$0xf]  ;;  %v7694_v4 = vrot.slane %v7692_v52, 4 }
 0x457   : > { %7247 = vrot.lane.b32.xlu1 %v7157_v54, %s11722_s22  ;;  %6052 = vst.msk [vmem:[#allocation2 + $0x26c] sm:$0xf] %vm17690_vm15, %v5988_v26  ;;  %v6193_v54 = vrot.slane %v15738_v42, 5  ;;  %v6531_v26 = vld [vmem:[#allocation3 + $0x44] sm:$0x1]  ;;  %vm17702_vm15 = vmmov %vm17681_vm0  ;;  %v10991_v15 = vor.u32 %v11502_v13, %v10990_v39 }
 0x458   : > { %v6681_v35 = vshll.u32 %v6531_v26, 16  ;;  %v10872_v29 = vld [vmem:[#allocation2 + $0x14] sm:$0xf0]  ;;  %v7443_v9 = vld [vmem:[#allocation3 + $0x8c] sm:$0x1]  ;;  %v7685_v16 = vor.u32 %v7684_v51, %v7681_v57 }
 0x459   : > { %v5984_v5 = vpop.permute.xlu1 %5983  ;;  %7870 = vrot.lane.b32.xlu2 %v7619_v2, %s11722_s22  ;;  %v6679_v2 = vrot.slane %v6678_v60, 4  ;;  %v6195_v45 = vrot.slane %v6193_v54, 4  ;;  %v7362_v0 = vld [vmem:[#allocation3 + $0x60] sm:$0xf]  ;;  %v6068_v40 = vld [vmem:[#allocation3 + $0x3c] sm:$0xe] }
 0x45a   : > { %6050 = vst.msk [vmem:[#allocation2 + $0x244] sm:$0xf] %vm17693_vm12, %v5984_v5  ;;  %v6683_v25 = vrot.slane %v6681_v35, 5  ;;  %v7688_v5 = vshll.u32 %v15734_v27, 16  ;;  %v7174_v60 = vrot.slane %v15768_v50, 5  ;;  %v10825_v32 = vrot.slane %v6068_v40, 9  ;;  %vm17705_vm12 = vmmov %vm17681_vm0 }
 0x45b   : > { %v6396_v11 = vpop.permute.xlu2 %6395  ;;  %9111 = vmatmul.bf16.gmra.mxu1 %v10971_v22  ;;  %v6197_v44 = vsel %vm12010_vm6, %v6195_v45, %v6196_v62  ;;  %v7671_v22 = vor.u32 %v7670_v1, %v15728_v61  ;;  %7394 = vst.msk [vmem:[#allocation2 + $0xfc] sm:$0xf] %vm17702_vm15, %v7362_v0  ;;  %v7168_v27 = vsel %vm12010_vm6, %v10844_v49, %v7167_v18  ;;  %v6341_v46 = vld [vmem:[#allocation3 + $0x6c] sm:$0xf]  ;;  %v15790_v36 = vld [vmem:[#allocation3 + $0x78] sm:$0xe]  ;;  %vm17706_vm0 = vmmov %vm17688_vm1 }
 0x45c   : > { %7249 = vrot.lane.b32.xlu0 %v7161_v19, %s11722_s22  ;;  %6488 = vst.msk [vmem:[#allocation2 + $0x40] sm:$0xf] %vm17694_vm4, %v6396_v11  ;;  %v6684_v19 = vsel %vm11842_vm2, %v6679_v2, %v6683_v25  ;;  %v6532_v11 = vld [vmem:[#allocation3 + $0x48] sm:$0xf]  ;;  %v11471_v1 = vld [vmem:[#allocation2 + $0xc] sm:$0xf]  ;;  %v6187_v18 = vsel %vm12010_vm6, %v10825_v32, %v6186_v21  ;;  %vm17707_vm4 = vmmov %vm17706_vm0 }
 0x45d   : > { %6306 = vst.msk [vmem:[#allocation2 + $0x108] sm:$0xf] %vm17700_vm9, %v6197_v44  ;;  %v6686_v47 = vshrl.u32 %v6532_v11, 16  ;;  %v6689_v8 = vshll.u32 %v6532_v11, 16  ;;  %v15783_v58 = vrot.slane %v7671_v22, 4  ;;  %v15796_v26 = vrot.slane %v7688_v5, 5  ;;  %vm17709_vm14 = vmmov %vm17706_vm0 }
 0x45e   : > { %v7222_v12 = vpop.permute.xlu0 %7221  ;;  %6990 = vst.msk [vmem:[#allocation2 + $0xbc] sm:$0xf] %vm17701_vm7, %v6684_v19  ;;  %v11583_v35 = vld [vmem:[%s17469_s3 + $0x108] sm:$0xff]  ;;  %v6342_v49 = vld [vmem:[#allocation3 + $0x70] sm:$0xf]  ;;  %v10845_v56 = vrot.slane %v15790_v36, 9  ;;  %vm17711_vm8 = vmmov %vm17706_vm0 }
 0x45f   : > { %6417 = vrot.lane.b32.xlu1 %v6339_v33, %s11722_s22  ;;  %7317 = vst.msk [vmem:[#allocation2 + $0x8] sm:$0xf] %vm17695_vm13, %v7222_v12  ;;  %v6533_v33 = vld [vmem:[#allocation3 + $0x4c] sm:$0xf]  ;;  %v6691_v24 = vrot.slane %v6689_v8, 5  ;;  %v15811_v21 = vrot.slane %v7174_v60, 4  ;;  %9440 = vmatpush.bf16.msra.mxu1 %v11583_v35  ;;  %v7695_v39 = vor.u32 %v7694_v4, %v15796_v26  ;;  %vm17708_vm13 = vmmov %vm17701_vm7  ;;  %v7667_v4 = vsel %vm11842_vm2, %v15761_v28, %v15728_v61 }
 0x460   : > { %v6695_v63 = vshll.u32 %v6533_v33, 16  ;;  %v6699_v43 = vshrl.u32 %v6533_v33, 16  ;;  %6303 = vst.msk [vmem:[#allocation2 + $0xcc] sm:$0xf] %vm17705_vm12, %v6187_v18  ;;  %v15818_v52 = vld [vmem:[#allocation3 + $0x88] sm:$0xf]  ;;  %vm17713_vm9 = vmmov %vm17706_vm0 }
 0x461   : > { %v6390_v31 = vpop.permute.xlu1 %6389  ;;  %6419 = vrot.lane.b32.xlu2 %v6340_v30, %s11722_s22  ;;  %v6688_v30 = vrot.slane %v6686_v47, 4  ;;  %v7444_v57 = vld [vmem:[#allocation3 + $0x90] sm:$0xf]  ;;  %v7181_v11 = vrot.slane %v15818_v52, 5  ;;  %v6076_v33 = vld [vmem:[#allocation3 + $0x5c] sm:$0x1]  ;;  %vm17716_vm15 = vmmov %vm17706_vm0 }
 0x462   : > { %6485 = vst.msk [vmem:[#allocation2 + $0x4] sm:$0xf] %vm17697_vm11, %v6390_v31  ;;  %v7698_v31 = vshll.u32 %v7443_v9, 16  ;;  %v6701_v44 = vrot.slane %v6699_v43, 4  ;;  %v15827_v9 = vld [vmem:[#allocation3 + $0x58] sm:$0xf]  ;;  %vm17710_vm11 = vmmov %vm17701_vm7 }
 0x463   : > { %v7851_v20 = vpop.permute.xlu2 %7850  ;;  %v6692_v14 = vor.u32 %v6691_v24, %v6688_v30  ;;  %v15836_v47 = vld [vmem:[#allocation3 + $0x94] sm:$0xf]  ;;  %v7703_v8 = vshrl.u32 %v7444_v57, 16  ;;  %v6203_v30 = vrot.slane %v6076_v33, 5  ;;  %v15847_v24 = vrot.slane %v7695_v39, 4 }
 0x464   : > { %7876 = vrot.lane.b32.xlu0 %v7653_v55, %s11722_s22  ;;  %7944 = vst.msk [vmem:[#allocation2 + $0x34] sm:$0xf] %vm17699_vm3, %v7851_v20  ;;  %v6697_v55 = vrot.slane %v6695_v63, 5  ;;  %v15813_v20 = vrot.slane %v7685_v16, 4  ;;  %v15815_v25 = vrot.slane %v7698_v31, 5  ;;  %v7171_v63 = vsel %vm12010_vm6, %v15757_v41, %v7170_v37  ;;  %vm17712_vm3 = vmmov %vm17701_vm7 }
 0x465   : > { %v6693_v62 = vrot.slane %v6692_v14, 4  ;;  %v11010_v48 = vld [vmem:[#allocation2 + $0x118] sm:$0xf]  ;;  %v7712_v41 = vshll.u32 %v15836_v47, 16  ;;  %v15856_v37 = vrot.slane %v7181_v11, 4  ;;  %v15860_v16 = vrot.slane %v7703_v8, 4 }
 0x466   : > { %v7849_v34 = vpop.permute.xlu0 %7848  ;;  %v10878_v13 = vld [vmem:[#allocation2 + $0x8] sm:$0xf]  ;;  %v6702_v0 = vor.u32 %v6701_v44, %v6697_v55  ;;  %v7716_v43 = vshrl.u32 %v15836_v47, 16  ;;  %v11507_v18 = vld [vmem:[#allocation2 + $0x128] sm:$0xf0] }
 0x467   : > { %7251 = vrot.lane.b32.xlu1 %v7164_v38, %s11722_s22  ;;  %7943 = vst.msk [vmem:[#allocation2 + $0x20] sm:$0xf] %vm17688_vm1, %v7849_v34  ;;  %v15792_v38 = vld [vmem:[#allocation3 + $0x80] sm:$0x1]  ;;  %v6698_v51 = vsel %vm11842_vm2, %v6693_v62, %v6697_v55  ;;  %v11011_v35 = vor.u32 %v11507_v18, %v11010_v48  ;;  %v6535_v62 = vld [vmem:[#allocation3 + $0x54] sm:$0xf]  ;;  %vm17714_vm1 = vmmov %vm17712_vm3 }
 0x468   : > { %v7177_v5 = vrot.slane %v15792_v38, 5  ;;  %6991 = vst.msk [vmem:[#allocation2 + $0xd0] sm:$0xf] %vm17708_vm13, %v6698_v51  ;;  %v15875_v44 = vld [vmem:[#allocation3 + $0x58] sm:$0xf]  ;;  %v6710_v61 = vshrl.u32 %v6535_v62, 16  ;;  %vm17715_vm7 = vmmov %vm17714_vm1 }
 0x469   : > { %v7224_v59 = vpop.permute.xlu1 %7223  ;;  %v11470_v7 = vld [vmem:[#allocation2 + $0x4] sm:$0xf]  ;;  %7874 = vrot.lane.b32.xlu2 %v7643_v3, %s11722_s22  ;;  %v6200_v3 = vrot.slane %v15827_v9, 5  ;;  %v6713_v28 = vshll.u32 %v6535_v62, 16  ;;  %v15885_v51 = vld [vmem:[#allocation3 + $0x8c] sm:$0x1]  ;;  %vm17719_vm12 = vmmov %vm17714_vm1 }
 0x46a   : > { %7318 = vst.msk [vmem:[#allocation2 + $0x1c] sm:$0xf] %vm17703_vm10, %v7224_v59  ;;  %v10875_v12 = vor.u32 %v11470_v7, %v10872_v29  ;;  %v15825_v29 = vld [vmem:[#allocation3 + $0x84] sm:$0xe]  ;;  %v7677_v7 = vsel %vm11842_vm2, %v15783_v58, %v15753_v6  ;;  %v6534_v6 = vld [vmem:[#allocation3 + $0x50] sm:$0x1]  ;;  %vm17717_vm10 = vmmov %vm17706_vm0 }
 0x46b   : > { %v6400_v53 = vpop.permute.xlu2 %6399  ;;  %9116 = vmatmul.bf16.gmra.mxu1 %v10991_v15  ;;  %v7706_v15 = vshll.u32 %v7444_v57, 16  ;;  %v6202_v40 = vrot.slane %v6200_v3, 4  ;;  %v10846_v32 = vrot.slane %v15825_v29, 9  ;;  %v15883_v57 = vld [vmem:[#allocation3 + $0x98] sm:$0x1]  ;;  %v15890_v33 = vrot.slane %v7712_v41, 5  ;;  %vm17721_vm13 = vmmov %vm17706_vm0 }
 0x46c   : > { %9175 = vmatmul.bf16.vlgmr.msra.gmra.mxu2 %v10875_v12  ;;  %6490 = vst.msk [vmem:[#allocation2 + $0x68] sm:$0xf] %vm17704_vm5, %v6400_v53  ;;  %7253 = vrot.lane.b32.xlu0 %v7168_v27, %s11722_s22  ;;  %v7361_v12 = vld [vmem:[#allocation3 + $0x58] sm:$0xf]  ;;  %v6703_v53 = vrot.slane %v6702_v0, 4  ;;  %v6705_v27 = vshll.u32 %v6534_v6, 16  ;;  %vm17718_vm5 = vmmov %vm17706_vm0 }
 0x46d   : > { %7393 = vst.msk [vmem:[#allocation2 + $0xe8] sm:$0xf] %vm17710_vm11, %v7361_v12  ;;  %v15862_v31 = vrot.slane %v7706_v15, 5  ;;  %v7447_v39 = vld [vmem:[#allocation3 + $0x9c] sm:$0xf]  ;;  %v6712_v36 = vrot.slane %v6710_v61, 4  ;;  %vm17723_vm11 = vmmov %vm17706_vm0 }
 0x46e   : > { %v7226_v10 = vpop.permute.xlu0 %7225  ;;  %v10880_v2 = vld [vmem:[#allocation2 + $0x1c] sm:$0xf0]  ;;  %v15897_v47 = vrot.slane %v7716_v43, 4  ;;  %v7722_v8 = vshll.u32 %v15883_v57, 16  ;;  %v6071_v15 = vld [vmem:[#allocation3 + $0x48] sm:$0xe] }
 0x46f   : > { %6421 = vrot.lane.b32.xlu1 %v6341_v46, %s11722_s22  ;;  %7319 = vst.msk [vmem:[#allocation2 + $0x30] sm:$0xf] %vm17706_vm0, %v7226_v10  ;;  %v10883_v45 = vor.u32 %v11471_v1, %v10880_v2  ;;  %v6204_v46 = vsel %vm12010_vm6, %v6202_v40, %v6203_v30  ;;  %v6707_v1 = vrot.slane %v6705_v27, 5  ;;  %v10892_v2 = vld [vmem:[#allocation2 + $0x3c] sm:$0xf0]  ;;  %v7730_v40 = vshll.u32 %v7447_v39, 16 }
 0x470   : > { %6308 = vst.msk [vmem:[#allocation2 + $0x130] sm:$0xf] %vm17712_vm3, %v6204_v46  ;;  %v6344_v12 = vld [vmem:[#allocation3 + $0x7c] sm:$0xf]  ;;  %v10826_v6 = vrot.slane %v6071_v15, 9  ;;  %v7184_v48 = vrot.slane %v15885_v51, 5  ;;  %vm17725_vm3 = vmmov %vm17706_vm0 }
 0x471   : > { %v6394_v34 = vpop.permute.xlu1 %6393  ;;  %v11473_v22 = vld [vmem:[#allocation2 + $0x18] sm:$0xf0]  ;;  %9353 = vmatmul.bf16.vlgmr.msra.gmra.mxu0 %v10883_v45  ;;  %6423 = vrot.lane.b32.xlu2 %v6342_v49, %s11722_s22  ;;  %v6708_v49 = vsel %vm11842_vm2, %v6703_v53, %v6707_v1  ;;  %v7364_v45 = vld [vmem:[#allocation3 + $0x6c] sm:$0xf]  ;;  %v6723_v41 = vshrl.u32 %v15875_v44, 16  ;;  %v15962_v52 = vrot.slane %v7722_v8, 5 }
 0x472   : > { %6487 = vst.msk [vmem:[#allocation2 + $0x2c] sm:$0xf] %vm17707_vm4, %v6394_v34  ;;  %v10879_v19 = vor.u32 %v11473_v22, %v10878_v13  ;;  %v7175_v13 = vsel %vm12010_vm6, %v10845_v56, %v7174_v60  ;;  %v6343_v22 = vld [vmem:[#allocation3 + $0x78] sm:$0xf]  ;;  %v6719_v60 = vshll.u32 %v15875_v44, 16  ;;  %v6194_v1 = vsel %vm12010_vm6, %v10826_v6, %v6193_v54  ;;  %vm17720_vm4 = vmmov %vm17714_vm1 }
 0x473   : > { %v7855_v59 = vpop.permute.xlu2 %7854  ;;  %6992 = vst.msk [vmem:[#allocation2 + $0xe4] sm:$0xf] %vm17714_vm1, %v6708_v49  ;;  %v7449_v18 = vld [vmem:[#allocation3 + $0xa4] sm:$0x1]  ;;  %v7178_v54 = vsel %vm12010_vm6, %v15811_v21, %v7177_v5  ;;  %v15932_v61 = vld [vmem:[#allocation3 + $0x90] sm:$0xe] }
 0x474   : > { %9264 = vmatmul.bf16.vlgmr.msra.gmra.mxu3 %v10879_v19  ;;  %7946 = vst.msk [vmem:[#allocation2 + $0x5c] sm:$0xf] %vm17709_vm14, %v7855_v59  ;;  %7880 = vrot.lane.b32.xlu0 %v7677_v7, %s11722_s22  ;;  %v11476_v19 = vld [vmem:[#allocation2 + $0x34] sm:$0xf]  ;;  %v6715_v59 = vrot.slane %v6713_v28, 5  ;;  %v7709_v7 = vor.u32 %v15862_v31, %v15860_v16  ;;  %v6721_v43 = vrot.slane %v6719_v60, 5  ;;  %vm17722_vm14 = vmmov %vm17714_vm1 }
 0x475   : > { %7396 = vst.msk [vmem:[#allocation2 + $0x124] sm:$0xf] %vm17715_vm7, %v7364_v45  ;;  %v15904_v16 = vld [vmem:[#allocation3 + $0x94] sm:$0xf]  ;;  %v15919_v49 = vld [vmem:[#allocation3 + $0x64] sm:$0xf]  ;;  %vm17728_vm7 = vmmov %vm17720_vm4 }
 0x476   : > { %v7853_v58 = vpop.permute.xlu0 %7852  ;;  %v6716_v30 = vor.u32 %v6715_v59, %v6712_v36  ;;  %v10898_v53 = vld [vmem:[#allocation2 + $0x30] sm:$0xf]  ;;  %6305 = vst.msk [vmem:[#allocation2 + $0xf4] sm:$0xf] %vm17719_vm12, %v6194_v1  ;;  %v6079_v45 = vld [vmem:[#allocation3 + $0x68] sm:$0x1]  ;;  %vm17732_vm12 = vmmov %vm17706_vm0 }
 0x477   : > { %7255 = vrot.lane.b32.xlu1 %v7171_v63, %s11722_s22  ;;  %7945 = vst.msk [vmem:[#allocation2 + $0x48] sm:$0xf] %vm17711_vm8, %v7853_v58  ;;  %v7727_v63 = vshrl.u32 %v7447_v39, 16  ;;  %v6207_v62 = vrot.slane %v15919_v49, 5  ;;  %v6725_v38 = vrot.slane %v6723_v41, 4  ;;  %vm17724_vm8 = vmmov %vm17714_vm1 }
 0x478   : > { %v6717_v31 = vrot.slane %v6716_v30, 4  ;;  %v11030_v21 = vld [vmem:[#allocation2 + $0x140] sm:$0xf]  ;;  %v11512_v5 = vld [vmem:[#allocation2 + $0x150] sm:$0xf0] }
 0x479   : > { %v7228_v14 = vpop.permute.xlu1 %7227  ;;  %v11475_v10 = vld [vmem:[#allocation2 + $0x2c] sm:$0xf]  ;;  %7878 = vrot.lane.b32.xlu2 %v7667_v4, %s11722_s22  ;;  %v7701_v4 = vsel %vm11842_vm2, %v15847_v24, %v15815_v25  ;;  %v7719_v25 = vor.u32 %v15897_v47, %v15890_v33  ;;  %v7188_v24 = vrot.slane %v15904_v16, 5  ;;  %v6209_v39 = vrot.slane %v6207_v62, 4  ;;  %v10912_v36 = vld [vmem:[#allocation2 + $0x64] sm:$0xf0] }
 0x47a   : > { %7320 = vst.msk [vmem:[#allocation2 + $0x44] sm:$0xf] %vm17713_vm9, %v7228_v14  ;;  %v10895_v55 = vor.u32 %v11475_v10, %v10892_v2  ;;  %v7448_v14 = vld [vmem:[#allocation3 + $0xa0] sm:$0xf]  ;;  %v15915_v2 = vrot.slane %v7709_v7, 4  ;;  %v6722_v42 = vsel %vm11842_vm2, %v6717_v31, %v6721_v43  ;;  %v6726_v7 = vor.u32 %v6725_v38, %v6721_v43  ;;  %vm17726_vm9 = vmmov %vm17714_vm1 }
 0x47b   : > { %v6404_v34 = vpop.permute.xlu2 %6403  ;;  %9121 = vmatmul.bf16.gmra.mxu1 %v11011_v35  ;;  %v7729_v35 = vrot.slane %v7727_v63, 4  ;;  %v7736_v28 = vshll.u32 %v7448_v14, 16  ;;  %6993 = vst.msk [vmem:[#allocation2 + $0xf8] sm:$0xf] %vm17720_vm4, %v6722_v42  ;;  %v7363_v60 = vld [vmem:[#allocation3 + $0x64] sm:$0xf]  ;;  %vm17727_vm1 = vmmov %vm17706_vm0 }
 0x47c   : > { %9180 = vmatmul.bf16.gmra.mxu2 %v10895_v55  ;;  %6492 = vst.msk [vmem:[#allocation2 + $0x90] sm:$0xf] %vm17716_vm15, %v6404_v34  ;;  %7257 = vrot.lane.b32.xlu0 %v7175_v13, %s11722_s22  ;;  %v7732_v55 = vrot.slane %v7730_v40, 5  ;;  %v7740_v34 = vshrl.u32 %v7448_v14, 16  ;;  %v7746_v13 = vshll.u32 %v7449_v18, 16  ;;  %v15953_v63 = vrot.slane %v7719_v25, 4  ;;  %vm17729_vm15 = vmmov %vm17706_vm0 }
 0x47d   : > { %7395 = vst.msk [vmem:[#allocation2 + $0x110] sm:$0xf] %vm17722_vm14, %v7363_v60  ;;  %v7450_v29 = vld [vmem:[#allocation3 + $0xa8] sm:$0xf]  ;;  %v15965_v6 = vrot.slane %v7736_v28, 5  ;;  %v15974_v57 = vrot.slane %v7188_v24, 4  ;;  %vm17736_vm14 = vmmov %vm17727_vm1 }
 0x47e   : > { %v7230_v0 = vpop.permute.xlu0 %7229  ;;  %v10900_v50 = vld [vmem:[#allocation2 + $0x44] sm:$0xf0]  ;;  %v7733_v59 = vor.u32 %v7732_v55, %v7729_v35  ;;  %v6345_v41 = vld [vmem:[#allocation3 + $0x84] sm:$0xf]  ;;  %v15970_v31 = vrot.slane %v7746_v13, 5  ;;  %v7754_v14 = vshll.u32 %v7450_v29, 16 }
 0x47f   : > { %6425 = vrot.lane.b32.xlu1 %v6343_v22, %s11722_s22  ;;  %7321 = vst.msk [vmem:[#allocation2 + $0x58] sm:$0xf] %vm17717_vm10, %v7230_v0  ;;  %v10903_v56 = vor.u32 %v11476_v19, %v10900_v50  ;;  %v15935_v22 = vpop.f32.mrf.mxu1  ;;  %v15939_v19 = vld [vmem:[#allocation3 + $0x98] sm:$0x1]  ;;  %v6210_v0 = vrot.slane %v6079_v45, 5  ;;  %v7691_v50 = vsel %vm11842_vm2, %v15813_v20, %v15796_v26  ;;  %v11031_v20 = vor.u32 %v11512_v5, %v11030_v21  ;;  %vm17730_vm10 = vmmov %vm17706_vm0 }
 0x480   : > { %v7191_v8 = vrot.slane %v15939_v19, 5  ;;  %v7451_v43 = vld [vmem:[#allocation3 + $0xac] sm:$0xf]  ;;  %v11481_v1 = vld [vmem:[#allocation2 + $0x5c] sm:$0xf] }
 0x481   : > { %v6398_v58 = vpop.permute.xlu1 %6397  ;;  %v11478_v27 = vld [vmem:[#allocation2 + $0x40] sm:$0xf0]  ;;  %9358 = vmatmul.bf16.gmra.mxu0 %v10903_v56  ;;  %6427 = vrot.lane.b32.xlu2 %v6344_v12, %s11722_s22  ;;  %v6537_v56 = vld [vmem:[#allocation3 + $0x5c] sm:$0x1]  ;;  %v7182_v12 = vsel %vm12010_vm6, %v10846_v32, %v7181_v11  ;;  %v6211_v40 = vsel %vm12010_vm6, %v6209_v39, %v6210_v0  ;;  %v6727_v11 = vrot.slane %v6726_v7, 4  ;;  %v10847_v32 = vrot.slane %v15932_v61, 9 }
 0x482   : > { %6489 = vst.msk [vmem:[#allocation2 + $0x54] sm:$0xf] %vm17718_vm5, %v6398_v58  ;;  %v10899_v46 = vor.u32 %v11478_v27, %v10898_v53  ;;  %v6729_v26 = vshll.u32 %v6537_v56, 16  ;;  %v7742_v58 = vrot.slane %v7740_v34, 4  ;;  %v15981_v55 = vld [vmem:[#allocation3 + $0x9c] sm:$0xe]  ;;  %vm17731_vm5 = vmmov %vm17720_vm4 }
 0x483   : > { %v7859_v10 = vpop.permute.xlu2 %7858  ;;  %6310 = vst.msk [vmem:[#allocation2 + $0x158] sm:$0xf] %vm17724_vm8, %v6211_v40  ;;  %v15983_v42 = vld [vmem:[#allocation3 + $0xa0] sm:$0xf]  ;;  %v6346_v25 = vld [vmem:[#allocation3 + $0x88] sm:$0xf]  ;;  %vm17738_vm8 = vmmov %vm17727_vm1 }
 0x484   : > { %9269 = vmatmul.bf16.gmra.mxu3 %v10899_v46  ;;  %7948 = vst.msk [vmem:[#allocation2 + $0x84] sm:$0xf] %vm17706_vm0, %v7859_v10  ;;  %7884 = vrot.lane.b32.xlu0 %v7701_v4, %s11722_s22  ;;  %v6731_v53 = vrot.slane %v6729_v26, 5  ;;  %v15968_v46 = vrot.slane %v7733_v59, 4  ;;  %v7751_v4 = vshrl.u32 %v7450_v29, 16  ;;  %v7760_v13 = vshll.u32 %v7451_v43, 16  ;;  %vm17733_vm0 = vmmov %vm17720_vm4 }
 0x485   : > { %v6538_v28 = vld [vmem:[#allocation3 + $0x60] sm:$0xf]  ;;  %v6539_v34 = vld [vmem:[#allocation3 + $0x64] sm:$0xf]  ;;  %v7764_v38 = vshrl.u32 %v7451_v43, 16  ;;  %v7725_v59 = vsel %vm11842_vm2, %v15953_v63, %v15962_v52  ;;  %v10848_v40 = vrot.slane %v15981_v55, 9  ;;  %v7185_v43 = vsel %vm12010_vm6, %v15856_v37, %v7184_v48  ;;  %vm17734_vm4 = vmmov %vm17727_vm1 }
 0x486   : > { %v7857_v44 = vpop.permute.xlu0 %7856  ;;  %v6732_v18 = vsel %vm11842_vm2, %v6727_v11, %v6731_v53  ;;  %v6734_v21 = vshrl.u32 %v6538_v28, 16  ;;  %v6737_v5 = vshll.u32 %v6538_v28, 16  ;;  %v6074_v60 = vld [vmem:[#allocation3 + $0x54] sm:$0xe]  ;;  %v7195_v26 = vrot.slane %v15983_v42, 5 }
 0x487   : > { %7259 = vrot.lane.b32.xlu1 %v7178_v54, %s11722_s22  ;;  %7947 = vst.msk [vmem:[#allocation2 + $0x70] sm:$0xf] %vm17721_vm13, %v7857_v44  ;;  %v7366_v54 = vld [vmem:[#allocation3 + $0x78] sm:$0xf]  ;;  %v7743_v44 = vor.u32 %v7742_v58, %v15965_v6  ;;  %v15990_v39 = vpop.f32.mrf.mxu1  ;;  %v7753_v29 = vrot.slane %v7751_v4, 4  ;;  %v7756_v63 = vrot.slane %v7754_v14, 5  ;;  %vm17735_vm13 = vmmov %vm17733_vm0 }
 0x488   : > { %6994 = vst.msk [vmem:[#allocation2 + $0x10c] sm:$0xf] %vm17726_vm9, %v6732_v18  ;;  %v6736_v7 = vrot.slane %v6734_v21, 4  ;;  %v6747_v11 = vshrl.u32 %v6539_v34, 16  ;;  %v16004_v58 = vrot.slane %v7760_v13, 5  ;;  %vm17740_vm9 = vmmov %vm17727_vm1 }
 0x489   : > { %v7232_v47 = vpop.permute.xlu1 %7231  ;;  %v11480_v15 = vld [vmem:[#allocation2 + $0x54] sm:$0xf]  ;;  %7882 = vrot.lane.b32.xlu2 %v7691_v50, %s11722_s22  ;;  %7398 = vst.msk [vmem:[#allocation2 + $0x14c] sm:$0xf] %vm17728_vm7, %v7366_v54  ;;  %v10918_v50 = vld [vmem:[#allocation2 + $0x58] sm:$0xf]  ;;  %vm17742_vm7 = vmmov %vm17734_vm4 }
 0x48a   : > { %7322 = vst.msk [vmem:[#allocation2 + $0x6c] sm:$0xf] %vm17723_vm11, %v7232_v47  ;;  %v10915_v30 = vor.u32 %v11480_v15, %v10912_v36  ;;  %v6739_v47 = vrot.slane %v6737_v5, 5  ;;  %v6743_v15 = vshll.u32 %v6539_v34, 16  ;;  %v7452_v53 = vld [vmem:[#allocation3 + $0xb0] sm:$0x1]  ;;  %vm17737_vm11 = vmmov %vm17733_vm0 }
 0x48b   : > { %v6408_v27 = vpop.permute.xlu2 %6407  ;;  %9126 = vmatmul.bf16.gmra.mxu1 %v11031_v20  ;;  %v10827_v20 = vrot.slane %v6074_v60, 9  ;;  %v16015_v4 = vld [vmem:[#allocation3 + $0xa4] sm:$0x1]  ;;  %v11050_v9 = vld [vmem:[#allocation2 + $0x168] sm:$0xf]  ;;  %v7770_v51 = vshll.u32 %v7452_v53, 16 }
 0x48c   : > { %9185 = vmatmul.bf16.gmra.mxu2 %v10915_v30  ;;  %6494 = vst.msk [vmem:[#allocation2 + $0xb8] sm:$0xf] %vm17725_vm3, %v6408_v27  ;;  %7261 = vrot.lane.b32.xlu0 %v7182_v12, %s11722_s22  ;;  %v15998_v12 = vrot.slane %v7743_v44, 4  ;;  %v6740_v52 = vor.u32 %v6739_v47, %v6736_v7  ;;  %v7766_v27 = vrot.slane %v7764_v38, 4  ;;  %v6745_v18 = vrot.slane %v6743_v15, 5  ;;  %vm17739_vm3 = vmmov %vm17733_vm0 }
 0x48d   : > { %v16022_v37 = vld [vmem:[#allocation3 + $0x70] sm:$0xf]  ;;  %v6082_v48 = vld [vmem:[#allocation3 + $0x74] sm:$0x1]  ;;  %v16033_v38 = vrot.slane %v7195_v26, 4 }
 0x48e   : > { %v7234_v10 = vpop.permute.xlu0 %7233  ;;  %v10920_v35 = vld [vmem:[#allocation2 + $0x6c] sm:$0xf0]  ;;  %v6741_v14 = vrot.slane %v6740_v52, 4  ;;  %v7767_v13 = vor.u32 %v7766_v27, %v16004_v58  ;;  %v6214_v21 = vrot.slane %v16022_v37, 5  ;;  %v6217_v60 = vrot.slane %v6082_v48, 5 }
 0x48f   : > { %6429 = vrot.lane.b32.xlu1 %v6345_v41, %s11722_s22  ;;  %7323 = vst.msk [vmem:[#allocation2 + $0x80] sm:$0xf] %vm17727_vm1, %v7234_v10  ;;  %v10923_v45 = vor.u32 %v11481_v1, %v10920_v35  ;;  %v6201_v41 = vsel %vm12010_vm6, %v10827_v20, %v6200_v3  ;;  %v11517_v10 = vld [vmem:[#allocation2 + $0x178] sm:$0xf0]  ;;  %v10932_v3 = vld [vmem:[#allocation2 + $0x8c] sm:$0xf0]  ;;  %v7757_v35 = vor.u32 %v7756_v63, %v7753_v29  ;;  %vm17741_vm1 = vmmov %vm17733_vm0 }
 0x490   : > { %6307 = vst.msk [vmem:[#allocation2 + $0x11c] sm:$0xf] %vm17731_vm5, %v6201_v41  ;;  %v6746_v54 = vsel %vm11842_vm2, %v6741_v14, %v6745_v18  ;;  %v11051_v5 = vor.u32 %v11517_v10, %v11050_v9  ;;  %v6347_v47 = vld [vmem:[#allocation3 + $0x90] sm:$0xf]  ;;  %v16051_v20 = vrot.slane %v7770_v51, 5  ;;  %vm17745_vm5 = vmmov %vm17733_vm0 }
 0x491   : > { %v6402_v0 = vpop.permute.xlu1 %6401  ;;  %v11483_v36 = vld [vmem:[#allocation2 + $0x68] sm:$0xf0]  ;;  %9363 = vmatmul.bf16.gmra.mxu0 %v10923_v45  ;;  %6431 = vrot.lane.b32.xlu2 %v6346_v25, %s11722_s22  ;;  %v6749_v25 = vrot.slane %v6747_v11, 4  ;;  %v7715_v45 = vsel %vm11842_vm2, %v15915_v2, %v15890_v33  ;;  %6995 = vst.msk [vmem:[#allocation2 + $0x120] sm:$0xf] %vm17733_vm0, %v6746_v54  ;;  %v7198_v2 = vrot.slane %v16015_v4, 5 }
 0x492   : > { %6491 = vst.msk [vmem:[#allocation2 + $0x7c] sm:$0xf] %vm17729_vm15, %v6402_v0  ;;  %v10919_v56 = vor.u32 %v11483_v36, %v10918_v50  ;;  %v7365_v0 = vld [vmem:[#allocation3 + $0x70] sm:$0xf]  ;;  %v7189_v36 = vsel %vm12010_vm6, %v10847_v32, %v7188_v24  ;;  %v16049_v15 = vrot.slane %v7757_v35, 4  ;;  %v16057_v11 = vrot.slane %v7767_v13, 4  ;;  %vm17743_vm15 = vmmov %vm17734_vm4 }
 0x493   : > { %v7863_v30 = vpop.permute.xlu2 %7862  ;;  %v6750_v50 = vor.u32 %v6749_v25, %v6745_v18  ;;  %7397 = vst.msk [vmem:[#allocation2 + $0x138] sm:$0xf] %vm17735_vm13, %v7365_v0  ;;  %v7453_v16 = vld [vmem:[#allocation3 + $0xb4] sm:$0xf]  ;;  %v11486_v24 = vld [vmem:[#allocation2 + $0x84] sm:$0xf]  ;;  %v7192_v0 = vsel %vm12010_vm6, %v15974_v57, %v7191_v8  ;;  %vm17748_vm13 = vmmov %vm17742_vm7  ;;  %v7199_v37 = vsel %vm12010_vm6, %v16033_v38, %v7198_v2 }
 0x494   : > { %9274 = vmatmul.bf16.gmra.mxu3 %v10919_v56  ;;  %7950 = vst.msk [vmem:[#allocation2 + $0xac] sm:$0xf] %vm17730_vm10, %v7863_v30  ;;  %7888 = vrot.lane.b32.xlu0 %v7725_v59, %s11722_s22  ;;  %v6216_v59 = vrot.slane %v6214_v21, 4  ;;  %v6540_v56 = vld [vmem:[#allocation3 + $0x68] sm:$0x1]  ;;  %v7778_v14 = vshll.u32 %v7453_v16, 16  ;;  %vm17744_vm10 = vmmov %vm17733_vm0 }
 0x495   : > { %v6751_v61 = vrot.slane %v6750_v50, 4  ;;  %v6753_v30 = vshll.u32 %v6540_v56, 16  ;;  %v7454_v32 = vld [vmem:[#allocation3 + $0xb8] sm:$0xf]  ;;  %v6348_v27 = vld [vmem:[#allocation3 + $0x94] sm:$0xf] }
 0x496   : > { %v7861_v1 = vpop.permute.xlu0 %7860  ;;  %v6218_v29 = vsel %vm12010_vm6, %v6216_v59, %v6217_v60  ;;  %v10938_v18 = vld [vmem:[#allocation2 + $0x80] sm:$0xf]  ;;  %v16064_v9 = vld [vmem:[#allocation3 + $0xac] sm:$0xf]  ;;  %v7784_v10 = vshll.u32 %v7454_v32, 16 }
 0x497   : > { %7263 = vrot.lane.b32.xlu1 %v7185_v43, %s11722_s22  ;;  %7949 = vst.msk [vmem:[#allocation2 + $0x98] sm:$0xf] %vm17732_vm12, %v7861_v1  ;;  %v6755_v53 = vrot.slane %v6753_v30, 5  ;;  %v16062_v43 = vld [vmem:[#allocation3 + $0xa8] sm:$0xe]  ;;  %v7775_v1 = vshrl.u32 %v7453_v16, 16  ;;  %vm17746_vm12 = vmmov %vm17734_vm4 }
 0x498   : > { %v16028_v28 = vpop.f32.mrf.mxu1  ;;  %6312 = vst.msk [vmem:[#allocation2 + $0x180] sm:$0xf] %vm17737_vm11, %v6218_v29  ;;  %v7368_v51 = vld [vmem:[#allocation3 + $0x84] sm:$0xf]  ;;  %v6077_v59 = vld [vmem:[#allocation3 + $0x60] sm:$0xe]  ;;  %vm17750_vm11 = vmmov %vm17742_vm7 }
 0x499   : > { %v7236_v44 = vpop.permute.xlu1 %7235  ;;  %v11485_v34 = vld [vmem:[#allocation2 + $0x7c] sm:$0xf]  ;;  %7886 = vrot.lane.b32.xlu2 %v7715_v45, %s11722_s22  ;;  %v6756_v35 = vsel %vm11842_vm2, %v6751_v61, %v6755_v53  ;;  %v6541_v45 = vld [vmem:[#allocation3 + $0x6c] sm:$0xf]  ;;  %7400 = vst.msk [vmem:[#allocation2 + $0x174] sm:$0xf] %vm17741_vm1, %v7368_v51  ;;  %v7739_v51 = vsel %vm11842_vm2, %v15968_v46, %v15965_v6 }
 0x49a   : > { %7324 = vst.msk [vmem:[#allocation2 + $0x94] sm:$0xf] %vm17734_vm4, %v7236_v44  ;;  %v10935_v33 = vor.u32 %v11485_v34, %v10932_v3  ;;  %v7788_v3 = vshrl.u32 %v7454_v32, 16  ;;  %v6542_v34 = vld [vmem:[#allocation3 + $0x70] sm:$0xf]  ;;  %v6758_v13 = vshrl.u32 %v6541_v45, 16  ;;  %vm17747_vm4 = vmmov %vm17733_vm0 }
 0x49b   : > { %v6412_v7 = vpop.permute.xlu2 %6411  ;;  %9131 = vmatmul.bf16.gmra.mxu1 %v11051_v5  ;;  %6996 = vst.msk [vmem:[#allocation2 + $0x134] sm:$0xf] %vm17739_vm3, %v6756_v35  ;;  %v6761_v5 = vshll.u32 %v6541_v45, 16  ;;  %v6767_v50 = vshll.u32 %v6542_v34, 16  ;;  %v10849_v56 = vrot.slane %v16062_v43, 9  ;;  %v10828_v61 = vrot.slane %v6077_v59, 9  ;;  %vm17752_vm3 = vmmov %vm17742_vm7 }
 0x49c   : > { %9190 = vmatmul.bf16.gmra.mxu2 %v10935_v33  ;;  %6496 = vst.msk [vmem:[#allocation2 + $0xe0] sm:$0xf] %vm17736_vm14, %v6412_v7  ;;  %7265 = vrot.lane.b32.xlu0 %v7189_v36, %s11722_s22  ;;  %v7749_v33 = vsel %vm11842_vm2, %v15998_v12, %v15970_v31  ;;  %v6771_v36 = vshrl.u32 %v6542_v34, 16  ;;  %v7455_v7 = vld [vmem:[#allocation3 + $0xbc] sm:$0x1]  ;;  %v7202_v19 = vrot.slane %v16064_v9, 5  ;;  %vm17749_vm14 = vmmov %vm17733_vm0 }
 0x49d   : > { %v6763_v16 = vrot.slane %v6761_v5, 5  ;;  %v16087_v31 = vrot.slane %v7775_v1, 4  ;;  %v6769_v57 = vrot.slane %v6767_v50, 5  ;;  %v11070_v30 = vld [vmem:[#allocation2 + $0x190] sm:$0xf]  ;;  %v16091_v32 = vrot.slane %v7784_v10, 5  ;;  %vm17754_vm1 = vmmov %vm17752_vm3 }
 0x49e   : > { %v7238_v63 = vpop.permute.xlu0 %7237  ;;  %v10940_v52 = vld [vmem:[#allocation2 + $0x94] sm:$0xf0]  ;;  %v6773_v8 = vrot.slane %v6771_v36, 4  ;;  %v11522_v53 = vld [vmem:[#allocation2 + $0x1a0] sm:$0xf0]  ;;  %v7794_v10 = vshll.u32 %v7455_v7, 16 }
 0x49f   : > { %6433 = vrot.lane.b32.xlu1 %v6347_v47, %s11722_s22  ;;  %7325 = vst.msk [vmem:[#allocation2 + $0xa8] sm:$0xf] %vm17738_vm8, %v7238_v63  ;;  %v10943_v41 = vor.u32 %v11486_v24, %v10940_v52  ;;  %v6760_v47 = vrot.slane %v6758_v13, 4  ;;  %v16089_v24 = vrot.slane %v7778_v14, 5  ;;  %v6208_v63 = vsel %vm12010_vm6, %v10828_v61, %v6207_v62  ;;  %v16097_v52 = vld [vmem:[#allocation3 + $0x7c] sm:$0xf]  ;;  %vm17751_vm8 = vmmov %vm17733_vm0 }
 0x4a0   : > { %v16068_v48 = vpop.f32.mrf.mxu1  ;;  %v6085_v1 = vld [vmem:[#allocation3 + $0x80] sm:$0x1]  ;;  %v6221_v14 = vrot.slane %v16097_v52, 5  ;;  %v16104_v35 = vld [vmem:[#allocation3 + $0xb0] sm:$0x1]  ;;  %v11071_v34 = vor.u32 %v11522_v53, %v11070_v30  ;;  %v16120_v5 = vrot.slane %v7202_v19, 4 }
 0x4a1   : > { %v6406_v54 = vpop.permute.xlu1 %6405  ;;  %v11488_v25 = vld [vmem:[#allocation2 + $0x90] sm:$0xf0]  ;;  %9368 = vmatmul.bf16.gmra.mxu0 %v10943_v41  ;;  %6435 = vrot.lane.b32.xlu2 %v6348_v27, %s11722_s22  ;;  %v6764_v29 = vor.u32 %v6763_v16, %v6760_v47  ;;  %v10952_v27 = vld [vmem:[#allocation2 + $0xb4] sm:$0xf0]  ;;  %v16101_v41 = vrot.slane %v7788_v3, 4  ;;  %v7781_v47 = vor.u32 %v16089_v24, %v16087_v31  ;;  %v7205_v55 = vrot.slane %v16104_v35, 5 }
 0x4a2   : > { %6493 = vst.msk [vmem:[#allocation2 + $0xa4] sm:$0xf] %vm17740_vm9, %v6406_v54  ;;  %v10939_v44 = vor.u32 %v11488_v25, %v10938_v18  ;;  %v6774_v18 = vor.u32 %v6773_v8, %v6769_v57  ;;  %v7367_v62 = vld [vmem:[#allocation3 + $0x7c] sm:$0xf]  ;;  %v6223_v45 = vrot.slane %v6221_v14, 4  ;;  %v16138_v8 = vrot.slane %v7794_v10, 5  ;;  %vm17753_vm9 = vmmov %vm17733_vm0 }
 0x4a3   : > { %v7867_v60 = vpop.permute.xlu2 %7866  ;;  %v6765_v49 = vrot.slane %v6764_v29, 4  ;;  %6309 = vst.msk [vmem:[#allocation2 + $0x144] sm:$0xf] %vm17744_vm10, %v6208_v63  ;;  %v6543_v46 = vld [vmem:[#allocation3 + $0x74] sm:$0x1]  ;;  %vm17757_vm10 = vmmov %vm17733_vm0 }
 0x4a4   : > { %9279 = vmatmul.bf16.gmra.mxu3 %v10939_v44  ;;  %7952 = vst.msk [vmem:[#allocation2 + $0xd4] sm:$0xf] %vm17742_vm7, %v7867_v60  ;;  %7892 = vrot.lane.b32.xlu0 %v7749_v33, %s11722_s22  ;;  %v6224_v44 = vrot.slane %v6085_v1, 5  ;;  %v6777_v50 = vshll.u32 %v6543_v46, 16  ;;  %v7370_v36 = vld [vmem:[#allocation3 + $0x90] sm:$0xf]  ;;  %v7196_v60 = vsel %vm12010_vm6, %v10848_v40, %v7195_v26  ;;  %v7791_v40 = vor.u32 %v16101_v41, %v16091_v32  ;;  %vm17755_vm7 = vmmov %vm17733_vm0 }
 0x4a5   : > { %7399 = vst.msk [vmem:[#allocation2 + $0x160] sm:$0xf] %vm17745_vm5, %v7367_v62  ;;  %v6770_v6 = vsel %vm11842_vm2, %v6765_v49, %v6769_v57  ;;  %v6349_v7 = vld [vmem:[#allocation3 + $0x9c] sm:$0xf]  ;;  %v6544_v16 = vld [vmem:[#allocation3 + $0x78] sm:$0xf]  ;;  %vm17758_vm5 = vmmov %vm17733_vm0 }
 0x4a6   : > { %v7865_v12 = vpop.permute.xlu0 %7864  ;;  %6997 = vst.msk [vmem:[#allocation2 + $0x148] sm:$0xf] %vm17733_vm0, %v6770_v6  ;;  %v6225_v33 = vsel %vm12010_vm6, %v6223_v45, %v6224_v44  ;;  %v6545_v61 = vld [vmem:[#allocation3 + $0x7c] sm:$0xf]  ;;  %v11491_v57 = vld [vmem:[#allocation2 + $0xac] sm:$0xf] }
 0x4a7   : > { %7267 = vrot.lane.b32.xlu1 %v7192_v0, %s11722_s22  ;;  %7951 = vst.msk [vmem:[#allocation2 + $0xc0] sm:$0xf] %vm17743_vm15, %v7865_v12  ;;  %v6775_v0 = vrot.slane %v6774_v18, 4  ;;  %v11582_v26 = vld [vmem:[%s17469_s3 + $0x100] sm:$0xff]  ;;  %v6779_v31 = vrot.slane %v6777_v50, 5  ;;  %v6782_v63 = vshrl.u32 %v6544_v16, 16  ;;  %vm17756_vm15 = vmmov %vm17754_vm1 }
 0x4a8   : > { %v16111_v25 = vpop.f32.mrf.mxu1  ;;  %6314 = vst.msk [vmem:[#allocation2 + $0x1a8] sm:$0xf] %vm17747_vm4, %v6225_v33  ;;  %v6350_v30 = vld [vmem:[#allocation3 + $0xa0] sm:$0xf]  ;;  %v10958_v24 = vld [vmem:[#allocation2 + $0xa8] sm:$0xf]  ;;  %9441 = vmatpush.bf16.msra.mxu1 %v11582_v26  ;;  %vm17760_vm4 = vmmov %vm17733_vm0 }
 0x4a9   : > { %v7240_v54 = vpop.permute.xlu1 %7239  ;;  %v11490_v3 = vld [vmem:[#allocation2 + $0xa4] sm:$0xf]  ;;  %7890 = vrot.lane.b32.xlu2 %v7739_v51, %s11722_s22  ;;  %7402 = vst.msk [vmem:[#allocation2 + $0x19c] sm:$0xf] %vm17749_vm14, %v7370_v36  ;;  %v6785_v53 = vshll.u32 %v6544_v16, 16  ;;  %v16149_v1 = vrot.slane %v7781_v47, 4  ;;  %v6780_v18 = vsel %vm11842_vm2, %v6775_v0, %v6779_v31  ;;  %vm17762_vm14 = vmmov %vm17733_vm0 }
 0x4aa   : > { %7326 = vst.msk [vmem:[#allocation2 + $0xbc] sm:$0xf] %vm17746_vm12, %v7240_v54  ;;  %v10955_v13 = vor.u32 %v11490_v3, %v10952_v27  ;;  %v6791_v27 = vshll.u32 %v6545_v61, 16  ;;  %v16151_v41 = vld [vmem:[#allocation3 + $0xb4] sm:$0xe]  ;;  %v6795_v10 = vshrl.u32 %v6545_v61, 16  ;;  %vm17759_vm12 = vmmov %vm17754_vm1 }
 0x4ab   : > { %v6416_v59 = vpop.permute.xlu2 %6415  ;;  %9136 = vmatmul.bf16.gmra.mxu1 %v11071_v34  ;;  %v6080_v49 = vld [vmem:[#allocation3 + $0x6c] sm:$0xe]  ;;  %v16155_v62 = vld [vmem:[#allocation3 + $0x88] sm:$0xf]  ;;  %6998 = vst.msk [vmem:[#allocation2 + $0x15c] sm:$0xf] %vm17751_vm8, %v6780_v18  ;;  %vm17764_vm8 = vmmov %vm17733_vm0 }
 0x4ac   : > { %9195 = vmatmul.bf16.gmra.mxu2 %v10955_v13  ;;  %6498 = vst.msk [vmem:[#allocation2 + $0x108] sm:$0xf] %vm17748_vm13, %v6416_v59  ;;  %7269 = vrot.lane.b32.xlu0 %v7196_v60, %s11722_s22  ;;  %v6784_v45 = vrot.slane %v6782_v63, 4  ;;  %v6787_v44 = vrot.slane %v6785_v53, 5  ;;  %v6793_v13 = vrot.slane %v6791_v27, 5  ;;  %v10829_v6 = vrot.slane %v6080_v49, 9  ;;  %vm17761_vm13 = vmmov %vm17754_vm1 }
 0x4ad   : > { %v6088_v46 = vld [vmem:[#allocation3 + $0x8c] sm:$0x1]  ;;  %v16162_v33 = vrot.slane %v7791_v40, 4  ;;  %v6228_v50 = vrot.slane %v16155_v62, 5  ;;  %v7369_v36 = vld [vmem:[#allocation3 + $0x88] sm:$0xf] }
 0x4ae   : > { %v7242_v42 = vpop.permute.xlu0 %7241  ;;  %v10960_v12 = vld [vmem:[#allocation2 + $0xbc] sm:$0xf0]  ;;  %v6788_v0 = vor.u32 %v6787_v44, %v6784_v45  ;;  %v16169_v47 = vld [vmem:[#allocation3 + $0xb8] sm:$0xf]  ;;  %v6215_v16 = vsel %vm12010_vm6, %v10829_v6, %v6214_v21  ;;  %7401 = vst.msk [vmem:[#allocation2 + $0x188] sm:$0xf] %vm17753_vm9, %v7369_v36  ;;  %vm17766_vm9 = vmmov %vm17754_vm1 }
 0x4af   : > { %6437 = vrot.lane.b32.xlu1 %v6349_v7, %s11722_s22  ;;  %7327 = vst.msk [vmem:[#allocation2 + $0xd0] sm:$0xf] %vm17750_vm11, %v7242_v42  ;;  %v10963_v29 = vor.u32 %v11491_v57, %v10960_v12  ;;  %v6546_v59 = vld [vmem:[#allocation3 + $0x80] sm:$0x1]  ;;  %v7773_v7 = vsel %vm11842_vm2, %v16057_v11, %v16051_v20  ;;  %v6797_v61 = vrot.slane %v6795_v10, 4  ;;  %v10850_v42 = vrot.slane %v16151_v41, 9  ;;  %vm17763_vm11 = vmmov %vm17754_vm1 }
 0x4b0   : > { %v16157_v54 = vpop.f32.mrf.mxu1  ;;  %v6801_v57 = vshll.u32 %v6546_v59, 16  ;;  %v6789_v12 = vrot.slane %v6788_v0, 4  ;;  %v6230_v20 = vrot.slane %v6228_v50, 4  ;;  %v6231_v11 = vrot.slane %v6088_v46, 5  ;;  %v11090_v40 = vld [vmem:[#allocation2 + $0x1b8] sm:$0xf] }
 0x4b1   : > { %v6410_v51 = vpop.permute.xlu1 %6409  ;;  %v11493_v3 = vld [vmem:[#allocation2 + $0xb8] sm:$0xf0]  ;;  %9373 = vmatmul.bf16.gmra.mxu0 %v10963_v29  ;;  %6439 = vrot.lane.b32.xlu2 %v6350_v30, %s11722_s22  ;;  %v11527_v26 = vld [vmem:[#allocation2 + $0x1c8] sm:$0xf0]  ;;  %6311 = vst.msk [vmem:[#allocation2 + $0x16c] sm:$0xf] %vm17755_vm7, %v6215_v16  ;;  %v6798_v31 = vor.u32 %v6797_v61, %v6793_v13  ;;  %v7203_v61 = vsel %vm12010_vm6, %v10849_v56, %v7202_v19  ;;  %vm17768_vm7 = vmmov %vm17766_vm9 }
 0x4b2   : > { %6495 = vst.msk [vmem:[#allocation2 + $0xcc] sm:$0xf] %vm17752_vm3, %v6410_v51  ;;  %v10959_v34 = vor.u32 %v11493_v3, %v10958_v24  ;;  %v10972_v30 = vld [vmem:[#allocation2 + $0xdc] sm:$0xf0]  ;;  %v6794_v4 = vsel %vm11842_vm2, %v6789_v12, %v6793_v13  ;;  %v6232_v29 = vsel %vm12010_vm6, %v6230_v20, %v6231_v11  ;;  %v7372_v38 = vld [vmem:[#allocation3 + $0x9c] sm:$0xf]  ;;  %v7763_v51 = vsel %vm11842_vm2, %v16049_v15, %v16004_v58  ;;  %vm17765_vm3 = vmmov %vm17733_vm0 }
 0x4b3   : > { %v7871_v60 = vpop.permute.xlu2 %7870  ;;  %v16189_v24 = vld [vmem:[#allocation3 + $0xc0] sm:$0xf]  ;;  %v6547_v2 = vld [vmem:[#allocation3 + $0x84] sm:$0xf]  ;;  %v6548_v63 = vld [vmem:[#allocation3 + $0x88] sm:$0xf]  ;;  %v11091_v44 = vor.u32 %v11527_v26, %v11090_v40 }
 0x4b4   : > { %9284 = vmatmul.bf16.gmra.mxu3 %v10959_v34  ;;  %7954 = vst.msk [vmem:[#allocation2 + $0xfc] sm:$0xf] %vm17754_vm1, %v7871_v60  ;;  %7896 = vrot.lane.b32.xlu0 %v7773_v7, %s11722_s22  ;;  %v16195_v53 = vld [vmem:[#allocation3 + $0xc4] sm:$0xf]  ;;  %v6799_v27 = vrot.slane %v6798_v31, 4  ;;  %v6803_v18 = vrot.slane %v6801_v57, 5  ;;  %vm17767_vm1 = vmmov %vm17733_vm0 }
 0x4b5   : > { %6999 = vst.msk [vmem:[#allocation2 + $0x170] sm:$0xf] %vm17757_vm10, %v6794_v4  ;;  %v6806_v10 = vshrl.u32 %v6547_v2, 16  ;;  %v6809_v49 = vshll.u32 %v6547_v2, 16  ;;  %v7209_v13 = vrot.slane %v16169_v47, 5  ;;  %v6815_v6 = vshll.u32 %v6548_v63, 16  ;;  %vm17770_vm10 = vmmov %vm17768_vm7 }
 0x4b6   : > { %v7869_v21 = vpop.permute.xlu0 %7868  ;;  %6316 = vst.msk [vmem:[#allocation2 + $0x1d0] sm:$0xf] %vm17758_vm5, %v6232_v29  ;;  %v6804_v0 = vsel %vm11842_vm2, %v6799_v27, %v6803_v18  ;;  %v6083_v15 = vld [vmem:[#allocation3 + $0x78] sm:$0xe]  ;;  %v6819_v59 = vshrl.u32 %v6548_v63, 16  ;;  %v7799_v20 = vshrl.u32 %v16189_v24, 16  ;;  %vm17771_vm5 = vmmov %vm17733_vm0 }
 0x4b7   : > { %7271 = vrot.lane.b32.xlu1 %v7199_v37, %s11722_s22  ;;  %7953 = vst.msk [vmem:[#allocation2 + $0xe8] sm:$0xf] %vm17756_vm15, %v7869_v21  ;;  %v6808_v36 = vrot.slane %v6806_v10, 4  ;;  %v6811_v58 = vrot.slane %v6809_v49, 5  ;;  %v10830_v60 = vrot.slane %v6083_v15, 9  ;;  %v7802_v11 = vshll.u32 %v16189_v24, 16  ;;  %vm17769_vm15 = vmmov %vm17733_vm0 }
 0x4b8   : > { %v16202_v45 = vpop.f32.mrf.mxu1  ;;  %7000 = vst.msk [vmem:[#allocation2 + $0x184] sm:$0xf] %vm17733_vm0, %v6804_v0  ;;  %v16211_v7 = vld [vmem:[#allocation3 + $0x94] sm:$0xf]  ;;  %v6351_v57 = vld [vmem:[#allocation3 + $0xa8] sm:$0xf]  ;;  %v7797_v0 = vsel %vm11842_vm2, %v16162_v33, %v16138_v8 }
 0x4b9   : > { %v7244_v3 = vpop.permute.xlu1 %7243  ;;  %v11495_v34 = vld [vmem:[#allocation2 + $0xcc] sm:$0xf]  ;;  %7894 = vrot.lane.b32.xlu2 %v7763_v51, %s11722_s22  ;;  %v11496_v12 = vld [vmem:[#allocation2 + $0xd4] sm:$0xf]  ;;  %7404 = vst.msk [vmem:[#allocation2 + $0x1c4] sm:$0xf] %vm17760_vm4, %v7372_v38  ;;  %v6812_v37 = vor.u32 %v6811_v58, %v6808_v36  ;;  %v6222_v43 = vsel %vm12010_vm6, %v10830_v60, %v6221_v14  ;;  %vm17774_vm4 = vmmov %vm17767_vm1 }
 0x4ba   : > { %7328 = vst.msk [vmem:[#allocation2 + $0xe4] sm:$0xf] %vm17759_vm12, %v7244_v3  ;;  %v10975_v46 = vor.u32 %v11495_v34, %v10972_v30  ;;  %v7808_v9 = vshll.u32 %v16195_v53, 16  ;;  %v6817_v21 = vrot.slane %v6815_v6, 5  ;;  %v6091_v56 = vld [vmem:[#allocation3 + $0x98] sm:$0x1]  ;;  %vm17772_vm12 = vmmov %vm17733_vm0 }
 0x4bb   : > { %v6420_v16 = vpop.permute.xlu2 %6419  ;;  %9141 = vmatmul.bf16.gmra.mxu1 %v11091_v44  ;;  %v6813_v26 = vrot.slane %v6812_v37, 4  ;;  %6313 = vst.msk [vmem:[#allocation2 + $0x194] sm:$0xf] %vm17762_vm14, %v6222_v43  ;;  %v6235_v31 = vrot.slane %v16211_v7, 5  ;;  %v6352_v30 = vld [vmem:[#allocation3 + $0xac] sm:$0xf]  ;;  %vm17773_vm0 = vmmov %vm17768_vm7 }
 0x4bc   : > { %9200 = vmatmul.bf16.gmra.mxu2 %v10975_v46  ;;  %6500 = vst.msk [vmem:[#allocation2 + $0x130] sm:$0xf] %vm17761_vm13, %v6420_v16  ;;  %7273 = vrot.lane.b32.xlu0 %v7203_v61, %s11722_s22  ;;  %v10978_v24 = vld [vmem:[#allocation2 + $0xd0] sm:$0xf]  ;;  %v7812_v52 = vshrl.u32 %v16195_v53, 16  ;;  %v6821_v38 = vrot.slane %v6819_v59, 4  ;;  %vm17775_vm13 = vmmov %vm17773_vm0 }
 0x4bd   : > { %v7371_v29 = vld [vmem:[#allocation3 + $0x94] sm:$0xf]  ;;  %v6818_v14 = vsel %vm11842_vm2, %v6813_v26, %v6817_v21  ;;  %v6237_v2 = vrot.slane %v6235_v31, 4  ;;  %v6238_v63 = vrot.slane %v6091_v56, 5  ;;  %v6549_v27 = vld [vmem:[#allocation3 + $0x8c] sm:$0x1]  ;;  %vm17776_vm14 = vmmov %vm17773_vm0 }
 0x4be   : > { %v7246_v19 = vpop.permute.xlu0 %7245  ;;  %v10980_v40 = vld [vmem:[#allocation2 + $0xe4] sm:$0xf0]  ;;  %7403 = vst.msk [vmem:[#allocation2 + $0x1b0] sm:$0xf] %vm17764_vm8, %v7371_v29  ;;  %v16241_v51 = vrot.slane %v7799_v20, 4  ;;  %v6822_v53 = vor.u32 %v6821_v38, %v6817_v21  ;;  %v6825_v3 = vshll.u32 %v6549_v27, 16  ;;  %vm17778_vm8 = vmmov %vm17767_vm1 }
 0x4bf   : > { %6441 = vrot.lane.b32.xlu1 %v6351_v57, %s11722_s22  ;;  %7329 = vst.msk [vmem:[#allocation2 + $0xf8] sm:$0xf] %vm17763_vm11, %v7246_v19  ;;  %v10983_v4 = vor.u32 %v11496_v12, %v10980_v40  ;;  %v6239_v34 = vsel %vm12010_vm6, %v6237_v2, %v6238_v63  ;;  %v7974_v6 = vld [vmem:[#allocation3 + $0x18] sm:$0xe]  ;;  %v7975_v46 = vld [vmem:[#allocation3 + $0x1c] sm:$0xf]  ;;  %vm17777_vm11 = vmmov %vm17773_vm0 }
 0x4c0   : > { %v16239_v10 = vpop.f32.mrf.mxu1  ;;  %7001 = vst.msk [vmem:[#allocation2 + $0x198] sm:$0xf] %vm17765_vm3, %v6818_v14  ;;  %v6823_v36 = vrot.slane %v6822_v53, 4  ;;  %v6827_v58 = vrot.slane %v6825_v3, 5  ;;  %v7976_v15 = vld [vmem:[#allocation3 + $0x20] sm:$0x1]  ;;  %v7787_v14 = vsel %vm11842_vm2, %v16149_v1, %v16091_v32  ;;  %v7210_v1 = vsel %vm12010_vm6, %v10850_v42, %v7209_v13  ;;  %vm17779_vm3 = vmmov %vm17767_vm1 }
 0x4c1   : > { %v6414_v18 = vpop.permute.xlu1 %6413  ;;  %v11498_v49 = vld [vmem:[#allocation2 + $0xe0] sm:$0xf0]  ;;  %9378 = vmatmul.bf16.gmra.mxu0 %v10983_v4  ;;  %6443 = vrot.lane.b32.xlu2 %v6352_v30, %s11722_s22  ;;  %6318 = vst.msk [vmem:[#allocation2 + $0x1f8] sm:$0xf] %vm17767_vm1, %v6239_v34  ;;  %v16253_v60 = vrot.slane %v7802_v11, 5  ;;  %v16255_v16 = vrot.slane %v7808_v9, 5  ;;  %v7206_v11 = vsel %vm12010_vm6, %v16120_v5, %v7205_v55 }
 0x4c2   : > { %6497 = vst.msk [vmem:[#allocation2 + $0xf4] sm:$0xf] %vm17766_vm9, %v6414_v18  ;;  %v10979_v44 = vor.u32 %v11498_v49, %v10978_v24  ;;  %v7458_v61 = vld [vmem:[#allocation3 + $0xc8] sm:$0x1]  ;;  %v10852_v57 = vrot.slane %v7974_v6, 9  ;;  %v8072_v12 = vrot.slane %v7975_v46, 5  ;;  %v6828_v33 = vsel %vm11842_vm2, %v6823_v36, %v6827_v58  ;;  %vm17780_vm9 = vmmov %vm17773_vm0 }
 0x4c3   : > { %v7875_v59 = vpop.permute.xlu2 %7874  ;;  %v11532_v20 = vld [vmem:[#allocation2 + $0x1f0] sm:$0xf0]  ;;  %v7814_v8 = vrot.slane %v7812_v52, 4  ;;  %v8075_v37 = vrot.slane %v7976_v15, 5  ;;  %v6550_v21 = vld [vmem:[#allocation3 + $0x90] sm:$0xf]  ;;  %v7805_v34 = vor.u32 %v16253_v60, %v16241_v51 }
 0x4c4   : > { %9289 = vmatmul.bf16.gmra.mxu3 %v10979_v44  ;;  %7956 = vst.msk [vmem:[#allocation2 + $0x124] sm:$0xf] %vm17768_vm7, %v7875_v59  ;;  %7900 = vrot.lane.b32.xlu0 %v7797_v0, %s11722_s22  ;;  %v16266_v43 = vld [vmem:[#allocation3 + $0xbc] sm:$0x1]  ;;  %v8073_v56 = vsel %vm12010_vm6, %v10852_v57, %v8072_v12  ;;  %v8074_v19 = vrot.slane %v8072_v12, 4  ;;  %v6830_v26 = vshrl.u32 %v6550_v21, 16  ;;  %vm17781_vm7 = vmmov %vm17773_vm0 }
 0x4c5   : > { %7002 = vst.msk [vmem:[#allocation2 + $0x1ac] sm:$0xf] %vm17769_vm15, %v6828_v33  ;;  %v7374_v40 = vld [vmem:[#allocation3 + $0xa8] sm:$0xf]  ;;  %v11110_v35 = vld [vmem:[#allocation2 + $0x1e0] sm:$0xf]  ;;  %v7815_v18 = vor.u32 %v7814_v8, %v16255_v16  ;;  %vm17782_vm15 = vmmov %vm17767_vm1 }
 0x4c6   : > { %v7873_v9 = vpop.permute.xlu0 %7872  ;;  %v10992_v30 = vld [vmem:[#allocation2 + $0x104] sm:$0xf0]  ;;  %v7818_v24 = vshll.u32 %v7458_v61, 16  ;;  %v6551_v4 = vld [vmem:[#allocation3 + $0x94] sm:$0xf]  ;;  %v6833_v5 = vshll.u32 %v6550_v21, 16  ;;  %v8076_v55 = vsel %vm12010_vm6, %v8074_v19, %v8075_v37  ;;  %v11111_v53 = vor.u32 %v11532_v20, %v11110_v35 }
 0x4c7   : > { %7275 = vrot.lane.b32.xlu1 %v7206_v11, %s11722_s22  ;;  %7955 = vst.msk [vmem:[#allocation2 + $0x110] sm:$0xf] %vm17770_vm10, %v7873_v9  ;;  %v6832_v52 = vrot.slane %v6830_v26, 4  ;;  %v6839_v29 = vshll.u32 %v6551_v4, 16  ;;  %v6843_v38 = vshrl.u32 %v6551_v4, 16  ;;  %v16288_v44 = vrot.slane %v7209_v13, 4  ;;  %vm17783_vm10 = vmmov %vm17767_vm1 }
 0x4c8   : > { %8214 = vst.msk [vmem:[#allocation2 + $0x10] sm:$0xf] %vm17771_vm5, %v8073_v56  ;;  %v16280_v63 = vpop.f32.mrf.mxu1  ;;  %v6835_v49 = vrot.slane %v6833_v5, 5  ;;  %v6086_v32 = vld [vmem:[#allocation3 + $0x84] sm:$0xe]  ;;  %v7820_v6 = vrot.slane %v7818_v24, 5  ;;  %vm17784_vm5 = vmmov %vm17773_vm0 }
 0x4c9   : > { %v7248_v2 = vpop.permute.xlu1 %7247  ;;  %v11500_v27 = vld [vmem:[#allocation2 + $0xf4] sm:$0xf]  ;;  %8215 = vst.msk [vmem:[#allocation2 + $0x24] sm:$0xf] %vm17772_vm12, %v8076_v55  ;;  %7898 = vrot.lane.b32.xlu2 %v7787_v14, %s11722_s22  ;;  %v7212_v46 = vrot.slane %v16266_v43, 5  ;;  %v6841_v15 = vrot.slane %v6839_v29, 5  ;;  %vm17785_vm12 = vmmov %vm17767_vm1 }
 0x4ca   : > { %7330 = vst.msk [vmem:[#allocation2 + $0x10c] sm:$0xf] %vm17773_vm0, %v7248_v2  ;;  %v10995_v3 = vor.u32 %v11500_v27, %v10992_v30  ;;  %v16300_v0 = vld [vmem:[#allocation3 + $0xa0] sm:$0xf]  ;;  %v6353_v58 = vld [vmem:[#allocation3 + $0xb4] sm:$0xf]  ;;  %v6836_v47 = vor.u32 %v6835_v49, %v6832_v52  ;;  %vm17786_vm0 = vmmov %vm17767_vm1 }
 0x4cb   : > { %7406 = vst.msk [vmem:[#allocation2 + $0x1ec] sm:$0xf] %vm17774_vm4, %v7374_v40  ;;  %v6424_v36 = vpop.permute.xlu2 %6423  ;;  %9146 = vmatmul.bf16.gmra.mxu1 %v11111_v53  ;;  %v6242_v41 = vrot.slane %v16300_v0, 5  ;;  %v6845_v59 = vrot.slane %v6843_v38, 4  ;;  %v7816_v42 = vrot.slane %v7815_v18, 4  ;;  %v10831_v51 = vrot.slane %v6086_v32, 9  ;;  %vm17787_vm4 = vmmov %vm17784_vm5 }
 0x4cc   : > { %9205 = vmatmul.bf16.gmra.mxu2 %v10995_v3  ;;  %6502 = vst.msk [vmem:[#allocation2 + $0x158] sm:$0xf] %vm17775_vm13, %v6424_v36  ;;  %7277 = vrot.lane.b32.xlu0 %v7210_v1, %s11722_s22  ;;  %v16305_v13 = vld [vmem:[#allocation3 + $0xc0] sm:$0xe]  ;;  %v11501_v61 = vld [vmem:[#allocation2 + $0xfc] sm:$0xf]  ;;  %v7213_v36 = vsel %vm12010_vm6, %v16288_v44, %v7212_v46  ;;  %vm17788_vm13 = vmmov %vm17786_vm0 }
 0x4cd   : > { %v7460_v12 = vld [vmem:[#allocation3 + $0xd0] sm:$0xf]  ;;  %v6094_v37 = vld [vmem:[#allocation3 + $0xa4] sm:$0x1]  ;;  %v6354_v21 = vld [vmem:[#allocation3 + $0xb8] sm:$0xf]  ;;  %v6846_v19 = vor.u32 %v6845_v59, %v6841_v15  ;;  %v6229_v5 = vsel %vm12010_vm6, %v10831_v51, %v6228_v50  ;;  %v7821_v62 = vsel %vm11842_vm2, %v7816_v42, %v7820_v6 }
 0x4ce   : > { %v7250_v60 = vpop.permute.xlu0 %7249  ;;  %v11000_v57 = vld [vmem:[#allocation2 + $0x10c] sm:$0xf0]  ;;  %v7832_v8 = vshll.u32 %v7460_v12, 16  ;;  %v7836_v33 = vshrl.u32 %v7460_v12, 16  ;;  %v16309_v11 = vrot.slane %v7805_v34, 4  ;;  %v6837_v9 = vrot.slane %v6836_v47, 4 }
 0x4cf   : > { %6445 = vrot.lane.b32.xlu1 %v6353_v58, %s11722_s22  ;;  %7331 = vst.msk [vmem:[#allocation2 + $0x120] sm:$0xf] %vm17776_vm14, %v7250_v60  ;;  %v11003_v20 = vor.u32 %v11501_v61, %v11000_v57  ;;  %v6244_v56 = vrot.slane %v6242_v41, 4  ;;  %v10998_v35 = vld [vmem:[#allocation2 + $0xf8] sm:$0xf]  ;;  %v10851_v24 = vrot.slane %v16305_v13, 9  ;;  %vm17789_vm14 = vmmov %vm17786_vm0 }
 0x4d0   : > { %v16313_v26 = vpop.f32.mrf.mxu1  ;;  %v16316_v4 = vrot.slane %v7832_v8, 5  ;;  %v16324_v52 = vld [vmem:[#allocation3 + $0xc4] sm:$0xf]  ;;  %v16326_v29 = vld [vmem:[#allocation3 + $0xd4] sm:$0x1]  ;;  %v16328_v38 = vrot.slane %v7836_v33, 4  ;;  %v6842_v14 = vsel %vm11842_vm2, %v6837_v9, %v6841_v15 }
 0x4d1   : > { %v6418_v40 = vpop.permute.xlu1 %6417  ;;  %v11503_v30 = vld [vmem:[#allocation2 + $0x108] sm:$0xf0]  ;;  %9383 = vmatmul.bf16.gmra.mxu0 %v11003_v20  ;;  %6447 = vrot.lane.b32.xlu2 %v6354_v21, %s11722_s22  ;;  %v6245_v2 = vrot.slane %v6094_v37, 5  ;;  %7003 = vst.msk [vmem:[#allocation2 + $0x1c0] sm:$0xf] %vm17778_vm8, %v6842_v14  ;;  %v6847_v3 = vrot.slane %v6846_v19, 4  ;;  %v7811_v20 = vsel %vm11842_vm2, %v16309_v11, %v16255_v16  ;;  %vm17791_vm8 = vmmov %vm17787_vm4 }
 0x4d2   : > { %6499 = vst.msk [vmem:[#allocation2 + $0x11c] sm:$0xf] %vm17777_vm11, %v6418_v40  ;;  %v10999_v55 = vor.u32 %v11503_v30, %v10998_v35  ;;  %v6552_v50 = vld [vmem:[#allocation3 + $0x98] sm:$0x1]  ;;  %v7977_v27 = vld [vmem:[#allocation3 + $0x24] sm:$0xe]  ;;  %v7839_v9 = vor.u32 %v16328_v38, %v16316_v4  ;;  %vm17790_vm11 = vmmov %vm17787_vm4 }
 0x4d3   : > { %v7879_v18 = vpop.permute.xlu2 %7878  ;;  %v11130_v49 = vld [vmem:[#allocation2 + $0x208] sm:$0xf]  ;;  %6315 = vst.msk [vmem:[#allocation2 + $0x1bc] sm:$0xf] %vm17779_vm3, %v6229_v5  ;;  %v6246_v53 = vsel %vm12010_vm6, %v6244_v56, %v6245_v2  ;;  %v6849_v32 = vshll.u32 %v6552_v50, 16  ;;  %v10853_v1 = vrot.slane %v7977_v27, 9  ;;  %vm17792_vm3 = vmmov %vm17786_vm0 }
 0x4d4   : > { %9294 = vmatmul.bf16.gmra.mxu3 %v10999_v55  ;;  %7958 = vst.msk [vmem:[#allocation2 + $0x14c] sm:$0xf] %vm17780_vm9, %v7879_v18  ;;  %7904 = vrot.lane.b32.xlu0 %v7821_v62, %s11722_s22  ;;  %v7373_v34 = vld [vmem:[#allocation3 + $0xa0] sm:$0xf]  ;;  %v7978_v6 = vld [vmem:[#allocation3 + $0x28] sm:$0xf]  ;;  %vm17793_vm9 = vmmov %vm17786_vm0 }
 0x4d5   : > { %v11537_v47 = vld [vmem:[#allocation2 + $0x218] sm:$0xf0]  ;;  %6320 = vst.msk [vmem:[#allocation2 + $0x220] sm:$0xf] %vm17767_vm1, %v6246_v53  ;;  %v6851_v15 = vrot.slane %v6849_v32, 5  ;;  %v8079_v59 = vrot.slane %v7978_v6, 5  ;;  %vm17794_vm1 = vmmov %vm17787_vm4 }
 0x4d6   : > { %v7877_v58 = vpop.permute.xlu0 %7876  ;;  %v11012_v42 = vld [vmem:[#allocation2 + $0x12c] sm:$0xf0]  ;;  %v7216_v51 = vrot.slane %v16324_v52, 5  ;;  %v7842_v60 = vshll.u32 %v16326_v29, 16  ;;  %v7979_v43 = vld [vmem:[#allocation3 + $0x2c] sm:$0x1]  ;;  %v11131_v37 = vor.u32 %v11537_v47, %v11130_v49 }
 0x4d7   : > { %7279 = vrot.lane.b32.xlu1 %v7213_v36, %s11722_s22  ;;  %7957 = vst.msk [vmem:[#allocation2 + $0x138] sm:$0xf] %vm17781_vm7, %v7877_v58  ;;  %v6852_v44 = vsel %vm11842_vm2, %v6847_v3, %v6851_v15  ;;  %v8080_v46 = vsel %vm12010_vm6, %v10853_v1, %v8079_v59  ;;  %v8081_v61 = vrot.slane %v8079_v59, 4  ;;  %v8082_v57 = vrot.slane %v7979_v43, 5  ;;  %v6553_v12 = vld [vmem:[#allocation3 + $0x9c] sm:$0xf]  ;;  %vm17795_vm7 = vmmov %vm17786_vm0 }
 0x4d8   : > { %7405 = vst.msk [vmem:[#allocation2 + $0x1d8] sm:$0xf] %vm17782_vm15, %v7373_v34  ;;  %v16359_v33 = vpop.f32.mrf.mxu1  ;;  %v7376_v56 = vld [vmem:[#allocation3 + $0xb4] sm:$0xf]  ;;  %v6554_v19 = vld [vmem:[#allocation3 + $0xa0] sm:$0xf]  ;;  %v7217_v38 = vsel %vm12010_vm6, %v10851_v24, %v7216_v51  ;;  %vm17796_vm15 = vmmov %vm17794_vm1 }
 0x4d9   : > { %v7252_v8 = vpop.permute.xlu1 %7251  ;;  %v11505_v21 = vld [vmem:[#allocation2 + $0x11c] sm:$0xf]  ;;  %7004 = vst.msk [vmem:[#allocation2 + $0x1d4] sm:$0xf] %vm17783_vm10, %v6852_v44  ;;  %7902 = vrot.lane.b32.xlu2 %v7811_v20, %s11722_s22  ;;  %v8083_v16 = vsel %vm12010_vm6, %v8081_v61, %v8082_v57  ;;  %v6854_v11 = vshrl.u32 %v6553_v12, 16  ;;  %v6857_v35 = vshll.u32 %v6553_v12, 16  ;;  %vm17797_vm10 = vmmov %vm17786_vm0 }
 0x4da   : > { %7332 = vst.msk [vmem:[#allocation2 + $0x134] sm:$0xf] %vm17784_vm5, %v7252_v8  ;;  %v11015_v40 = vor.u32 %v11505_v21, %v11012_v42  ;;  %v6089_v30 = vld [vmem:[#allocation3 + $0x90] sm:$0xe]  ;;  %v6863_v5 = vshll.u32 %v6554_v19, 16  ;;  %v6867_v55 = vshrl.u32 %v6554_v19, 16  ;;  %vm17798_vm5 = vmmov %vm17794_vm1 }
 0x4db   : > { %8216 = vst.msk [vmem:[#allocation2 + $0x38] sm:$0xf] %vm17785_vm12, %v8080_v46  ;;  %v10832_v52 = vrot.slane %v6089_v30, 9  ;;  %v6428_v29 = vpop.permute.xlu2 %6427  ;;  %9151 = vmatmul.bf16.gmra.mxu1 %v11131_v37  ;;  %v6355_v14 = vld [vmem:[#allocation3 + $0xc0] sm:$0xf]  ;;  %v7218_v2 = vrot.slane %v7216_v51, 4  ;;  %vm17799_vm12 = vmmov %vm17786_vm0 }
 0x4dc   : > { %9210 = vmatmul.bf16.gmra.mxu2 %v11015_v40  ;;  %8217 = vst.msk [vmem:[#allocation2 + $0x4c] sm:$0xf] %vm17786_vm0, %v8083_v16  ;;  %v6856_v62 = vrot.slane %v6854_v11, 4  ;;  %v6859_v50 = vrot.slane %v6857_v35, 5  ;;  %7281 = vrot.lane.b32.xlu0 %v7217_v38, %s11722_s22  ;;  %v11506_v27 = vld [vmem:[#allocation2 + $0x124] sm:$0xf] }
 0x4dd   : > { %6504 = vst.msk [vmem:[#allocation2 + $0x180] sm:$0xf] %vm17787_vm4, %v6428_v29  ;;  %v7840_v18 = vrot.slane %v7839_v9, 4  ;;  %v7844_v49 = vrot.slane %v7842_v60, 5  ;;  %v6236_v13 = vsel %vm12010_vm6, %v10832_v52, %v6235_v31  ;;  %v6865_v3 = vrot.slane %v6863_v5, 5  ;;  %vm17800_vm4 = vmmov %vm17794_vm1 }
 0x4de   : > { %v11020_v53 = vld [vmem:[#allocation2 + $0x134] sm:$0xf0]  ;;  %7408 = vst.msk [vmem:[#allocation2 + $0x214] sm:$0xf] %vm17788_vm13, %v7376_v56  ;;  %v6860_v24 = vor.u32 %v6859_v50, %v6856_v62  ;;  %v6869_v32 = vrot.slane %v6867_v55, 4  ;;  %v7254_v34 = vpop.permute.xlu0 %7253  ;;  %vm17801_vm13 = vmmov %vm17786_vm0 }
 0x4df   : > { %v6356_v1 = vld [vmem:[#allocation3 + $0xc4] sm:$0xf]  ;;  %6449 = vrot.lane.b32.xlu1 %v6355_v14, %s11722_s22  ;;  %v11023_v6 = vor.u32 %v11506_v27, %v11020_v53  ;;  %v7060_v36 = vld [vmem:[#allocation3 + $0xc8] sm:$0x1]  ;;  %6317 = vst.msk [vmem:[#allocation2 + $0x1e4] sm:$0xf] %vm17789_vm14, %v6236_v13  ;;  %v7845_v43 = vsel %vm11842_vm2, %v7840_v18, %v7844_v49  ;;  %vm17802_vm14 = vmmov %vm17794_vm1 }
 0x4e0   : > { %v16383_v58 = vld [vmem:[#allocation3 + $0xac] sm:$0xf]  ;;  %v6097_v7 = vld [vmem:[#allocation3 + $0xb0] sm:$0x1]  ;;  %7333 = vst.msk [vmem:[#allocation2 + $0x148] sm:$0xf] %vm17790_vm11, %v7254_v34  ;;  %v6870_v59 = vor.u32 %v6869_v32, %v6865_v3  ;;  %v16387_v51 = vpop.f32.mrf.mxu1  ;;  %vm17803_vm11 = vmmov %vm17794_vm1 }
 0x4e1   : > { %v11018_v31 = vld [vmem:[#allocation2 + $0x120] sm:$0xf]  ;;  %v6861_v47 = vrot.slane %v6860_v24, 4  ;;  %v6249_v15 = vrot.slane %v16383_v58, 5  ;;  %v6422_v42 = vpop.permute.xlu1 %6421  ;;  %v11508_v60 = vld [vmem:[#allocation2 + $0x130] sm:$0xf0]  ;;  %9388 = vmatmul.bf16.gmra.mxu0 %v11023_v6  ;;  %6451 = vrot.lane.b32.xlu2 %v6356_v1, %s11722_s22 }
 0x4e2   : > { %v7375_v44 = vld [vmem:[#allocation3 + $0xac] sm:$0xf]  ;;  %v6555_v46 = vld [vmem:[#allocation3 + $0xa4] sm:$0x1]  ;;  %6501 = vst.msk [vmem:[#allocation2 + $0x144] sm:$0xf] %vm17791_vm8, %v6422_v42  ;;  %v11019_v61 = vor.u32 %v11508_v60, %v11018_v31  ;;  %vm17804_vm8 = vmmov %vm17786_vm0 }
 0x4e3   : > { %v6866_v57 = vsel %vm11842_vm2, %v6861_v47, %v6865_v3  ;;  %v6251_v12 = vrot.slane %v6249_v15, 4  ;;  %v6252_v20 = vrot.slane %v6097_v7, 5  ;;  %v6871_v8 = vrot.slane %v6870_v59, 4  ;;  %v7883_v21 = vpop.permute.xlu2 %7882  ;;  %7407 = vst.msk [vmem:[#allocation2 + $0x200] sm:$0xf] %vm17793_vm9, %v7375_v44  ;;  %vm17806_vm9 = vmmov %vm17794_vm1 }
 0x4e4   : > { %7005 = vst.msk [vmem:[#allocation2 + $0x1e8] sm:$0xf] %vm17792_vm3, %v6866_v57  ;;  %v6873_v37 = vshll.u32 %v6555_v46, 16  ;;  %9299 = vmatmul.bf16.gmra.mxu3 %v11019_v61  ;;  %v7219_v9 = vrot.slane %v7060_v36, 5  ;;  %v7980_v19 = vld [vmem:[#allocation3 + $0x30] sm:$0xe]  ;;  %7908 = vrot.lane.b32.xlu0 %v7845_v43, %s11722_s22  ;;  %vm17805_vm3 = vmmov %vm17786_vm0 }
 0x4e5   : > { %v6253_v56 = vsel %vm12010_vm6, %v6251_v12, %v6252_v20  ;;  %7960 = vst.msk [vmem:[#allocation2 + $0x174] sm:$0xf] %vm17794_vm1, %v7883_v21  ;;  %v7459_v40 = vld [vmem:[#allocation3 + $0xcc] sm:$0xf]  ;;  %v10854_v11 = vrot.slane %v7980_v19, 9  ;;  %vm17807_vm1 = vmmov %vm17786_vm0 }
 0x4e6   : > { %v6875_v16 = vrot.slane %v6873_v37, 5  ;;  %v7220_v35 = vsel %vm12010_vm6, %v7218_v2, %v7219_v9  ;;  %v7823_v30 = vshrl.u32 %v7459_v40, 16  ;;  %v7826_v5 = vshll.u32 %v7459_v40, 16  ;;  %6322 = vst.msk [vmem:[#allocation2 + $0x248] sm:$0xf] %vm17795_vm7, %v6253_v56  ;;  %v7881_v52 = vpop.permute.xlu0 %7880  ;;  %vm17808_vm7 = vmmov %vm17786_vm0 }
 0x4e7   : > { %v7981_v55 = vld [vmem:[#allocation3 + $0x34] sm:$0xf]  ;;  %7283 = vrot.lane.b32.xlu1 %v7220_v35, %s11722_s22  ;;  %v11150_v29 = vld [vmem:[#allocation2 + $0x230] sm:$0xf]  ;;  %v11542_v38 = vld [vmem:[#allocation2 + $0x240] sm:$0xf0] }
 0x4e8   : > { %v6876_v14 = vsel %vm11842_vm2, %v6871_v8, %v6875_v16  ;;  %v7982_v62 = vld [vmem:[#allocation3 + $0x38] sm:$0x1]  ;;  %v8086_v50 = vrot.slane %v7981_v55, 5  ;;  %7959 = vst.msk [vmem:[#allocation2 + $0x160] sm:$0xf] %vm17796_vm15, %v7881_v52  ;;  %v7825_v18 = vrot.slane %v7823_v30, 4  ;;  %v16410_v13 = vpop.f32.mrf.mxu1  ;;  %v11151_v1 = vor.u32 %v11542_v38, %v11150_v29  ;;  %vm17809_vm15 = vmmov %vm17800_vm4 }
 0x4e9   : > { %v11032_v27 = vld [vmem:[#allocation2 + $0x154] sm:$0xf0]  ;;  %v7828_v2 = vrot.slane %v7826_v5, 5  ;;  %v7256_v49 = vpop.permute.xlu1 %7255  ;;  %v11510_v53 = vld [vmem:[#allocation2 + $0x144] sm:$0xf]  ;;  %v8089_v32 = vrot.slane %v7982_v62, 5 }
 0x4ea   : > { %7006 = vst.msk [vmem:[#allocation2 + $0x1fc] sm:$0xf] %vm17797_vm10, %v6876_v14  ;;  %v8087_v24 = vsel %vm12010_vm6, %v10854_v11, %v8086_v50  ;;  %v8088_v3 = vrot.slane %v8086_v50, 4  ;;  %v11035_v34 = vor.u32 %v11510_v53, %v11032_v27  ;;  %v7378_v36 = vld [vmem:[#allocation3 + $0xc0] sm:$0xf]  ;;  %vm17810_vm10 = vmmov %vm17800_vm4 }
 0x4eb   : > { %7334 = vst.msk [vmem:[#allocation2 + $0x15c] sm:$0xf] %vm17798_vm5, %v7256_v49  ;;  %v7829_v6 = vor.u32 %v7828_v2, %v7825_v18  ;;  %v6556_v7 = vld [vmem:[#allocation3 + $0xa8] sm:$0xf]  ;;  %v6557_v47 = vld [vmem:[#allocation3 + $0xac] sm:$0xf]  ;;  %v6432_v60 = vpop.permute.xlu2 %6431  ;;  %9156 = vmatmul.bf16.gmra.mxu1 %v11151_v1  ;;  %vm17811_vm5 = vmmov %vm17786_vm0 }
 0x4ec   : > { %v8090_v31 = vsel %vm12010_vm6, %v8088_v3, %v8089_v32  ;;  %8218 = vst.msk [vmem:[#allocation2 + $0x60] sm:$0xf] %vm17799_vm12, %v8087_v24  ;;  %v6878_v59 = vshrl.u32 %v6556_v7, 16  ;;  %v6881_v42 = vshll.u32 %v6556_v7, 16  ;;  %9215 = vmatmul.bf16.gmra.mxu2 %v11035_v34  ;;  %v6887_v44 = vshll.u32 %v6557_v47, 16  ;;  %vm17812_vm12 = vmmov %vm17786_vm0 }
 0x4ed   : > { %v7830_v43 = vrot.slane %v7829_v6, 4  ;;  %8219 = vst.msk [vmem:[#allocation2 + $0x74] sm:$0xf] %vm17786_vm0, %v8090_v31  ;;  %v11511_v46 = vld [vmem:[#allocation2 + $0x14c] sm:$0xf]  ;;  %v6891_v12 = vshrl.u32 %v6557_v47, 16  ;;  %vm17813_vm0 = vmmov %vm17800_vm4 }
 0x4ee   : > { %6506 = vst.msk [vmem:[#allocation2 + $0x1a8] sm:$0xf] %vm17800_vm4, %v6432_v60  ;;  %v6880_v61 = vrot.slane %v6878_v59, 4  ;;  %v6883_v57 = vrot.slane %v6881_v42, 5  ;;  %v6889_v8 = vrot.slane %v6887_v44, 5  ;;  %v7258_v9 = vpop.permute.xlu0 %7257  ;;  %vm17814_vm4 = vmmov %vm17807_vm1 }
 0x4ef   : > { %v7835_v20 = vsel %vm11842_vm2, %v7830_v43, %v16316_v4  ;;  %7410 = vst.msk [vmem:[#allocation2 + $0x23c] sm:$0xf] %vm17801_vm13, %v7378_v36  ;;  %v6092_v37 = vld [vmem:[#allocation3 + $0x9c] sm:$0xe]  ;;  %v9176_v21 = vpop.f32.mrf.mxu2  ;;  %v11040_v56 = vld [vmem:[#allocation2 + $0x15c] sm:$0xf0]  ;;  %vm17815_vm13 = vmmov %vm17807_vm1 }
 0x4f0   : > { %7906 = vrot.lane.b32.xlu2 %v7835_v20, %s11722_s22  ;;  %v6884_v19 = vor.u32 %v6883_v57, %v6880_v61  ;;  %v10833_v40 = vrot.slane %v6092_v37, 9  ;;  %v16426_v16 = vld [vmem:[#allocation3 + $0xb8] sm:$0xf]  ;;  %v6893_v11 = vrot.slane %v6891_v12, 4  ;;  %7335 = vst.msk [vmem:[#allocation2 + $0x170] sm:$0xf] %vm17802_vm14, %v7258_v9  ;;  %v11043_v35 = vor.u32 %v11511_v46, %v11040_v56  ;;  %v16430_v55 = vpop.f32.mrf.mxu1  ;;  %vm17816_vm14 = vmmov %vm17807_vm1 }
 0x4f1   : > { %v6100_v30 = vld [vmem:[#allocation3 + $0xbc] sm:$0x1]  ;;  %v6256_v4 = vrot.slane %v16426_v16, 5  ;;  %v6426_v5 = vpop.permute.xlu1 %6425  ;;  %v11038_v52 = vld [vmem:[#allocation2 + $0x148] sm:$0xf]  ;;  %v9177_v6 = vadd.f32 %v9176_v21, %v15935_v22  ;;  %s11353_s22 = sshll.u32 %s11822_s17, 8 }
 0x4f2   : > { %v11513_v29 = vld [vmem:[#allocation2 + $0x158] sm:$0xf0]  ;;  %v6885_v38 = vrot.slane %v6884_v19, 4  ;;  %v6243_v14 = vsel %vm12010_vm6, %v10833_v40, %v6242_v41  ;;  %v6894_v62 = vor.u32 %v6893_v11, %v6889_v8  ;;  %6503 = vst.msk [vmem:[#allocation2 + $0x16c] sm:$0xf] %vm17803_vm11, %v6426_v5  ;;  %9393 = vmatmul.bf16.gmra.mxu0 %v11043_v35  ;;  %v6259_v18 = vrot.slane %v6100_v30, 5  ;;  %vm17817_vm11 = vmmov %vm17813_vm0  ;;  %s17198_s12 = scalar_lea.vmem %s17467_s1, %s11353_s22  ;;  %s9950_s22 = scalar_lea.hbm %s17474_s8, %s11586_s20 }
 0x4f3   : > { %v11039_v50 = vor.u32 %v11513_v29, %v11038_v52  ;;  %v6258_v27 = vrot.slane %v6256_v4, 4  ;;  %6319 = vst.msk [vmem:[#allocation2 + $0x20c] sm:$0xf] %vm17804_vm8, %v6243_v14  ;;  %v6558_v49 = vld [vmem:[#allocation3 + $0xb0] sm:$0x1]  ;;  %v7887_v53 = vpop.permute.xlu2 %7886  ;;  %vm17818_vm8 = vmmov %vm17813_vm0  ;;  %s10032_s17 = sshll.u32 %s311_s25, 8 }
 0x4f4   : > { %v6890_v2 = vsel %vm11842_vm2, %v6885_v38, %v6889_v8  ;;  %v11547_v0 = vld [vmem:[#allocation2 + $0x268] sm:$0xf0]  ;;  %v7377_v24 = vld [vmem:[#allocation3 + $0xb8] sm:$0xf]  ;;  %v6895_v3 = vrot.slane %v6894_v62, 4  ;;  %v6897_v32 = vshll.u32 %v6558_v49, 16 }
 0x4f5   : > { %9304 = vmatmul.bf16.gmra.mxu3 %v11039_v50  ;;  %7007 = vst.msk [vmem:[#allocation2 + $0x210] sm:$0xf] %vm17805_vm3, %v6890_v2  ;;  %v6260_v41 = vsel %vm12010_vm6, %v6258_v27, %v6259_v18  ;;  %v7983_v1 = vld [vmem:[#allocation3 + $0x3c] sm:$0xe]  ;;  %v7984_v34 = vld [vmem:[#allocation3 + $0x40] sm:$0xf]  ;;  %vm17819_vm3 = vmmov %vm17807_vm1 }
 0x4f6   : > { %7962 = vst.msk [vmem:[#allocation2 + $0x19c] sm:$0xf] %vm17806_vm9, %v7887_v53  ;;  %v11170_v36 = vld [vmem:[#allocation2 + $0x258] sm:$0xf]  ;;  %v6899_v7 = vrot.slane %v6897_v32, 5  ;;  %v10855_v47 = vrot.slane %v7983_v1, 9  ;;  %v7885_v61 = vpop.permute.xlu0 %7884  ;;  %vm17820_vm9 = vmmov %vm17807_vm1 }
 0x4f7   : > { %6324 = vst.msk [vmem:[#allocation2 + $0x270] sm:$0xf] %vm17807_vm1, %v6260_v41  ;;  %v7985_v31 = vld [vmem:[#allocation3 + $0x44] sm:$0x1]  ;;  %v9178_v59 = vpop.f32.mrf.mxu2  ;;  %v9265_v42 = vpop.f32.mrf.mxu3  ;;  %v11052_v60 = vld [vmem:[#allocation2 + $0x17c] sm:$0xf0]  ;;  %v11171_v21 = vor.u32 %v11547_v0, %v11170_v36  ;;  %vm17821_vm1 = vmmov %vm17813_vm0 }
 0x4f8   : > { %7409 = vst.msk [vmem:[#allocation2 + $0x228] sm:$0xf] %vm17808_vm7, %v7377_v24  ;;  %v8093_v43 = vrot.slane %v7984_v34, 5  ;;  %v8096_v44 = vrot.slane %v7985_v31, 5  ;;  %v16449_v46 = vadd.f32 %v9265_v42, %v9177_v6  ;;  %v6900_v57 = vsel %vm11842_vm2, %v6895_v3, %v6899_v7  ;;  %v6559_v22 = vld [vmem:[#allocation3 + $0xb4] sm:$0xf]  ;;  %v16454_v37 = vpop.f32.mrf.mxu1  ;;  %vm17822_vm7 = vmmov %vm17819_vm3 }
 0x4f9   : > { %v6560_v12 = vld [vmem:[#allocation3 + $0xb8] sm:$0xf]  ;;  %v6095_v20 = vld [vmem:[#allocation3 + $0xa8] sm:$0xe]  ;;  %7961 = vst.msk [vmem:[#allocation2 + $0x188] sm:$0xf] %vm17809_vm15, %v7885_v61  ;;  %v7260_v8 = vpop.permute.xlu1 %7259  ;;  %v9179_v53 = vadd.f32 %v9178_v59, %v15990_v39  ;;  %vm17823_vm15 = vmmov %vm17819_vm3 }
 0x4fa   : > { %v11515_v9 = vld [vmem:[#allocation2 + $0x16c] sm:$0xf]  ;;  %v8094_v56 = vsel %vm12010_vm6, %v10855_v47, %v8093_v43  ;;  %v8095_v19 = vrot.slane %v8093_v43, 4  ;;  %v6902_v40 = vshrl.u32 %v6559_v22, 16  ;;  %7336 = vst.msk [vmem:[#allocation2 + $0x184] sm:$0xf] %vm17810_vm10, %v7260_v8  ;;  %vm17824_vm10 = vmmov %vm17813_vm0 }
 0x4fb   : > { %v11055_v11 = vor.u32 %v11515_v9, %v11052_v60  ;;  %v6905_v35 = vshll.u32 %v6559_v22, 16  ;;  %v6911_v30 = vshll.u32 %v6560_v12, 16  ;;  %v6915_v5 = vshrl.u32 %v6560_v12, 16  ;;  %7008 = vst.msk [vmem:[#allocation2 + $0x224] sm:$0xf] %vm17811_vm5, %v6900_v57  ;;  %v6436_v14 = vpop.permute.xlu2 %6435  ;;  %9161 = vmatmul.bf16.gmra.mxu1 %v11171_v21  ;;  %vm17825_vm5 = vmmov %vm17813_vm0  ;;  %s17211_s19 = scalar_lea.vmem [#allocation4], %s10032_s17 }
 0x4fc   : > { %v8097_v52 = vsel %vm12010_vm6, %v8095_v19, %v8096_v44  ;;  %v6904_v29 = vrot.slane %v6902_v40, 4  ;;  %v10834_v38 = vrot.slane %v6095_v20, 9  ;;  %8220 = vst.msk [vmem:[#allocation2 + $0x88] sm:$0xf] %vm17812_vm12, %v8094_v56  ;;  %v7379_v27 = vld [vmem:[#allocation3 + $0xc4] sm:$0xf]  ;;  %vm17826_vm12 = vmmov %vm17819_vm3 }
 0x4fd   : > { %9220 = vmatmul.bf16.gmra.mxu2 %v11055_v11  ;;  %v6907_v62 = vrot.slane %v6905_v35, 5  ;;  %v6913_v50 = vrot.slane %v6911_v30, 5  ;;  %6508 = vst.msk [vmem:[#allocation2 + $0x1d0] sm:$0xf] %vm17813_vm0, %v6436_v14  ;;  %v6561_v2 = vld [vmem:[#allocation3 + $0xbc] sm:$0x1] }
 0x4fe   : > { %v6250_v18 = vsel %vm12010_vm6, %v10834_v38, %v6249_v15  ;;  %v6917_v49 = vrot.slane %v6915_v5, 4  ;;  %v11516_v0 = vld [vmem:[#allocation2 + $0x174] sm:$0xf]  ;;  %8221 = vst.msk [vmem:[#allocation2 + $0x9c] sm:$0xf] %vm17814_vm4, %v8097_v52  ;;  %v6921_v24 = vshll.u32 %v6561_v2, 16  ;;  %v7262_v15 = vpop.permute.xlu0 %7261  ;;  %vm17828_vm4 = vmmov %vm17821_vm1 }
 0x4ff   : > { %v6908_v41 = vor.u32 %v6907_v62, %v6904_v29  ;;  %v7986_v3 = vld [vmem:[#allocation3 + $0x48] sm:$0xe]  ;;  %v9181_v32 = vpop.f32.mrf.mxu2  ;;  %v9267_v1 = vpop.f32.mrf.mxu3  ;;  %v11058_v34 = vld [vmem:[#allocation2 + $0x170] sm:$0xf]  ;;  %6321 = vst.msk [vmem:[#allocation2 + $0x234] sm:$0xf] %vm17815_vm13, %v6250_v18  ;;  %vm17829_vm13 = vmmov %vm17819_vm3 }
 0x500   : > { %v6918_v6 = vor.u32 %v6917_v49, %v6913_v50  ;;  %v7987_v58 = vld [vmem:[#allocation3 + $0x4c] sm:$0xf]  ;;  %v7988_v36 = vld [vmem:[#allocation3 + $0x50] sm:$0x1]  ;;  %v16471_v7 = vadd.f32 %v9267_v1, %v9179_v53  ;;  %v11060_v31 = vld [vmem:[#allocation2 + $0x184] sm:$0xf0]  ;;  %v16475_v42 = vpop.f32.mrf.mxu1  ;;  %v9182_v52 = vadd.f32 %v9181_v32, %v16028_v28 }
 0x501   : > { %v6909_v47 = vrot.slane %v6908_v41, 4  ;;  %7411 = vst.msk [vmem:[#allocation2 + $0x250] sm:$0xf] %vm17816_vm14, %v7379_v27  ;;  %v6923_v39 = vrot.slane %v6921_v24, 5  ;;  %v6430_v59 = vpop.permute.xlu1 %6429  ;;  %v11518_v60 = vld [vmem:[#allocation2 + $0x180] sm:$0xf0]  ;;  %v11063_v43 = vor.u32 %v11516_v0, %v11060_v31  ;;  %vm17830_vm14 = vmmov %vm17819_vm3 }
 0x502   : > { %7337 = vst.msk [vmem:[#allocation2 + $0x198] sm:$0xf] %vm17817_vm11, %v7262_v15  ;;  %v6919_v44 = vrot.slane %v6918_v6, 4  ;;  %v10856_v61 = vrot.slane %v7986_v3, 9  ;;  %v11059_v57 = vor.u32 %v11518_v60, %v11058_v34  ;;  %v8100_v12 = vrot.slane %v7987_v58, 5  ;;  %vm17831_vm11 = vmmov %vm17819_vm3  ;;  %s9951_s24 = sshll.u32 %s17211_s19, 4  ;;  %s9952_s24 = int_to_ptr.vmem [resolvable:$true] %s9951_s24 }
 0x503   : > { %6505 = vst.msk [vmem:[#allocation2 + $0x194] sm:$0xf] %vm17818_vm8, %v6430_v59  ;;  %v6914_v22 = vsel %vm11842_vm2, %v6909_v47, %v6913_v50  ;;  %v6562_v20 = vld [vmem:[#allocation3 + $0xc0] sm:$0xf]  ;;  %9398 = vmatmul.bf16.gmra.mxu0 %v11063_v43  ;;  %v6563_v21 = vld [vmem:[#allocation3 + $0xc4] sm:$0xf]  ;;  %v7891_v9 = vpop.permute.xlu2 %7890  ;;  %vm17833_vm8 = vmmov %vm17821_vm1 }
 0x504   : > { %7009 = vst.msk [vmem:[#allocation2 + $0x238] sm:$0xf] %vm17819_vm3, %v6914_v22  ;;  %v6924_v8 = vsel %vm11842_vm2, %v6919_v44, %v6923_v39  ;;  %v8101_v56 = vsel %vm12010_vm6, %v10856_v61, %v8100_v12  ;;  %v8102_v19 = vrot.slane %v8100_v12, 4  ;;  %v8103_v40 = vrot.slane %v7988_v36, 5  ;;  %v11474_v35 = vld [vmem:[#allocation2 + $0x20] sm:$0xf0] }
 0x505   : > { %9309 = vmatmul.bf16.gmra.mxu3 %v11059_v57  ;;  %7010 = vst.msk [vmem:[#allocation2 + $0x24c] sm:$0xf] %vm17820_vm9, %v6924_v8  ;;  %v6926_v11 = vshrl.u32 %v6562_v20, 16  ;;  %v6929_v30 = vshll.u32 %v6562_v20, 16  ;;  %v6935_v5 = vshll.u32 %v6563_v21, 16  ;;  %v6939_v14 = vshrl.u32 %v6563_v21, 16  ;;  %vm17834_vm9 = vmmov %vm17819_vm3 }
 0x506   : > { %7964 = vst.msk [vmem:[#allocation2 + $0x1c4] sm:$0xf] %vm17821_vm1, %v7891_v9  ;;  %v8104_v29 = vsel %vm12010_vm6, %v8102_v19, %v8103_v40  ;;  %v6098_v62 = vld [vmem:[#allocation3 + $0xb4] sm:$0xe]  ;;  %v10886_v18 = vld [vmem:[#allocation2 + $0x10] sm:$0xf]  ;;  %v7889_v41 = vpop.permute.xlu0 %7888 }
 0x507   : > { %8222 = vst.msk [vmem:[#allocation2 + $0xb0] sm:$0xf] %vm17822_vm7, %v8101_v56  ;;  %v6928_v38 = vrot.slane %v6926_v11, 4  ;;  %v9183_v50 = vpop.f32.mrf.mxu2  ;;  %v9270_v27 = vpop.f32.mrf.mxu3  ;;  %v6931_v2 = vrot.slane %v6929_v30, 5  ;;  %v6937_v49 = vrot.slane %v6935_v5, 5  ;;  %v10835_v53 = vrot.slane %v6098_v62, 9  ;;  %vm17835_vm7 = vmmov %vm17819_vm3 }
 0x508   : > { %8223 = vst.msk [vmem:[#allocation2 + $0xc4] sm:$0xf] %vm17823_vm15, %v8104_v29  ;;  %v16492_v0 = vadd.f32 %v9270_v27, %v9182_v52  ;;  %v11072_v28 = vld [vmem:[#allocation2 + $0x1a4] sm:$0xf0]  ;;  %v6941_v3 = vrot.slane %v6939_v14, 4  ;;  %v16495_v1 = vpop.f32.mrf.mxu1  ;;  %v10887_v31 = vor.u32 %v11474_v35, %v10886_v18  ;;  %vm17827_vm0 = vcmask 523264   ;;  %vm17836_vm15 = vmmov %vm17819_vm3 }
 0x509   : > { %v6564_v24 = vld [vmem:[#allocation3 + $0xc8] sm:$0x1]  ;;  %7963 = vst.msk [vmem:[#allocation2 + $0x1b0] sm:$0xf] %vm17824_vm10, %v7889_v41  ;;  %v7264_v32 = vpop.permute.xlu1 %7263  ;;  %v6932_v6 = vor.u32 %v6931_v2, %v6928_v38  ;;  %v6257_v58 = vsel %vm12010_vm6, %v10835_v53, %v6256_v4  ;;  %v7989_v39 = vld [vmem:[#allocation3 + $0x54] sm:$0xe]  ;;  %v9184_v22 = vadd.f32 %v9183_v50, %v16068_v48  ;;  %vm17837_vm10 = vmmov %vm17821_vm1 }
 0x50a   : > { %v11520_v34 = vld [vmem:[#allocation2 + $0x194] sm:$0xf]  ;;  %v6945_v36 = vshll.u32 %v6564_v24, 16  ;;  %7338 = vst.msk [vmem:[#allocation2 + $0x1ac] sm:$0xf] %vm17825_vm5, %v7264_v32  ;;  %v6942_v47 = vor.u32 %v6941_v3, %v6937_v49  ;;  %v10857_v57 = vrot.slane %v7989_v39, 9  ;;  %vm17838_vm5 = vmmov %vm17821_vm1 }
 0x50b   : > { %v11075_v15 = vor.u32 %v11520_v34, %v11072_v28  ;;  %v7990_v59 = vld [vmem:[#allocation3 + $0x58] sm:$0xf]  ;;  %v6933_v60 = vrot.slane %v6932_v6, 4  ;;  %6323 = vst.msk [vmem:[#allocation2 + $0x25c] sm:$0xf] %vm17826_vm12, %v6257_v58  ;;  %v6440_v44 = vpop.permute.xlu2 %6439  ;;  %11332 = vmatmul.msk.bf16.vlgmr.msra.gmra.mxu1 %vm17827_vm0, %v10887_v31  ;;  %vm17839_vm12 = vmmov %vm17819_vm3  ;;  %s9953_s21 = sshll.u32 %s9950_s22, 4  ;;  %s9954_s21 = int_to_ptr.hbm [resolvable:$true] %s9953_s21 }
 0x50c   : > { %v7991_v43 = vld [vmem:[#allocation3 + $0x5c] sm:$0x1]  ;;  %v6943_v16 = vrot.slane %v6942_v47, 4  ;;  %v6947_v61 = vrot.slane %v6945_v36, 5  ;;  %v8107_v4 = vrot.slane %v7990_v59, 5  ;;  %s11672_s10 = sshra.s32 %s9954_s21, 4  ;;  %s11673_s10 = int_to_ptr.hbm [resolvable:$true] %s11672_s10 }
 0x50d   : > { %9225 = vmatmul.bf16.gmra.mxu2 %v11075_v15  ;;  %6510 = vst.msk [vmem:[#allocation2 + $0x1f8] sm:$0xf] %vm17828_vm4, %v6440_v44  ;;  %v6938_v12 = vsel %vm11842_vm2, %v6933_v60, %v6937_v49  ;;  %v8110_v20 = vrot.slane %v7991_v43, 5  ;;  %v7992_v8 = vld [vmem:[#allocation3 + $0x60] sm:$0xe]  ;;  %vm17840_vm4 = vmmov %vm17819_vm3  ;;  %s11678_s17 = scalar_lea.hbm %s17474_s8, 512  ;;  %p11679_p0 = scmp.lt.s32.totalorder %s11673_s10, %s17474_s8 }
 0x50e   : > { %v11521_v21 = vld [vmem:[#allocation2 + $0x19c] sm:$0xf]  ;;  %7011 = vst.msk [vmem:[#allocation2 + $0x260] sm:$0xf] %vm17829_vm13, %v6938_v12  ;;  %v6948_v9 = vsel %vm11842_vm2, %v6943_v16, %v6947_v61  ;;  %v8108_v56 = vsel %vm12010_vm6, %v10857_v57, %v8107_v4  ;;  %v8109_v19 = vrot.slane %v8107_v4, 4  ;;  %v10858_v40 = vrot.slane %v7992_v8, 9  ;;  %v7266_v52 = vpop.permute.xlu0 %7265  ;;  %vm17832_vm2 = vmmov %vm17821_vm1 }
 0x50f   : > { %v9186_v11 = vpop.f32.mrf.mxu2  ;;  %v9272_v48 = vpop.f32.mrf.mxu3  ;;  %7012 = vst.msk [vmem:[#allocation2 + $0x274] sm:$0xf] %vm17830_vm14, %v6948_v9  ;;  %v7993_v35 = vld [vmem:[#allocation3 + $0x64] sm:$0xf]  ;;  %v7994_v30 = vld [vmem:[#allocation3 + $0x68] sm:$0x1]  ;;  %vm17841_vm13 = vmmov %vm17821_vm1 }
 0x510   : > { %v16514_v5 = vadd.f32 %v9272_v48, %v9184_v22  ;;  %v11080_v29 = vld [vmem:[#allocation2 + $0x1ac] sm:$0xf0]  ;;  %v8111_v38 = vsel %vm12010_vm6, %v8109_v19, %v8110_v20  ;;  %8224 = vst.msk [vmem:[#allocation2 + $0xd8] sm:$0xf] %vm17831_vm11, %v8108_v56  ;;  %v8114_v23 = vrot.slane %v7993_v35, 5  ;;  %v16520_v62 = vpop.f32.mrf.mxu1  ;;  %v8117_v41 = vrot.slane %v7994_v30, 5  ;;  %vm17842_vm14 = vmmov %vm17819_vm3 }
 0x511   : > { %7339 = vst.msk [vmem:[#allocation2 + $0x1c0] sm:$0xf] %vm17832_vm2, %v7266_v52  ;;  %v6434_v14 = vpop.permute.xlu1 %6433  ;;  %v11078_v50 = vld [vmem:[#allocation2 + $0x198] sm:$0xf]  ;;  %v11523_v27 = vld [vmem:[#allocation2 + $0x1a8] sm:$0xf0]  ;;  %v11083_v18 = vor.u32 %v11521_v21, %v11080_v29  ;;  %v9187_v47 = vadd.f32 %v9186_v11, %v16111_v25  ;;  %v16546_v29 = vpop.f32.mrf.mxu0  ;;  %vm17843_vm11 = vmmov %vm17819_vm3 }
 0x512   : > { %6507 = vst.msk [vmem:[#allocation2 + $0x1bc] sm:$0xf] %vm17833_vm8, %v6434_v14  ;;  %v11079_v2 = vor.u32 %v11523_v27, %v11078_v50  ;;  %v8115_v49 = vsel %vm12010_vm6, %v10858_v40, %v8114_v23  ;;  %v8116_v53 = vrot.slane %v8114_v23, 4  ;;  %v7995_v28 = vld [vmem:[#allocation3 + $0x6c] sm:$0xe]  ;;  %vm17844_vm2 = vmmov %vm17821_vm1 }
 0x513   : > { %9403 = vmatmul.bf16.gmra.mxu0 %v11083_v18  ;;  %8225 = vst.msk [vmem:[#allocation2 + $0xec] sm:$0xf] %vm17819_vm3, %v8111_v38  ;;  %v7996_v24 = vld [vmem:[#allocation3 + $0x70] sm:$0xf]  ;;  %v7997_v3 = vld [vmem:[#allocation3 + $0x74] sm:$0x1]  ;;  %v7895_v32 = vpop.permute.xlu2 %7894  ;;  %vm17845_vm8 = vmmov %vm17821_vm1 }
 0x514   : > { %v11479_v34 = vld [vmem:[#allocation2 + $0x48] sm:$0xf0]  ;;  %v8118_v6 = vsel %vm12010_vm6, %v8116_v53, %v8117_v41  ;;  %8226 = vst.msk [vmem:[#allocation2 + $0x100] sm:$0xf] %vm17834_vm9, %v8115_v49  ;;  %v10859_v58 = vrot.slane %v7995_v28, 9  ;;  %v8121_v36 = vrot.slane %v7996_v24, 5  ;;  %vm17846_vm9 = vmmov %vm17819_vm3 }
 0x515   : > { %9314 = vmatmul.bf16.gmra.mxu3 %v11079_v2  ;;  %7966 = vst.msk [vmem:[#allocation2 + $0x1ec] sm:$0xf] %vm17821_vm1, %v7895_v32  ;;  %v8124_v15 = vrot.slane %v7997_v3, 5  ;;  %v7998_v31 = vld [vmem:[#allocation3 + $0x78] sm:$0xe] }
 0x516   : > { %8227 = vst.msk [vmem:[#allocation2 + $0x114] sm:$0xf] %vm17835_vm7, %v8118_v6  ;;  %v8122_v39 = vsel %vm12010_vm6, %v10859_v58, %v8121_v36  ;;  %v8123_v59 = vrot.slane %v8121_v36, 4  ;;  %v7999_v60 = vld [vmem:[#allocation3 + $0x7c] sm:$0xf]  ;;  %v10860_v43 = vrot.slane %v7998_v31, 9  ;;  %v7893_v4 = vpop.permute.xlu0 %7892  ;;  %vm17847_vm7 = vmmov %vm17819_vm3 }
 0x517   : > { %v9188_v44 = vpop.f32.mrf.mxu2  ;;  %v9275_v16 = vpop.f32.mrf.mxu3  ;;  %8228 = vst.msk [vmem:[#allocation2 + $0x128] sm:$0xf] %vm17836_vm15, %v8122_v39  ;;  %v8000_v61 = vld [vmem:[#allocation3 + $0x80] sm:$0x1]  ;;  %v10906_v22 = vld [vmem:[#allocation2 + $0x38] sm:$0xf]  ;;  %vm17848_vm15 = vmmov %vm17819_vm3 }
 0x518   : > { %v16535_v57 = vadd.f32 %v9275_v16, %v9187_v47  ;;  %v8125_v25 = vsel %vm12010_vm6, %v8123_v59, %v8124_v15  ;;  %v8128_v12 = vrot.slane %v7999_v60, 5  ;;  %v8001_v20 = vld [vmem:[#allocation3 + $0x84] sm:$0xe]  ;;  %7965 = vst.msk [vmem:[#allocation2 + $0x1d8] sm:$0xf] %vm17837_vm10, %v7893_v4  ;;  %v16540_v21 = vpop.f32.mrf.mxu1  ;;  %v10907_v19 = vor.u32 %v11479_v34, %v10906_v22  ;;  %vm17849_vm10 = vmmov %vm17821_vm1 }
 0x519   : > { %v7268_v8 = vpop.permute.xlu1 %7267  ;;  %v11525_v9 = vld [vmem:[#allocation2 + $0x1bc] sm:$0xf]  ;;  %v11092_v56 = vld [vmem:[#allocation2 + $0x1cc] sm:$0xf0]  ;;  %v8131_v35 = vrot.slane %v8000_v61, 5  ;;  %v10861_v52 = vrot.slane %v8001_v20, 9  ;;  %v9189_v27 = vadd.f32 %v9188_v44, %v16157_v54 }
 0x51a   : > { %7340 = vst.msk [vmem:[#allocation2 + $0x1d4] sm:$0xf] %vm17838_vm5, %v7268_v8  ;;  %v11095_v40 = vor.u32 %v11525_v9, %v11092_v56  ;;  %v8129_v11 = vsel %vm12010_vm6, %v10860_v43, %v8128_v12  ;;  %v8130_v48 = vrot.slane %v8128_v12, 4  ;;  %v8002_v30 = vld [vmem:[#allocation3 + $0x88] sm:$0xf]  ;;  %vm17850_vm5 = vmmov %vm17821_vm1 }
 0x51b   : > { %8229 = vst.msk [vmem:[#allocation2 + $0x13c] sm:$0xf] %vm17839_vm12, %v8125_v25  ;;  %v6444_v38 = vpop.permute.xlu2 %6443  ;;  %11333 = vmatmul.msk.bf16.gmra.mxu1 %vm17827_vm0, %v10907_v19  ;;  %v8003_v14 = vld [vmem:[#allocation3 + $0x8c] sm:$0x1]  ;;  %v8135_v50 = vrot.slane %v8002_v30, 5  ;;  %v16573_v19 = vpop.f32.mrf.mxu0  ;;  %vm17851_vm12 = vmmov %vm17819_vm3 }
 0x51c   : > { %v8132_v23 = vsel %vm12010_vm6, %v8130_v48, %v8131_v35  ;;  %8230 = vst.msk [vmem:[#allocation2 + $0x150] sm:$0xf] %vm17840_vm4, %v8129_v11  ;;  %v11526_v18 = vld [vmem:[#allocation2 + $0x1c4] sm:$0xf]  ;;  %v8138_v2 = vrot.slane %v8003_v14, 5  ;;  %vm17852_vm4 = vmmov %vm17819_vm3 }
 0x51d   : > { %9230 = vmatmul.bf16.gmra.mxu2 %v11095_v40  ;;  %6512 = vst.msk [vmem:[#allocation2 + $0x220] sm:$0xf] %vm17841_vm13, %v6444_v38  ;;  %v8004_v49 = vld [vmem:[#allocation3 + $0x90] sm:$0xe]  ;;  %v11098_v28 = vld [vmem:[#allocation2 + $0x1c0] sm:$0xf]  ;;  %v8136_v24 = vsel %vm12010_vm6, %v10861_v52, %v8135_v50  ;;  %vm17853_vm13 = vmmov %vm17821_vm1 }
 0x51e   : > { %8231 = vst.msk [vmem:[#allocation2 + $0x164] sm:$0xf] %vm17842_vm14, %v8132_v23  ;;  %v8137_v3 = vrot.slane %v8135_v50, 4  ;;  %v8005_v32 = vld [vmem:[#allocation3 + $0x94] sm:$0xf]  ;;  %v10862_v6 = vrot.slane %v8004_v49, 9  ;;  %v7270_v36 = vpop.permute.xlu0 %7269  ;;  %vm17854_vm14 = vmmov %vm17819_vm3 }
 0x51f   : > { %v9191_v53 = vpop.f32.mrf.mxu2  ;;  %v9277_v41 = vpop.f32.mrf.mxu3  ;;  %v8006_v34 = vld [vmem:[#allocation3 + $0x98] sm:$0x1]  ;;  %8232 = vst.msk [vmem:[#allocation2 + $0x178] sm:$0xf] %vm17843_vm11, %v8136_v24  ;;  %v8142_v54 = vrot.slane %v8005_v32, 5  ;;  %vm17855_vm11 = vmmov %vm17819_vm3 }
 0x520   : > { %v16557_v58 = vadd.f32 %v9277_v41, %v9189_v27  ;;  %v11100_v15 = vld [vmem:[#allocation2 + $0x1d4] sm:$0xf0]  ;;  %7341 = vst.msk [vmem:[#allocation2 + $0x1e8] sm:$0xf] %vm17844_vm2, %v7270_v36  ;;  %v16561_v47 = vpop.f32.mrf.mxu1  ;;  %v8139_v60 = vsel %vm12010_vm6, %v8137_v3, %v8138_v2  ;;  %v8007_v43 = vld [vmem:[#allocation3 + $0x9c] sm:$0xe]  ;;  %v9192_v40 = vadd.f32 %v9191_v53, %v16202_v45  ;;  %vm17856_vm2 = vmmov %vm17821_vm1 }
 0x521   : > { %v6438_v31 = vpop.permute.xlu1 %6437  ;;  %v11528_v39 = vld [vmem:[#allocation2 + $0x1d0] sm:$0xf0]  ;;  %v11103_v59 = vor.u32 %v11526_v18, %v11100_v15  ;;  %v8143_v16 = vsel %vm12010_vm6, %v10862_v6, %v8142_v54  ;;  %v8144_v61 = vrot.slane %v8142_v54, 4  ;;  %v8145_v4 = vrot.slane %v8006_v34, 5  ;;  %8233 = vst.msk [vmem:[#allocation2 + $0x18c] sm:$0xf] %vm17819_vm3, %v8139_v60 }
 0x522   : > { %6509 = vst.msk [vmem:[#allocation2 + $0x1e4] sm:$0xf] %vm17845_vm8, %v6438_v31  ;;  %v11099_v44 = vor.u32 %v11528_v39, %v11098_v28  ;;  %v8008_v22 = vld [vmem:[#allocation3 + $0xa0] sm:$0xf]  ;;  %v10863_v25 = vrot.slane %v8007_v43, 9  ;;  %vm17857_vm8 = vmmov %vm17821_vm1 }
 0x523   : > { %9408 = vmatmul.bf16.gmra.mxu0 %v11103_v59  ;;  %v7899_v12 = vpop.permute.xlu2 %7898  ;;  %v8146_v20 = vsel %vm12010_vm6, %v8144_v61, %v8145_v4  ;;  %8234 = vst.msk [vmem:[#allocation2 + $0x1a0] sm:$0xf] %vm17846_vm9, %v8143_v16  ;;  %v8009_v8 = vld [vmem:[#allocation3 + $0xa4] sm:$0x1]  ;;  %v11484_v9 = vld [vmem:[#allocation2 + $0x70] sm:$0xf0]  ;;  %vm17858_vm9 = vmmov %vm17819_vm3 }
 0x524   : > { %7968 = vst.msk [vmem:[#allocation2 + $0x214] sm:$0xf] %vm17821_vm1, %v7899_v12  ;;  %v8149_v56 = vrot.slane %v8008_v22, 5  ;;  %v10926_v11 = vld [vmem:[#allocation2 + $0x60] sm:$0xf]  ;;  %v8152_v14 = vrot.slane %v8009_v8, 5 }
 0x525   : > { %9319 = vmatmul.bf16.gmra.mxu3 %v11099_v44  ;;  %8235 = vst.msk [vmem:[#allocation2 + $0x1b4] sm:$0xf] %vm17847_vm7, %v8146_v20  ;;  %v8010_v48 = vld [vmem:[#allocation3 + $0xa8] sm:$0xe]  ;;  %v8011_v35 = vld [vmem:[#allocation3 + $0xac] sm:$0xf]  ;;  %v10927_v24 = vor.u32 %v11484_v9, %v10926_v11  ;;  %vm17859_vm7 = vmmov %vm17819_vm3 }
 0x526   : > { %v8150_v38 = vsel %vm12010_vm6, %v10863_v25, %v8149_v56  ;;  %v8151_v23 = vrot.slane %v8149_v56, 4  ;;  %v8012_v50 = vld [vmem:[#allocation3 + $0xb0] sm:$0x1]  ;;  %v10864_v27 = vrot.slane %v8010_v48, 9  ;;  %v7897_v2 = vpop.permute.xlu0 %7896  ;;  %v11112_v49 = vld [vmem:[#allocation2 + $0x1f4] sm:$0xf0] }
 0x527   : > { %v9193_v30 = vpop.f32.mrf.mxu2  ;;  %v9280_v52 = vpop.f32.mrf.mxu3  ;;  %8236 = vst.msk [vmem:[#allocation2 + $0x1c8] sm:$0xf] %vm17848_vm15, %v8150_v38  ;;  %v8156_v45 = vrot.slane %v8011_v35, 5  ;;  %v8013_v32 = vld [vmem:[#allocation3 + $0xb4] sm:$0xe]  ;;  %v8159_v15 = vrot.slane %v8012_v50, 5  ;;  %vm17860_vm15 = vmmov %vm17821_vm1 }
 0x528   : > { %v16579_v18 = vadd.f32 %v9280_v52, %v9192_v40  ;;  %7967 = vst.msk [vmem:[#allocation2 + $0x200] sm:$0xf] %vm17849_vm10, %v7897_v2  ;;  %v16583_v41 = vpop.f32.mrf.mxu1  ;;  %v8153_v3 = vsel %vm12010_vm6, %v8151_v23, %v8152_v14  ;;  %v8014_v54 = vld [vmem:[#allocation3 + $0xb8] sm:$0xf]  ;;  %v10865_v31 = vrot.slane %v8013_v32, 9  ;;  %v9194_v44 = vadd.f32 %v9193_v30, %v16239_v10  ;;  %v16600_v40 = vpop.f32.mrf.mxu0  ;;  %vm17862_vm10 = vmmov %vm17827_vm0 }
 0x529   : > { %v7272_v53 = vpop.permute.xlu1 %7271  ;;  %v11530_v28 = vld [vmem:[#allocation2 + $0x1e4] sm:$0xf]  ;;  %v8157_v6 = vsel %vm12010_vm6, %v10864_v27, %v8156_v45  ;;  %v8158_v36 = vrot.slane %v8156_v45, 4  ;;  %8237 = vst.msk [vmem:[#allocation2 + $0x1dc] sm:$0xf] %vm17851_vm12, %v8153_v3  ;;  %v8163_v43 = vrot.slane %v8014_v54, 5  ;;  %vm17864_vm12 = vmmov %vm17821_vm1 }
 0x52a   : > { %7342 = vst.msk [vmem:[#allocation2 + $0x1fc] sm:$0xf] %vm17850_vm5, %v7272_v53  ;;  %v11115_v34 = vor.u32 %v11530_v28, %v11112_v49  ;;  %v8015_v60 = vld [vmem:[#allocation3 + $0xbc] sm:$0x1]  ;;  %v11531_v16 = vld [vmem:[#allocation2 + $0x1ec] sm:$0xf]  ;;  %vm17863_vm5 = vmmov %vm17821_vm1 }
 0x52b   : > { %v6448_v39 = vpop.permute.xlu2 %6447  ;;  %11334 = vmatmul.msk.bf16.gmra.mxu1 %vm17827_vm0, %v10927_v24  ;;  %v8160_v59 = vsel %vm12010_vm6, %v8158_v36, %v8159_v15  ;;  %8238 = vst.msk [vmem:[#allocation2 + $0x1f0] sm:$0xf] %vm17852_vm4, %v8157_v6  ;;  %v8016_v61 = vld [vmem:[#allocation3 + $0xc0] sm:$0xe]  ;;  %v8017_v4 = vld [vmem:[#allocation3 + $0xc4] sm:$0xf]  ;;  %v8164_v12 = vsel %vm12010_vm6, %v10865_v31, %v8163_v43  ;;  %vm17865_vm0 = vmmov %vm17821_vm1 }
 0x52c   : > { %6514 = vst.msk [vmem:[#allocation2 + $0x248] sm:$0xf] %vm17853_vm13, %v6448_v39  ;;  %v8165_v20 = vrot.slane %v8163_v43, 4  ;;  %v8166_v8 = vrot.slane %v8015_v60, 5  ;;  %v8018_v9 = vld [vmem:[#allocation3 + $0xc8] sm:$0x1]  ;;  %vm17866_vm4 = vmmov %vm17865_vm0 }
 0x52d   : > { %9235 = vmatmul.bf16.gmra.mxu2 %v11115_v34  ;;  %8239 = vst.msk [vmem:[#allocation2 + $0x204] sm:$0xf] %vm17854_vm14, %v8160_v59  ;;  %v10866_v56 = vrot.slane %v8016_v61, 9  ;;  %v8170_v35 = vrot.slane %v8017_v4, 5  ;;  %v11118_v38 = vld [vmem:[#allocation2 + $0x1e8] sm:$0xf]  ;;  %vm17867_vm13 = vmmov %vm17865_vm0 }
 0x52e   : > { %v7274_v48 = vpop.permute.xlu0 %7273  ;;  %8240 = vst.msk [vmem:[#allocation2 + $0x218] sm:$0xf] %vm17855_vm11, %v8164_v12  ;;  %v8167_v50 = vsel %vm12010_vm6, %v8165_v20, %v8166_v8  ;;  %v8173_v45 = vrot.slane %v8018_v9, 5  ;;  %v11489_v34 = vld [vmem:[#allocation2 + $0x98] sm:$0xf0]  ;;  %vm17868_vm14 = vmmov %vm17865_vm0 }
 0x52f   : > { %v9196_v22 = vpop.f32.mrf.mxu2  ;;  %v9282_v25 = vpop.f32.mrf.mxu3  ;;  %v11120_v10 = vld [vmem:[#allocation2 + $0x1fc] sm:$0xf0]  ;;  %7343 = vst.msk [vmem:[#allocation2 + $0x210] sm:$0xf] %vm17856_vm2, %v7274_v48  ;;  %v8171_v2 = vsel %vm12010_vm6, %v10866_v56, %v8170_v35  ;;  %v8172_v49 = vrot.slane %v8170_v35, 4  ;;  %vm17869_vm11 = vmmov %vm17862_vm10 }
 0x530   : > { %v16602_v11 = vadd.f32 %v9282_v25, %v9194_v44  ;;  %v16606_v52 = vpop.f32.mrf.mxu1  ;;  %v11123_v14 = vor.u32 %v11531_v16, %v11120_v10  ;;  %8241 = vst.msk [vmem:[#allocation2 + $0x22c] sm:$0xf] %vm17819_vm3, %v8167_v50  ;;  %v9197_v24 = vadd.f32 %v9196_v22, %v16280_v63  ;;  %v10946_v15 = vld [vmem:[#allocation2 + $0x88] sm:$0xf]  ;;  %v11132_v39 = vld [vmem:[#allocation2 + $0x21c] sm:$0xf0]  ;;  %v16625_v59 = vpop.f32.mrf.mxu0  ;;  %vm17870_vm2 = vmmov %vm17865_vm0 }
 0x531   : > { %v6442_v30 = vpop.permute.xlu1 %6441  ;;  %v11533_v23 = vld [vmem:[#allocation2 + $0x1f8] sm:$0xf0]  ;;  %v8174_v28 = vsel %vm12010_vm6, %v8172_v49, %v8173_v45  ;;  %8242 = vst.msk [vmem:[#allocation2 + $0x240] sm:$0xf] %vm17858_vm9, %v8171_v2  ;;  %vm17861_vm6 = vmmov %vm17821_vm1  ;;  %v10947_v60 = vor.u32 %v11489_v34, %v10946_v15  ;;  %v11536_v25 = vld [vmem:[#allocation2 + $0x214] sm:$0xf] }
 0x532   : > { %6511 = vst.msk [vmem:[#allocation2 + $0x20c] sm:$0xf] %vm17857_vm8, %v6442_v30  ;;  %v11119_v27 = vor.u32 %v11533_v23, %v11118_v38  ;;  %v11494_v23 = vld [vmem:[#allocation2 + $0xc0] sm:$0xf0]  ;;  %vm17871_vm8 = vmmov %vm17865_vm0 }
 0x533   : > { %9413 = vmatmul.bf16.gmra.mxu0 %v11123_v14  ;;  %v7903_v53 = vpop.permute.xlu2 %7902  ;;  %8243 = vst.msk [vmem:[#allocation2 + $0x254] sm:$0xf] %vm17859_vm7, %v8174_v28  ;;  %vm17872_vm3 = vmmov %vm17865_vm0 }
 0x534   : > { %7970 = vst.msk [vmem:[#allocation2 + $0x23c] sm:$0xf] %vm17821_vm1, %v7903_v53  ;;  %v11152_v53 = vld [vmem:[#allocation2 + $0x244] sm:$0xf0]  ;;  %vm17873_vm9 = vmmov %vm17865_vm0 }
 0x535   : > { %9324 = vmatmul.bf16.gmra.mxu3 %v11119_v27  ;;  %v10966_v27 = vld [vmem:[#allocation2 + $0xb0] sm:$0xf]  ;;  %vm17874_vm1 = vmmov %vm17862_vm10 }
 0x536   : > { %v7901_v36 = vpop.permute.xlu0 %7900  ;;  %v11138_v9 = vld [vmem:[#allocation2 + $0x210] sm:$0xf]  ;;  %vm17875_vm7 = vmmov %vm17874_vm1 }
 0x537   : > { %v9198_v3 = vpop.f32.mrf.mxu2  ;;  %v9285_v32 = vpop.f32.mrf.mxu3  ;;  %7969 = vst.msk [vmem:[#allocation2 + $0x228] sm:$0xf] %vm17860_vm15, %v7901_v36  ;;  %vm17876_vm15 = vmmov %vm17874_vm1 }
 0x538   : > { %v16620_v6 = vadd.f32 %v9285_v32, %v9197_v24  ;;  %v16623_v17 = vpop.f32.mrf.mxu1  ;;  %v9199_v44 = vadd.f32 %v9198_v3, %v16313_v26  ;;  %v16637_v26 = vpop.f32.mrf.mxu0  ;;  %v10967_v24 = vor.u32 %v11494_v23, %v10966_v27 }
 0x539   : > { %v7276_v54 = vpop.permute.xlu1 %7275  ;;  %v11535_v31 = vld [vmem:[#allocation2 + $0x20c] sm:$0xf] }
 0x53a   : > { %7344 = vst.msk [vmem:[#allocation2 + $0x224] sm:$0xf] %vm17861_vm6, %v7276_v54  ;;  %v11135_v63 = vor.u32 %v11535_v31, %v11132_v39  ;;  %vm17878_vm6 = vmmov %vm17874_vm1 }
 0x53b   : > { %v6452_v43 = vpop.permute.xlu2 %6451  ;;  %11335 = vmatmul.msk.bf16.gmra.mxu1 %vm17862_vm10, %v10947_v60  ;;  %v11541_v31 = vld [vmem:[#allocation2 + $0x23c] sm:$0xf]  ;;  %vm17881_vm10 = vmmov %vm17874_vm1 }
 0x53c   : > { %6516 = vst.msk [vmem:[#allocation2 + $0x270] sm:$0xf] %vm17863_vm5, %v6452_v43  ;;  %vm17883_vm5 = vmmov %vm17874_vm1 }
 0x53d   : > { %9240 = vmatmul.bf16.gmra.mxu2 %v11135_v63 }
 0x53e   : > { %v7278_v22 = vpop.permute.xlu0 %7277  ;;  %v11140_v12 = vld [vmem:[#allocation2 + $0x224] sm:$0xf0] }
 0x53f   : > { %v9201_v16 = vpop.f32.mrf.mxu2  ;;  %v9287_v61 = vpop.f32.mrf.mxu3  ;;  %7345 = vst.msk [vmem:[#allocation2 + $0x238] sm:$0xf] %vm17864_vm12, %v7278_v22  ;;  %v11143_v48 = vor.u32 %v11536_v25, %v11140_v12  ;;  %v11499_v12 = vld [vmem:[#allocation2 + $0xe8] sm:$0xf0]  ;;  %vm17886_vm12 = vmmov %vm17874_vm1 }
 0x540   : > { %v16631_v4 = vadd.f32 %v9287_v61, %v9199_v44  ;;  %v16634_v8 = vpop.f32.mrf.mxu1  ;;  %v9202_v35 = vadd.f32 %v9201_v16, %v16359_v33  ;;  %v16648_v33 = vpop.f32.mrf.mxu0 }
 0x541   : > { %v6446_v20 = vpop.permute.xlu1 %6445  ;;  %v11538_v56 = vld [vmem:[#allocation2 + $0x220] sm:$0xf0] }
 0x542   : > { %6513 = vst.msk [vmem:[#allocation2 + $0x234] sm:$0xf] %vm17865_vm0, %v6446_v20  ;;  %v11139_v10 = vor.u32 %v11538_v56, %v11138_v9  ;;  %v10986_v56 = vld [vmem:[#allocation2 + $0xd8] sm:$0xf]  ;;  %vm17888_vm0 = vmmov %vm17874_vm1 }
 0x543   : > { %9418 = vmatmul.bf16.gmra.mxu0 %v11143_v48 }
 0x545   : > { %9329 = vmatmul.bf16.gmra.mxu3 %v11139_v10 }
 0x546   : > { %v7905_v50 = vpop.permute.xlu0 %7904  ;;  %v11158_v43 = vld [vmem:[#allocation2 + $0x238] sm:$0xf] }
 0x547   : > { %v9203_v30 = vpop.f32.mrf.mxu2  ;;  %v9290_v38 = vpop.f32.mrf.mxu3  ;;  %7971 = vst.msk [vmem:[#allocation2 + $0x250] sm:$0xf] %vm17866_vm4, %v7905_v50  ;;  %vm17891_vm4 = vmmov %vm17888_vm0 }
 0x548   : > { %v16640_v14 = vadd.f32 %v9290_v38, %v9202_v35  ;;  %v16643_v49 = vpop.f32.mrf.mxu1  ;;  %v9204_v32 = vadd.f32 %v9203_v30, %v16387_v51  ;;  %v16658_v20 = vpop.f32.mrf.mxu0  ;;  %v11172_v38 = vld [vmem:[#allocation2 + $0x26c] sm:$0xf0] }
 0x549   : > { %v7280_v2 = vpop.permute.xlu1 %7279  ;;  %v11540_v45 = vld [vmem:[#allocation2 + $0x234] sm:$0xf] }
 0x54a   : > { %7346 = vst.msk [vmem:[#allocation2 + $0x24c] sm:$0xf] %vm17867_vm13, %v7280_v2  ;;  %v11155_v28 = vor.u32 %v11540_v45, %v11152_v53  ;;  %v7907_v3 = vpop.permute.xlu2 %7906  ;;  %vm17893_vm13 = vmmov %vm17888_vm0 }
 0x54b   : > { %7972 = vst.msk [vmem:[#allocation2 + $0x264] sm:$0xf] %vm17868_vm14, %v7907_v3  ;;  %11336 = vmatmul.msk.bf16.gmra.mxu1 %vm17869_vm11, %v10967_v24  ;;  %vm17895_vm14 = vmmov %vm17888_vm0 }
 0x54c   : > { %vm17897_vm11 = vmmov %vm17888_vm0 }
 0x54d   : > { %9245 = vmatmul.bf16.gmra.mxu2 %v11155_v28 }
 0x54e   : > { %v7282_v54 = vpop.permute.xlu0 %7281  ;;  %v11160_v39 = vld [vmem:[#allocation2 + $0x24c] sm:$0xf0] }
 0x54f   : > { %v9206_v34 = vpop.f32.mrf.mxu2  ;;  %v9292_v36 = vpop.f32.mrf.mxu3  ;;  %7347 = vst.msk [vmem:[#allocation2 + $0x260] sm:$0xf] %vm17870_vm2, %v7282_v54  ;;  %v11163_v16 = vor.u32 %v11541_v31, %v11160_v39  ;;  %vm17898_vm2 = vmmov %vm17888_vm0 }
 0x550   : > { %v16651_v15 = vadd.f32 %v9292_v36, %v9204_v32  ;;  %v16654_v60 = vpop.f32.mrf.mxu1  ;;  %v9207_v51 = vadd.f32 %v9206_v34, %v16410_v13  ;;  %v10987_v13 = vor.u32 %v11499_v12, %v10986_v56  ;;  %v16672_v54 = vpop.f32.mrf.mxu0 }
 0x551   : > { %v6450_v63 = vpop.permute.xlu1 %6449  ;;  %v11543_v44 = vld [vmem:[#allocation2 + $0x248] sm:$0xf0] }
 0x552   : > { %6515 = vst.msk [vmem:[#allocation2 + $0x25c] sm:$0xf] %vm17871_vm8, %v6450_v63  ;;  %v11159_v61 = vor.u32 %v11543_v44, %v11158_v43  ;;  %v11546_v27 = vld [vmem:[#allocation2 + $0x264] sm:$0xf]  ;;  %v11504_v63 = vld [vmem:[#allocation2 + $0x110] sm:$0xf0]  ;;  %vm17899_vm8 = vmmov %vm17888_vm0 }
 0x553   : > { %9423 = vmatmul.bf16.gmra.mxu0 %v11163_v16  ;;  %v11006_v16 = vld [vmem:[#allocation2 + $0x100] sm:$0xf] }
 0x555   : > { %9334 = vmatmul.bf16.gmra.mxu3 %v11159_v61  ;;  %v11007_v61 = vor.u32 %v11504_v63, %v11006_v16 }
 0x556   : > { %v7909_v48 = vpop.permute.xlu0 %7908  ;;  %v11178_v3 = vld [vmem:[#allocation2 + $0x260] sm:$0xf] }
 0x557   : > { %v9208_v22 = vpop.f32.mrf.mxu2  ;;  %v9295_v25 = vpop.f32.mrf.mxu3  ;;  %7973 = vst.msk [vmem:[#allocation2 + $0x278] sm:$0xf] %vm17872_vm3, %v7909_v48  ;;  %vm17900_vm3 = vmmov %vm17888_vm0 }
 0x558   : > { %v16660_v9 = vadd.f32 %v9295_v25, %v9207_v51  ;;  %v16662_v35 = vpop.f32.mrf.mxu1  ;;  %v9209_v50 = vadd.f32 %v9208_v22, %v16430_v55  ;;  %v9374_v16 = vpop.f32.mrf.mxu0 }
 0x559   : > { %v7284_v10 = vpop.permute.xlu1 %7283  ;;  %v11545_v30 = vld [vmem:[#allocation2 + $0x25c] sm:$0xf] }
 0x55a   : > { %7348 = vst.msk [vmem:[#allocation2 + $0x274] sm:$0xf] %vm17873_vm9, %v7284_v10  ;;  %v11175_v23 = vor.u32 %v11545_v30, %v11172_v38  ;;  %v11509_v30 = vld [vmem:[#allocation2 + $0x138] sm:$0xf0]  ;;  %vm17901_vm9 = vmmov %vm17888_vm0 }
 0x55b   : > { %11337 = vmatmul.msk.bf16.gmra.mxu1 %vm17874_vm1, %v10987_v13  ;;  %v11026_v13 = vld [vmem:[#allocation2 + $0x128] sm:$0xf]  ;;  %vm17902_vm1 = vmmov %vm17888_vm0 }
 0x55d   : > { %9250 = vmatmul.bf16.gmra.mxu2 %v11175_v23 }
 0x55e   : > { %v11180_v28 = vld [vmem:[#allocation2 + $0x274] sm:$0xf0] }
 0x55f   : > { %v9211_v2 = vpop.f32.mrf.mxu2  ;;  %v9297_v45 = vpop.f32.mrf.mxu3  ;;  %v11183_v34 = vor.u32 %v11546_v27, %v11180_v28 }
 0x560   : > { %v16668_v53 = vadd.f32 %v9297_v45, %v9209_v50  ;;  %v16670_v24 = vpop.f32.mrf.mxu1  ;;  %v9212_v31 = vadd.f32 %v9211_v2, %v16454_v37  ;;  %v11027_v50 = vor.u32 %v11509_v30, %v11026_v13  ;;  %v11519_v30 = vld [vmem:[#allocation2 + $0x188] sm:$0xf0] }
 0x561   : > { %v11548_v32 = vld [vmem:[#allocation2 + $0x270] sm:$0xf0] }
 0x562   : > { %v11179_v36 = vor.u32 %v11548_v32, %v11178_v3  ;;  %v11514_v32 = vld [vmem:[#allocation2 + $0x160] sm:$0xf0] }
 0x563   : > { %9428 = vmatmul.bf16.gmra.mxu0 %v11183_v34 }
 0x565   : > { %9339 = vmatmul.bf16.gmra.mxu3 %v11179_v36  ;;  %v9355_v36 = vadd.f32 %v16546_v29, %v16449_v46  ;;  %v9376_v29 = vpop.f32.mrf.mxu0 }
 0x567   : > { %v9213_v39 = vpop.f32.mrf.mxu2  ;;  %v9300_v55 = vpop.f32.mrf.mxu3 }
 0x568   : > { %v16675_v43 = vadd.f32 %v9300_v55, %v9212_v31  ;;  %v16677_v44 = vpop.f32.mrf.mxu1  ;;  %v9214_v51 = vadd.f32 %v9213_v39, %v16475_v42  ;;  %v11046_v55 = vld [vmem:[#allocation2 + $0x150] sm:$0xf] }
 0x56b   : > { %11338 = vmatmul.msk.bf16.gmra.mxu1 %vm17875_vm7, %v11007_v61  ;;  %vm17903_vm7 = vmmov %vm17888_vm0 }
 0x56f   : > { %v9216_v22 = vpop.f32.mrf.mxu2  ;;  %v9302_v25 = vpop.f32.mrf.mxu3 }
 0x570   : > { %v16681_v12 = vadd.f32 %v9302_v25, %v9214_v51  ;;  %v16683_v56 = vpop.f32.mrf.mxu1  ;;  %v9217_v37 = vadd.f32 %v9216_v22, %v16495_v1  ;;  %v9357_v22 = vadd.f32 %v16573_v19, %v16471_v7  ;;  %v9379_v7 = vpop.f32.mrf.mxu0  ;;  %v9362_v19 = vadd.f32 %v16625_v59, %v16514_v5 }
 0x577   : > { %v9218_v48 = vpop.f32.mrf.mxu2 }
 0x578   : > { %v9305_v10 = vpop.f32.mrf.mxu3  ;;  %v16688_v23 = vpop.f32.mrf.mxu1  ;;  %v9219_v42 = vadd.f32 %v9218_v48, %v16520_v62  ;;  %v11047_v62 = vor.u32 %v11514_v32, %v11046_v55  ;;  %v9365_v32 = vadd.f32 %v16637_v26, %v16535_v57  ;;  %v9367_v55 = vadd.f32 %v16648_v33, %v16557_v58  ;;  %v11106_v26 = vld [vmem:[#allocation2 + $0x1c8] sm:$0xf] }
 0x579   : > { %v16686_v38 = vadd.f32 %v9305_v10, %v9217_v37 }
 0x57b   : > { %11339 = vmatmul.msk.bf16.gmra.mxu1 %vm17876_vm15, %v11027_v50  ;;  %vm17904_vm15 = vmmov %vm17888_vm0 }
 0x580   : > { %v9221_v27 = vpop.f32.mrf.mxu2  ;;  %v9307_v2 = vpop.f32.mrf.mxu3 }
 0x581   : > { %v16692_v45 = vadd.f32 %v9307_v2, %v9219_v42  ;;  %v16694_v28 = vpop.f32.mrf.mxu1  ;;  %v9222_v1 = vadd.f32 %v9221_v27, %v16540_v21  ;;  %v11066_v42 = vld [vmem:[#allocation2 + $0x178] sm:$0xf] }
 0x582   : > { %v11067_v2 = vor.u32 %v11519_v30, %v11066_v42 }
 0x588   : > { %v9310_v3 = vpop.f32.mrf.mxu3  ;;  %v9223_v31 = vpop.f32.mrf.mxu2 }
 0x589   : > { %v16697_v34 = vadd.f32 %v9310_v3, %v9222_v1  ;;  %v9443_v39 = vpop.f32.mrf.mxu1  ;;  %v9224_v61 = vadd.f32 %v9223_v31, %v16561_v47  ;;  %v9360_v47 = vadd.f32 %v16600_v40, %v16492_v0  ;;  %v11524_v3 = vld [vmem:[#allocation2 + $0x1b0] sm:$0xf0]  ;;  %v11086_v0 = vld [vmem:[#allocation2 + $0x1a0] sm:$0xf]  ;;  %v9381_v40 = vpop.f32.mrf.mxu0 }
 0x58a   : > { %v16701_v63 = vadd.f32 %v9443_v39, %v9355_v36  ;;  %v11087_v39 = vor.u32 %v11524_v3, %v11086_v0 }
 0x58b   : > { %11340 = vmatmul.msk.bf16.gmra.mxu1 %vm17878_vm6, %v11047_v62  ;;  %vm17905_vm6 = vmmov %vm17888_vm0 }
 0x58c   : > { %17877 = vst [vmem:[#allocation16_spill] sm:$0xff] %v16701_v63 }
 0x590   : > { %v9312_v51 = vpop.f32.mrf.mxu3  ;;  %v9226_v46 = vpop.f32.mrf.mxu2 }
 0x591   : > { %v16705_v21 = vadd.f32 %v9312_v51, %v9224_v61  ;;  %v9445_v25 = vpop.f32.mrf.mxu1  ;;  %v9227_v48 = vadd.f32 %v9226_v46, %v16583_v41  ;;  %v9384_v59 = vpop.f32.mrf.mxu0  ;;  %v11529_v61 = vld [vmem:[#allocation2 + $0x1d8] sm:$0xf0]  ;;  %v9370_v51 = vadd.f32 %v16658_v20, %v16579_v18  ;;  %v11126_v18 = vld [vmem:[#allocation2 + $0x1f0] sm:$0xf] }
 0x592   : > { %v16709_v37 = vadd.f32 %v9445_v25, %v9357_v22  ;;  %v11107_v25 = vor.u32 %v11529_v61, %v11106_v26  ;;  %v9385_v61 = vadd.f32 %v9384_v59, %v16660_v9 }
 0x594   : > { %17879 = vst [vmem:[#allocation10_spill] sm:$0xff] %v16709_v37 }
 0x598   : > { %v9315_v10 = vpop.f32.mrf.mxu3 }
 0x599   : > { %v16712_v13 = vadd.f32 %v9315_v10, %v9227_v48  ;;  %v9448_v50 = vpop.f32.mrf.mxu1  ;;  %v9386_v46 = vpop.f32.mrf.mxu0  ;;  %v9372_v48 = vadd.f32 %v16672_v54, %v16602_v11  ;;  %v11534_v10 = vld [vmem:[#allocation2 + $0x200] sm:$0xf0]  ;;  %v11539_v11 = vld [vmem:[#allocation2 + $0x228] sm:$0xf0]  ;;  %v9380_v54 = vadd.f32 %v9379_v7, %v16640_v14 }
 0x59a   : > { %v16716_v27 = vadd.f32 %v9448_v50, %v9360_v47  ;;  %v9375_v47 = vadd.f32 %v9374_v16, %v16620_v6  ;;  %v11127_v42 = vor.u32 %v11534_v10, %v11126_v18 }
 0x59b   : > { %11341 = vmatmul.msk.bf16.gmra.mxu1 %vm17881_vm10, %v11067_v2  ;;  %v9377_v2 = vadd.f32 %v9376_v29, %v16631_v4  ;;  %v11544_v29 = vld [vmem:[#allocation2 + $0x250] sm:$0xf0]  ;;  %vm17906_vm10 = vmmov %vm17888_vm0 }
 0x59c   : > { %17880 = vst [vmem:[#allocation19_spill] sm:$0xff] %v16716_v27 }
 0x5a1   : > { %v9450_v1 = vpop.f32.mrf.mxu1  ;;  %v9389_v30 = vpop.f32.mrf.mxu0 }
 0x5a2   : > { %v16721_v41 = vadd.f32 %v9450_v1, %v9362_v19  ;;  %v9390_v10 = vadd.f32 %v9389_v30, %v16675_v43 }
 0x5a9   : > { %v9453_v36 = vpop.f32.mrf.mxu1  ;;  %v9391_v1 = vpop.f32.mrf.mxu0 }
 0x5aa   : > { %v16725_v31 = vadd.f32 %v9453_v36, %v9365_v32  ;;  %v11146_v36 = vld [vmem:[#allocation2 + $0x218] sm:$0xf]  ;;  %v9392_v18 = vadd.f32 %v9391_v1, %v16681_v12 }
 0x5ab   : > { %11342 = vmatmul.msk.bf16.gmra.mxu1 %vm17883_vm5, %v11087_v39  ;;  %v11147_v6 = vor.u32 %v11539_v11, %v11146_v36  ;;  %v9382_v39 = vadd.f32 %v9381_v40, %v16651_v15  ;;  %v11186_v15 = vld [vmem:[#allocation2 + $0x268] sm:$0xf]  ;;  %v11549_v40 = vld [vmem:[#allocation2 + $0x278] sm:$0xf0]  ;;  %v16776_v36 = vpop.f32.mrf.mxu2  ;;  %vm17907_vm5 = vmmov %vm17888_vm0 }
 0x5ac   : > { %17882 = vst [vmem:[#allocation21_spill] sm:$0xff] %v16725_v31 }
 0x5b1   : > { %v9455_v62 = vpop.f32.mrf.mxu1  ;;  %v9394_v16 = vpop.f32.mrf.mxu0 }
 0x5b2   : > { %v16730_v5 = vadd.f32 %v9455_v62, %v9367_v55 }
 0x5b4   : > { %17884 = vst [vmem:[#allocation23_spill] sm:$0xff] %v16730_v5 }
 0x5b9   : > { %v9458_v57 = vpop.f32.mrf.mxu1  ;;  %v9396_v4 = vpop.f32.mrf.mxu0 }
 0x5ba   : > { %v16734_v22 = vadd.f32 %v9458_v57, %v9370_v51  ;;  %v11166_v57 = vld [vmem:[#allocation2 + $0x240] sm:$0xf]  ;;  %v9397_v43 = vadd.f32 %v9396_v4, %v16692_v45 }
 0x5bb   : > { %11343 = vmatmul.msk.bf16.gmra.mxu1 %vm17886_vm12, %v11107_v25  ;;  %v11167_v7 = vor.u32 %v11544_v29, %v11166_v57  ;;  %v9387_v25 = vadd.f32 %v9386_v46, %v16668_v53  ;;  %vm17908_vm12 = vmmov %vm17888_vm0 }
 0x5bc   : > { %17885 = vst [vmem:[#allocation8_spill] sm:$0xff] %v16734_v22 }
 0x5c1   : > { %v9460_v58 = vpop.f32.mrf.mxu1  ;;  %v9399_v26 = vpop.f32.mrf.mxu0 }
 0x5c2   : > { %v16739_v33 = vadd.f32 %v9460_v58, %v9372_v48  ;;  %v9400_v12 = vadd.f32 %v9399_v26, %v16697_v34 }
 0x5c4   : > { %17887 = vst [vmem:[#allocation9_spill] sm:$0xff] %v16739_v33 }
 0x5c9   : > { %v9463_v50 = vpop.f32.mrf.mxu1  ;;  %v9401_v9 = vpop.f32.mrf.mxu0 }
 0x5ca   : > { %v16742_v20 = vadd.f32 %v9463_v50, %v9375_v47  ;;  %v11187_v47 = vor.u32 %v11549_v40, %v11186_v15  ;;  %v9402_v45 = vadd.f32 %v9401_v9, %v16705_v21 }
 0x5cb   : > { %11344 = vmatmul.msk.bf16.gmra.mxu1 %vm17888_vm0, %v11127_v42 }
 0x5d1   : > { %v9465_v19 = vpop.f32.mrf.mxu1  ;;  %v9404_v53 = vpop.f32.mrf.mxu0 }
 0x5d2   : > { %v16746_v3 = vadd.f32 %v9465_v19, %v9377_v2  ;;  %v9405_v46 = vadd.f32 %v9404_v53, %v16712_v13  ;;  %v9395_v19 = vadd.f32 %v9394_v16, %v16686_v38  ;;  %v16785_v38 = vpop.f32.mrf.mxu2  ;;  %v9523_v53 = vsel %vm17898_vm2, %v16701_v63, 0.0  ;;  %vm17913_vm2 = vmmov %vm17888_vm0 }
 0x5d4   : > { %17889 = vst [vmem:[#allocation11_spill] sm:$0xff] %v16746_v3 }
 0x5d9   : > { %v9468_v32 = vpop.f32.mrf.mxu1  ;;  %v16783_v13 = vpop.f32.mrf.mxu0 }
 0x5da   : > { %v16749_v0 = vadd.f32 %v9468_v32, %v9380_v54 }
 0x5db   : > { %11345 = vmatmul.msk.bf16.gmra.mxu1 %vm17891_vm4, %v11147_v6  ;;  %v16778_v6 = vpop.f32.mrf.mxu3  ;;  %vm17909_vm4 = vmmov %vm17888_vm0 }
 0x5dc   : > { %17890 = vst [vmem:[#allocation12_spill] sm:$0xff] %v16749_v0 }
 0x5e1   : > { %v9470_v55 = vpop.f32.mrf.mxu1  ;;  %v16792_v29 = vpop.f32.mrf.mxu0 }
 0x5e2   : > { %v16753_v62 = vadd.f32 %v9470_v55, %v9382_v39 }
 0x5e3   : > { %v16787_v16 = vpop.f32.mrf.mxu3 }
 0x5e4   : > { %17892 = vst [vmem:[#allocation13_spill] sm:$0xff] %v16753_v62 }
 0x5e9   : > { %v9473_v51 = vpop.f32.mrf.mxu1 }
 0x5ea   : > { %v16756_v14 = vadd.f32 %v9473_v51, %v9385_v61  ;;  %v16794_v61 = vpop.f32.mrf.mxu2 }
 0x5eb   : > { %11346 = vmatmul.msk.bf16.gmra.mxu1 %vm17893_vm13, %v11167_v7  ;;  %v16796_v51 = vpop.f32.mrf.mxu3  ;;  %v16800_v7 = vpop.f32.mrf.mxu0  ;;  %vm17910_vm13 = vmmov %vm17888_vm0 }
 0x5f1   : > { %v9475_v48 = vpop.f32.mrf.mxu1 }
 0x5f2   : > { %v16760_v58 = vadd.f32 %v9475_v48, %v9387_v25  ;;  %v16802_v26 = vpop.f32.mrf.mxu2 }
 0x5f3   : > { %v16806_v48 = vpop.f32.mrf.mxu3  ;;  %v16808_v21 = vpop.f32.mrf.mxu0 }
 0x5f9   : > { %v9478_v50 = vpop.f32.mrf.mxu1 }
 0x5fa   : > { %v16763_v59 = vadd.f32 %v9478_v50, %v9390_v10  ;;  %v9238_v40 = vpop.f32.mrf.mxu2 }
 0x5fb   : > { %11347 = vmatmul.msk.bf16.gmra.mxu1 %vm17895_vm14, %v11187_v47  ;;  %v16812_v10 = vpop.f32.mrf.mxu3  ;;  %v16816_v50 = vpop.f32.mrf.mxu0  ;;  %vm17911_vm14 = vmmov %vm17888_vm0 }
 0x5fc   : > { %17894 = vst [vmem:[#allocation14_spill] sm:$0xff] %v16763_v59 }
 0x601   : > { %v9480_v42 = vpop.f32.mrf.mxu1 }
 0x602   : > { %v16767_v2 = vadd.f32 %v9480_v42, %v9392_v18  ;;  %v16818_v9 = vpop.f32.mrf.mxu2  ;;  %v9524_v18 = vsel %vm17897_vm11, %v16709_v37, 0.0  ;;  %vm17912_vm11 = vmmov %vm17888_vm0 }
 0x603   : > { %v16822_v42 = vpop.f32.mrf.mxu3 }
 0x604   : > { %17896 = vst [vmem:[#allocation15_spill] sm:$0xff] %v16767_v2 }
 0x609   : > { %v9483_v11 = vpop.f32.mrf.mxu1 }
 0x60a   : > { %v16771_v54 = vadd.f32 %v9483_v11, %v9395_v19  ;;  %v9525_v19 = vadd.f32 %v9524_v18, %v9523_v53  ;;  %v9243_v37 = vpop.f32.mrf.mxu2  ;;  %v9534_v18 = vsel %vm17903_vm7, %v16734_v22, 0.0  ;;  %vm17918_vm7 = vmmov %vm17888_vm0 }
 0x611   : > { %v9485_v30 = vpop.f32.mrf.mxu1 }
 0x612   : > { %v16774_v32 = vadd.f32 %v9485_v30, %v9397_v43  ;;  %v9528_v43 = vsel %vm17900_vm3, %v16721_v41, 0.0  ;;  %vm17915_vm3 = vmmov %vm17888_vm0 }
 0x619   : > { %v9488_v1 = vpop.f32.mrf.mxu1 }
 0x61a   : > { %v16781_v39 = vadd.f32 %v9488_v1, %v9400_v12  ;;  %v9530_v12 = vsel %vm17901_vm9, %v16725_v31, 0.0  ;;  %vm17916_vm9 = vmmov %vm17888_vm0 }
 0x621   : > { %v9490_v55 = vpop.f32.mrf.mxu1 }
 0x622   : > { %v16790_v4 = vadd.f32 %v9490_v55, %v9402_v45  ;;  %v16834_v45 = vpop.f32.mrf.mxu0  ;;  %v9532_v55 = vsel %vm17902_vm1, %v16730_v5, 0.0  ;;  %vm17917_vm1 = vmmov %vm17888_vm0 }
 0x629   : > { %v9493_v34 = vpop.f32.mrf.mxu1 }
 0x62a   : > { %v16798_v57 = vadd.f32 %v9493_v34, %v9405_v46  ;;  %v9526_v46 = vsel %vm17899_vm8, %v16716_v27, 0.0  ;;  %v16840_v27 = vpop.f32.mrf.mxu3  ;;  %vm17914_vm8 = vmmov %vm17888_vm0 }
 0x62b   : > { %v9527_v30 = vadd.f32 %v9526_v46, %v9525_v19  ;;  %v9536_v46 = vsel %vm17904_vm15, %v16739_v33, 0.0  ;;  %vm17919_vm15 = vmmov %vm17888_vm0 }
 0x62d   : > { %v9529_v1 = vadd.f32 %v9528_v43, %v9527_v30  ;;  %v9538_v43 = vsel %vm17905_vm6, %v16742_v20, 0.0  ;;  %vm17920_vm6 = vmmov %vm17888_vm0 }
 0x62f   : > { %v9531_v34 = vadd.f32 %v9530_v12, %v9529_v1  ;;  %v9540_v12 = vsel %vm17906_vm10, %v16746_v3, 0.0  ;;  %v16850_v1 = vpop.f32.mrf.mxu0  ;;  %v9548_v3 = vsel %vm17909_vm4, %v16760_v58, 0.0  ;;  %vm17921_vm10 = vmmov %vm17888_vm0 }
 0x630   : > { %vm17924_vm4 = vmmov %vm17888_vm0 }
 0x631   : > { %v16804_v25 = vpop.f32.mrf.mxu1  ;;  %v9533_v53 = vadd.f32 %v9532_v55, %v9531_v34  ;;  %v9542_v55 = vsel %vm17907_vm5, %v16749_v0, 0.0  ;;  %v9246_v34 = vpop.f32.mrf.mxu2  ;;  %vm17922_vm5 = vmmov %vm17888_vm0 }
 0x633   : > { %v9535_v19 = vadd.f32 %v9534_v18, %v9533_v53  ;;  %v9544_v18 = vsel %vm17908_vm12, %v16753_v62, 0.0  ;;  %v9335_v53 = vpop.f32.mrf.mxu3  ;;  %v9229_v62 = vadd.f32 %v16776_v36, %v16606_v52  ;;  %v9556_v36 = vsel %vm17913_vm2, %v16774_v32, 0.0  ;;  %vm17923_vm12 = vmmov %vm17888_vm0 }
 0x634   : > { %vm17934_vm2 = vmmov %vm17888_vm0 }
 0x635   : > { %v9537_v30 = vadd.f32 %v9536_v46, %v9535_v19  ;;  %v9546_v46 = vsel %vm17888_vm0, %v16756_v14, 0.0 }
 0x637   : > { %v9539_v5 = vadd.f32 %v9538_v43, %v9537_v30  ;;  %v9550_v30 = vsel %vm17910_vm13, %v16763_v59, 0.0  ;;  %v16864_v0 = vpop.f32.mrf.mxu0  ;;  %vm17925_vm13 = vmmov %vm17888_vm0 }
 0x639   : > { %v16810_v15 = vpop.f32.mrf.mxu1  ;;  %v9541_v22 = vadd.f32 %v9540_v12, %v9539_v5 }
 0x63b   : > { %v9543_v33 = vadd.f32 %v9542_v55, %v9541_v22  ;;  %v9552_v22 = vsel %vm17911_vm14, %v16767_v2, 0.0  ;;  %v9248_v55 = vpop.f32.mrf.mxu2  ;;  %v9337_v59 = vpop.f32.mrf.mxu3  ;;  %vm17926_vm14 = vmmov %vm17888_vm0 }
 0x63d   : > { %v9545_v19 = vadd.f32 %v9544_v18, %v9543_v33  ;;  %v9232_v18 = vadd.f32 %v16785_v38, %v16623_v17  ;;  %v9239_v38 = vadd.f32 %v9238_v40, %v16654_v60  ;;  %v9562_v60 = vsel %vm17916_vm9, %v16798_v57, 0.0  ;;  %vm17939_vm9 = vmmov %vm17888_vm0 }
 0x63f   : > { %v9547_v43 = vadd.f32 %v9546_v46, %v9545_v19  ;;  %v9318_v46 = vadd.f32 %v16778_v6, %v9229_v62  ;;  %v9554_v19 = vsel %vm17912_vm11, %v16771_v54, 0.0  ;;  %v9321_v52 = vadd.f32 %v16787_v16, %v9232_v18  ;;  %vm17933_vm11 = vmmov %vm17888_vm0 }
 0x640   : > { %v9558_v62 = vsel %vm17914_vm8, %v16781_v39, 0.0  ;;  %vm17936_vm8 = vmmov %vm17888_vm0 }
 0x641   : > { %v16814_v47 = vpop.f32.mrf.mxu1  ;;  %v9549_v5 = vadd.f32 %v9548_v3, %v9547_v43  ;;  %v9234_v43 = vadd.f32 %v16794_v61, %v16634_v8  ;;  %v9407_v6 = vadd.f32 %v16783_v13, %v9318_v46  ;;  %v9560_v61 = vsel %vm17915_vm3, %v16790_v4, 0.0  ;;  %vm17938_vm3 = vmmov %vm17888_vm0 }
 0x642   : > { %v9328_v13 = vadd.f32 %v16812_v10, %v9239_v38  ;;  %v9247_v46 = vadd.f32 %v9246_v34, %v16677_v44 }
 0x643   : > { %v9551_v33 = vadd.f32 %v9550_v30, %v9549_v5  ;;  %v9237_v30 = vadd.f32 %v16802_v26, %v16643_v49  ;;  %v9323_v17 = vadd.f32 %v16796_v51, %v9234_v43  ;;  %v9410_v49 = vadd.f32 %v16792_v29, %v9321_v52  ;;  %v9426_v26 = vpop.f32.mrf.mxu0  ;;  %v9251_v40 = vpop.f32.mrf.mxu2 }
 0x644   : > { %v9242_v51 = vadd.f32 %v16818_v9, %v16662_v35  ;;  %v9336_v52 = vadd.f32 %v9335_v53, %v9247_v46  ;;  %v9252_v34 = vadd.f32 %v9251_v40, %v16688_v23 }
 0x645   : > { %v9553_v3 = vadd.f32 %v9552_v22, %v9551_v33  ;;  %v9326_v16 = vadd.f32 %v16806_v48, %v9237_v30  ;;  %v16893_v22 = vadd.f32 %v16804_v25, %v9407_v6  ;;  %v9412_v48 = vadd.f32 %v16800_v7, %v9323_v17 }
 0x646   : > { %v9244_v25 = vadd.f32 %v9243_v37, %v16670_v24  ;;  %v9331_v29 = vadd.f32 %v16822_v42, %v9242_v51  ;;  %v9417_v42 = vadd.f32 %v16816_v50, %v9328_v13  ;;  %v9425_v23 = vadd.f32 %v16864_v0, %v9336_v52 }
 0x647   : > { %v9555_v2 = vadd.f32 %v9554_v19, %v9553_v3  ;;  %v9564_v35 = vsel %vm17917_vm1, %v16893_v22, 0.0  ;;  %v16910_v9 = vadd.f32 %v16814_v47, %v9412_v48  ;;  %v9415_v10 = vadd.f32 %v16808_v21, %v9326_v16  ;;  %vm17941_vm1 = vmmov %vm17888_vm0 }
 0x648   : > { %v9333_v7 = vadd.f32 %v16840_v27, %v9244_v25  ;;  %v9249_v3 = vadd.f32 %v9248_v55, %v16683_v56  ;;  %v9420_v27 = vadd.f32 %v16834_v45, %v9331_v29 }
 0x649   : > { %v16828_v11 = vpop.f32.mrf.mxu1  ;;  %v9557_v5 = vadd.f32 %v9556_v36, %v9555_v2  ;;  %v16902_v2 = vadd.f32 %v16810_v15, %v9410_v49  ;;  %v9340_v15 = vpop.f32.mrf.mxu3  ;;  %v9568_v44 = vsel %vm17919_vm15, %v16910_v9, 0.0  ;;  %vm17945_vm15 = vmmov %vm17888_vm0 }
 0x64a   : > { %v16918_v37 = vadd.f32 %v16828_v11, %v9415_v10  ;;  %v9338_v30 = vadd.f32 %v9337_v59, %v9249_v3  ;;  %v9422_v53 = vadd.f32 %v16850_v1, %v9333_v7  ;;  %v9341_v17 = vadd.f32 %v9340_v15, %v9252_v34  ;;  %v17929_v34 = vld [vmem:[#allocation10_spill] sm:$0xff] }
 0x64b   : > { %v9559_v33 = vadd.f32 %v9558_v62, %v9557_v5  ;;  %v9566_v24 = vsel %vm17918_vm7, %v16902_v2, 0.0  ;;  %v9429_v36 = vpop.f32.mrf.mxu0  ;;  %v9253_v62 = vpop.f32.mrf.mxu2  ;;  %vm17943_vm7 = vmmov %vm17888_vm0 }
 0x64c   : > { %v9570_v50 = vsel %vm17920_vm6, %v16918_v37, 0.0  ;;  %v9430_v49 = vadd.f32 %v9429_v36, %v9341_v17  ;;  %v17931_v17 = vld [vmem:[#allocation21_spill] sm:$0xff]  ;;  %vm17946_vm6 = vmmov %vm17888_vm0 }
 0x64d   : > { %v9561_v18 = vadd.f32 %v9560_v61, %v9559_v33  ;;  %v9254_v61 = vadd.f32 %v9253_v62, %v16694_v28  ;;  %v17932_v62 = vld [vmem:[#allocation23_spill] sm:$0xff] }
 0x64f   : > { %v9563_v19 = vadd.f32 %v9562_v60, %v9561_v18 }
 0x651   : > { %v16842_v63 = vpop.f32.mrf.mxu1  ;;  %v9565_v47 = vadd.f32 %v9564_v35, %v9563_v19  ;;  %v9342_v5 = vpop.f32.mrf.mxu3 }
 0x652   : > { %v16925_v21 = vadd.f32 %v16842_v63, %v9417_v42  ;;  %v9343_v33 = vadd.f32 %v9342_v5, %v9254_v61 }
 0x653   : > { %v9567_v11 = vadd.f32 %v9566_v24, %v9565_v47 }
 0x654   : > { %v9572_v63 = vsel %vm17921_vm10, %v16925_v21, 0.0  ;;  %vm17947_vm10 = vmmov %vm17888_vm0 }
 0x655   : > { %v9569_v55 = vadd.f32 %v9568_v44, %v9567_v11  ;;  %v17928_v44 = vld [vmem:[#allocation16_spill] sm:$0xff]  ;;  %v17930_v11 = vld [vmem:[#allocation19_spill] sm:$0xff] }
 0x657   : > { %v9571_v59 = vadd.f32 %v9570_v50, %v9569_v55 }
 0x659   : > { %v16854_v31 = vpop.f32.mrf.mxu1  ;;  %v9573_v1 = vadd.f32 %v9572_v63, %v9571_v59 }
 0x65a   : > { %v16932_v56 = vadd.f32 %v16854_v31, %v9420_v27  ;;  %v9427_v31 = vadd.f32 %v9426_v26, %v9338_v30 }
 0x65c   : > { %v9574_v6 = vsel %vm17922_vm5, %v16932_v56, 0.0  ;;  %vm17949_vm5 = vmmov %vm17888_vm0 }
 0x65d   : > { %v9575_v0 = vadd.f32 %v9574_v6, %v9573_v1  ;;  %v17935_v1 = vld [vmem:[#allocation8_spill] sm:$0xff] }
 0x661   : > { %v16866_v12 = vpop.f32.mrf.mxu1 }
 0x662   : > { %v16938_v45 = vadd.f32 %v16866_v12, %v9422_v53 }
 0x664   : > { %v9576_v12 = vsel %vm17923_vm12, %v16938_v45, 0.0  ;;  %vm17951_vm12 = vmmov %vm17888_vm0 }
 0x665   : > { %v9577_v26 = vadd.f32 %v9576_v12, %v9575_v0  ;;  %v17937_v0 = vld [vmem:[#allocation9_spill] sm:$0xff] }
 0x669   : > { %v9513_v8 = vpop.f32.mrf.mxu1 }
 0x66a   : > { %v16943_v38 = vadd.f32 %v9513_v8, %v9425_v23  ;;  %v9431_v8 = vpop.f32.mrf.mxu0 }
 0x66b   : > { %v9432_v28 = vadd.f32 %v9431_v8, %v9343_v33 }
 0x66c   : > { %v9578_v13 = vsel %vm17888_vm0, %v16943_v38, 0.0 }
 0x66d   : > { %v9579_v25 = vadd.f32 %v9578_v13, %v9577_v26 }
 0x671   : > { %v9515_v43 = vpop.f32.mrf.mxu1 }
 0x672   : > { %v16948_v51 = vadd.f32 %v9515_v43, %v9427_v31  ;;  %v17927_v43 = vld [vmem:[#allocation26_spill] sm:$0xff] }
 0x674   : > { %v9580_v48 = vsel %vm17924_vm4, %v16948_v51, 0.0  ;;  %vm17952_vm4 = vmmov %vm17888_vm0 }
 0x675   : > { %v9581_v18 = vadd.f32 %v9580_v48, %v9579_v25 }
 0x679   : > { %v9518_v16 = vpop.f32.mrf.mxu1 }
 0x67a   : > { %v16952_v60 = vadd.f32 %v9518_v16, %v9430_v49 }
 0x67c   : > { %v9582_v40 = vsel %vm17925_vm13, %v16952_v60, 0.0  ;;  %vm17953_vm13 = vmmov %vm17888_vm0 }
 0x67d   : > { %v9583_v10 = vadd.f32 %v9582_v40, %v9581_v18  ;;  %v17940_v18 = vld [vmem:[#allocation11_spill] sm:$0xff] }
 0x681   : > { %v9520_v29 = vpop.f32.mrf.mxu1 }
 0x682   : > { %v16958_v35 = vadd.f32 %v9520_v29, %v9432_v28 }
 0x684   : > { %v9584_v46 = vsel %vm17926_vm14, %v16958_v35, 0.0  ;;  %vm17954_vm14 = vmmov %vm17888_vm0 }
 0x685   : > { %v9585_v15 = vadd.f32 %v9584_v46, %v9583_v10 }
 0x687   : > { %v9586_v19 = vrot.slane %v9585_v15, 4 }
 0x689   : > { %v9587_v7 = vadd.f32 %v9586_v19, %v9585_v15  ;;  %v17942_v19 = vld [vmem:[#allocation12_spill] sm:$0xff] }
 0x68b   : > { %v9588_v24 = vrot.slane %v9587_v7, 2 }
 0x68d   : > { %v9589_v42 = vadd.f32 %v9588_v24, %v9587_v7 }
 0x68f   : > { %v9590_v3 = vrot.slane %v9589_v42, 1 }
 0x691   : > { %v9591_v47 = vadd.f32 %v9590_v3, %v9589_v42  ;;  %v17944_v3 = vld [vmem:[#allocation13_spill] sm:$0xff] }
 0x693   : > { %v16963_v52 = vmul.f32 %v9591_v47, %v17927_v43 }
 0x695   : > { %v16967_v27 = vsub.f32 %v17928_v44, %v16963_v52  ;;  %v16971_v36 = vsub.f32 %v17929_v34, %v16963_v52  ;;  %v16975_v30 = vsub.f32 %v17930_v11, %v16963_v52  ;;  %v16979_v50 = vsub.f32 %v16721_v41, %v16963_v52 }
 0x696   : > { %v16987_v63 = vsub.f32 %v17931_v17, %v16963_v52  ;;  %v16993_v59 = vsub.f32 %v17932_v62, %v16963_v52  ;;  %v17001_v16 = vsub.f32 %v17935_v1, %v16963_v52  ;;  %v17008_v33 = vsub.f32 %v17937_v0, %v16963_v52 }
 0x697   : > { %v9625_v53 = vmul.f32 %v16967_v27, %v16967_v27  ;;  %v9626_v55 = vmul.f32 %v16971_v36, %v16971_v36  ;;  %v9627_v23 = vmul.f32 %v16975_v30, %v16975_v30  ;;  %v9628_v41 = vmul.f32 %v16979_v50, %v16979_v50 }
 0x698   : > { %v9629_v61 = vmul.f32 %v16987_v63, %v16987_v63  ;;  %v9630_v13 = vmul.f32 %v16993_v59, %v16993_v59  ;;  %v17015_v48 = vsub.f32 %v16742_v20, %v16963_v52  ;;  %v9631_v25 = vmul.f32 %v17001_v16, %v17001_v16 }
 0x699   : > { %v9657_v6 = vsel %vm17933_vm11, %v9625_v53, 0.0  ;;  %v9658_v31 = vsel %vm17934_vm2, %v9626_v55, 0.0  ;;  %v9660_v49 = vsel %vm17936_vm8, %v9627_v23, 0.0  ;;  %v9662_v8 = vsel %vm17938_vm3, %v9628_v41, 0.0  ;;  %vm17955_vm11 = vmmov %vm17888_vm0 }
 0x69a   : > { %v9659_v5 = vadd.f32 %v9658_v31, %v9657_v6  ;;  %v9664_v28 = vsel %vm17939_vm9, %v9629_v61, 0.0  ;;  %v17022_v29 = vsub.f32 %v17940_v18, %v16963_v52  ;;  %v9632_v10 = vmul.f32 %v17008_v33, %v17008_v33  ;;  %vm17956_vm2 = vmmov %vm17888_vm0 }
 0x69b   : > { %v9666_v46 = vsel %vm17941_vm1, %v9630_v13, 0.0  ;;  %v17029_v20 = vsub.f32 %v17942_v19, %v16963_v52  ;;  %v9633_v7 = vmul.f32 %v17015_v48, %v17015_v48  ;;  %v9668_v24 = vsel %vm17943_vm7, %v9631_v25, 0.0  ;;  %vm17957_vm8 = vmmov %vm17888_vm0 }
 0x69c   : > { %v9661_v12 = vadd.f32 %v9660_v49, %v9659_v5  ;;  %v17036_v47 = vsub.f32 %v17944_v3, %v16963_v52  ;;  %v9634_v44 = vmul.f32 %v17022_v29, %v17022_v29  ;;  %v9670_v34 = vsel %vm17945_vm15, %v9632_v10, 0.0  ;;  %v17948_v5 = vld [vmem:[#allocation14_spill] sm:$0xff]  ;;  %vm17958_vm3 = vmmov %vm17888_vm0 }
 0x69d   : > { %v17043_v53 = vsub.f32 %v16756_v14, %v16963_v52  ;;  %v9635_v55 = vmul.f32 %v17029_v20, %v17029_v20  ;;  %v9672_v17 = vsel %vm17946_vm6, %v9633_v7, 0.0  ;;  %v17050_v62 = vsub.f32 %v16760_v58, %v16963_v52  ;;  %vm17959_vm9 = vmmov %vm17888_vm0 }
 0x69e   : > { %v9663_v26 = vadd.f32 %v9662_v8, %v9661_v12  ;;  %v9636_v41 = vmul.f32 %v17036_v47, %v17036_v47  ;;  %v9674_v6 = vsel %vm17947_vm10, %v9634_v44, 0.0  ;;  %v17057_v14 = vsub.f32 %v17948_v5, %v16963_v52  ;;  %v17950_v12 = vld [vmem:[#allocation15_spill] sm:$0xff]  ;;  %vm17960_vm1 = vmmov %vm17888_vm0 }
 0x69f   : > { %v9637_v1 = vmul.f32 %v17043_v53, %v17043_v53  ;;  %v9676_v61 = vsel %vm17949_vm5, %v9635_v55, 0.0  ;;  %v17064_v58 = vsub.f32 %v17950_v12, %v16963_v52  ;;  %v9638_v0 = vmul.f32 %v17050_v62, %v17050_v62  ;;  %vm17961_vm7 = vmmov %vm17888_vm0 }
 0x6a0   : > { %v9665_v40 = vadd.f32 %v9664_v28, %v9663_v26  ;;  %v9678_v13 = vsel %vm17951_vm12, %v9636_v41, 0.0  ;;  %v17071_v26 = vsub.f32 %v16771_v54, %v16963_v52  ;;  %v9639_v25 = vmul.f32 %v17057_v14, %v17057_v14  ;;  %vm17962_vm15 = vmmov %vm17888_vm0 }
 0x6a1   : > { %v9680_v28 = vsel %vm17888_vm0, %v9637_v1, 0.0  ;;  %v17078_v18 = vsub.f32 %v16774_v32, %v16963_v52  ;;  %v9640_v10 = vmul.f32 %v17064_v58, %v17064_v58  ;;  %v17085_v54 = vsub.f32 %v16781_v39, %v16963_v52  ;;  %vm17963_vm6 = vmmov %vm17888_vm0 }
 0x6a2   : > { %v9667_v15 = vadd.f32 %v9666_v46, %v9665_v40  ;;  %v9682_v46 = vsel %vm17952_vm4, %v9638_v0, 0.0  ;;  %v9641_v19 = vmul.f32 %v17071_v26, %v17071_v26  ;;  %v9684_v7 = vsel %vm17953_vm13, %v9639_v25, 0.0  ;;  %vm17964_vm10 = vmmov %vm17888_vm0 }
 0x6a3   : > { %v17092_v32 = vsub.f32 %v16790_v4, %v16963_v52  ;;  %v9686_v3 = vsel %vm17954_vm14, %v9640_v10, 0.0  ;;  %v17099_v39 = vsub.f32 %v16798_v57, %v16963_v52  ;;  %v17106_v4 = vsub.f32 %v16893_v22, %v16963_v52  ;;  %vm17965_vm5 = vmmov %vm17888_vm0 }
 0x6a4   : > { %v9669_v42 = vadd.f32 %v9668_v24, %v9667_v15  ;;  %v17113_v57 = vsub.f32 %v16902_v2, %v16963_v52  ;;  %v17120_v22 = vsub.f32 %v16910_v9, %v16963_v52  ;;  %v17127_v2 = vsub.f32 %v16918_v37, %v16963_v52  ;;  %vm17966_vm12 = vmmov %vm17888_vm0 }
 0x6a5   : > { %v9646_v1 = vmul.f32 %v17106_v4, %v17106_v4  ;;  %v17134_v9 = vsub.f32 %v16925_v21, %v16963_v52  ;;  %v17141_v37 = vsub.f32 %v16932_v56, %v16963_v52  ;;  %v17148_v21 = vsub.f32 %v16938_v45, %v16963_v52  ;;  %vm17967_vm4 = vmmov %vm17888_vm0 }
 0x6a6   : > { %v9671_v11 = vadd.f32 %v9670_v34, %v9669_v42  ;;  %v9642_v42 = vmul.f32 %v17078_v18, %v17078_v18  ;;  %v9643_v34 = vmul.f32 %v17085_v54, %v17085_v54  ;;  %v9647_v12 = vmul.f32 %v17113_v57, %v17113_v57  ;;  %vm17968_vm13 = vmmov %vm17888_vm0 }
 0x6a7   : > { %v9698_v25 = vsel %vm17960_vm1, %v9646_v1, 0.0  ;;  %v17155_v56 = vsub.f32 %v16943_v38, %v16963_v52  ;;  %v17162_v45 = vsub.f32 %v16948_v51, %v16963_v52  ;;  %v17169_v38 = vsub.f32 %v16952_v60, %v16963_v52  ;;  %vm17969_vm14 = vmmov %vm17888_vm0 }
 0x6a8   : > { %v9673_v23 = vadd.f32 %v9672_v17, %v9671_v11  ;;  %v9688_v11 = vsel %vm17955_vm11, %v9641_v19, 0.0  ;;  %v9644_v17 = vmul.f32 %v17092_v32, %v17092_v32  ;;  %v9700_v10 = vsel %vm17961_vm7, %v9647_v12, 0.0  ;;  %vm17972_vm1 = vmmov %vm17888_vm0 }
 0x6a9   : > { %v9624_v51 = vsub.f32 %v16958_v35, %v16963_v52  ;;  %vm17973_vm7 = vmmov %vm17888_vm0 }
 0x6aa   : > { %v9675_v31 = vadd.f32 %v9674_v6, %v9673_v23  ;;  %v9690_v23 = vsel %vm17956_vm2, %v9642_v42, 0.0  ;;  %v9645_v6 = vmul.f32 %v17099_v39, %v17099_v39 }
 0x6ac   : > { %v9677_v49 = vadd.f32 %v9676_v61, %v9675_v31  ;;  %v9692_v31 = vsel %vm17957_vm8, %v9643_v34, 0.0  ;;  %v9694_v61 = vsel %vm17958_vm3, %v9644_v17, 0.0  ;;  %v9696_v0 = vsel %vm17959_vm9, %v9645_v6, 0.0  ;;  %vm17970_vm3 = vmmov %vm17888_vm0 }
 0x6ad   : > { %vm17971_vm9 = vmmov %vm17888_vm0 }
 0x6ae   : > { %v9679_v8 = vadd.f32 %v9678_v13, %v9677_v49 }
 0x6b0   : > { %v9681_v40 = vadd.f32 %v9680_v28, %v9679_v8  ;;  %v9648_v8 = vmul.f32 %v17120_v22, %v17120_v22 }
 0x6b2   : > { %v9683_v15 = vadd.f32 %v9682_v46, %v9681_v40  ;;  %v9649_v40 = vmul.f32 %v17127_v2, %v17127_v2  ;;  %v9702_v19 = vsel %vm17962_vm15, %v9648_v8, 0.0  ;;  %vm17974_vm15 = vmmov %vm17888_vm0 }
 0x6b4   : > { %v9685_v24 = vadd.f32 %v9684_v7, %v9683_v15  ;;  %v9650_v15 = vmul.f32 %v17134_v9, %v17134_v9  ;;  %v9704_v42 = vsel %vm17963_vm6, %v9649_v40, 0.0  ;;  %vm17975_vm6 = vmmov %vm17888_vm0 }
 0x6b6   : > { %v9687_v44 = vadd.f32 %v9686_v3, %v9685_v24  ;;  %v9651_v24 = vmul.f32 %v17141_v37, %v17141_v37  ;;  %v9706_v34 = vsel %vm17964_vm10, %v9650_v15, 0.0  ;;  %vm17976_vm10 = vmmov %vm17888_vm0 }
 0x6b8   : > { %v9689_v55 = vadd.f32 %v9688_v11, %v9687_v44  ;;  %v9652_v44 = vmul.f32 %v17148_v21, %v17148_v21  ;;  %v9708_v17 = vsel %vm17965_vm5, %v9651_v24, 0.0  ;;  %vm17977_vm5 = vmmov %vm17888_vm0 }
 0x6ba   : > { %v9691_v41 = vadd.f32 %v9690_v23, %v9689_v55  ;;  %v9653_v55 = vmul.f32 %v17155_v56, %v17155_v56  ;;  %v9710_v6 = vsel %vm17966_vm12, %v9652_v44, 0.0  ;;  %vm17978_vm12 = vmmov %vm17888_vm0 }
 0x6bc   : > { %v9693_v5 = vadd.f32 %v9692_v31, %v9691_v41  ;;  %v9654_v41 = vmul.f32 %v17162_v45, %v17162_v45  ;;  %v9712_v60 = vsel %vm17888_vm0, %v9653_v55, 0.0  ;;  %v17203_v55 = vld [vmem:[%s17473_s7] ss:$0 sm:$0xff] }
 0x6be   : > { %v9695_v49 = vadd.f32 %v9694_v61, %v9693_v5  ;;  %v9655_v5 = vmul.f32 %v17169_v38, %v17169_v38  ;;  %v9656_v61 = vmul.f32 %v9624_v51, %v9624_v51 }
 0x6c0   : > { %v9697_v13 = vadd.f32 %v9696_v0, %v9695_v49  ;;  %v9714_v49 = vsel %vm17967_vm4, %v9654_v41, 0.0  ;;  %v9716_v0 = vsel %vm17968_vm13, %v9655_v5, 0.0  ;;  %v9718_v35 = vsel %vm17969_vm14, %v9656_v61, 0.0  ;;  %v9873_v41 = vld [vmem:[%s17198_s12 + $0xf8] sm:$0xff]  ;;  %vm17979_vm4 = vmmov %vm17888_vm0 }
 0x6c1   : > { %vm17980_vm13 = vmmov %vm17888_vm0 }
 0x6c2   : > { %v9699_v28 = vadd.f32 %v9698_v25, %v9697_v13  ;;  %vm17981_vm14 = vmmov %vm17888_vm0 }
 0x6c4   : > { %v9701_v46 = vadd.f32 %v9700_v10, %v9699_v28 }
 0x6c6   : > { %v9703_v7 = vadd.f32 %v9702_v19, %v9701_v46 }
 0x6c8   : > { %v9705_v3 = vadd.f32 %v9704_v42, %v9703_v7 }
 0x6ca   : > { %v9707_v11 = vadd.f32 %v9706_v34, %v9705_v3 }
 0x6cc   : > { %v9709_v23 = vadd.f32 %v9708_v17, %v9707_v11  ;;  %v17190_v11 = vld [vmem:[%s17472_s6] ss:$0 sm:$0xff] }
 0x6ce   : > { %v9711_v31 = vadd.f32 %v9710_v6, %v9709_v23 }
 0x6d0   : > { %v9713_v1 = vadd.f32 %v9712_v60, %v9711_v31 }
 0x6d2   : > { %v9715_v12 = vadd.f32 %v9714_v49, %v9713_v1 }
 0x6d4   : > { %v9717_v13 = vadd.f32 %v9716_v0, %v9715_v12 }
 0x6d6   : > { %v9719_v52 = vadd.f32 %v9718_v35, %v9717_v13 }
 0x6d8   : > { %v9720_v8 = vrot.slane %v9719_v52, 4 }
 0x6da   : > { %v9721_v25 = vadd.f32 %v9720_v8, %v9719_v52 }
 0x6dc   : > { %v9722_v28 = vrot.slane %v9721_v25, 2 }
 0x6de   : > { %v9723_v40 = vadd.f32 %v9722_v28, %v9721_v25  ;;  %v9843_v28 = vld [vmem:[%s17198_s12 + $0x8] sm:$0xff] }
 0x6e0   : > { %v9724_v10 = vrot.slane %v9723_v40, 1 }
 0x6e2   : > { %v9725_v46 = vadd.f32 %v9724_v10, %v9723_v40  ;;  %v9844_v40 = vld [vmem:[%s17198_s12 + $0x10] sm:$0xff] }
 0x6e4   : > { %v9726_v15 = vmul.f32 %v9725_v46, %v17927_v43  ;;  %v9845_v46 = vld [vmem:[%s17198_s12 + $0x18] sm:$0xff] }
 0x6e6   : > { %v9727_v19 = vadd.f32 1e-05, %v9726_v15 }
 0x6e8   : > { %11656 = vrsqrt.f32 %v9727_v19  ;;  %vm9734_vm2 = vweird.f32 %v9727_v19 }
 0x6ee   : > { %v11657_v7 = vpop.eup %11656 }
 0x6ef   : > { %v9729_v24 = vmul.f32 %v11657_v7, %v9727_v19  ;;  %vm9735_vm11 = vweird.f32 %v11657_v7 }
 0x6f0   : > { %vm9736_vm8 = vmor %vm9734_vm2, %vm9735_vm11 }
 0x6f1   : > { %v9730_v42 = vmul.f32 %v11657_v7, %v9729_v24  ;;  %vm17982_vm11 = vmmov %vm17888_vm0 }
 0x6f2   : > { %vm17983_vm2 = vmmov %vm17888_vm0 }
 0x6f3   : > { %v9731_v3 = vmul.f32 0.5, %v9730_v42  ;;  %v9846_v42 = vld [vmem:[%s17198_s12 + $0x20] sm:$0xff] }
 0x6f5   : > { %v9732_v44 = vsub.f32 1.5, %v9731_v3 }
 0x6f7   : > { %v9733_v34 = vmul.f32 %v11657_v7, %v9732_v44 }
 0x6f9   : > { %v17193_v43 = vsel %vm9736_vm8, %v11657_v7, %v9733_v34  ;;  %vm17984_vm8 = vmmov %vm17888_vm0 }
 0x6fa   : > { %v9769_v17 = vmul.f32 %v17193_v43, %v9624_v51  ;;  %v9738_v5 = vmul.f32 %v17193_v43, %v16967_v27  ;;  %v9739_v60 = vmul.f32 %v17193_v43, %v16971_v36  ;;  %v9740_v51 = vmul.f32 %v17193_v43, %v16975_v30 }
 0x6fb   : > { %v9741_v1 = vmul.f32 %v17193_v43, %v16979_v50  ;;  %v9742_v61 = vmul.f32 %v17193_v43, %v16987_v63  ;;  %v9743_v49 = vmul.f32 %v17193_v43, %v16993_v59  ;;  %v9744_v12 = vmul.f32 %v17193_v43, %v17001_v16 }
 0x6fc   : > { %v9805_v23 = vmul.f32 %v17190_v11, %v9769_v17  ;;  %v9774_v27 = vmul.f32 %v17190_v11, %v9738_v5  ;;  %v9775_v36 = vmul.f32 %v17190_v11, %v9739_v60  ;;  %v9776_v30 = vmul.f32 %v17190_v11, %v9740_v51  ;;  %v9849_v51 = vld [vmem:[%s17198_s12 + $0x38] sm:$0xff] }
 0x6fd   : > { %v9745_v50 = vmul.f32 %v17193_v43, %v17008_v33  ;;  %v9777_v63 = vmul.f32 %v17190_v11, %v9741_v1  ;;  %v9746_v59 = vmul.f32 %v17193_v43, %v17015_v48  ;;  %v9778_v0 = vmul.f32 %v17190_v11, %v9742_v61  ;;  %v9842_v48 = vld [vmem:[%s17198_s12] sm:$0xff] }
 0x6fe   : > { %v9841_v6 = vadd.f32 %v17203_v55, %v9805_v23  ;;  %v9747_v16 = vmul.f32 %v17193_v43, %v17022_v29  ;;  %v9748_v13 = vmul.f32 %v17193_v43, %v17029_v20  ;;  %v9779_v35 = vmul.f32 %v17190_v11, %v9743_v49 }
 0x6ff   : > { %v9780_v52 = vmul.f32 %v17190_v11, %v9744_v12  ;;  %v9810_v33 = vadd.f32 %v17203_v55, %v9774_v27  ;;  %v9811_v8 = vadd.f32 %v17203_v55, %v9775_v36  ;;  %v9812_v25 = vadd.f32 %v17203_v55, %v9776_v30 }
 0x700   : > { %v9905_v31 = vadd.f32 %v9873_v41, %v9841_v6  ;;  %v9749_v29 = vmul.f32 %v17193_v43, %v17036_v47  ;;  %v9781_v20 = vmul.f32 %v17190_v11, %v9745_v50  ;;  %v9813_v10 = vadd.f32 %v17203_v55, %v9777_v63  ;;  %v9848_v6 = vld [vmem:[%s17198_s12 + $0x30] sm:$0xff]  ;;  %v9851_v50 = vld [vmem:[%s17198_s12 + $0x48] sm:$0xff] }
 0x701   : > { %v9750_v15 = vmul.f32 %v17193_v43, %v17043_v53  ;;  %v9751_v19 = vmul.f32 %v17193_v43, %v17050_v62  ;;  %v9782_v7 = vmul.f32 %v17190_v11, %v9746_v59  ;;  %v9814_v24 = vadd.f32 %v17203_v55, %v9778_v0  ;;  %v9847_v53 = vld [vmem:[%s17198_s12 + $0x28] sm:$0xff] }
 0x702   : > { %9937 = vst.msk [vmem:[%s17211_s19 + $0xf8] sm:$0xff] %vm17970_vm3, %v9905_v31  ;;  %v9752_v47 = vmul.f32 %v17193_v43, %v17057_v14  ;;  %v9783_v3 = vmul.f32 %v17190_v11, %v9747_v16  ;;  %v9784_v44 = vmul.f32 %v17190_v11, %v9748_v13  ;;  %v9815_v34 = vadd.f32 %v17203_v55, %v9779_v35  ;;  %v9852_v16 = vld [vmem:[%s17198_s12 + $0x50] sm:$0xff]  ;;  %vm17985_vm3 = vmmov %vm17888_vm0 }
 0x703   : > { %v9816_v62 = vadd.f32 %v17203_v55, %v9780_v52  ;;  %v9874_v17 = vadd.f32 %v9842_v48, %v9810_v33  ;;  %v9875_v23 = vadd.f32 %v9843_v28, %v9811_v8  ;;  %v9876_v41 = vadd.f32 %v9844_v40, %v9812_v25  ;;  %v9853_v33 = vld [vmem:[%s17198_s12 + $0x58] sm:$0xff]  ;;  %v9854_v28 = vld [vmem:[%s17198_s12 + $0x60] sm:$0xff] }
 0x704   : > { %v9753_v31 = vmul.f32 %v17193_v43, %v17064_v58  ;;  %v9785_v14 = vmul.f32 %v17190_v11, %v9749_v29  ;;  %v9817_v5 = vadd.f32 %v17203_v55, %v9781_v20  ;;  %v9877_v60 = vadd.f32 %v9845_v46, %v9813_v10  ;;  %v9850_v58 = vld [vmem:[%s17198_s12 + $0x40] sm:$0xff]  ;;  %v9855_v10 = vld [vmem:[%s17198_s12 + $0x68] sm:$0xff] }
 0x705   : > { %v9754_v1 = vmul.f32 %v17193_v43, %v17071_v26  ;;  %v9786_v61 = vmul.f32 %v17190_v11, %v9750_v15  ;;  %v9818_v49 = vadd.f32 %v17203_v55, %v9782_v7  ;;  %v9878_v12 = vadd.f32 %v9846_v42, %v9814_v24  ;;  %9906 = vst.msk [vmem:[%s17211_s19] sm:$0xff] %vm17971_vm9, %v9874_v17  ;;  %v9856_v7 = vld [vmem:[%s17198_s12 + $0x70] sm:$0xff]  ;;  %vm17986_vm9 = vmmov %vm17888_vm0 }
 0x706   : > { %v9755_v27 = vmul.f32 %v17193_v43, %v17078_v18  ;;  %v9787_v36 = vmul.f32 %v17190_v11, %v9751_v19  ;;  %v9819_v30 = vadd.f32 %v17203_v55, %v9783_v3  ;;  %v9879_v26 = vadd.f32 %v9847_v53, %v9815_v34  ;;  %9907 = vst.msk [vmem:[%s17211_s19 + $0x8] sm:$0xff] %vm17972_vm1, %v9875_v23  ;;  %v9857_v3 = vld [vmem:[%s17198_s12 + $0x78] sm:$0xff]  ;;  %vm17987_vm1 = vmmov %vm17888_vm0 }
 0x707   : > { %v9756_v63 = vmul.f32 %v17193_v43, %v17085_v54  ;;  %v9788_v59 = vmul.f32 %v17190_v11, %v9752_v47  ;;  %v9820_v0 = vadd.f32 %v17203_v55, %v9784_v44  ;;  %v9880_v18 = vadd.f32 %v9848_v6, %v9816_v62  ;;  %9908 = vst.msk [vmem:[%s17211_s19 + $0x10] sm:$0xff] %vm17973_vm7, %v9876_v41  ;;  %v9858_v62 = vld [vmem:[%s17198_s12 + $0x80] sm:$0xff]  ;;  %v9859_v6 = vld [vmem:[%s17198_s12 + $0x88] sm:$0xff]  ;;  %vm17988_vm7 = vmmov %vm17888_vm0 }
 0x708   : > { %v9757_v13 = vmul.f32 %v17193_v43, %v17092_v32  ;;  %v9789_v35 = vmul.f32 %v17190_v11, %v9753_v31  ;;  %v9821_v52 = vadd.f32 %v17203_v55, %v9785_v14  ;;  %v9881_v54 = vadd.f32 %v9849_v51, %v9817_v5  ;;  %9909 = vst.msk [vmem:[%s17211_s19 + $0x18] sm:$0xff] %vm17974_vm15, %v9877_v60  ;;  %v9860_v60 = vld [vmem:[%s17198_s12 + $0x90] sm:$0xff]  ;;  %vm17989_vm15 = vmmov %vm17888_vm0 }
 0x709   : > { %v9758_v8 = vmul.f32 %v17193_v43, %v17099_v39  ;;  %v9790_v25 = vmul.f32 %v17190_v11, %v9754_v1  ;;  %v9822_v48 = vadd.f32 %v17203_v55, %v9786_v61  ;;  %v9882_v32 = vadd.f32 %v9850_v58, %v9818_v49  ;;  %9910 = vst.msk [vmem:[%s17211_s19 + $0x20] sm:$0xff] %vm17975_vm6, %v9878_v12  ;;  %v9861_v49 = vld [vmem:[%s17198_s12 + $0x98] sm:$0xff]  ;;  %vm17990_vm6 = vmmov %vm17888_vm0 }
 0x70a   : > { %v9759_v40 = vmul.f32 %v17193_v43, %v17106_v4  ;;  %v9791_v29 = vmul.f32 %v17190_v11, %v9755_v27  ;;  %v9823_v20 = vadd.f32 %v17203_v55, %v9787_v36  ;;  %v9883_v39 = vadd.f32 %v9851_v50, %v9819_v30  ;;  %9911 = vst.msk [vmem:[%s17211_s19 + $0x28] sm:$0xff] %vm17976_vm10, %v9879_v26  ;;  %v9862_v36 = vld [vmem:[%s17198_s12 + $0xa0] sm:$0xff]  ;;  %vm17991_vm10 = vmmov %vm17888_vm0 }
 0x70b   : > { %v9760_v46 = vmul.f32 %v17193_v43, %v17113_v57  ;;  %v9792_v15 = vmul.f32 %v17190_v11, %v9756_v63  ;;  %v9824_v19 = vadd.f32 %v17203_v55, %v9788_v59  ;;  %v9884_v4 = vadd.f32 %v9852_v16, %v9820_v0  ;;  %9912 = vst.msk [vmem:[%s17211_s19 + $0x30] sm:$0xff] %vm17977_vm5, %v9880_v18  ;;  %v9863_v63 = vld [vmem:[%s17198_s12 + $0xa8] sm:$0xff]  ;;  %vm17992_vm5 = vmmov %vm17888_vm0 }
 0x70c   : > { %v9761_v24 = vmul.f32 %v17193_v43, %v17120_v22  ;;  %v9793_v42 = vmul.f32 %v17190_v11, %v9757_v13  ;;  %v9825_v47 = vadd.f32 %v17203_v55, %v9789_v35  ;;  %v9885_v57 = vadd.f32 %v9853_v33, %v9821_v52  ;;  %9913 = vst.msk [vmem:[%s17211_s19 + $0x38] sm:$0xff] %vm17978_vm12, %v9881_v54  ;;  %vm17993_vm12 = vmmov %vm17888_vm0 }
 0x70d   : > { %v9762_v44 = vmul.f32 %v17193_v43, %v17127_v2  ;;  %v9794_v34 = vmul.f32 %v17190_v11, %v9758_v8  ;;  %v9826_v53 = vadd.f32 %v17203_v55, %v9790_v25  ;;  %v9886_v22 = vadd.f32 %v9854_v28, %v9822_v48  ;;  %9914 = vst.msk [vmem:[%s17211_s19 + $0x40] sm:$0xff] %vm17888_vm0, %v9882_v32  ;;  %v9866_v8 = vld [vmem:[%s17198_s12 + $0xc0] sm:$0xff]  ;;  %v9867_v28 = vld [vmem:[%s17198_s12 + $0xc8] sm:$0xff] }
 0x70e   : > { %v9763_v17 = vmul.f32 %v17193_v43, %v17134_v9  ;;  %v9795_v23 = vmul.f32 %v17190_v11, %v9759_v40  ;;  %v9827_v41 = vadd.f32 %v17203_v55, %v9791_v29  ;;  %v9887_v2 = vadd.f32 %v9855_v10, %v9823_v20  ;;  %9915 = vst.msk [vmem:[%s17211_s19 + $0x48] sm:$0xff] %vm17979_vm4, %v9883_v39  ;;  %v9868_v39 = vld [vmem:[%s17198_s12 + $0xd0] sm:$0xff]  ;;  %vm17994_vm4 = vmmov %vm17888_vm0 }
 0x70f   : > { %v9764_v31 = vmul.f32 %v17193_v43, %v17141_v37  ;;  %v9796_v14 = vmul.f32 %v17190_v11, %v9760_v46  ;;  %v9828_v5 = vadd.f32 %v17203_v55, %v9792_v15  ;;  %v9888_v9 = vadd.f32 %v9856_v7, %v9824_v19  ;;  %9916 = vst.msk [vmem:[%s17211_s19 + $0x50] sm:$0xff] %vm17980_vm13, %v9884_v4  ;;  %v9869_v15 = vld [vmem:[%s17198_s12 + $0xd8] sm:$0xff]  ;;  %v9870_v4 = vld [vmem:[%s17198_s12 + $0xe0] sm:$0xff]  ;;  %vm17995_vm13 = vmmov %vm17888_vm0 }
 0x710   : > { %v9765_v51 = vmul.f32 %v17193_v43, %v17148_v21  ;;  %v9797_v1 = vmul.f32 %v17190_v11, %v9761_v24  ;;  %v9829_v61 = vadd.f32 %v17203_v55, %v9793_v42  ;;  %v9889_v37 = vadd.f32 %v9857_v3, %v9825_v47  ;;  %9917 = vst.msk [vmem:[%s17211_s19 + $0x58] sm:$0xff] %vm17981_vm14, %v9885_v57  ;;  %v9871_v42 = vld [vmem:[%s17198_s12 + $0xe8] sm:$0xff]  ;;  %v9872_v3 = vld [vmem:[%s17198_s12 + $0xf0] sm:$0xff]  ;;  %vm17996_vm14 = vmmov %vm17888_vm0 }
 0x711   : > { %v9766_v12 = vmul.f32 %v17193_v43, %v17155_v56  ;;  %v9798_v58 = vmul.f32 %v17190_v11, %v9762_v44  ;;  %v9830_v27 = vadd.f32 %v17203_v55, %v9794_v34  ;;  %v9890_v21 = vadd.f32 %v9858_v62, %v9826_v53  ;;  %9918 = vst.msk [vmem:[%s17211_s19 + $0x60] sm:$0xff] %vm17982_vm11, %v9886_v22  ;;  %vm17997_vm11 = vmmov %vm17888_vm0 }
 0x712   : > { %v9767_v30 = vmul.f32 %v17193_v43, %v17162_v45  ;;  %v9799_v26 = vmul.f32 %v17190_v11, %v9763_v17  ;;  %v9831_v50 = vadd.f32 %v17203_v55, %v9795_v23  ;;  %v9891_v56 = vadd.f32 %v9859_v6, %v9827_v41  ;;  %9919 = vst.msk [vmem:[%s17211_s19 + $0x68] sm:$0xff] %vm17983_vm2, %v9887_v2  ;;  %v9864_v45 = vld [vmem:[%s17198_s12 + $0xb0] sm:$0xff]  ;;  %vm17998_vm2 = vmmov %vm17888_vm0 }
 0x713   : > { %v9768_v59 = vmul.f32 %v17193_v43, %v17169_v38  ;;  %v9800_v0 = vmul.f32 %v17190_v11, %v9764_v31  ;;  %v9832_v18 = vadd.f32 %v17203_v55, %v9796_v14  ;;  %v9892_v16 = vadd.f32 %v9860_v60, %v9828_v5  ;;  %9920 = vst.msk [vmem:[%s17211_s19 + $0x70] sm:$0xff] %vm17984_vm8, %v9888_v9  ;;  %v9865_v38 = vld [vmem:[%s17198_s12 + $0xb8] sm:$0xff]  ;;  %vm17999_vm8 = vmmov %vm17888_vm0  ;;  %s11674_s12 = scalar_lea.hbm %s11673_s10, 256 }
 0x714   : > { %v9801_v13 = vmul.f32 %v17190_v11, %v9765_v51  ;;  %v9833_v35 = vadd.f32 %v17203_v55, %v9797_v1  ;;  %v9893_v52 = vadd.f32 %v9861_v49, %v9829_v61  ;;  %9921 = vst.msk [vmem:[%s17211_s19 + $0x78] sm:$0xff] %vm17985_vm3, %v9889_v37  ;;  %v9802_v43 = vmul.f32 %v17190_v11, %v9766_v12  ;;  %p11675_p11 = scmp.ne.s32.totalorder %s11673_s10, %s11674_s12  ;;  %p11680_p1 = scmp.lt.s32.totalorder %s11678_s17, %s11674_s12 }
 0x715   : > { %v9834_v54 = vadd.f32 %v17203_v55, %v9798_v58  ;;  %v9894_v33 = vadd.f32 %v9862_v36, %v9830_v27  ;;  %9922 = vst.msk [vmem:[%s17211_s19 + $0x80] sm:$0xff] %vm17986_vm9, %v9890_v21  ;;  %v9803_v25 = vmul.f32 %v17190_v11, %v9767_v30  ;;  %v9835_v48 = vadd.f32 %v17203_v55, %v9799_v26 }
 0x716   : > { %v9895_v32 = vadd.f32 %v9863_v63, %v9831_v50  ;;  %9923 = vst.msk [vmem:[%s17211_s19 + $0x88] sm:$0xff] %vm17987_vm1, %v9891_v56  ;;  %v9804_v40 = vmul.f32 %v17190_v11, %v9768_v59  ;;  %v9836_v29 = vadd.f32 %v17203_v55, %v9800_v0  ;;  %v9896_v20 = vadd.f32 %v9864_v45, %v9832_v18  ;;  %p11676_p12 = pnand %p11675_p11, %p11810_p5  ;;  %p11681_p2 = por %p11680_p1, %p11679_p0 }
 0x717   : > { %9924 = vst.msk [vmem:[%s17211_s19 + $0x90] sm:$0xff] %vm17988_vm7, %v9892_v16  ;;  %v9837_v10 = vadd.f32 %v17203_v55, %v9801_v13  ;;  %v9897_v46 = vadd.f32 %v9865_v38, %v9833_v35  ;;  %v9838_v11 = vadd.f32 %v17203_v55, %v9802_v43  ;;  %v9898_v19 = vadd.f32 %v9866_v8, %v9834_v54 }
 0x718   : > { %9925 = vst.msk [vmem:[%s17211_s19 + $0x98] sm:$0xff] %vm17989_vm15, %v9893_v52  ;;  %v9839_v7 = vadd.f32 %v17203_v55, %v9803_v25  ;;  %v9899_v24 = vadd.f32 %v9867_v28, %v9835_v48  ;;  %v9840_v47 = vadd.f32 %v17203_v55, %v9804_v40  ;;  %v9900_v57 = vadd.f32 %v9868_v39, %v9836_v29  ;;  %p11677_p13 = pneg %p11676_p12 }
 0x719   : > { %9926 = vst.msk [vmem:[%s17211_s19 + $0xa0] sm:$0xff] %vm17990_vm6, %v9894_v33  ;;  %v9901_v44 = vadd.f32 %v9869_v15, %v9837_v10  ;;  %v9902_v34 = vadd.f32 %v9870_v4, %v9838_v11 }
 0x71a   : > { %9927 = vst.msk [vmem:[%s17211_s19 + $0xa8] sm:$0xff] %vm17991_vm10, %v9895_v32  ;;  %v9903_v53 = vadd.f32 %v9871_v42, %v9839_v7  ;;  %v9904_v55 = vadd.f32 %v9872_v3, %v9840_v47  ;;  %p11682_p3 = pnand %p11681_p2, %p11677_p13 }
 0x71b   : > { %9928 = vst.msk [vmem:[%s17211_s19 + $0xb0] sm:$0xff] %vm17992_vm5, %v9896_v20 }
 0x71c   : > { %9929 = vst.msk [vmem:[%s17211_s19 + $0xb8] sm:$0xff] %vm17993_vm12, %v9897_v46 }
 0x71d   : > { %9930 = vst.msk [vmem:[%s17211_s19 + $0xc0] sm:$0xff] %vm17888_vm0, %v9898_v19 }
 0x71e   : > { %9931 = vst.msk [vmem:[%s17211_s19 + $0xc8] sm:$0xff] %vm17994_vm4, %v9899_v24 }
 0x71f   : > { %9932 = vst.msk [vmem:[%s17211_s19 + $0xd0] sm:$0xff] %vm17995_vm13, %v9900_v57 }
 0x720   : > { %9933 = vst.msk [vmem:[%s17211_s19 + $0xd8] sm:$0xff] %vm17996_vm14, %v9901_v44 }
 0x721   : > { %9934 = vst.msk [vmem:[%s17211_s19 + $0xe0] sm:$0xff] %vm17997_vm11, %v9902_v34 }
 0x722   : > { %9935 = vst.msk [vmem:[%s17211_s19 + $0xe8] sm:$0xff] %vm17998_vm2, %v9903_v53 }
 0x723   : > { %9936 = vst.msk [vmem:[%s17211_s19 + $0xf0] sm:$0xff] %vm17999_vm8, %v9904_v55 }
 0x724   : > { %11685 = shalt.err (!%p11682_p3)
}
 0x725   : > { %s11725_s25 = smov 128   ;;  %s11726_s19 = smov 8  }
 0x726   : > { %11604 = dma.vmem_to_hbm [thread:$0]  (%p11810_p5), %s9952_s24, 4096, %s9954_s21, %s9939_s26, %s11725_s25, %s11725_s25, %s11726_s19  }
 0x727 PF: > { %p11610_p4 = scmp.ge.s32.totalorder %s11720_s30, 2  ;;  %s9968_s23 = sand.u32 1, %s11708_s27  }
 0x728   : > { %s9969_s22 = scalar_lea.sflag [#allocation5], %s9968_s23 }
 0x729   : > { %p11607_p7 = pnand %p11610_p4, %p11814_p6 }
 0x72b   : > { %p11608_p8 = pneg %p11607_p7 }
 0x72d   : > { %11703 = dma.done.wait (%p11608_p8), %s9969_s22, 4096  }
 0x72e   : > { %11705 = vsyncadd (%p11608_p8), %s9969_s22, 4294963200  ;;  %p18_p9 = scmp.ge.s32.totalorder %s11797_s11, 4   ;;  %s18000_s27 = smov %s11712_s28 }
 0x72f   : > { %s18001_s28 = smov %s11716_s29  ;;  %s18002_s29 = smov %s11808_s14 }
 0x730   : > { %s18003_s30 = smov %s11797_s11  ;;  %20 = sbr.rel (!%p18_p9) target bundleno = 3 (0x3), region = 95 }
 0x735   :  { %9975 = vsyncpa [#allocation5], 1 }
 0x736   :  { %9977 = vsyncpa [#allocation5 + $0x1], 1 }

</bundles_post_ra>
